<compile_context>
chip_gen: v5e
topology: v5e:2x2
jax: 0.10.0
libtpu: 0.0.40
codegen_flags: <defaults>
</compile_context>

<pallas_src>
import functools

import jax
import jax.numpy as jnp
from jax.experimental import pallas as pl
from jax.experimental.pallas import tpu as pltpu

HIDDEN = 768        # fixed by the module (nn.Linear(768, 768), LayerNorm(768))
EPS = 1e-12


def _round_up(a, m):
    return ((a + m - 1) // m) * m


def _transform_kernel(x_ref, wt_ref, p_ref, out_ref):
    # x_ref: (tm, H) input dtype; wt_ref: (H, H) bf16 holding W^T;
    # p_ref: (3, H) f32 rows = [bias, gamma, beta]; out_ref: (tm, H).
    x = x_ref[...].astype(jnp.bfloat16)          # cast in-register: bf16 MXU feed
    h = jnp.dot(x, wt_ref[...], preferred_element_type=jnp.float32)   # f32 acc
    p = p_ref[...]
    h = jnp.maximum(h + p[0:1, :], 0.0)          # bias + ReLU (f32, VPU)
    # One-pass LayerNorm stats: var = E[h^2] - mean^2 (no (h-mean)^2 tile).
    inv_h = jnp.float32(1.0 / HIDDEN)
    mean = jnp.sum(h, axis=-1, keepdims=True) * inv_h
    ex2 = jnp.sum(h * h, axis=-1, keepdims=True) * inv_h
    var = jnp.maximum(ex2 - mean * mean, 0.0)    # clamp tiny negative rounding
    inv_std = jax.lax.rsqrt(var + EPS)
    out_ref[...] = ((h - mean) * inv_std * p[1:2, :] + p[2:3, :]).astype(out_ref.dtype)


def prepare_params(w_dense, b_dense, gamma, beta):
    """One-time parameter prep: transpose + bf16-cast W, pack the vectors."""
    wt = jnp.asarray(w_dense).T.astype(jnp.bfloat16)                 # (H, H) = W^T
    params = jnp.stack(
        [jnp.asarray(b_dense), jnp.asarray(gamma), jnp.asarray(beta)]
    ).astype(jnp.float32)                                            # (3, H)
    return wt, params


@functools.partial(jax.jit, static_argnames=("tm",))
def bert_head_transform(x, wt, params, *, tm=512):
    """x: [..., 768]; wt: (768,768) bf16 = W^T; params: (3,768) f32."""
    orig_shape = x.shape
    H = orig_shape[-1]
    assert H == HIDDEN
    x2 = x.reshape(-1, H)
    N = x2.shape[0]

    # Effective token tile: multiple of 256 (2x256x256 MXU; also 128-aligned for
    # v5e), capped so grid >= 2 whenever N allows it (keeps both v7x TCs busy).
    half = _round_up(pl.cdiv(N, 2), 256)
    tm_eff = max(256, min(tm, half))
    grid = (pl.cdiv(N, tm_eff),)        # ragged tail handled by Pallas masking

    cost = pl.CostEstimate(
        flops=2 * N * H * H + 8 * N * H,
        transcendentals=N,                                       # rsqrt per row
        bytes_accessed=(N * H * x2.dtype.itemsize                # x in
                        + H * H * 2                              # W^T (bf16)
                        + 3 * H * 4                              # bias/gamma/beta
                        + N * H * x2.dtype.itemsize),            # out
    )

    out = pl.pallas_call(
        _transform_kernel,
        out_shape=jax.ShapeDtypeStruct((N, H), x2.dtype),
        grid_spec=pltpu.PrefetchScalarGridSpec(
            num_scalar_prefetch=0,
            grid=grid,
            in_specs=[
                pl.BlockSpec((tm_eff, H), lambda i: (i, 0)),   # x tile
                pl.BlockSpec((H, H), lambda i: (0, 0)),        # W^T (grid-invariant)
                pl.BlockSpec((3, H), lambda i: (0, 0)),        # packed b/gamma/beta
            ],
            out_specs=pl.BlockSpec((tm_eff, H), lambda i: (i, 0)),
        ),
        compiler_params=pltpu.CompilerParams(
            dimension_semantics=("parallel",)),
        cost_estimate=cost,
    )(x2, wt, params)

    return out.reshape(orig_shape)


def bert_prediction_head_transform(x, w_dense, b_dense, gamma, beta, *, tm=512):
    """Convenience wrapper matching the PyTorch module's parameterization."""
    wt, params = prepare_params(w_dense, b_dense, gamma, beta)
    return bert_head_transform(x, wt, params, tm=tm)


def _reference(x, w_dense, b_dense, gamma, beta):
    # Same numerics as the kernel: bf16 matmul with f32 accumulation, then
    # f32 bias/ReLU/LayerNorm (eps inside sqrt, biased variance — PyTorch LN).
    xb = x.reshape(-1, HIDDEN).astype(jnp.bfloat16)
    wb = w_dense.T.astype(jnp.bfloat16)
    h = jnp.dot(xb, wb, preferred_element_type=jnp.float32).reshape(x.shape)
    h = jnp.maximum(h + b_dense, 0.0)
    mean = jnp.mean(h, axis=-1, keepdims=True)
    var = jnp.mean((h - mean) ** 2, axis=-1, keepdims=True)
    h = (h - mean) / jnp.sqrt(var + EPS)
    return h * gamma + beta


if __name__ == "__main__":
    key = jax.random.PRNGKey(0)
    k_x, k_w, k_b = jax.random.split(key, 3)

    B, S = 2, 8                          # small demo shapes; hidden fixed at 768
    x = jax.random.normal(k_x, (B, S, HIDDEN), dtype=jnp.float32)
    w_dense = jax.random.normal(k_w, (HIDDEN, HIDDEN), dtype=jnp.float32) * 0.02
    b_dense = jax.random.normal(k_b, (HIDDEN,), dtype=jnp.float32) * 0.02
    gamma = jnp.ones((HIDDEN,), dtype=jnp.float32)   # nn.LayerNorm defaults
    beta = jnp.zeros((HIDDEN,), dtype=jnp.float32)

    out = bert_prediction_head_transform(x, w_dense, b_dense, gamma, beta)
    out = jax.block_until_ready(out)

    ref = _reference(x, w_dense, b_dense, gamma, beta)
    assert out.shape == (B, S, HIDDEN)
    assert jnp.allclose(out, ref, atol=2e-3, rtol=2e-3), (
        float(jnp.max(jnp.abs(out - ref))))

    print("KERNEL_OK")
</pallas_src>

<mosaic_0001>
module attributes {stable_mosaic.version = 11 : i64} {
  func.func @_transform_kernel(%arg0: i32, %arg1: memref<256x768xf32, #tpu.memory_space<vmem>>, %arg2: memref<768x768xbf16, #tpu.memory_space<vmem>>, %arg3: memref<3x768xf32, #tpu.memory_space<vmem>>, %arg4: memref<256x768xf32, #tpu.memory_space<vmem>>) attributes {dimension_semantics = [#tpu.dimension_semantics<parallel>], iteration_bounds = array<i64: 1>, scalar_prefetch = 0 : i64, scratch_operands = 0 : i64, tpu.core_type = #tpu.core_type<tc>, window_params = [{transform_indices = @transform_0, window_bounds = array<i64: 256, 768>}, {pipeline_mode = #tpu.pipeline_mode<synchronous>, transform_indices = @transform_1, window_bounds = array<i64: 768, 768>}, {pipeline_mode = #tpu.pipeline_mode<synchronous>, transform_indices = @transform_2, window_bounds = array<i64: 3, 768>}, {transform_indices = @transform_3, window_bounds = array<i64: 256, 768>}]} {
    %c0 = arith.constant 0 : index
    %c0_0 = arith.constant 0 : index
    %0 = vector.load %arg1[%c0, %c0_0] : memref<256x768xf32, #tpu.memory_space<vmem>>, vector<256x768xf32>
    %1 = arith.truncf %0 : vector<256x768xf32> to vector<256x768xbf16>
    %c0_1 = arith.constant 0 : index
    %c0_2 = arith.constant 0 : index
    %2 = vector.load %arg2[%c0_1, %c0_2] : memref<768x768xbf16, #tpu.memory_space<vmem>>, vector<768x768xbf16>
    %cst = arith.constant dense<0.000000e+00> : vector<256x768xf32>
    %3 = tpu.matmul %1, %2, %cst {dimension_numbers = #tpu.dot_dimension_numbers<[1], [0], [0], [1], [0, 0, 1, 1], [], []>} : vector<256x768xbf16>, vector<768x768xbf16>, vector<256x768xf32> -> vector<256x768xf32>
    %c0_3 = arith.constant 0 : index
    %c0_4 = arith.constant 0 : index
    %4 = vector.load %arg3[%c0_3, %c0_4] : memref<3x768xf32, #tpu.memory_space<vmem>>, vector<3x768xf32>
    %5 = vector.extract_strided_slice %4 {offsets = [0, 0], sizes = [1, 768], strides = [1, 1]} : vector<3x768xf32> to vector<1x768xf32>
    %6 = vector.broadcast %5 : vector<1x768xf32> to vector<256x768xf32>
    %7 = arith.addf %3, %6 : vector<256x768xf32>
    %cst_5 = arith.constant 0.000000e+00 : f32
    %8 = vector.broadcast %cst_5 : f32 to vector<256x768xf32>
    %9 = arith.maximumf %7, %8 : vector<256x768xf32>
    %cst_6 = arith.constant dense<0.000000e+00> : vector<256xf32>
    %10 = vector.multi_reduction <add>, %9, %cst_6 [1] : vector<256x768xf32> to vector<256xf32>
    %11 = vector.shape_cast %10 : vector<256xf32> to vector<256x1xf32>
    %cst_7 = arith.constant 0.00130208337 : f32
    %12 = vector.broadcast %cst_7 : f32 to vector<256x1xf32>
    %13 = arith.mulf %11, %12 : vector<256x1xf32>
    %14 = arith.mulf %9, %9 : vector<256x768xf32>
    %cst_8 = arith.constant dense<0.000000e+00> : vector<256xf32>
    %15 = vector.multi_reduction <add>, %14, %cst_8 [1] : vector<256x768xf32> to vector<256xf32>
    %16 = vector.shape_cast %15 : vector<256xf32> to vector<256x1xf32>
    %cst_9 = arith.constant 0.00130208337 : f32
    %17 = vector.broadcast %cst_9 : f32 to vector<256x1xf32>
    %18 = arith.mulf %16, %17 : vector<256x1xf32>
    %19 = arith.mulf %13, %13 : vector<256x1xf32>
    %20 = arith.subf %18, %19 : vector<256x1xf32>
    %cst_10 = arith.constant 0.000000e+00 : f32
    %21 = vector.broadcast %cst_10 : f32 to vector<256x1xf32>
    %22 = arith.maximumf %20, %21 : vector<256x1xf32>
    %cst_11 = arith.constant 9.99999996E-13 : f32
    %23 = vector.broadcast %cst_11 : f32 to vector<256x1xf32>
    %24 = arith.addf %22, %23 : vector<256x1xf32>
    %25 = math.rsqrt %24 : vector<256x1xf32>
    %26 = vector.broadcast %13 : vector<256x1xf32> to vector<256x768xf32>
    %27 = arith.subf %9, %26 : vector<256x768xf32>
    %28 = vector.broadcast %25 : vector<256x1xf32> to vector<256x768xf32>
    %29 = arith.mulf %27, %28 : vector<256x768xf32>
    %30 = vector.extract_strided_slice %4 {offsets = [1, 0], sizes = [1, 768], strides = [1, 1]} : vector<3x768xf32> to vector<1x768xf32>
    %31 = vector.broadcast %30 : vector<1x768xf32> to vector<256x768xf32>
    %32 = arith.mulf %29, %31 : vector<256x768xf32>
    %33 = vector.extract_strided_slice %4 {offsets = [2, 0], sizes = [1, 768], strides = [1, 1]} : vector<3x768xf32> to vector<1x768xf32>
    %34 = vector.broadcast %33 : vector<1x768xf32> to vector<256x768xf32>
    %35 = arith.addf %32, %34 : vector<256x768xf32>
    %c0_12 = arith.constant 0 : index
    %c0_13 = arith.constant 0 : index
    %36 = vector.load %arg4[%c0_12, %c0_13] : memref<256x768xf32, #tpu.memory_space<vmem>>, vector<256x768xf32>
    tpu.vector_store %arg4[%c0_12, %c0_13], %35 {strides = array<i32>} : memref<256x768xf32, #tpu.memory_space<vmem>>, vector<256x768xf32>,
    return
  }
  func.func @transform_0(%arg0: i32) -> (i32, i32) {
    %c0_i32 = arith.constant 0 : i32
    %c0_i32_0 = arith.constant 0 : i32
    return %arg0, %c0_i32 : i32, i32
  }
  func.func @transform_1(%arg0: i32) -> (i32, i32) {
    %c0_i32 = arith.constant 0 : i32
    %c0_i32_0 = arith.constant 0 : i32
    %c0_i32_1 = arith.constant 0 : i32
    return %c0_i32, %c0_i32_0 : i32, i32
  }
  func.func @transform_2(%arg0: i32) -> (i32, i32) {
    %c0_i32 = arith.constant 0 : i32
    %c0_i32_0 = arith.constant 0 : i32
    %c0_i32_1 = arith.constant 0 : i32
    return %c0_i32, %c0_i32_0 : i32, i32
  }
  func.func @transform_3(%arg0: i32) -> (i32, i32) {
    %c0_i32 = arith.constant 0 : i32
    %c0_i32_0 = arith.constant 0 : i32
    return %arg0, %c0_i32 : i32, i32
  }
}

</mosaic_0001>

<bundles_post_ra>
// kernel: bert_head_transform.1
= control target key start
LH: loop header
LB: loop body
LE: loop exit
PB: predicated region body
PF: predicated region fallthrough
CT: control target
= control target key end

     0   :  { %8 = vsyncpa [#allocation3], 0  ;;  %s14700_s0 = inlined_call_operand.hbm [shape: f32[16,768], index: 0, kind: input, shape index: {}]   ;;  %s14701_s1 = inlined_call_operand.hbm [shape: bf16[768,768], index: 1, kind: input, shape index: {}]   ;;  %s14702_s2 = inlined_call_operand.hbm [shape: f32[3,768], index: 2, kind: input, shape index: {}]   ;;  %s14703_s3 = inlined_call_operand.hbm [shape: f32[16,768], index: 3, kind: output, shape index: {}]  }
   0x1   :  { %9 = vsyncpa [#allocation6], 0 }
   0x2   :  { %10 = vsyncpa [#allocation4], 0  ;;  %s28_s14 = sshll.u32 %s14701_s1, 4  ;;  %s29_s14 = int_to_ptr.hbm [resolvable:$true] %s28_s14 }
   0x3   :  { %14 = vsyncadd [#allocation3], 23040  ;;  %s9282_s15 = smov [#allocation5]   ;;  %s15_s19 = sshll.u32 %s14700_s0, 4  ;;  %s16_s19 = int_to_ptr.hbm [resolvable:$true] %s15_s19 }
   0x4   :  { %s30_s16 = sshll.u32 %s9282_s15, 4  ;;  %s9283_s20 = smov 384   ;;  %s31_s16 = int_to_ptr.vmem [resolvable:$true] %s30_s16 }
   0x5   :  { %s9284_s21 = smov 24   ;;  %s9285_s22 = smov [#allocation2]  }
   0x6   :  { %36 = dma.hbm_to_vmem [thread:$0]  %s29_s14, 36864, %s31_s16, [#allocation6], %s9283_s20, %s9283_s20, %s9284_s21  }
   0x7   :  { %s17_s23 = sshll.u32 %s9285_s22, 4  ;;  %s9286_s24 = smov 768   ;;  %s18_s23 = int_to_ptr.vmem [resolvable:$true] %s17_s23 }
   0x8   :  { %s9287_s25 = smov 48   ;;  %s42_s27 = sshll.u32 %s14702_s2, 4  ;;  %s43_s27 = int_to_ptr.hbm [resolvable:$true] %s42_s27 }
   0x9   :  { %23 = dma.hbm_to_vmem [thread:$0]  %s16_s19, 1536, %s18_s23, [#allocation3], %s9286_s24, %s9286_s24, %s9287_s25  }
   0xa   :  { %s9288_s28 = smov [#allocation7]  }
   0xb   :  { %s44_s0 = sshll.u32 %s9288_s28, 4  ;;  %s45_s0 = int_to_ptr.vmem [resolvable:$true] %s44_s0 }
   0xc   :  { %47 = dma.hbm_to_vmem [thread:$0]  %s43_s27, 384, %s45_s0, [#allocation6]  }
   0xd   :  { %9276 = dma.done.wait [#allocation3], 24576  }
   0xe   :  { %9277 = vsyncadd [#allocation3], 4294942720 }
   0xf   :  { %9278 = dma.done.wait [#allocation6], 37248  }
  0x10   :  { %9279 = vsyncadd [#allocation6], 4294930048  ;;  %v7834_v0 = vld [vmem:[#allocation5 + $0x150] sm:$0xf]  ;;  %v8861_v1 = vld [vmem:[#allocation5 + $0x164] sm:$0xf0] }
  0x11   :  { %v8026_v2 = vld [vmem:[#allocation5 + $0x2d0] sm:$0xf]  ;;  %v7835_v3 = vor.u32 %v8861_v1, %v7834_v0  ;;  %v8909_v4 = vld [vmem:[#allocation5 + $0x2e4] sm:$0xf0]  ;;  %v7810_v11 = vld [vmem:[#allocation5 + $0x120] sm:$0xf] }
  0x12   :  { %v8218_v5 = vld [vmem:[#allocation5 + $0x450] sm:$0xf]  ;;  %v8957_v6 = vld [vmem:[#allocation5 + $0x464] sm:$0xf0]  ;;  %v8027_v7 = vor.u32 %v8909_v4, %v8026_v2  ;;  %v8855_v13 = vld [vmem:[#allocation5 + $0x134] sm:$0xf0] }
  0x13   :  { %v8219_v8 = vor.u32 %v8957_v6, %v8218_v5  ;;  %v8410_v9 = vld [vmem:[#allocation5 + $0x5d0] sm:$0xf]  ;;  %v9005_v10 = vld [vmem:[#allocation5 + $0x5e4] sm:$0xf0]  ;;  %2100 = vmatpush.bf16.msra.mxu0 %v7835_v3  ;;  %v8002_v14 = vld [vmem:[#allocation5 + $0x2a0] sm:$0xf]  ;;  %v7811_v16 = vor.u32 %v8855_v13, %v7810_v11 }
  0x14   :  { %v8411_v12 = vor.u32 %v9005_v10, %v8410_v9  ;;  %v8903_v15 = vld [vmem:[#allocation5 + $0x2b4] sm:$0xf0]  ;;  %2189 = vmatpush.bf16.msra.mxu1 %v8027_v7  ;;  %v8194_v18 = vld [vmem:[#allocation5 + $0x420] sm:$0xf]  ;;  %v7786_v23 = vld [vmem:[#allocation5 + $0xf0] sm:$0xf] }
  0x15   :  { %2278 = vmatpush.bf16.msra.mxu2 %v8219_v8  ;;  %v8003_v17 = vor.u32 %v8903_v15, %v8002_v14  ;;  %v8951_v19 = vld [vmem:[#allocation5 + $0x434] sm:$0xf0]  ;;  %v8386_v20 = vld [vmem:[#allocation5 + $0x5a0] sm:$0xf]  ;;  %v8849_v24 = vld [vmem:[#allocation5 + $0x104] sm:$0xf0] }
  0x16   :  { %2367 = vmatpush.bf16.msra.mxu3 %v8411_v12  ;;  %v8195_v21 = vor.u32 %v8951_v19, %v8194_v18  ;;  %v8999_v22 = vld [vmem:[#allocation5 + $0x5b4] sm:$0xf0]  ;;  %v7978_v26 = vld [vmem:[#allocation5 + $0x270] sm:$0xf]  ;;  %v8897_v27 = vld [vmem:[#allocation5 + $0x284] sm:$0xf0]  ;;  %v7787_v29 = vor.u32 %v8849_v24, %v7786_v23 }
  0x17   :  { %v8387_v25 = vor.u32 %v8999_v22, %v8386_v20  ;;  %v8170_v28 = vld [vmem:[#allocation5 + $0x3f0] sm:$0xf]  ;;  %2101 = vmatpush.bf16.msra.mxu0 %v7811_v16  ;;  %v8945_v30 = vld [vmem:[#allocation5 + $0x404] sm:$0xf0]  ;;  %v7979_v33 = vor.u32 %v8897_v27, %v7978_v26  ;;  %v7762_v35 = vld [vmem:[#allocation5 + $0xc0] sm:$0xf] }
  0x18   :  { %v8362_v31 = vld [vmem:[#allocation5 + $0x570] sm:$0xf]  ;;  %v8993_v32 = vld [vmem:[#allocation5 + $0x584] sm:$0xf0]  ;;  %2190 = vmatpush.bf16.msra.mxu1 %v8003_v17  ;;  %v8171_v34 = vor.u32 %v8945_v30, %v8170_v28  ;;  %v8843_v36 = vld [vmem:[#allocation5 + $0xd4] sm:$0xf0] }
  0x19   :  { %2279 = vmatpush.bf16.msra.mxu2 %v8195_v21  ;;  %v7954_v37 = vld [vmem:[#allocation5 + $0x240] sm:$0xf]  ;;  %v8363_v38 = vor.u32 %v8993_v32, %v8362_v31  ;;  %v8891_v39 = vld [vmem:[#allocation5 + $0x254] sm:$0xf0]  ;;  %v7763_v44 = vor.u32 %v8843_v36, %v7762_v35  ;;  %v7738_v47 = vld [vmem:[#allocation5 + $0x90] sm:$0xf] }
  0x1a   :  { %2368 = vmatpush.bf16.msra.mxu3 %v8387_v25  ;;  %v8146_v40 = vld [vmem:[#allocation5 + $0x3c0] sm:$0xf]  ;;  %v8939_v41 = vld [vmem:[#allocation5 + $0x3d4] sm:$0xf0]  ;;  %v7955_v45 = vor.u32 %v8891_v39, %v7954_v37  ;;  %v8837_v48 = vld [vmem:[#allocation5 + $0xa4] sm:$0xf0] }
  0x1b   :  { %v8338_v42 = vld [vmem:[#allocation5 + $0x540] sm:$0xf]  ;;  %v8987_v43 = vld [vmem:[#allocation5 + $0x554] sm:$0xf0]  ;;  %2102 = vmatpush.bf16.msra.mxu0 %v7787_v29  ;;  %v8147_v46 = vor.u32 %v8939_v41, %v8146_v40  ;;  %v7930_v49 = vld [vmem:[#allocation5 + $0x210] sm:$0xf]  ;;  %v7739_v56 = vor.u32 %v8837_v48, %v7738_v47 }
  0x1c   :  { %2191 = vmatpush.bf16.msra.mxu1 %v7979_v33  ;;  %v8339_v50 = vor.u32 %v8987_v43, %v8338_v42  ;;  %v8885_v51 = vld [vmem:[#allocation5 + $0x224] sm:$0xf0]  ;;  %v8122_v52 = vld [vmem:[#allocation5 + $0x390] sm:$0xf]  ;;  %v7714_v59 = vld [vmem:[#allocation5 + $0x60] sm:$0xf] }
  0x1d   :  { %2280 = vmatpush.bf16.msra.mxu2 %v8171_v34  ;;  %v8933_v53 = vld [vmem:[#allocation5 + $0x3a4] sm:$0xf0]  ;;  %v8314_v54 = vld [vmem:[#allocation5 + $0x510] sm:$0xf]  ;;  %v7931_v57 = vor.u32 %v8885_v51, %v7930_v49  ;;  %v8831_v60 = vld [vmem:[#allocation5 + $0x74] sm:$0xf0] }
  0x1e   :  { %2369 = vmatpush.bf16.msra.mxu3 %v8363_v38  ;;  %v8981_v55 = vld [vmem:[#allocation5 + $0x524] sm:$0xf0]  ;;  %v8123_v58 = vor.u32 %v8933_v53, %v8122_v52  ;;  %v7906_v61 = vld [vmem:[#allocation5 + $0x1e0] sm:$0xf]  ;;  %v8879_v63 = vld [vmem:[#allocation5 + $0x1f4] sm:$0xf0]  ;;  %v7715_v4 = vor.u32 %v8831_v60, %v7714_v59 }
  0x1f   :  { %2103 = vmatpush.bf16.msra.mxu0 %v7763_v44  ;;  %v8315_v62 = vor.u32 %v8981_v55, %v8314_v54  ;;  %v8098_v0 = vld [vmem:[#allocation5 + $0x360] sm:$0xf]  ;;  %v8927_v1 = vld [vmem:[#allocation5 + $0x374] sm:$0xf0]  ;;  %v7907_v5 = vor.u32 %v8879_v63, %v7906_v61  ;;  %v7690_v7 = vld [vmem:[#allocation5 + $0x30] sm:$0xf] }
  0x20   :  { %2192 = vmatpush.bf16.msra.mxu1 %v7955_v45  ;;  %v8290_v2 = vld [vmem:[#allocation5 + $0x4e0] sm:$0xf]  ;;  %v8975_v3 = vld [vmem:[#allocation5 + $0x4f4] sm:$0xf0]  ;;  %v8099_v6 = vor.u32 %v8927_v1, %v8098_v0  ;;  %v8825_v8 = vld [vmem:[#allocation5 + $0x44] sm:$0xf0] }
  0x21   :  { %2281 = vmatpush.bf16.msra.mxu2 %v8147_v46  ;;  %v7882_v9 = vld [vmem:[#allocation5 + $0x1b0] sm:$0xf]  ;;  %v8291_v10 = vor.u32 %v8975_v3, %v8290_v2  ;;  %v8873_v11 = vld [vmem:[#allocation5 + $0x1c4] sm:$0xf0]  ;;  %v7666_v16 = vld [vmem:[#allocation5] sm:$0xf]  ;;  %v7691_v17 = vor.u32 %v8825_v8, %v7690_v7 }
  0x22   :  { %2370 = vmatpush.bf16.msra.mxu3 %v8339_v50  ;;  %v8074_v12 = vld [vmem:[#allocation5 + $0x330] sm:$0xf]  ;;  %v8921_v13 = vld [vmem:[#allocation5 + $0x344] sm:$0xf0]  ;;  %v8819_v18 = vld [vmem:[#allocation5 + $0x14] sm:$0xf0]  ;;  %v7883_v21 = vor.u32 %v8873_v11, %v7882_v9 }
  0x23   :  { %2104 = vmatpush.bf16.msra.mxu0 %v7739_v56  ;;  %v8266_v14 = vld [vmem:[#allocation5 + $0x4b0] sm:$0xf]  ;;  %v8969_v15 = vld [vmem:[#allocation5 + $0x4c4] sm:$0xf0]  ;;  %v7858_v19 = vld [vmem:[#allocation5 + $0x180] sm:$0xf]  ;;  %v8075_v22 = vor.u32 %v8921_v13, %v8074_v12  ;;  %v7667_v33 = vor.u32 %v8819_v18, %v7666_v16 }
  0x24   :  { %2193 = vmatpush.bf16.msra.mxu1 %v7931_v57  ;;  %v8867_v20 = vld [vmem:[#allocation5 + $0x194] sm:$0xf0]  ;;  %v8050_v23 = vld [vmem:[#allocation5 + $0x300] sm:$0xf]  ;;  %v8267_v26 = vor.u32 %v8969_v15, %v8266_v14  ;;  %v66_v29 = vld [vmem:[#allocation2 + $0x30] sm:$0xff] }
  0x25   :  { %2282 = vmatpush.bf16.msra.mxu2 %v8123_v58  ;;  %v8915_v24 = vld [vmem:[#allocation5 + $0x314] sm:$0xf0]  ;;  %v8242_v25 = vld [vmem:[#allocation5 + $0x480] sm:$0xf]  ;;  %v61_v30 = vld [vmem:[#allocation2 + $0x8] sm:$0xff]  ;;  %v7859_v37 = vor.u32 %v8867_v20, %v7858_v19 }
  0x26   :  { %2371 = vmatpush.bf16.msra.mxu3 %v8315_v62  ;;  %v8963_v27 = vld [vmem:[#allocation5 + $0x494] sm:$0xf0]  ;;  %v60_v28 = vld [vmem:[#allocation2] sm:$0xff]  ;;  %v8858_v31 = vld [vmem:[#allocation5 + $0x154] sm:$0xf]  ;;  %v8051_v38 = vor.u32 %v8915_v24, %v8050_v23 }
  0x27   :  { %2105 = vmatpush.bf16.msra.mxu0 %v7715_v4  ;;  %v7836_v32 = vld [vmem:[#allocation5 + $0x168] sm:$0xf0]  ;;  %v67_v34 = vld [vmem:[#allocation2 + $0x38] sm:$0xff]  ;;  %v8906_v35 = vld [vmem:[#allocation5 + $0x2d4] sm:$0xf]  ;;  %v8243_v42 = vor.u32 %v8963_v27, %v8242_v25  ;;  %v9322_v47 = vpack.c.bf16 %v66_v29, %v60_v28 }
  0x28   :  { %2194 = vmatpush.bf16.msra.mxu1 %v7907_v5  ;;  %v8028_v36 = vld [vmem:[#allocation5 + $0x2e8] sm:$0xf0]  ;;  %v62_v39 = vld [vmem:[#allocation2 + $0x10] sm:$0xff]  ;;  %v68_v40 = vld [vmem:[#allocation2 + $0x40] sm:$0xff]  ;;  %v7839_v44 = vor.u32 %v8858_v31, %v7836_v32  ;;  %v9324_v51 = vpack.c.bf16 %v67_v34, %v61_v30 }
  0x29   :  { %2283 = vmatpush.bf16.msra.mxu2 %v8099_v6  ;;  %v63_v41 = vld [vmem:[#allocation2 + $0x18] sm:$0xff]  ;;  %v69_v43 = vld [vmem:[#allocation2 + $0x48] sm:$0xff]  ;;  %v8602_v45 = vld [vmem:[#allocation5 + $0x750] sm:$0xf]  ;;  %15285 = vst [vmem:[#allocation12_spill] sm:$0xff] %v9322_v47  ;;  %v8031_v48 = vor.u32 %v8906_v35, %v8028_v36  ;;  %v9326_v52 = vpack.c.bf16 %v68_v40, %v62_v39 }
  0x2a   :  { %2372 = vmatpush.bf16.msra.mxu3 %v8291_v10  ;;  %v9053_v46 = vld [vmem:[#allocation5 + $0x764] sm:$0xf0]  ;;  %v8794_v49 = vld [vmem:[#allocation5 + $0x8d0] sm:$0xf]  ;;  %15286 = vst [vmem:[#allocation13_spill] sm:$0xff] %v9324_v51  ;;  %v9328_v53 = vpack.c.bf16 %v69_v43, %v63_v41  ;;  %v72_v4 = vld [vmem:[#allocation2 + $0x60] sm:$0xff] }
  0x2b   :  { %2106 = vmatpush.bf16.msra.mxu0 %v7691_v17  ;;  %v9101_v50 = vld [vmem:[#allocation5 + $0x8e4] sm:$0xf0]  ;;  %15287 = vst [vmem:[#allocation14_spill] sm:$0xff] %v9326_v52  ;;  %v8603_v54 = vor.u32 %v9053_v46, %v8602_v45  ;;  %v8852_v56 = vld [vmem:[#allocation5 + $0x124] sm:$0xf]  ;;  %v78_v5 = vld [vmem:[#allocation2 + $0x90] sm:$0xff] }
  0x2c   :  { %2195 = vmatpush.bf16.msra.mxu1 %v7883_v21  ;;  %15288 = vst [vmem:[#allocation15_spill] sm:$0xff] %v9328_v53  ;;  %v8795_v55 = vor.u32 %v9101_v50, %v8794_v49  ;;  %v7812_v57 = vld [vmem:[#allocation5 + $0x138] sm:$0xf0]  ;;  %v8578_v58 = vld [vmem:[#allocation5 + $0x720] sm:$0xf]  ;;  %v73_v6 = vld [vmem:[#allocation2 + $0x68] sm:$0xff]  ;;  %v9334_v12 = vpack.c.bf16 %v78_v5, %v72_v4 }
  0x2d   :  { %2284 = vmatpush.bf16.msra.mxu2 %v8075_v22  ;;  %v7815_v59 = vor.u32 %v8852_v56, %v7812_v57  ;;  %v9047_v60 = vld [vmem:[#allocation5 + $0x734] sm:$0xf0]  ;;  %v8900_v61 = vld [vmem:[#allocation5 + $0x2a4] sm:$0xf]  ;;  %v8004_v62 = vld [vmem:[#allocation5 + $0x2b8] sm:$0xf0] }
  0x2e   :  { %2373 = vmatpush.bf16.msra.mxu3 %v8267_v26  ;;  %v8579_v63 = vor.u32 %v9047_v60, %v8578_v58  ;;  %v8007_v0 = vor.u32 %v8900_v61, %v8004_v62  ;;  %v8770_v1 = vld [vmem:[#allocation5 + $0x8a0] sm:$0xf]  ;;  %v9095_v2 = vld [vmem:[#allocation5 + $0x8b4] sm:$0xf0]  ;;  %v74_v8 = vld [vmem:[#allocation2 + $0x70] sm:$0xff]  ;;  %15289 = vst [vmem:[#allocation16_spill] sm:$0xff] %v9334_v12 }
  0x2f   :  { %2107 = vmatpush.bf16.msra.mxu0 %v7667_v33  ;;  %v8771_v3 = vor.u32 %v9095_v2, %v8770_v1  ;;  %v79_v7 = vld [vmem:[#allocation2 + $0x98] sm:$0xff]  ;;  %v80_v9 = vld [vmem:[#allocation2 + $0xa0] sm:$0xff]  ;;  %v81_v11 = vld [vmem:[#allocation2 + $0xa8] sm:$0xff] }
  0x30   :  { %2196 = vmatpush.bf16.msra.mxu1 %v7859_v37  ;;  %v75_v10 = vld [vmem:[#allocation2 + $0x78] sm:$0xff]  ;;  %v9336_v13 = vpack.c.bf16 %v79_v7, %v73_v6  ;;  %v9338_v14 = vpack.c.bf16 %v80_v9, %v74_v8  ;;  %v84_v16 = vld [vmem:[#allocation2 + $0xc0] sm:$0xff]  ;;  %v90_v17 = vld [vmem:[#allocation2 + $0xf0] sm:$0xff] }
  0x31   :  { %2285 = vmatpush.bf16.msra.mxu2 %v8051_v38  ;;  %v9340_v15 = vpack.c.bf16 %v81_v11, %v75_v10  ;;  %v85_v18 = vld [vmem:[#allocation2 + $0xc8] sm:$0xff]  ;;  %v91_v19 = vld [vmem:[#allocation2 + $0xf8] sm:$0xff]  ;;  %v86_v20 = vld [vmem:[#allocation2 + $0xd0] sm:$0xff]  ;;  %v9346_v24 = vpack.c.bf16 %v90_v17, %v84_v16 }
  0x32   :  { %2374 = vmatpush.bf16.msra.mxu3 %v8243_v42  ;;  %2108 = vmatmul.bf16.vlgmr.msra.gmra.mxu0 %v9322_v47  ;;  %15290 = vst [vmem:[#allocation17_spill] sm:$0xff] %v9336_v13  ;;  %v92_v21 = vld [vmem:[#allocation2 + $0x100] sm:$0xff]  ;;  %v87_v22 = vld [vmem:[#allocation2 + $0xd8] sm:$0xff]  ;;  %v93_v23 = vld [vmem:[#allocation2 + $0x108] sm:$0xff]  ;;  %v9348_v25 = vpack.c.bf16 %v91_v19, %v85_v18 }
  0x33   :  { %2197 = vmatmul.bf16.vlgmr.msra.gmra.mxu1 %v9324_v51  ;;  %2456 = vmatpush.bf16.msrb.mxu0 %v8603_v54  ;;  %15291 = vst [vmem:[#allocation18_spill] sm:$0xff] %v9338_v14  ;;  %v9350_v26 = vpack.c.bf16 %v92_v21, %v86_v20  ;;  %v9352_v27 = vpack.c.bf16 %v93_v23, %v87_v22  ;;  %v8846_v28 = vld [vmem:[#allocation5 + $0xf4] sm:$0xf]  ;;  %v7788_v29 = vld [vmem:[#allocation5 + $0x108] sm:$0xf0]  ;;  %v96_v40 = vld [vmem:[#allocation2 + $0x120] sm:$0xff] }
  0x34   :  { %2286 = vmatmul.bf16.vlgmr.msra.gmra.mxu2 %v9326_v52  ;;  %2545 = vmatpush.bf16.msrb.mxu1 %v8795_v55  ;;  %15292 = vst [vmem:[#allocation19_spill] sm:$0xff] %v9340_v15  ;;  %v8554_v30 = vld [vmem:[#allocation5 + $0x6f0] sm:$0xf]  ;;  %v7791_v31 = vor.u32 %v8846_v28, %v7788_v29  ;;  %v9041_v32 = vld [vmem:[#allocation5 + $0x704] sm:$0xf0]  ;;  %v103_v43 = vld [vmem:[#allocation2 + $0x158] sm:$0xff] }
  0x35   :  { %2634 = vmatpush.bf16.msrb.mxu2 %v7839_v44  ;;  %2375 = vmatmul.bf16.vlgmr.msra.gmra.mxu3 %v9328_v53  ;;  %15293 = vst [vmem:[#allocation20_spill] sm:$0xff] %v9346_v24  ;;  %v8894_v33 = vld [vmem:[#allocation5 + $0x274] sm:$0xf]  ;;  %v7980_v34 = vld [vmem:[#allocation5 + $0x288] sm:$0xf0]  ;;  %v8555_v35 = vor.u32 %v9041_v32, %v8554_v30  ;;  %v104_v45 = vld [vmem:[#allocation2 + $0x160] sm:$0xff] }
  0x36   :  { %2723 = vmatpush.bf16.msrb.mxu3 %v8031_v48  ;;  %15294 = vst [vmem:[#allocation21_spill] sm:$0xff] %v9348_v25  ;;  %v7983_v36 = vor.u32 %v8894_v33, %v7980_v34  ;;  %v8746_v37 = vld [vmem:[#allocation5 + $0x870] sm:$0xf]  ;;  %v9089_v38 = vld [vmem:[#allocation5 + $0x884] sm:$0xf0]  ;;  %v99_v46 = vld [vmem:[#allocation2 + $0x138] sm:$0xff] }
  0x37   :  { %2457 = vmatpush.bf16.msrb.mxu0 %v8579_v63  ;;  %15295 = vst [vmem:[#allocation22_spill] sm:$0xff] %v9350_v26  ;;  %v8747_v39 = vor.u32 %v9089_v38, %v8746_v37  ;;  %v102_v41 = vld [vmem:[#allocation2 + $0x150] sm:$0xff]  ;;  %v97_v42 = vld [vmem:[#allocation2 + $0x128] sm:$0xff]  ;;  %v108_v56 = vld [vmem:[#allocation2 + $0x180] sm:$0xff] }
  0x38   :  { %2546 = vmatpush.bf16.msrb.mxu1 %v8771_v3  ;;  %15296 = vst [vmem:[#allocation23_spill] sm:$0xff] %v9352_v27  ;;  %v98_v44 = vld [vmem:[#allocation2 + $0x130] sm:$0xff]  ;;  %v105_v48 = vld [vmem:[#allocation2 + $0x168] sm:$0xff]  ;;  %v9358_v49 = vpack.c.bf16 %v102_v41, %v96_v40  ;;  %v9360_v50 = vpack.c.bf16 %v103_v43, %v97_v42  ;;  %v116_v61 = vld [vmem:[#allocation2 + $0x1c0] sm:$0xff] }
  0x39   :  { %2635 = vmatpush.bf16.msrb.mxu2 %v7815_v59  ;;  %v9362_v54 = vpack.c.bf16 %v104_v45, %v98_v44  ;;  %v9364_v55 = vpack.c.bf16 %v105_v48, %v99_v46  ;;  %v114_v57 = vld [vmem:[#allocation2 + $0x1b0] sm:$0xff]  ;;  %v109_v58 = vld [vmem:[#allocation2 + $0x188] sm:$0xff]  ;;  %v115_v59 = vld [vmem:[#allocation2 + $0x1b8] sm:$0xff] }
  0x3a   :  { %2724 = vmatpush.bf16.msrb.mxu3 %v8007_v0  ;;  %15297 = vst [vmem:[#allocation24_spill] sm:$0xff] %v9358_v49  ;;  %v110_v60 = vld [vmem:[#allocation2 + $0x190] sm:$0xff]  ;;  %v111_v62 = vld [vmem:[#allocation2 + $0x198] sm:$0xff]  ;;  %v117_v63 = vld [vmem:[#allocation2 + $0x1c8] sm:$0xff]  ;;  %v9370_v0 = vpack.c.bf16 %v114_v57, %v108_v56  ;;  %v9372_v1 = vpack.c.bf16 %v115_v59, %v109_v58 }
  0x3b   :  { %2458 = vmatpush.bf16.msrb.mxu0 %v8555_v35  ;;  %15298 = vst [vmem:[#allocation25_spill] sm:$0xff] %v9360_v50  ;;  %v9374_v2 = vpack.c.bf16 %v116_v61, %v110_v60  ;;  %v9376_v3 = vpack.c.bf16 %v117_v63, %v111_v62  ;;  %v8840_v4 = vld [vmem:[#allocation5 + $0xc4] sm:$0xf]  ;;  %v7764_v5 = vld [vmem:[#allocation5 + $0xd8] sm:$0xf0]  ;;  %v126_v21 = vld [vmem:[#allocation2 + $0x210] sm:$0xff] }
  0x3c   :  { %2547 = vmatpush.bf16.msrb.mxu1 %v8747_v39  ;;  %15299 = vst [vmem:[#allocation26_spill] sm:$0xff] %v9362_v54  ;;  %v8530_v6 = vld [vmem:[#allocation5 + $0x6c0] sm:$0xf]  ;;  %v7767_v7 = vor.u32 %v8840_v4, %v7764_v5  ;;  %v9035_v8 = vld [vmem:[#allocation5 + $0x6d4] sm:$0xf0]  ;;  %v121_v22 = vld [vmem:[#allocation2 + $0x1e8] sm:$0xff] }
  0x3d   :  { %2636 = vmatpush.bf16.msrb.mxu2 %v7791_v31  ;;  %15300 = vst [vmem:[#allocation27_spill] sm:$0xff] %v9364_v55  ;;  %v8888_v9 = vld [vmem:[#allocation5 + $0x244] sm:$0xf]  ;;  %v7956_v10 = vld [vmem:[#allocation5 + $0x258] sm:$0xf0]  ;;  %v8531_v11 = vor.u32 %v9035_v8, %v8530_v6  ;;  %v122_v28 = vld [vmem:[#allocation2 + $0x1f0] sm:$0xff] }
  0x3e   :  { %2725 = vmatpush.bf16.msrb.mxu3 %v7983_v36  ;;  %15301 = vst [vmem:[#allocation28_spill] sm:$0xff] %v9370_v0  ;;  %v7959_v16 = vor.u32 %v8888_v9, %v7956_v10  ;;  %v8722_v17 = vld [vmem:[#allocation5 + $0x840] sm:$0xf]  ;;  %v9083_v18 = vld [vmem:[#allocation5 + $0x854] sm:$0xf0]  ;;  %v129_v31 = vld [vmem:[#allocation2 + $0x228] sm:$0xff] }
  0x3f   :  { %15302 = vst [vmem:[#allocation29_spill] sm:$0xff] %v9372_v1  ;;  %v8723_v19 = vor.u32 %v9083_v18, %v8722_v17  ;;  %2459 = vmatpush.bf16.msrb.mxu0 %v8531_v11  ;;  %v120_v20 = vld [vmem:[#allocation2 + $0x1e0] sm:$0xff]  ;;  %v127_v23 = vld [vmem:[#allocation2 + $0x218] sm:$0xff]  ;;  %v138_v37 = vld [vmem:[#allocation2 + $0x270] sm:$0xff] }
  0x40   :  { %15303 = vst [vmem:[#allocation30_spill] sm:$0xff] %v9374_v2  ;;  %v128_v29 = vld [vmem:[#allocation2 + $0x220] sm:$0xff]  ;;  %v123_v30 = vld [vmem:[#allocation2 + $0x1f8] sm:$0xff]  ;;  %v9382_v32 = vpack.c.bf16 %v126_v21, %v120_v20  ;;  %v9384_v33 = vpack.c.bf16 %v127_v23, %v121_v22  ;;  %v133_v38 = vld [vmem:[#allocation2 + $0x248] sm:$0xff] }
  0x41   :  { %15304 = vst [vmem:[#allocation31_spill] sm:$0xff] %v9376_v3  ;;  %2637 = vmatpush.bf16.msrb.mxu2 %v7767_v7  ;;  %2548 = vmatpush.bf16.msrb.mxu1 %v8723_v19  ;;  %v9386_v34 = vpack.c.bf16 %v128_v29, %v122_v28  ;;  %v9388_v35 = vpack.c.bf16 %v129_v31, %v123_v30  ;;  %v132_v36 = vld [vmem:[#allocation2 + $0x240] sm:$0xff]  ;;  %v139_v39 = vld [vmem:[#allocation2 + $0x278] sm:$0xff]  ;;  %v134_v40 = vld [vmem:[#allocation2 + $0x250] sm:$0xff] }
  0x42   :  { %2113 = vmatmul.bf16.gmra.mxu0 %v9334_v12  ;;  %2726 = vmatpush.bf16.msrb.mxu3 %v7959_v16  ;;  %15305 = vst [vmem:[#allocation32_spill] sm:$0xff] %v9382_v32  ;;  %v140_v41 = vld [vmem:[#allocation2 + $0x280] sm:$0xff]  ;;  %v135_v42 = vld [vmem:[#allocation2 + $0x258] sm:$0xff]  ;;  %v141_v43 = vld [vmem:[#allocation2 + $0x288] sm:$0xff]  ;;  %v9394_v44 = vpack.c.bf16 %v138_v37, %v132_v36  ;;  %v9396_v45 = vpack.c.bf16 %v139_v39, %v133_v38 }
  0x43   :  { %2202 = vmatmul.bf16.gmra.mxu1 %v9336_v13  ;;  %15306 = vst [vmem:[#allocation33_spill] sm:$0xff] %v9384_v33  ;;  %v9398_v46 = vpack.c.bf16 %v140_v41, %v134_v40  ;;  %v9400_v48 = vpack.c.bf16 %v141_v43, %v135_v42  ;;  %v8834_v56 = vld [vmem:[#allocation5 + $0x94] sm:$0xf]  ;;  %v7740_v57 = vld [vmem:[#allocation5 + $0xa8] sm:$0xf0]  ;;  %v144_v8 = vld [vmem:[#allocation2 + $0x2a0] sm:$0xff] }
  0x44   :  { %2291 = vmatmul.bf16.gmra.mxu2 %v9338_v14  ;;  %15307 = vst [vmem:[#allocation34_spill] sm:$0xff] %v9386_v34  ;;  %v8506_v58 = vld [vmem:[#allocation5 + $0x690] sm:$0xf]  ;;  %v7743_v59 = vor.u32 %v8834_v56, %v7740_v57  ;;  %v9029_v60 = vld [vmem:[#allocation5 + $0x6a4] sm:$0xf0]  ;;  %v151_v11 = vld [vmem:[#allocation2 + $0x2d8] sm:$0xff] }
  0x45   :  { %2380 = vmatmul.bf16.gmra.mxu3 %v9340_v15  ;;  %15308 = vst [vmem:[#allocation35_spill] sm:$0xff] %v9388_v35  ;;  %v8882_v61 = vld [vmem:[#allocation5 + $0x214] sm:$0xf]  ;;  %v7932_v62 = vld [vmem:[#allocation5 + $0x228] sm:$0xf0]  ;;  %v8507_v63 = vor.u32 %v9029_v60, %v8506_v58  ;;  %v152_v17 = vld [vmem:[#allocation2 + $0x2e0] sm:$0xff] }
  0x46   :  { %15309 = vst [vmem:[#allocation36_spill] sm:$0xff] %v9394_v44  ;;  %v7935_v4 = vor.u32 %v8882_v61, %v7932_v62  ;;  %2638 = vmatpush.bf16.msrb.mxu2 %v7743_v59  ;;  %v8698_v5 = vld [vmem:[#allocation5 + $0x810] sm:$0xf]  ;;  %v9077_v6 = vld [vmem:[#allocation5 + $0x824] sm:$0xf0]  ;;  %v147_v18 = vld [vmem:[#allocation2 + $0x2b8] sm:$0xff] }
  0x47   :  { %15310 = vst [vmem:[#allocation37_spill] sm:$0xff] %v9396_v45  ;;  %2460 = vmatpush.bf16.msrb.mxu0 %v8507_v63  ;;  %v8699_v7 = vor.u32 %v9077_v6, %v8698_v5  ;;  %v150_v9 = vld [vmem:[#allocation2 + $0x2d0] sm:$0xff]  ;;  %v145_v10 = vld [vmem:[#allocation2 + $0x2a8] sm:$0xff]  ;;  %v636_v28 = vld [vmem:[#allocation7] sm:$0x77] }
  0x48   :  { %15311 = vst [vmem:[#allocation38_spill] sm:$0xff] %v9398_v46  ;;  %2727 = vmatpush.bf16.msrb.mxu3 %v7935_v4  ;;  %v146_v16 = vld [vmem:[#allocation2 + $0x2b0] sm:$0xff]  ;;  %v153_v19 = vld [vmem:[#allocation2 + $0x2e8] sm:$0xff]  ;;  %v9406_v20 = vpack.c.bf16 %v150_v9, %v144_v8  ;;  %v9408_v21 = vpack.c.bf16 %v151_v11, %v145_v10  ;;  %v642_v29 = vperm.slane %v636_v28, 0  ;;  %v156_v30 = vld [vmem:[#allocation2 + $0x300] sm:$0xff] }
  0x49   :  { %15312 = vst [vmem:[#allocation39_spill] sm:$0xff] %v9400_v48  ;;  %2549 = vmatpush.bf16.msrb.mxu1 %v8699_v7  ;;  %v9410_v22 = vpack.c.bf16 %v152_v17, %v146_v16  ;;  %v9412_v23 = vpack.c.bf16 %v153_v19, %v147_v18  ;;  %v162_v31 = vld [vmem:[#allocation2 + $0x330] sm:$0xff]  ;;  %v157_v36 = vld [vmem:[#allocation2 + $0x308] sm:$0xff]  ;;  %v163_v38 = vld [vmem:[#allocation2 + $0x338] sm:$0xff] }
  0x4a   :  { %15313 = vst [vmem:[#allocation40_spill] sm:$0xff] %v9406_v20  ;;  %v9418_v37 = vperm.slane %v642_v29, 0  ;;  %v158_v39 = vld [vmem:[#allocation2 + $0x310] sm:$0xff]  ;;  %v164_v40 = vld [vmem:[#allocation2 + $0x340] sm:$0xff]  ;;  %v159_v41 = vld [vmem:[#allocation2 + $0x318] sm:$0xff]  ;;  %v9420_v43 = vpack.c.bf16 %v162_v31, %v156_v30  ;;  %v9422_v57 = vpack.c.bf16 %v163_v38, %v157_v36 }
  0x4b   :  { %15314 = vst [vmem:[#allocation41_spill] sm:$0xff] %v9408_v21  ;;  %v165_v42 = vld [vmem:[#allocation2 + $0x348] sm:$0xff]  ;;  %v9424_v58 = vpack.c.bf16 %v164_v40, %v158_v39  ;;  %v8828_v63 = vld [vmem:[#allocation5 + $0x64] sm:$0xf]  ;;  %v7716_v4 = vld [vmem:[#allocation5 + $0x78] sm:$0xf0] }
  0x4c   :  { %15315 = vst [vmem:[#allocation42_spill] sm:$0xff] %v9410_v22  ;;  %v9427_v61 = vpack.c.bf16 %v165_v42, %v159_v41  ;;  %v8482_v5 = vld [vmem:[#allocation5 + $0x660] sm:$0xf]  ;;  %v7719_v6 = vor.u32 %v8828_v63, %v7716_v4  ;;  %v9023_v7 = vld [vmem:[#allocation5 + $0x674] sm:$0xf0]  ;;  %v174_v41 = vld [vmem:[#allocation2 + $0x390] sm:$0xff] }
  0x4d   :  { %15316 = vst [vmem:[#allocation43_spill] sm:$0xff] %v9412_v23  ;;  %v8876_v8 = vld [vmem:[#allocation5 + $0x1e4] sm:$0xf]  ;;  %v7908_v9 = vld [vmem:[#allocation5 + $0x1f8] sm:$0xf0]  ;;  %v8483_v11 = vor.u32 %v9023_v7, %v8482_v5  ;;  %v169_v42 = vld [vmem:[#allocation2 + $0x368] sm:$0xff] }
  0x4e   :  { %15317 = vst [vmem:[#allocation44_spill] sm:$0xff] %v9420_v43  ;;  %v7911_v16 = vor.u32 %v8876_v8, %v7908_v9  ;;  %2639 = vmatpush.bf16.msrb.mxu2 %v7719_v6  ;;  %v8674_v31 = vld [vmem:[#allocation5 + $0x7e0] sm:$0xf]  ;;  %v9071_v36 = vld [vmem:[#allocation5 + $0x7f4] sm:$0xf0]  ;;  %v177_v63 = vld [vmem:[#allocation2 + $0x3a8] sm:$0xff] }
  0x4f   :  { %15318 = vst [vmem:[#allocation45_spill] sm:$0xff] %v9422_v57  ;;  %2461 = vmatpush.bf16.msrb.mxu0 %v8483_v11  ;;  %v8675_v39 = vor.u32 %v9071_v36, %v8674_v31  ;;  %v168_v40 = vld [vmem:[#allocation2 + $0x360] sm:$0xff]  ;;  %v8412_v14 = vld [vmem:[#allocation5 + $0x5e8] sm:$0xf0]  ;;  %v246_v52 = vld [vmem:[#allocation2 + $0x5d0] sm:$0xff] }
  0x50   :  { %15319 = vst [vmem:[#allocation46_spill] sm:$0xff] %v9424_v58  ;;  %2728 = vmatpush.bf16.msrb.mxu3 %v7911_v16  ;;  %v9436_v5 = vpack.c.bf16 %v174_v41, %v168_v40  ;;  %v240_v53 = vld [vmem:[#allocation2 + $0x5a0] sm:$0xff] }
  0x51   :  { %15320 = vst [vmem:[#allocation47_spill] sm:$0xff] %v9427_v61  ;;  %2550 = vmatpush.bf16.msrb.mxu1 %v8675_v39 }
  0x52   :  { %2118 = vmatmul.bf16.gmra.mxu0 %v9346_v24  ;;  %15321 = vst [vmem:[#allocation48_spill] sm:$0xff] %v9436_v5 }
  0x53   :  { %2207 = vmatmul.bf16.gmra.mxu1 %v9348_v25 }
  0x54   :  { %2296 = vmatmul.bf16.gmra.mxu2 %v9350_v26 }
  0x55   :  { %2385 = vmatmul.bf16.gmra.mxu3 %v9352_v27 }
  0x62   :  { %2123 = vmatmul.bf16.gmra.mxu0 %v9358_v49 }
  0x63   :  { %2212 = vmatmul.bf16.gmra.mxu1 %v9360_v50 }
  0x64   :  { %2301 = vmatmul.bf16.gmra.mxu2 %v9362_v54 }
  0x65   :  { %2390 = vmatmul.bf16.gmra.mxu3 %v9364_v55  ;;  %v217_v55 = vld [vmem:[#allocation2 + $0x4e8] sm:$0xff] }
  0x72   :  { %2128 = vmatmul.bf16.gmra.mxu0 %v9370_v0 }
  0x73   :  { %2217 = vmatmul.bf16.gmra.mxu1 %v9372_v1 }
  0x74   :  { %2306 = vmatmul.bf16.gmra.mxu2 %v9374_v2  ;;  %v222_v2 = vld [vmem:[#allocation2 + $0x510] sm:$0xff] }
  0x75   :  { %2395 = vmatmul.bf16.gmra.mxu3 %v9376_v3  ;;  %v216_v3 = vld [vmem:[#allocation2 + $0x4e0] sm:$0xff] }
  0x82   :  { %2133 = vmatmul.bf16.gmra.mxu0 %v9382_v32 }
  0x83   :  { %2222 = vmatmul.bf16.gmra.mxu1 %v9384_v33 }
  0x84   :  { %2311 = vmatmul.bf16.gmra.mxu2 %v9386_v34  ;;  %v9059_v34 = vld [vmem:[#allocation5 + $0x794] sm:$0xf0] }
  0x85   :  { %2400 = vmatmul.bf16.gmra.mxu3 %v9388_v35 }
  0x92   :  { %2138 = vmatmul.bf16.gmra.mxu0 %v9394_v44 }
  0x93   :  { %2227 = vmatmul.bf16.gmra.mxu1 %v9396_v45 }
  0x94   :  { %2316 = vmatmul.bf16.gmra.mxu2 %v9398_v46 }
  0x95   :  { %2405 = vmatmul.bf16.gmra.mxu3 %v9400_v48 }
  0xa2   :  { %2143 = vmatmul.bf16.gmra.mxu0 %v9406_v20 }
  0xa3   :  { %2232 = vmatmul.bf16.gmra.mxu1 %v9408_v21 }
  0xa4   :  { %2321 = vmatmul.bf16.gmra.mxu2 %v9410_v22 }
  0xa5   :  { %2410 = vmatmul.bf16.gmra.mxu3 %v9412_v23  ;;  %v193_v23 = vld [vmem:[#allocation2 + $0x428] sm:$0xff] }
  0xaf   :  { %v2109_v56 = vpop.f32.mrf.mxu0 }
  0xb0   :  { %v2110_v59 = vadd.f32 %v2109_v56, %v9418_v37  ;;  %v2198_v60 = vpop.f32.mrf.mxu1  ;;  %v175_v56 = vld [vmem:[#allocation2 + $0x398] sm:$0xff] }
  0xb1   :  { %v9438_v9 = vpack.c.bf16 %v175_v56, %v169_v42  ;;  %v180_v42 = vld [vmem:[#allocation2 + $0x3c0] sm:$0xff]  ;;  %v186_v56 = vld [vmem:[#allocation2 + $0x3f0] sm:$0xff] }
  0xb2   :  { %v2199_v62 = vadd.f32 %v2198_v60, %v2110_v59  ;;  %2148 = vmatmul.bf16.gmra.mxu0 %v9420_v43  ;;  %v170_v59 = vld [vmem:[#allocation2 + $0x370] sm:$0xff]  ;;  %v176_v60 = vld [vmem:[#allocation2 + $0x3a0] sm:$0xff] }
  0xb3   :  { %2237 = vmatmul.bf16.gmra.mxu1 %v9422_v57  ;;  %15322 = vst [vmem:[#allocation49_spill] sm:$0xff] %v9438_v9 }
  0xb4   :  { %2326 = vmatmul.bf16.gmra.mxu2 %v9424_v58  ;;  %v198_v58 = vld [vmem:[#allocation2 + $0x450] sm:$0xff] }
  0xb5   :  { %2415 = vmatmul.bf16.gmra.mxu3 %v9427_v61  ;;  %v192_v61 = vld [vmem:[#allocation2 + $0x420] sm:$0xff] }
  0xb7   :  { %v2287_v10 = vpop.f32.mrf.mxu2  ;;  %v2111_v19 = vpop.f32.mrf.mxu0 }
  0xb8   :  { %v2288_v17 = vadd.f32 %v2287_v10, %v2199_v62  ;;  %v2376_v18 = vpop.f32.mrf.mxu3  ;;  %v2112_v28 = vadd.f32 %v2111_v19, %v9418_v37  ;;  %v2200_v29 = vpop.f32.mrf.mxu1  ;;  %v171_v62 = vld [vmem:[#allocation2 + $0x378] sm:$0xff]  ;;  %v9440_v10 = vpack.c.bf16 %v176_v60, %v170_v59  ;;  %v181_v59 = vld [vmem:[#allocation2 + $0x3c8] sm:$0xff] }
  0xb9   :  { %v187_v60 = vld [vmem:[#allocation2 + $0x3f8] sm:$0xff] }
  0xba   :  { %v9434_v30 = vadd.f32 %v2376_v18, %v2288_v17  ;;  %v2201_v38 = vadd.f32 %v2200_v29, %v2112_v28  ;;  %15323 = vst [vmem:[#allocation50_spill] sm:$0xff] %v9440_v10  ;;  %v9443_v17 = vpack.c.bf16 %v177_v63, %v171_v62  ;;  %v182_v62 = vld [vmem:[#allocation2 + $0x3d0] sm:$0xff]  ;;  %v188_v63 = vld [vmem:[#allocation2 + $0x400] sm:$0xff] }
  0xbc   :  { %15324 = vst [vmem:[#allocation51_spill] sm:$0xff] %v9443_v17 }
  0xbf   :  { %v2289_v4 = vpop.f32.mrf.mxu2  ;;  %v2114_v8 = vpop.f32.mrf.mxu0 }
  0xc0   :  { %v2290_v6 = vadd.f32 %v2289_v4, %v2201_v38  ;;  %v2378_v7 = vpop.f32.mrf.mxu3  ;;  %v2115_v11 = vadd.f32 %v2114_v8, %v9418_v37  ;;  %v2203_v16 = vpop.f32.mrf.mxu1  ;;  %v183_v4 = vld [vmem:[#allocation2 + $0x3d8] sm:$0xff]  ;;  %v9454_v8 = vpack.c.bf16 %v186_v56, %v180_v42  ;;  %v7692_v42 = vld [vmem:[#allocation5 + $0x48] sm:$0xf0]  ;;  %v8458_v56 = vld [vmem:[#allocation5 + $0x630] sm:$0xf] }
  0xc2   :  { %v9445_v18 = vadd.f32 %v2378_v7, %v2290_v6  ;;  %v2204_v19 = vadd.f32 %v2203_v16, %v2115_v11  ;;  %2153 = vmatmul.bf16.gmra.mxu0 %v9436_v5  ;;  %v189_v6 = vld [vmem:[#allocation2 + $0x408] sm:$0xff]  ;;  %15325 = vst [vmem:[#allocation52_spill] sm:$0xff] %v9454_v8 }
  0xc3   :  { %2242 = vmatmul.bf16.gmra.mxu1 %v9438_v9 }
  0xc4   :  { %2331 = vmatmul.bf16.gmra.mxu2 %v9440_v10  ;;  %v9065_v10 = vld [vmem:[#allocation5 + $0x7c4] sm:$0xf0] }
  0xc5   :  { %2420 = vmatmul.bf16.gmra.mxu3 %v9443_v17 }
  0xc7   :  { %v2292_v28 = vpop.f32.mrf.mxu2  ;;  %v2116_v36 = vpop.f32.mrf.mxu0 }
  0xc8   :  { %v2293_v29 = vadd.f32 %v2292_v28, %v2204_v19  ;;  %v2381_v31 = vpop.f32.mrf.mxu3  ;;  %v2117_v38 = vadd.f32 %v2116_v36, %v9418_v37  ;;  %v2205_v39 = vpop.f32.mrf.mxu1  ;;  %v9456_v28 = vpack.c.bf16 %v187_v60, %v181_v59  ;;  %v9458_v36 = vpack.c.bf16 %v188_v63, %v182_v62  ;;  %v9017_v60 = vld [vmem:[#allocation5 + $0x644] sm:$0xf0]  ;;  %v8870_v62 = vld [vmem:[#allocation5 + $0x1b4] sm:$0xf]  ;;  %v7884_v63 = vld [vmem:[#allocation5 + $0x1c8] sm:$0xf0] }
  0xca   :  { %v9452_v40 = vadd.f32 %v2381_v31, %v2293_v29  ;;  %v2206_v41 = vadd.f32 %v2205_v39, %v2117_v38  ;;  %15326 = vst [vmem:[#allocation53_spill] sm:$0xff] %v9456_v28  ;;  %v9461_v38 = vpack.c.bf16 %v189_v6, %v183_v4  ;;  %v8459_v6 = vor.u32 %v9017_v60, %v8458_v56  ;;  %v199_v56 = vld [vmem:[#allocation2 + $0x458] sm:$0xff]  ;;  %v194_v60 = vld [vmem:[#allocation2 + $0x430] sm:$0xff] }
  0xcb   :  { %15327 = vst [vmem:[#allocation54_spill] sm:$0xff] %v9458_v36 }
  0xcc   :  { %15328 = vst [vmem:[#allocation55_spill] sm:$0xff] %v9461_v38  ;;  %2462 = vmatpush.bf16.msrb.mxu0 %v8459_v6 }
  0xcf   :  { %v2294_v7 = vpop.f32.mrf.mxu2  ;;  %v2119_v19 = vpop.f32.mrf.mxu0 }
  0xd0   :  { %v2295_v11 = vadd.f32 %v2294_v7, %v2206_v41  ;;  %v2383_v16 = vpop.f32.mrf.mxu3  ;;  %v2120_v29 = vadd.f32 %v2119_v19, %v9418_v37  ;;  %v2208_v31 = vpop.f32.mrf.mxu1  ;;  %v8822_v41 = vld [vmem:[#allocation5 + $0x34] sm:$0xf]  ;;  %v7887_v7 = vor.u32 %v8870_v62, %v7884_v63  ;;  %v195_v62 = vld [vmem:[#allocation2 + $0x438] sm:$0xff] }
  0xd1   :  { %v7695_v59 = vor.u32 %v8822_v41, %v7692_v42 }
  0xd2   :  { %v9463_v39 = vadd.f32 %v2383_v16, %v2295_v11  ;;  %v2209_v17 = vadd.f32 %v2208_v31, %v2120_v29  ;;  %2158 = vmatmul.bf16.gmra.mxu0 %v9454_v8  ;;  %2729 = vmatpush.bf16.msrb.mxu3 %v7887_v7 }
  0xd3   :  { %2247 = vmatmul.bf16.gmra.mxu1 %v9456_v28  ;;  %2640 = vmatpush.bf16.msrb.mxu2 %v7695_v59  ;;  %v201_v59 = vld [vmem:[#allocation2 + $0x468] sm:$0xff] }
  0xd4   :  { %2336 = vmatmul.bf16.gmra.mxu2 %v9458_v36  ;;  %v8650_v36 = vld [vmem:[#allocation5 + $0x7b0] sm:$0xf] }
  0xd5   :  { %2425 = vmatmul.bf16.gmra.mxu3 %v9461_v38  ;;  %v8651_v42 = vor.u32 %v9065_v10, %v8650_v36 }
  0xd7   :  { %v2297_v4 = vpop.f32.mrf.mxu2  ;;  %v2121_v19 = vpop.f32.mrf.mxu0  ;;  %2551 = vmatpush.bf16.msrb.mxu1 %v8651_v42 }
  0xd8   :  { %v2298_v11 = vadd.f32 %v2297_v4, %v2209_v17  ;;  %v2386_v16 = vpop.f32.mrf.mxu3  ;;  %v2122_v29 = vadd.f32 %v2121_v19, %v9418_v37  ;;  %v2210_v31 = vpop.f32.mrf.mxu1  ;;  %v200_v17 = vld [vmem:[#allocation2 + $0x460] sm:$0xff]  ;;  %v9472_v4 = vpack.c.bf16 %v198_v58, %v192_v61 }
  0xd9   :  { %v9476_v19 = vpack.c.bf16 %v200_v17, %v194_v60 }
  0xda   :  { %v9470_v38 = vadd.f32 %v2386_v16, %v2298_v11  ;;  %v2211_v41 = vadd.f32 %v2210_v31, %v2122_v29  ;;  %15329 = vst [vmem:[#allocation56_spill] sm:$0xff] %v9472_v4  ;;  %v9474_v16 = vpack.c.bf16 %v199_v56, %v193_v23  ;;  %v9479_v29 = vpack.c.bf16 %v201_v59, %v195_v62  ;;  %v204_v59 = vld [vmem:[#allocation2 + $0x480] sm:$0xff] }
  0xdb   :  { %15331 = vst [vmem:[#allocation58_spill] sm:$0xff] %v9476_v19 }
  0xdc   :  { %15330 = vst [vmem:[#allocation57_spill] sm:$0xff] %v9474_v16 }
  0xdd   :  { %15332 = vst [vmem:[#allocation59_spill] sm:$0xff] %v9479_v29 }
  0xdf   :  { %v2299_v63 = vpop.f32.mrf.mxu2  ;;  %v2124_v11 = vpop.f32.mrf.mxu0 }
  0xe0   :  { %v2300_v6 = vadd.f32 %v2299_v63, %v2211_v41  ;;  %v2388_v7 = vpop.f32.mrf.mxu3  ;;  %v2125_v10 = vadd.f32 %v2124_v11, %v9418_v37  ;;  %v2213_v36 = vpop.f32.mrf.mxu1  ;;  %v210_v63 = vld [vmem:[#allocation2 + $0x4b0] sm:$0xff] }
  0xe1   :  { %v206_v11 = vld [vmem:[#allocation2 + $0x490] sm:$0xff] }
  0xe2   :  { %v9481_v31 = vadd.f32 %v2388_v7, %v2300_v6  ;;  %v2214_v42 = vadd.f32 %v2213_v36, %v2125_v10  ;;  %2163 = vmatmul.bf16.gmra.mxu0 %v9472_v4  ;;  %v205_v6 = vld [vmem:[#allocation2 + $0x488] sm:$0xff]  ;;  %v211_v7 = vld [vmem:[#allocation2 + $0x4b8] sm:$0xff]  ;;  %v212_v10 = vld [vmem:[#allocation2 + $0x4c0] sm:$0xff] }
  0xe3   :  { %2252 = vmatmul.bf16.gmra.mxu1 %v9474_v16  ;;  %v207_v36 = vld [vmem:[#allocation2 + $0x498] sm:$0xff]  ;;  %v9492_v46 = vpack.c.bf16 %v211_v7, %v205_v6 }
  0xe4   :  { %2341 = vmatmul.bf16.gmra.mxu2 %v9476_v19  ;;  %v213_v19 = vld [vmem:[#allocation2 + $0x4c8] sm:$0xff]  ;;  %v9011_v6 = vld [vmem:[#allocation5 + $0x614] sm:$0xf0]  ;;  %v7860_v7 = vld [vmem:[#allocation5 + $0x198] sm:$0xf0] }
  0xe5   :  { %2430 = vmatmul.bf16.gmra.mxu3 %v9479_v29  ;;  %v9490_v29 = vpack.c.bf16 %v210_v63, %v204_v59  ;;  %15334 = vst [vmem:[#allocation61_spill] sm:$0xff] %v9492_v46  ;;  %v8434_v59 = vld [vmem:[#allocation5 + $0x600] sm:$0xf] }
  0xe7   :  { %v2302_v23 = vpop.f32.mrf.mxu2  ;;  %v2126_v41 = vpop.f32.mrf.mxu0  ;;  %15333 = vst [vmem:[#allocation60_spill] sm:$0xff] %v9490_v29 }
  0xe8   :  { %v2303_v58 = vadd.f32 %v2302_v23, %v2214_v42  ;;  %v2391_v61 = vpop.f32.mrf.mxu3  ;;  %v2127_v56 = vadd.f32 %v2126_v41, %v9418_v37  ;;  %v2215_v60 = vpop.f32.mrf.mxu1  ;;  %v9494_v41 = vpack.c.bf16 %v212_v10, %v206_v11  ;;  %v8435_v11 = vor.u32 %v9011_v6, %v8434_v59  ;;  %v223_v59 = vld [vmem:[#allocation2 + $0x518] sm:$0xff]  ;;  %v218_v6 = vld [vmem:[#allocation2 + $0x4f0] sm:$0xff] }
  0xea   :  { %v9488_v17 = vadd.f32 %v2391_v61, %v2303_v58  ;;  %v2216_v62 = vadd.f32 %v2215_v60, %v2127_v56  ;;  %15335 = vst [vmem:[#allocation62_spill] sm:$0xff] %v9494_v41  ;;  %v9497_v56 = vpack.c.bf16 %v213_v19, %v207_v36  ;;  %2463 = vmatpush.bf16.msrb.mxu0 %v8435_v11 }
  0xec   :  { %15336 = vst [vmem:[#allocation63_spill] sm:$0xff] %v9497_v56 }
  0xef   :  { %v2304_v22 = vpop.f32.mrf.mxu2  ;;  %v2129_v48 = vpop.f32.mrf.mxu0 }
  0xf0   :  { %v2305_v42 = vadd.f32 %v2304_v22, %v2216_v62  ;;  %v2393_v23 = vpop.f32.mrf.mxu3  ;;  %v2130_v58 = vadd.f32 %v2129_v48, %v9418_v37  ;;  %v2218_v61 = vpop.f32.mrf.mxu1  ;;  %v8816_v22 = vld [vmem:[#allocation5 + $0x4] sm:$0xf]  ;;  %v7668_v62 = vld [vmem:[#allocation5 + $0x18] sm:$0xf0] }
  0xf1   :  { %v7671_v63 = vor.u32 %v8816_v22, %v7668_v62  ;;  %v8864_v48 = vld [vmem:[#allocation5 + $0x184] sm:$0xf] }
  0xf2   :  { %v9499_v60 = vadd.f32 %v2393_v23, %v2305_v42  ;;  %v2219_v35 = vadd.f32 %v2218_v61, %v2130_v58  ;;  %2168 = vmatmul.bf16.gmra.mxu0 %v9490_v29  ;;  %v7863_v10 = vor.u32 %v8864_v48, %v7860_v7  ;;  %v219_v48 = vld [vmem:[#allocation2 + $0x4f8] sm:$0xff] }
  0xf3   :  { %2257 = vmatmul.bf16.gmra.mxu1 %v9492_v46  ;;  %2641 = vmatpush.bf16.msrb.mxu2 %v7671_v63  ;;  %v225_v63 = vld [vmem:[#allocation2 + $0x528] sm:$0xff] }
  0xf4   :  { %2346 = vmatmul.bf16.gmra.mxu2 %v9494_v41  ;;  %2730 = vmatpush.bf16.msrb.mxu3 %v7863_v10  ;;  %v8626_v41 = vld [vmem:[#allocation5 + $0x780] sm:$0xf] }
  0xf5   :  { %2435 = vmatmul.bf16.gmra.mxu3 %v9497_v56  ;;  %v8627_v62 = vor.u32 %v9059_v34, %v8626_v41 }
  0xf7   :  { %v2307_v19 = vpop.f32.mrf.mxu2  ;;  %v2131_v23 = vpop.f32.mrf.mxu0  ;;  %2552 = vmatpush.bf16.msrb.mxu1 %v8627_v62 }
  0xf8   :  { %v2308_v36 = vadd.f32 %v2307_v19, %v2219_v35  ;;  %v2396_v42 = vpop.f32.mrf.mxu3  ;;  %v2132_v58 = vadd.f32 %v2131_v23, %v9418_v37  ;;  %v2220_v61 = vpop.f32.mrf.mxu1  ;;  %v224_v35 = vld [vmem:[#allocation2 + $0x520] sm:$0xff]  ;;  %v9508_v19 = vpack.c.bf16 %v222_v2, %v216_v3 }
  0xf9   :  { %v9512_v23 = vpack.c.bf16 %v224_v35, %v218_v6 }
  0xfa   :  { %v9506_v56 = vadd.f32 %v2396_v42, %v2308_v36  ;;  %v2221_v22 = vadd.f32 %v2220_v61, %v2132_v58  ;;  %15337 = vst [vmem:[#allocation64_spill] sm:$0xff] %v9508_v19  ;;  %v9510_v42 = vpack.c.bf16 %v223_v59, %v217_v55  ;;  %v9515_v58 = vpack.c.bf16 %v225_v63, %v219_v48  ;;  %v228_v63 = vld [vmem:[#allocation2 + $0x540] sm:$0xff] }
  0xfb   :  { %15339 = vst [vmem:[#allocation66_spill] sm:$0xff] %v9512_v23 }
  0xfc   :  { %15338 = vst [vmem:[#allocation65_spill] sm:$0xff] %v9510_v42 }
  0xfd   :  { %15340 = vst [vmem:[#allocation67_spill] sm:$0xff] %v9515_v58 }
  0xff   :  { %v2309_v7 = vpop.f32.mrf.mxu2  ;;  %v2134_v36 = vpop.f32.mrf.mxu0 }
 0x100   :  { %v2310_v11 = vadd.f32 %v2309_v7, %v2221_v22  ;;  %v2398_v10 = vpop.f32.mrf.mxu3  ;;  %v2135_v34 = vadd.f32 %v2134_v36, %v9418_v37  ;;  %v2223_v41 = vpop.f32.mrf.mxu1  ;;  %v234_v7 = vld [vmem:[#allocation2 + $0x570] sm:$0xff] }
 0x101   :  { %v230_v36 = vld [vmem:[#allocation2 + $0x550] sm:$0xff] }
 0x102   :  { %v9517_v61 = vadd.f32 %v2398_v10, %v2310_v11  ;;  %v2224_v62 = vadd.f32 %v2223_v41, %v2135_v34  ;;  %2173 = vmatmul.bf16.gmra.mxu0 %v9508_v19  ;;  %v229_v11 = vld [vmem:[#allocation2 + $0x548] sm:$0xff]  ;;  %v235_v10 = vld [vmem:[#allocation2 + $0x578] sm:$0xff]  ;;  %v236_v34 = vld [vmem:[#allocation2 + $0x580] sm:$0xff] }
 0x103   :  { %2262 = vmatmul.bf16.gmra.mxu1 %v9510_v42  ;;  %v231_v41 = vld [vmem:[#allocation2 + $0x558] sm:$0xff]  ;;  %v9528_v26 = vpack.c.bf16 %v235_v10, %v229_v11  ;;  %v8220_v11 = vld [vmem:[#allocation5 + $0x468] sm:$0xf0] }
 0x104   :  { %2351 = vmatmul.bf16.gmra.mxu2 %v9512_v23  ;;  %v237_v23 = vld [vmem:[#allocation2 + $0x588] sm:$0xff] }
 0x105   :  { %2440 = vmatmul.bf16.gmra.mxu3 %v9515_v58  ;;  %v9526_v58 = vpack.c.bf16 %v234_v7, %v228_v63  ;;  %15342 = vst [vmem:[#allocation69_spill] sm:$0xff] %v9528_v26  ;;  %v8954_v63 = vld [vmem:[#allocation5 + $0x454] sm:$0xf]  ;;  %v8796_v10 = vld [vmem:[#allocation5 + $0x8e8] sm:$0xf0] }
 0x107   :  { %v2312_v55 = vpop.f32.mrf.mxu2  ;;  %v2136_v22 = vpop.f32.mrf.mxu0  ;;  %15341 = vst [vmem:[#allocation68_spill] sm:$0xff] %v9526_v58 }
 0x108   :  { %v2313_v2 = vadd.f32 %v2312_v55, %v2224_v62  ;;  %v2401_v3 = vpop.f32.mrf.mxu3  ;;  %v2137_v59 = vadd.f32 %v2136_v22, %v9418_v37  ;;  %v2225_v6 = vpop.f32.mrf.mxu1  ;;  %v9530_v22 = vpack.c.bf16 %v236_v34, %v230_v36  ;;  %v8223_v36 = vor.u32 %v8954_v63, %v8220_v11  ;;  %v247_v63 = vld [vmem:[#allocation2 + $0x5d8] sm:$0xff]  ;;  %v242_v11 = vld [vmem:[#allocation2 + $0x5b0] sm:$0xff] }
 0x10a   :  { %v9524_v35 = vadd.f32 %v2401_v3, %v2313_v2  ;;  %v2226_v48 = vadd.f32 %v2225_v6, %v2137_v59  ;;  %15343 = vst [vmem:[#allocation70_spill] sm:$0xff] %v9530_v22  ;;  %v9533_v59 = vpack.c.bf16 %v237_v23, %v231_v41  ;;  %2812 = vmatpush.bf16.msra.mxu0 %v8223_v36 }
 0x10c   :  { %15344 = vst [vmem:[#allocation71_spill] sm:$0xff] %v9533_v59 }
 0x10f   :  { %v2314_v54 = vpop.f32.mrf.mxu2  ;;  %v2139_v27 = vpop.f32.mrf.mxu0 }
 0x110   :  { %v2315_v62 = vadd.f32 %v2314_v54, %v2226_v48  ;;  %v2403_v55 = vpop.f32.mrf.mxu3  ;;  %v2140_v2 = vadd.f32 %v2139_v27, %v9418_v37  ;;  %v2228_v3 = vpop.f32.mrf.mxu1  ;;  %v9050_v54 = vld [vmem:[#allocation5 + $0x754] sm:$0xf]  ;;  %v8604_v48 = vld [vmem:[#allocation5 + $0x768] sm:$0xf0] }
 0x111   :  { %v8607_v7 = vor.u32 %v9050_v54, %v8604_v48  ;;  %v9098_v27 = vld [vmem:[#allocation5 + $0x8d4] sm:$0xf] }
 0x112   :  { %v9535_v6 = vadd.f32 %v2403_v55, %v2315_v62  ;;  %v2229_v15 = vadd.f32 %v2228_v3, %v2140_v2  ;;  %2178 = vmatmul.bf16.gmra.mxu0 %v9526_v58  ;;  %v8799_v34 = vor.u32 %v9098_v27, %v8796_v10  ;;  %v243_v27 = vld [vmem:[#allocation2 + $0x5b8] sm:$0xff] }
 0x113   :  { %2267 = vmatmul.bf16.gmra.mxu1 %v9528_v26  ;;  %2990 = vmatpush.bf16.msra.mxu2 %v8607_v7  ;;  %v241_v26 = vld [vmem:[#allocation2 + $0x5a8] sm:$0xff] }
 0x114   :  { %2356 = vmatmul.bf16.gmra.mxu2 %v9530_v22  ;;  %3079 = vmatpush.bf16.msra.mxu3 %v8799_v34  ;;  %v9002_v22 = vld [vmem:[#allocation5 + $0x5d4] sm:$0xf]  ;;  %v249_v7 = vld [vmem:[#allocation2 + $0x5e8] sm:$0xff] }
 0x115   :  { %2445 = vmatmul.bf16.gmra.mxu3 %v9533_v59  ;;  %v8415_v48 = vor.u32 %v9002_v22, %v8412_v14 }
 0x117   :  { %v2317_v23 = vpop.f32.mrf.mxu2  ;;  %v2141_v55 = vpop.f32.mrf.mxu0  ;;  %2901 = vmatpush.bf16.msra.mxu1 %v8415_v48 }
 0x118   :  { %v2318_v41 = vadd.f32 %v2317_v23, %v2229_v15  ;;  %v2406_v62 = vpop.f32.mrf.mxu3  ;;  %v2142_v2 = vadd.f32 %v2141_v55, %v9418_v37  ;;  %v2230_v3 = vpop.f32.mrf.mxu1  ;;  %v248_v15 = vld [vmem:[#allocation2 + $0x5e0] sm:$0xff]  ;;  %v9544_v23 = vpack.c.bf16 %v246_v52, %v240_v53 }
 0x119   :  { %v9548_v55 = vpack.c.bf16 %v248_v15, %v242_v11 }
 0x11a   :  { %v9542_v59 = vadd.f32 %v2406_v62, %v2318_v41  ;;  %v2231_v54 = vadd.f32 %v2230_v3, %v2142_v2  ;;  %15345 = vst [vmem:[#allocation72_spill] sm:$0xff] %v9544_v23  ;;  %v9546_v62 = vpack.c.bf16 %v247_v63, %v241_v26  ;;  %v9551_v2 = vpack.c.bf16 %v249_v7, %v243_v27  ;;  %v64_v7 = vld [vmem:[#allocation2 + $0x20] sm:$0xff] }
 0x11b   :  { %15347 = vst [vmem:[#allocation74_spill] sm:$0xff] %v9548_v55 }
 0x11c   :  { %15346 = vst [vmem:[#allocation73_spill] sm:$0xff] %v9546_v62 }
 0x11d   :  { %15348 = vst [vmem:[#allocation75_spill] sm:$0xff] %v9551_v2 }
 0x11f   :  { %v2319_v10 = vpop.f32.mrf.mxu2  ;;  %v2144_v41 = vpop.f32.mrf.mxu0 }
 0x120   :  { %v2320_v36 = vadd.f32 %v2319_v10, %v2231_v54  ;;  %v2408_v34 = vpop.f32.mrf.mxu3  ;;  %v2145_v14 = vadd.f32 %v2144_v41, %v9418_v37  ;;  %v2233_v22 = vpop.f32.mrf.mxu1  ;;  %v70_v10 = vld [vmem:[#allocation2 + $0x50] sm:$0xff] }
 0x122   :  { %v9553_v3 = vadd.f32 %v2408_v34, %v2320_v36  ;;  %v2234_v48 = vadd.f32 %v2233_v22, %v2145_v14  ;;  %2183 = vmatmul.bf16.gmra.mxu0 %v9544_v23  ;;  %v65_v36 = vld [vmem:[#allocation2 + $0x28] sm:$0xff]  ;;  %v71_v34 = vld [vmem:[#allocation2 + $0x58] sm:$0xff]  ;;  %v9562_v14 = vpack.c.bf16 %v70_v10, %v64_v7  ;;  %v9092_v10 = vld [vmem:[#allocation5 + $0x8a4] sm:$0xf] }
 0x123   :  { %2272 = vmatmul.bf16.gmra.mxu1 %v9546_v62  ;;  %v9564_v62 = vpack.c.bf16 %v71_v34, %v65_v36  ;;  %v8196_v7 = vld [vmem:[#allocation5 + $0x438] sm:$0xf0]  ;;  %v82_v23 = vld [vmem:[#allocation2 + $0xb0] sm:$0xff] }
 0x124   :  { %2361 = vmatmul.bf16.gmra.mxu2 %v9548_v55  ;;  %15350 = vst [vmem:[#allocation77_spill] sm:$0xff] %v9562_v14  ;;  %v8772_v36 = vld [vmem:[#allocation5 + $0x8b8] sm:$0xf0] }
 0x125   :  { %2450 = vmatmul.bf16.gmra.mxu3 %v9551_v2  ;;  %15351 = vst [vmem:[#allocation78_spill] sm:$0xff] %v9564_v62 }
 0x127   :  { %v2322_v52 = vpop.f32.mrf.mxu2  ;;  %v2146_v54 = vpop.f32.mrf.mxu0 }
 0x128   :  { %v2323_v53 = vadd.f32 %v2322_v52, %v2234_v48  ;;  %v2411_v26 = vpop.f32.mrf.mxu3  ;;  %v2147_v63 = vadd.f32 %v2146_v54, %v9418_v37  ;;  %v2235_v11 = vpop.f32.mrf.mxu1 }
 0x12a   :  { %v9560_v15 = vadd.f32 %v2411_v26, %v2323_v53  ;;  %v2236_v27 = vadd.f32 %v2235_v11, %v2147_v63  ;;  %v9044_v26 = vld [vmem:[#allocation5 + $0x724] sm:$0xf]  ;;  %v8580_v63 = vld [vmem:[#allocation5 + $0x738] sm:$0xf0] }
 0x12b   :  { %v8948_v11 = vld [vmem:[#allocation5 + $0x424] sm:$0xf] }
 0x12c   :  { %15349 = vst [vmem:[#allocation76_spill] sm:$0xff] %v9560_v15  ;;  %v8199_v34 = vor.u32 %v8948_v11, %v8196_v7  ;;  %v77_v15 = vld [vmem:[#allocation2 + $0x88] sm:$0xff]  ;;  %v83_v11 = vld [vmem:[#allocation2 + $0xb8] sm:$0xff] }
 0x12e   :  { %2813 = vmatpush.bf16.msra.mxu0 %v8199_v34 }
 0x12f   :  { %v2324_v41 = vpop.f32.mrf.mxu2  ;;  %v2149_v2 = vpop.f32.mrf.mxu0 }
 0x130   :  { %v2325_v22 = vadd.f32 %v2324_v41, %v2236_v27  ;;  %v2413_v55 = vpop.f32.mrf.mxu3  ;;  %v2150_v48 = vadd.f32 %v2149_v2, %v9418_v37  ;;  %v2238_v52 = vpop.f32.mrf.mxu1  ;;  %v8583_v27 = vor.u32 %v9044_v26, %v8580_v63 }
 0x132   :  { %v9567_v54 = vadd.f32 %v2413_v55, %v2325_v22  ;;  %v2239_v53 = vadd.f32 %v2238_v52, %v2150_v48  ;;  %2464 = vmatmul.bf16.vlgmr.msrb.gmra.mxu0 %v9562_v14  ;;  %v8775_v55 = vor.u32 %v9092_v10, %v8772_v36  ;;  %2991 = vmatpush.bf16.msra.mxu2 %v8583_v27  ;;  %v8388_v14 = vld [vmem:[#allocation5 + $0x5b8] sm:$0xf0] }
 0x133   :  { %2553 = vmatmul.bf16.vlgmr.msrb.gmra.mxu1 %v9564_v62 }
 0x134   :  { %15352 = vst [vmem:[#allocation79_spill] sm:$0xff] %v9567_v54  ;;  %2642 = vmatmul.bf16.vlgmr.msrb.gmra.mxu2 %v9322_v47  ;;  %3080 = vmatpush.bf16.msra.mxu3 %v8775_v55  ;;  %v8996_v47 = vld [vmem:[#allocation5 + $0x5a4] sm:$0xf] }
 0x135   :  { %2731 = vmatmul.bf16.vlgmr.msrb.gmra.mxu3 %v9324_v51  ;;  %v8391_v63 = vor.u32 %v8996_v47, %v8388_v14  ;;  %v76_v54 = vld [vmem:[#allocation2 + $0x80] sm:$0xff] }
 0x136   :  { %v9576_v7 = vpack.c.bf16 %v82_v23, %v76_v54 }
 0x137   :  { %v2327_v2 = vpop.f32.mrf.mxu2  ;;  %v2151_v48 = vpop.f32.mrf.mxu0  ;;  %2902 = vmatpush.bf16.msra.mxu1 %v8391_v63  ;;  %v94_v63 = vld [vmem:[#allocation2 + $0x110] sm:$0xff] }
 0x138   :  { %v2328_v41 = vadd.f32 %v2327_v2, %v2239_v53  ;;  %v2416_v22 = vpop.f32.mrf.mxu3  ;;  %v2152_v52 = vadd.f32 %v2151_v48, %v9418_v37  ;;  %v2240_v62 = vpop.f32.mrf.mxu1  ;;  %15353 = vst [vmem:[#allocation80_spill] sm:$0xff] %v9576_v7  ;;  %v9578_v2 = vpack.c.bf16 %v83_v11, %v77_v15  ;;  %v89_v11 = vld [vmem:[#allocation2 + $0xe8] sm:$0xff] }
 0x13a   :  { %v9574_v51 = vadd.f32 %v2416_v22, %v2328_v41  ;;  %v2241_v26 = vadd.f32 %v2240_v62, %v2152_v52  ;;  %15354 = vst [vmem:[#allocation81_spill] sm:$0xff] %v9578_v2 }
 0x13f   :  { %v2329_v53 = vpop.f32.mrf.mxu2  ;;  %v2154_v36 = vpop.f32.mrf.mxu0 }
 0x140   :  { %v2330_v27 = vadd.f32 %v2329_v53, %v2241_v26  ;;  %v2418_v10 = vpop.f32.mrf.mxu3  ;;  %v2155_v34 = vadd.f32 %v2154_v36, %v9418_v37  ;;  %v2243_v55 = vpop.f32.mrf.mxu1  ;;  %v88_v26 = vld [vmem:[#allocation2 + $0xe0] sm:$0xff]  ;;  %v95_v53 = vld [vmem:[#allocation2 + $0x118] sm:$0xff] }
 0x142   :  { %v9581_v41 = vadd.f32 %v2418_v10, %v2330_v27  ;;  %v2244_v62 = vadd.f32 %v2243_v55, %v2155_v34  ;;  %2469 = vmatmul.bf16.gmra.mxu0 %v9576_v7  ;;  %v9590_v10 = vpack.c.bf16 %v94_v63, %v88_v26  ;;  %v8172_v26 = vld [vmem:[#allocation5 + $0x408] sm:$0xf0]  ;;  %v9086_v63 = vld [vmem:[#allocation5 + $0x874] sm:$0xf] }
 0x143   :  { %2558 = vmatmul.bf16.gmra.mxu1 %v9578_v2  ;;  %v101_v2 = vld [vmem:[#allocation2 + $0x148] sm:$0xff] }
 0x144   :  { %2647 = vmatmul.bf16.gmra.mxu2 %v9334_v12  ;;  %15355 = vst [vmem:[#allocation82_spill] sm:$0xff] %v9590_v10 }
 0x145   :  { %2736 = vmatmul.bf16.gmra.mxu3 %v9336_v13  ;;  %v9592_v13 = vpack.c.bf16 %v95_v53, %v89_v11  ;;  %v8748_v11 = vld [vmem:[#allocation5 + $0x888] sm:$0xf0] }
 0x147   :  { %v2332_v47 = vpop.f32.mrf.mxu2  ;;  %v2156_v54 = vpop.f32.mrf.mxu0  ;;  %15356 = vst [vmem:[#allocation83_spill] sm:$0xff] %v9592_v13 }
 0x148   :  { %v2333_v23 = vadd.f32 %v2332_v47, %v2244_v62  ;;  %v2421_v14 = vpop.f32.mrf.mxu3  ;;  %v2157_v15 = vadd.f32 %v2156_v54, %v9418_v37  ;;  %v2245_v22 = vpop.f32.mrf.mxu1 }
 0x14a   :  { %v9588_v48 = vadd.f32 %v2421_v14, %v2333_v23  ;;  %v2246_v52 = vadd.f32 %v2245_v22, %v2157_v15  ;;  %v9038_v14 = vld [vmem:[#allocation5 + $0x6f4] sm:$0xf]  ;;  %v8556_v15 = vld [vmem:[#allocation5 + $0x708] sm:$0xf0] }
 0x14b   :  { %v8942_v22 = vld [vmem:[#allocation5 + $0x3f4] sm:$0xf] }
 0x14f   :  { %v2334_v27 = vpop.f32.mrf.mxu2  ;;  %v2159_v55 = vpop.f32.mrf.mxu0 }
 0x150   :  { %v2335_v36 = vadd.f32 %v2334_v27, %v2246_v52  ;;  %v2423_v34 = vpop.f32.mrf.mxu3  ;;  %v2160_v62 = vadd.f32 %v2159_v55, %v9418_v37  ;;  %v2248_v47 = vpop.f32.mrf.mxu1  ;;  %v8559_v52 = vor.u32 %v9038_v14, %v8556_v15  ;;  %v8175_v27 = vor.u32 %v8942_v22, %v8172_v26  ;;  %v107_v22 = vld [vmem:[#allocation2 + $0x178] sm:$0xff] }
 0x152   :  { %v9595_v54 = vadd.f32 %v2423_v34, %v2335_v36  ;;  %v2249_v23 = vadd.f32 %v2248_v47, %v2160_v62  ;;  %2474 = vmatmul.bf16.gmra.mxu0 %v9590_v10  ;;  %v8751_v36 = vor.u32 %v9086_v63, %v8748_v11  ;;  %2992 = vmatpush.bf16.msra.mxu2 %v8559_v52  ;;  %v100_v10 = vld [vmem:[#allocation2 + $0x140] sm:$0xff] }
 0x153   :  { %2563 = vmatmul.bf16.gmra.mxu1 %v9592_v13  ;;  %2814 = vmatpush.bf16.msra.mxu0 %v8175_v27  ;;  %v8364_v13 = vld [vmem:[#allocation5 + $0x588] sm:$0xf0] }
 0x154   :  { %15357 = vst [vmem:[#allocation84_spill] sm:$0xff] %v9595_v54  ;;  %2652 = vmatmul.bf16.gmra.mxu2 %v9346_v24  ;;  %3081 = vmatpush.bf16.msra.mxu3 %v8751_v36  ;;  %v8990_v24 = vld [vmem:[#allocation5 + $0x574] sm:$0xf] }
 0x155   :  { %2741 = vmatmul.bf16.gmra.mxu3 %v9348_v25  ;;  %v8367_v15 = vor.u32 %v8990_v24, %v8364_v13  ;;  %v106_v54 = vld [vmem:[#allocation2 + $0x170] sm:$0xff] }
 0x156   :  { %v9604_v26 = vpack.c.bf16 %v106_v54, %v100_v10 }
 0x157   :  { %v2337_v53 = vpop.f32.mrf.mxu2  ;;  %v2161_v62 = vpop.f32.mrf.mxu0  ;;  %2903 = vmatpush.bf16.msra.mxu1 %v8367_v15  ;;  %v118_v15 = vld [vmem:[#allocation2 + $0x1d0] sm:$0xff] }
 0x158   :  { %v2338_v34 = vadd.f32 %v2337_v53, %v2249_v23  ;;  %v2426_v55 = vpop.f32.mrf.mxu3  ;;  %v2162_v47 = vadd.f32 %v2161_v62, %v9418_v37  ;;  %v2250_v12 = vpop.f32.mrf.mxu1  ;;  %15358 = vst [vmem:[#allocation85_spill] sm:$0xff] %v9604_v26  ;;  %v9606_v53 = vpack.c.bf16 %v107_v22, %v101_v2  ;;  %v113_v22 = vld [vmem:[#allocation2 + $0x1a8] sm:$0xff] }
 0x15a   :  { %v9602_v25 = vadd.f32 %v2426_v55, %v2338_v34  ;;  %v2251_v14 = vadd.f32 %v2250_v12, %v2162_v47  ;;  %15359 = vst [vmem:[#allocation86_spill] sm:$0xff] %v9606_v53 }
 0x15f   :  { %v2339_v23 = vpop.f32.mrf.mxu2  ;;  %v2164_v11 = vpop.f32.mrf.mxu0 }
 0x160   :  { %v2340_v52 = vadd.f32 %v2339_v23, %v2251_v14  ;;  %v2428_v63 = vpop.f32.mrf.mxu3  ;;  %v2165_v27 = vadd.f32 %v2164_v11, %v9418_v37  ;;  %v2253_v36 = vpop.f32.mrf.mxu1  ;;  %v112_v14 = vld [vmem:[#allocation2 + $0x1a0] sm:$0xff]  ;;  %v119_v23 = vld [vmem:[#allocation2 + $0x1d8] sm:$0xff] }
 0x162   :  { %v9609_v34 = vadd.f32 %v2428_v63, %v2340_v52  ;;  %v2254_v12 = vadd.f32 %v2253_v36, %v2165_v27  ;;  %2479 = vmatmul.bf16.gmra.mxu0 %v9604_v26  ;;  %v9618_v63 = vpack.c.bf16 %v118_v15, %v112_v14  ;;  %v8148_v14 = vld [vmem:[#allocation5 + $0x3d8] sm:$0xf0]  ;;  %v9080_v15 = vld [vmem:[#allocation5 + $0x844] sm:$0xf] }
 0x163   :  { %2568 = vmatmul.bf16.gmra.mxu1 %v9606_v53  ;;  %v125_v53 = vld [vmem:[#allocation2 + $0x208] sm:$0xff] }
 0x164   :  { %2657 = vmatmul.bf16.gmra.mxu2 %v9358_v49  ;;  %15360 = vst [vmem:[#allocation87_spill] sm:$0xff] %v9618_v63 }
 0x165   :  { %2746 = vmatmul.bf16.gmra.mxu3 %v9360_v50  ;;  %v9620_v50 = vpack.c.bf16 %v119_v23, %v113_v22  ;;  %v8724_v22 = vld [vmem:[#allocation5 + $0x858] sm:$0xf0] }
 0x167   :  { %v2342_v13 = vpop.f32.mrf.mxu2  ;;  %v2166_v54 = vpop.f32.mrf.mxu0  ;;  %15361 = vst [vmem:[#allocation88_spill] sm:$0xff] %v9620_v50 }
 0x168   :  { %v2343_v24 = vadd.f32 %v2342_v13, %v2254_v12  ;;  %v2431_v10 = vpop.f32.mrf.mxu3  ;;  %v2167_v2 = vadd.f32 %v2166_v54, %v9418_v37  ;;  %v2255_v55 = vpop.f32.mrf.mxu1 }
 0x16a   :  { %v9616_v62 = vadd.f32 %v2431_v10, %v2343_v24  ;;  %v2256_v47 = vadd.f32 %v2255_v55, %v2167_v2  ;;  %v9032_v10 = vld [vmem:[#allocation5 + $0x6c4] sm:$0xf]  ;;  %v8532_v2 = vld [vmem:[#allocation5 + $0x6d8] sm:$0xf0] }
 0x16b   :  { %v8936_v55 = vld [vmem:[#allocation5 + $0x3c4] sm:$0xf] }
 0x16f   :  { %v2344_v52 = vpop.f32.mrf.mxu2  ;;  %v2169_v36 = vpop.f32.mrf.mxu0 }
 0x170   :  { %v2345_v11 = vadd.f32 %v2344_v52, %v2256_v47  ;;  %v2433_v27 = vpop.f32.mrf.mxu3  ;;  %v2170_v12 = vadd.f32 %v2169_v36, %v9418_v37  ;;  %v2258_v13 = vpop.f32.mrf.mxu1  ;;  %v8535_v47 = vor.u32 %v9032_v10, %v8532_v2  ;;  %v8151_v52 = vor.u32 %v8936_v55, %v8148_v14  ;;  %v131_v55 = vld [vmem:[#allocation2 + $0x238] sm:$0xff] }
 0x172   :  { %v9623_v54 = vadd.f32 %v2433_v27, %v2345_v11  ;;  %v2259_v24 = vadd.f32 %v2258_v13, %v2170_v12  ;;  %2484 = vmatmul.bf16.gmra.mxu0 %v9618_v63  ;;  %v8727_v11 = vor.u32 %v9080_v15, %v8724_v22  ;;  %2993 = vmatpush.bf16.msra.mxu2 %v8535_v47  ;;  %v124_v63 = vld [vmem:[#allocation2 + $0x200] sm:$0xff] }
 0x173   :  { %2573 = vmatmul.bf16.gmra.mxu1 %v9620_v50  ;;  %2815 = vmatpush.bf16.msra.mxu0 %v8151_v52  ;;  %v8340_v50 = vld [vmem:[#allocation5 + $0x558] sm:$0xf0] }
 0x174   :  { %15362 = vst [vmem:[#allocation89_spill] sm:$0xff] %v9623_v54  ;;  %2662 = vmatmul.bf16.gmra.mxu2 %v9370_v0  ;;  %3082 = vmatpush.bf16.msra.mxu3 %v8727_v11  ;;  %v8984_v0 = vld [vmem:[#allocation5 + $0x544] sm:$0xf]  ;;  %v130_v54 = vld [vmem:[#allocation2 + $0x230] sm:$0xff] }
 0x175   :  { %2751 = vmatmul.bf16.gmra.mxu3 %v9372_v1  ;;  %v8343_v2 = vor.u32 %v8984_v0, %v8340_v50  ;;  %v9632_v14 = vpack.c.bf16 %v130_v54, %v124_v63 }
 0x177   :  { %v2347_v23 = vpop.f32.mrf.mxu2  ;;  %v2171_v12 = vpop.f32.mrf.mxu0  ;;  %2904 = vmatpush.bf16.msra.mxu1 %v8343_v2  ;;  %15363 = vst [vmem:[#allocation90_spill] sm:$0xff] %v9632_v14  ;;  %v142_v2 = vld [vmem:[#allocation2 + $0x290] sm:$0xff] }
 0x178   :  { %v2348_v27 = vadd.f32 %v2347_v23, %v2259_v24  ;;  %v2436_v36 = vpop.f32.mrf.mxu3  ;;  %v2172_v13 = vadd.f32 %v2171_v12, %v9418_v37  ;;  %v2260_v49 = vpop.f32.mrf.mxu1  ;;  %v9634_v23 = vpack.c.bf16 %v131_v55, %v125_v53  ;;  %v137_v55 = vld [vmem:[#allocation2 + $0x268] sm:$0xff] }
 0x17a   :  { %v9630_v1 = vadd.f32 %v2436_v36, %v2348_v27  ;;  %v2261_v10 = vadd.f32 %v2260_v49, %v2172_v13  ;;  %15364 = vst [vmem:[#allocation91_spill] sm:$0xff] %v9634_v23 }
 0x17f   :  { %v2349_v24 = vpop.f32.mrf.mxu2  ;;  %v2174_v22 = vpop.f32.mrf.mxu0 }
 0x180   :  { %v2350_v47 = vadd.f32 %v2349_v24, %v2261_v10  ;;  %v2438_v15 = vpop.f32.mrf.mxu3  ;;  %v2175_v52 = vadd.f32 %v2174_v22, %v9418_v37  ;;  %v2263_v11 = vpop.f32.mrf.mxu1  ;;  %v136_v10 = vld [vmem:[#allocation2 + $0x260] sm:$0xff]  ;;  %v143_v24 = vld [vmem:[#allocation2 + $0x298] sm:$0xff] }
 0x182   :  { %v9637_v27 = vadd.f32 %v2438_v15, %v2350_v47  ;;  %v2264_v49 = vadd.f32 %v2263_v11, %v2175_v52  ;;  %2489 = vmatmul.bf16.gmra.mxu0 %v9632_v14  ;;  %v9646_v15 = vpack.c.bf16 %v142_v2, %v136_v10 }
 0x183   :  { %2578 = vmatmul.bf16.gmra.mxu1 %v9634_v23 }
 0x184   :  { %2667 = vmatmul.bf16.gmra.mxu2 %v9382_v32  ;;  %15365 = vst [vmem:[#allocation92_spill] sm:$0xff] %v9646_v15 }
 0x185   :  { %2756 = vmatmul.bf16.gmra.mxu3 %v9384_v33  ;;  %v9648_v33 = vpack.c.bf16 %v143_v24, %v137_v55 }
 0x187   :  { %v2352_v50 = vpop.f32.mrf.mxu2  ;;  %v2176_v54 = vpop.f32.mrf.mxu0  ;;  %15366 = vst [vmem:[#allocation93_spill] sm:$0xff] %v9648_v33 }
 0x188   :  { %v2353_v0 = vadd.f32 %v2352_v50, %v2264_v49  ;;  %v2441_v63 = vpop.f32.mrf.mxu3  ;;  %v2177_v53 = vadd.f32 %v2176_v54, %v9418_v37  ;;  %v2265_v36 = vpop.f32.mrf.mxu1 }
 0x18a   :  { %v9644_v12 = vadd.f32 %v2441_v63, %v2353_v0  ;;  %v2266_v13 = vadd.f32 %v2265_v36, %v2177_v53  ;;  %v9026_v53 = vld [vmem:[#allocation5 + $0x694] sm:$0xf]  ;;  %v8508_v36 = vld [vmem:[#allocation5 + $0x6a8] sm:$0xf0] }
 0x18b   :  { %v8511_v24 = vor.u32 %v9026_v53, %v8508_v36  ;;  %v149_v53 = vld [vmem:[#allocation2 + $0x2c8] sm:$0xff]  ;;  %v155_v36 = vld [vmem:[#allocation2 + $0x2f8] sm:$0xff] }
 0x18d   :  { %2994 = vmatpush.bf16.msra.mxu2 %v8511_v24 }
 0x18f   :  { %v2354_v47 = vpop.f32.mrf.mxu2  ;;  %v2179_v11 = vpop.f32.mrf.mxu0 }
 0x190   :  { %v2355_v22 = vadd.f32 %v2354_v47, %v2266_v13  ;;  %v2443_v52 = vpop.f32.mrf.mxu3  ;;  %v2180_v49 = vadd.f32 %v2179_v11, %v9418_v37  ;;  %v2268_v50 = vpop.f32.mrf.mxu1  ;;  %v8930_v13 = vld [vmem:[#allocation5 + $0x394] sm:$0xf]  ;;  %v8124_v47 = vld [vmem:[#allocation5 + $0x3a8] sm:$0xf0] }
 0x192   :  { %v9651_v54 = vadd.f32 %v2443_v52, %v2355_v22  ;;  %v2269_v0 = vadd.f32 %v2268_v50, %v2180_v49  ;;  %2494 = vmatmul.bf16.gmra.mxu0 %v9646_v15  ;;  %v9074_v22 = vld [vmem:[#allocation5 + $0x814] sm:$0xf]  ;;  %v8700_v52 = vld [vmem:[#allocation5 + $0x828] sm:$0xf0]  ;;  %v8127_v50 = vor.u32 %v8930_v13, %v8124_v47 }
 0x193   :  { %2583 = vmatmul.bf16.gmra.mxu1 %v9648_v33  ;;  %v8703_v32 = vor.u32 %v9074_v22, %v8700_v52 }
 0x194   :  { %15367 = vst [vmem:[#allocation94_spill] sm:$0xff] %v9651_v54  ;;  %2672 = vmatmul.bf16.gmra.mxu2 %v9394_v44  ;;  %v8316_v44 = vld [vmem:[#allocation5 + $0x528] sm:$0xf0]  ;;  %2816 = vmatpush.bf16.msra.mxu0 %v8127_v50  ;;  %v154_v54 = vld [vmem:[#allocation2 + $0x2f0] sm:$0xff]  ;;  %v160_v50 = vld [vmem:[#allocation2 + $0x320] sm:$0xff] }
 0x195   :  { %2761 = vmatmul.bf16.gmra.mxu3 %v9396_v45  ;;  %v8978_v45 = vld [vmem:[#allocation5 + $0x514] sm:$0xf] }
 0x196   :  { %3083 = vmatpush.bf16.msra.mxu3 %v8703_v32 }
 0x197   :  { %v2357_v63 = vpop.f32.mrf.mxu2  ;;  %v2181_v55 = vpop.f32.mrf.mxu0 }
 0x198   :  { %v2358_v10 = vadd.f32 %v2357_v63, %v2269_v0  ;;  %v2446_v2 = vpop.f32.mrf.mxu3  ;;  %v2182_v11 = vadd.f32 %v2181_v55, %v9418_v37  ;;  %v2270_v49 = vpop.f32.mrf.mxu1  ;;  %v8319_v0 = vor.u32 %v8978_v45, %v8316_v44  ;;  %v148_v63 = vld [vmem:[#allocation2 + $0x2c0] sm:$0xff] }
 0x199   :  { %v9660_v14 = vpack.c.bf16 %v154_v54, %v148_v63  ;;  %v161_v63 = vld [vmem:[#allocation2 + $0x328] sm:$0xff] }
 0x19a   :  { %v9658_v33 = vadd.f32 %v2446_v2, %v2358_v10  ;;  %v2271_v15 = vadd.f32 %v2270_v49, %v2182_v11  ;;  %2905 = vmatpush.bf16.msra.mxu1 %v8319_v0  ;;  %v9662_v10 = vpack.c.bf16 %v155_v36, %v149_v53  ;;  %v166_v0 = vld [vmem:[#allocation2 + $0x350] sm:$0xff]  ;;  %v167_v53 = vld [vmem:[#allocation2 + $0x358] sm:$0xff] }
 0x19b   :  { %15368 = vst [vmem:[#allocation95_spill] sm:$0xff] %v9660_v14 }
 0x19c   :  { %15369 = vst [vmem:[#allocation96_spill] sm:$0xff] %v9662_v10 }
 0x19f   :  { %v2359_v23 = vpop.f32.mrf.mxu2  ;;  %v2184_v47 = vpop.f32.mrf.mxu0 }
 0x1a0   :  { %v2360_v55 = vadd.f32 %v2359_v23, %v2271_v15  ;;  %v2448_v13 = vpop.f32.mrf.mxu3  ;;  %v2185_v2 = vadd.f32 %v2184_v47, %v9418_v37  ;;  %v2273_v24 = vpop.f32.mrf.mxu1 }
 0x1a2   :  { %v9665_v22 = vadd.f32 %v2448_v13, %v2360_v55  ;;  %v2274_v32 = vadd.f32 %v2273_v24, %v2185_v2  ;;  %2499 = vmatmul.bf16.gmra.mxu0 %v9660_v14  ;;  %v9674_v55 = vpack.c.bf16 %v166_v0, %v160_v50  ;;  %v9676_v24 = vpack.c.bf16 %v167_v53, %v161_v63  ;;  %v8484_v50 = vld [vmem:[#allocation5 + $0x678] sm:$0xf0]  ;;  %v8924_v0 = vld [vmem:[#allocation5 + $0x364] sm:$0xf] }
 0x1a3   :  { %2588 = vmatmul.bf16.gmra.mxu1 %v9662_v10 }
 0x1a4   :  { %2677 = vmatmul.bf16.gmra.mxu2 %v9406_v20  ;;  %15370 = vst [vmem:[#allocation97_spill] sm:$0xff] %v9674_v55  ;;  %v172_v20 = vld [vmem:[#allocation2 + $0x380] sm:$0xff] }
 0x1a5   :  { %2766 = vmatmul.bf16.gmra.mxu3 %v9408_v21  ;;  %15371 = vst [vmem:[#allocation98_spill] sm:$0xff] %v9676_v24 }
 0x1a7   :  { %v2362_v44 = vpop.f32.mrf.mxu2  ;;  %v2186_v15 = vpop.f32.mrf.mxu0 }
 0x1a8   :  { %v2363_v45 = vadd.f32 %v2362_v44, %v2274_v32  ;;  %v2451_v23 = vpop.f32.mrf.mxu3  ;;  %v2187_v54 = vadd.f32 %v2186_v15, %v9418_v37  ;;  %v2275_v52 = vpop.f32.mrf.mxu1  ;;  %v9176_v32 = vld [vmem:[#allocation7] sm:$0x77] }
 0x1a9   :  { %v643_v44 = vperm.slane %v9176_v32, 4 }
 0x1aa   :  { %v9672_v11 = vadd.f32 %v2451_v23, %v2363_v45  ;;  %v2276_v49 = vadd.f32 %v2275_v52, %v2187_v54 }
 0x1ab   :  { %v9686_v54 = vperm.slane %v643_v44, 0 }
 0x1af   :  { %v2364_v36 = vpop.f32.mrf.mxu2  ;;  %v2465_v2 = vpop.f32.mrf.mxu0 }
 0x1b0   :  { %v2365_v13 = vadd.f32 %v2364_v36, %v2276_v49  ;;  %v2453_v47 = vpop.f32.mrf.mxu3  ;;  %v2466_v37 = vadd.f32 %v2465_v2, %v9434_v30  ;;  %v2554_v15 = vpop.f32.mrf.mxu1  ;;  %v9020_v49 = vld [vmem:[#allocation5 + $0x664] sm:$0xf]  ;;  %v8676_v2 = vld [vmem:[#allocation5 + $0x7f8] sm:$0xf0] }
 0x1b1   :  { %v8487_v36 = vor.u32 %v9020_v49, %v8484_v50  ;;  %v178_v49 = vld [vmem:[#allocation2 + $0x3b0] sm:$0xff]  ;;  %v173_v50 = vld [vmem:[#allocation2 + $0x388] sm:$0xff] }
 0x1b2   :  { %v9679_v45 = vadd.f32 %v2453_v47, %v2365_v13  ;;  %v9681_v23 = vadd.f32 %v2554_v15, %v2466_v37  ;;  %2504 = vmatmul.bf16.gmra.mxu0 %v9674_v55  ;;  %v8100_v13 = vld [vmem:[#allocation5 + $0x378] sm:$0xf0]  ;;  %v9068_v47 = vld [vmem:[#allocation5 + $0x7e4] sm:$0xf] }
 0x1b3   :  { %2593 = vmatmul.bf16.gmra.mxu1 %v9676_v24  ;;  %v8103_v15 = vor.u32 %v8924_v0, %v8100_v13  ;;  %v8679_v44 = vor.u32 %v9068_v47, %v8676_v2  ;;  %2995 = vmatpush.bf16.msra.mxu2 %v8487_v36  ;;  %v179_v24 = vld [vmem:[#allocation2 + $0x3b8] sm:$0xff] }
 0x1b4   :  { %15372 = vst [vmem:[#allocation99_spill] sm:$0xff] %v9681_v23  ;;  %2682 = vmatmul.bf16.gmra.mxu2 %v9420_v43  ;;  %v8292_v43 = vld [vmem:[#allocation5 + $0x4f8] sm:$0xf0] }
 0x1b5   :  { %2771 = vmatmul.bf16.gmra.mxu3 %v9422_v57  ;;  %v8972_v57 = vld [vmem:[#allocation5 + $0x4e4] sm:$0xf]  ;;  %2817 = vmatpush.bf16.msra.mxu0 %v8103_v15 }
 0x1b6   :  { %3084 = vmatpush.bf16.msra.mxu3 %v8679_v44  ;;  %v184_v15 = vld [vmem:[#allocation2 + $0x3e0] sm:$0xff]  ;;  %v190_v44 = vld [vmem:[#allocation2 + $0x410] sm:$0xff] }
 0x1b7   :  { %v2643_v52 = vpop.f32.mrf.mxu2  ;;  %v2467_v53 = vpop.f32.mrf.mxu0 }
 0x1b8   :  { %v2644_v30 = vadd.f32 %v2643_v52, %v9686_v54  ;;  %v2732_v63 = vpop.f32.mrf.mxu3  ;;  %v2468_v32 = vadd.f32 %v2467_v53, %v9445_v18  ;;  %v2556_v37 = vpop.f32.mrf.mxu1  ;;  %v8295_v52 = vor.u32 %v8972_v57, %v8292_v43  ;;  %v9695_v18 = vpack.c.bf16 %v178_v49, %v172_v20  ;;  %v191_v49 = vld [vmem:[#allocation2 + $0x418] sm:$0xff] }
 0x1b9   :  { %v9698_v53 = vpack.c.bf16 %v179_v24, %v173_v50 }
 0x1ba   :  { %v9691_v23 = vadd.f32 %v2732_v63, %v2644_v30  ;;  %v9693_v21 = vadd.f32 %v2556_v37, %v2468_v32  ;;  %2906 = vmatpush.bf16.msra.mxu1 %v8295_v52  ;;  %15374 = vst [vmem:[#allocation101_spill] sm:$0xff] %v9695_v18  ;;  %v185_v52 = vld [vmem:[#allocation2 + $0x3e8] sm:$0xff] }
 0x1bb   :  { %15375 = vst [vmem:[#allocation102_spill] sm:$0xff] %v9698_v53 }
 0x1bc   :  { %15373 = vst [vmem:[#allocation100_spill] sm:$0xff] %v9693_v21  ;;  %v8268_v21 = vld [vmem:[#allocation5 + $0x4c8] sm:$0xf0] }
 0x1bf   :  { %v2645_v55 = vpop.f32.mrf.mxu2  ;;  %v2470_v63 = vpop.f32.mrf.mxu0 }
 0x1c0   :  { %v2646_v0 = vadd.f32 %v2645_v55, %v9686_v54  ;;  %v2734_v30 = vpop.f32.mrf.mxu3  ;;  %v2471_v36 = vadd.f32 %v2470_v63, %v9452_v40  ;;  %v2559_v13 = vpop.f32.mrf.mxu1 }
 0x1c2   :  { %v9701_v47 = vadd.f32 %v2734_v30, %v2646_v0  ;;  %v9703_v43 = vadd.f32 %v2559_v13, %v2471_v36  ;;  %2509 = vmatmul.bf16.gmra.mxu0 %v9695_v18  ;;  %v9715_v0 = vpack.c.bf16 %v190_v44, %v184_v15  ;;  %v9718_v13 = vpack.c.bf16 %v191_v49, %v185_v52  ;;  %v8918_v15 = vld [vmem:[#allocation5 + $0x334] sm:$0xf] }
 0x1c3   :  { %2598 = vmatmul.bf16.gmra.mxu1 %v9698_v53 }
 0x1c4   :  { %15376 = vst [vmem:[#allocation103_spill] sm:$0xff] %v9703_v43  ;;  %2687 = vmatmul.bf16.gmra.mxu2 %v9436_v5  ;;  %v8966_v43 = vld [vmem:[#allocation5 + $0x4b4] sm:$0xf] }
 0x1c5   :  { %2776 = vmatmul.bf16.gmra.mxu3 %v9438_v9  ;;  %15378 = vst [vmem:[#allocation105_spill] sm:$0xff] %v9715_v0  ;;  %v203_v9 = vld [vmem:[#allocation2 + $0x478] sm:$0xff] }
 0x1c6   :  { %15379 = vst [vmem:[#allocation106_spill] sm:$0xff] %v9718_v13 }
 0x1c7   :  { %v2648_v20 = vpop.f32.mrf.mxu2  ;;  %v2472_v24 = vpop.f32.mrf.mxu0 }
 0x1c8   :  { %v2649_v57 = vadd.f32 %v2648_v20, %v9686_v54  ;;  %v2737_v55 = vpop.f32.mrf.mxu3  ;;  %v2473_v40 = vadd.f32 %v2472_v24, %v9463_v39  ;;  %v2561_v2 = vpop.f32.mrf.mxu1 }
 0x1ca   :  { %v9711_v32 = vadd.f32 %v2737_v55, %v2649_v57  ;;  %v9713_v37 = vadd.f32 %v2561_v2, %v2473_v40  ;;  %v9014_v40 = vld [vmem:[#allocation5 + $0x634] sm:$0xf]  ;;  %v8460_v2 = vld [vmem:[#allocation5 + $0x648] sm:$0xf0] }
 0x1cb   :  { %v8463_v49 = vor.u32 %v9014_v40, %v8460_v2  ;;  %v202_v40 = vld [vmem:[#allocation2 + $0x470] sm:$0xff]  ;;  %v197_v2 = vld [vmem:[#allocation2 + $0x448] sm:$0xff] }
 0x1cc   :  { %15377 = vst [vmem:[#allocation104_spill] sm:$0xff] %v9713_v37 }
 0x1cd   :  { %2996 = vmatpush.bf16.msra.mxu2 %v8463_v49 }
 0x1cf   :  { %v2650_v50 = vpop.f32.mrf.mxu2  ;;  %v2475_v36 = vpop.f32.mrf.mxu0 }
 0x1d0   :  { %v2651_v30 = vadd.f32 %v2650_v50, %v9686_v54  ;;  %v2739_v63 = vpop.f32.mrf.mxu3  ;;  %v2476_v39 = vadd.f32 %v2475_v36, %v9470_v38  ;;  %v2564_v20 = vpop.f32.mrf.mxu1  ;;  %v8076_v50 = vld [vmem:[#allocation5 + $0x348] sm:$0xf0] }
 0x1d2   :  { %v9721_v57 = vadd.f32 %v2739_v63, %v2651_v30  ;;  %v9723_v55 = vadd.f32 %v2564_v20, %v2476_v39  ;;  %2514 = vmatmul.bf16.gmra.mxu0 %v9715_v0  ;;  %v9062_v30 = vld [vmem:[#allocation5 + $0x7b4] sm:$0xf]  ;;  %v8652_v63 = vld [vmem:[#allocation5 + $0x7c8] sm:$0xf0]  ;;  %v8079_v20 = vor.u32 %v8918_v15, %v8076_v50 }
 0x1d3   :  { %2603 = vmatmul.bf16.gmra.mxu1 %v9718_v13 }
 0x1d4   :  { %15380 = vst [vmem:[#allocation107_spill] sm:$0xff] %v9723_v55  ;;  %2692 = vmatmul.bf16.gmra.mxu2 %v9454_v8  ;;  %v8655_v55 = vor.u32 %v9062_v30, %v8652_v63  ;;  %2818 = vmatpush.bf16.msra.mxu0 %v8079_v20  ;;  %v196_v8 = vld [vmem:[#allocation2 + $0x440] sm:$0xff]  ;;  %v214_v20 = vld [vmem:[#allocation2 + $0x4d0] sm:$0xff] }
 0x1d5   :  { %2781 = vmatmul.bf16.gmra.mxu3 %v9456_v28 }
 0x1d6   :  { %3085 = vmatpush.bf16.msra.mxu3 %v8655_v55 }
 0x1d7   :  { %v2653_v24 = vpop.f32.mrf.mxu2  ;;  %v2477_v52 = vpop.f32.mrf.mxu0 }
 0x1d8   :  { %v2654_v44 = vadd.f32 %v2653_v24, %v9686_v54  ;;  %v2742_v38 = vpop.f32.mrf.mxu3  ;;  %v2478_v36 = vadd.f32 %v2477_v52, %v9481_v31  ;;  %v2566_v39 = vpop.f32.mrf.mxu1  ;;  %v8271_v24 = vor.u32 %v8966_v43, %v8268_v21  ;;  %v9735_v31 = vpack.c.bf16 %v202_v40, %v196_v8  ;;  %v215_v40 = vld [vmem:[#allocation2 + $0x4d8] sm:$0xff] }
 0x1d9   :  { %v9738_v52 = vpack.c.bf16 %v203_v9, %v197_v2 }
 0x1da   :  { %v9731_v37 = vadd.f32 %v2742_v38, %v2654_v44  ;;  %v9733_v28 = vadd.f32 %v2566_v39, %v2478_v36  ;;  %2907 = vmatpush.bf16.msra.mxu1 %v8271_v24  ;;  %15382 = vst [vmem:[#allocation109_spill] sm:$0xff] %v9735_v31  ;;  %v208_v39 = vld [vmem:[#allocation2 + $0x4a0] sm:$0xff]  ;;  %v209_v24 = vld [vmem:[#allocation2 + $0x4a8] sm:$0xff] }
 0x1db   :  { %15383 = vst [vmem:[#allocation110_spill] sm:$0xff] %v9738_v52 }
 0x1dc   :  { %15381 = vst [vmem:[#allocation108_spill] sm:$0xff] %v9733_v28  ;;  %v8244_v28 = vld [vmem:[#allocation5 + $0x498] sm:$0xf0] }
 0x1df   :  { %v2655_v5 = vpop.f32.mrf.mxu2  ;;  %v2480_v38 = vpop.f32.mrf.mxu0 }
 0x1e0   :  { %v2656_v15 = vadd.f32 %v2655_v5, %v9686_v54  ;;  %v2744_v44 = vpop.f32.mrf.mxu3  ;;  %v2481_v49 = vadd.f32 %v2480_v38, %v9488_v17  ;;  %v2569_v50 = vpop.f32.mrf.mxu1 }
 0x1e2   :  { %v9741_v30 = vadd.f32 %v2744_v44, %v2656_v15  ;;  %v9743_v21 = vadd.f32 %v2569_v50, %v2481_v49  ;;  %2519 = vmatmul.bf16.gmra.mxu0 %v9735_v31  ;;  %v9755_v15 = vpack.c.bf16 %v214_v20, %v208_v39  ;;  %v9758_v50 = vpack.c.bf16 %v215_v40, %v209_v24  ;;  %v8912_v39 = vld [vmem:[#allocation5 + $0x304] sm:$0xf] }
 0x1e3   :  { %2608 = vmatmul.bf16.gmra.mxu1 %v9738_v52 }
 0x1e4   :  { %15384 = vst [vmem:[#allocation111_spill] sm:$0xff] %v9743_v21  ;;  %2697 = vmatmul.bf16.gmra.mxu2 %v9472_v4  ;;  %v8960_v21 = vld [vmem:[#allocation5 + $0x484] sm:$0xf] }
 0x1e5   :  { %2786 = vmatmul.bf16.gmra.mxu3 %v9474_v16  ;;  %15386 = vst [vmem:[#allocation113_spill] sm:$0xff] %v9755_v15  ;;  %v227_v16 = vld [vmem:[#allocation2 + $0x538] sm:$0xff] }
 0x1e6   :  { %15387 = vst [vmem:[#allocation114_spill] sm:$0xff] %v9758_v50 }
 0x1e7   :  { %v2658_v5 = vpop.f32.mrf.mxu2  ;;  %v2482_v43 = vpop.f32.mrf.mxu0 }
 0x1e8   :  { %v2659_v8 = vadd.f32 %v2658_v5, %v9686_v54  ;;  %v2747_v9 = vpop.f32.mrf.mxu3  ;;  %v2483_v17 = vadd.f32 %v2482_v43, %v9499_v60  ;;  %v2571_v55 = vpop.f32.mrf.mxu1 }
 0x1ea   :  { %v9751_v63 = vadd.f32 %v2747_v9, %v2659_v8  ;;  %v9753_v36 = vadd.f32 %v2571_v55, %v2483_v17  ;;  %v9008_v17 = vld [vmem:[#allocation5 + $0x604] sm:$0xf]  ;;  %v8436_v55 = vld [vmem:[#allocation5 + $0x618] sm:$0xf0] }
 0x1eb   :  { %v8439_v40 = vor.u32 %v9008_v17, %v8436_v55  ;;  %v226_v17 = vld [vmem:[#allocation2 + $0x530] sm:$0xff]  ;;  %v221_v55 = vld [vmem:[#allocation2 + $0x508] sm:$0xff] }
 0x1ec   :  { %15385 = vst [vmem:[#allocation112_spill] sm:$0xff] %v9753_v36 }
 0x1ed   :  { %2997 = vmatpush.bf16.msra.mxu2 %v8439_v40 }
 0x1ef   :  { %v2660_v2 = vpop.f32.mrf.mxu2  ;;  %v2485_v49 = vpop.f32.mrf.mxu0 }
 0x1f0   :  { %v2661_v44 = vadd.f32 %v2660_v2, %v9686_v54  ;;  %v2749_v38 = vpop.f32.mrf.mxu3  ;;  %v2486_v60 = vadd.f32 %v2485_v49, %v9506_v56  ;;  %v2574_v5 = vpop.f32.mrf.mxu1  ;;  %v8052_v2 = vld [vmem:[#allocation5 + $0x318] sm:$0xf0] }
 0x1f2   :  { %v9761_v8 = vadd.f32 %v2749_v38, %v2661_v44  ;;  %v9763_v9 = vadd.f32 %v2574_v5, %v2486_v60  ;;  %2524 = vmatmul.bf16.gmra.mxu0 %v9755_v15  ;;  %v9056_v44 = vld [vmem:[#allocation5 + $0x784] sm:$0xf]  ;;  %v8628_v38 = vld [vmem:[#allocation5 + $0x798] sm:$0xf0]  ;;  %v8055_v5 = vor.u32 %v8912_v39, %v8052_v2 }
 0x1f3   :  { %2613 = vmatmul.bf16.gmra.mxu1 %v9758_v50 }
 0x1f4   :  { %15388 = vst [vmem:[#allocation115_spill] sm:$0xff] %v9763_v9  ;;  %2702 = vmatmul.bf16.gmra.mxu2 %v9490_v29  ;;  %v8631_v9 = vor.u32 %v9056_v44, %v8628_v38  ;;  %2819 = vmatpush.bf16.msra.mxu0 %v8055_v5  ;;  %v220_v29 = vld [vmem:[#allocation2 + $0x500] sm:$0xff]  ;;  %v238_v5 = vld [vmem:[#allocation2 + $0x590] sm:$0xff] }
 0x1f5   :  { %2791 = vmatmul.bf16.gmra.mxu3 %v9492_v46 }
 0x1f6   :  { %3086 = vmatpush.bf16.msra.mxu3 %v8631_v9 }
 0x1f7   :  { %v2663_v43 = vpop.f32.mrf.mxu2  ;;  %v2487_v24 = vpop.f32.mrf.mxu0 }
 0x1f8   :  { %v2664_v20 = vadd.f32 %v2663_v43, %v9686_v54  ;;  %v2752_v56 = vpop.f32.mrf.mxu3  ;;  %v2488_v49 = vadd.f32 %v2487_v24, %v9517_v61  ;;  %v2576_v60 = vpop.f32.mrf.mxu1  ;;  %v8247_v43 = vor.u32 %v8960_v21, %v8244_v28  ;;  %v9775_v61 = vpack.c.bf16 %v226_v17, %v220_v29  ;;  %v239_v17 = vld [vmem:[#allocation2 + $0x598] sm:$0xff] }
 0x1f9   :  { %v9778_v24 = vpack.c.bf16 %v227_v16, %v221_v55 }
 0x1fa   :  { %v9771_v36 = vadd.f32 %v2752_v56, %v2664_v20  ;;  %v9773_v46 = vadd.f32 %v2576_v60, %v2488_v49  ;;  %2908 = vmatpush.bf16.msra.mxu1 %v8247_v43  ;;  %15390 = vst [vmem:[#allocation117_spill] sm:$0xff] %v9775_v61  ;;  %v232_v60 = vld [vmem:[#allocation2 + $0x560] sm:$0xff]  ;;  %v233_v43 = vld [vmem:[#allocation2 + $0x568] sm:$0xff] }
 0x1fb   :  { %15391 = vst [vmem:[#allocation118_spill] sm:$0xff] %v9778_v24 }
 0x1fc   :  { %15389 = vst [vmem:[#allocation116_spill] sm:$0xff] %v9773_v46  ;;  %v8034_v46 = vld [vmem:[#allocation5 + $0x2d8] sm:$0xf] }
 0x1ff   :  { %v2665_v4 = vpop.f32.mrf.mxu2  ;;  %v2490_v56 = vpop.f32.mrf.mxu0 }
 0x200   :  { %v2666_v39 = vadd.f32 %v2665_v4, %v9686_v54  ;;  %v2754_v20 = vpop.f32.mrf.mxu3  ;;  %v2491_v40 = vadd.f32 %v2490_v56, %v9524_v35  ;;  %v2579_v2 = vpop.f32.mrf.mxu1 }
 0x202   :  { %v9781_v44 = vadd.f32 %v2754_v20, %v2666_v39  ;;  %v9783_v28 = vadd.f32 %v2579_v2, %v2491_v40  ;;  %2529 = vmatmul.bf16.gmra.mxu0 %v9775_v61  ;;  %v9795_v39 = vpack.c.bf16 %v238_v5, %v232_v60  ;;  %v9798_v2 = vpack.c.bf16 %v239_v17, %v233_v43  ;;  %v8958_v60 = vld [vmem:[#allocation5 + $0x46c] sm:$0xf0]  ;;  %v7842_v5 = vld [vmem:[#allocation5 + $0x158] sm:$0xf] }
 0x203   :  { %2618 = vmatmul.bf16.gmra.mxu1 %v9778_v24 }
 0x204   :  { %15392 = vst [vmem:[#allocation119_spill] sm:$0xff] %v9783_v28  ;;  %2707 = vmatmul.bf16.gmra.mxu2 %v9508_v19  ;;  %v251_v19 = vld [vmem:[#allocation2 + $0x5f8] sm:$0xff] }
 0x205   :  { %2796 = vmatmul.bf16.gmra.mxu3 %v9510_v42  ;;  %15394 = vst [vmem:[#allocation121_spill] sm:$0xff] %v9795_v39  ;;  %v244_v42 = vld [vmem:[#allocation2 + $0x5c0] sm:$0xff] }
 0x206   :  { %15395 = vst [vmem:[#allocation122_spill] sm:$0xff] %v9798_v2 }
 0x207   :  { %v2668_v4 = vpop.f32.mrf.mxu2  ;;  %v2492_v21 = vpop.f32.mrf.mxu0 }
 0x208   :  { %v2669_v29 = vadd.f32 %v2668_v4, %v9686_v54  ;;  %v2757_v16 = vpop.f32.mrf.mxu3  ;;  %v2493_v35 = vadd.f32 %v2492_v21, %v9535_v6  ;;  %v2581_v9 = vpop.f32.mrf.mxu1  ;;  %v15397_v21 = vld [vmem:[#allocation69_spill] sm:$0xff] }
 0x20a   :  { %v9791_v38 = vadd.f32 %v2757_v16, %v2669_v29  ;;  %v9793_v49 = vadd.f32 %v2581_v9, %v2493_v35  ;;  %v8226_v9 = vld [vmem:[#allocation5 + $0x458] sm:$0xf] }
 0x20c   :  { %15393 = vst [vmem:[#allocation120_spill] sm:$0xff] %v9793_v49 }
 0x20f   :  { %v2670_v55 = vpop.f32.mrf.mxu2  ;;  %v2495_v40 = vpop.f32.mrf.mxu0 }
 0x210   :  { %v2671_v20 = vadd.f32 %v2670_v55, %v9686_v54  ;;  %v2759_v56 = vpop.f32.mrf.mxu3  ;;  %v2496_v6 = vadd.f32 %v2495_v40, %v9542_v59  ;;  %v2584_v4 = vpop.f32.mrf.mxu1  ;;  %v8227_v55 = vor.u32 %v8958_v60, %v8226_v9  ;;  %v9006_v40 = vld [vmem:[#allocation5 + $0x5ec] sm:$0xf0]  ;;  %v245_v60 = vld [vmem:[#allocation2 + $0x5c8] sm:$0xff] }
 0x211   :  { %v250_v9 = vld [vmem:[#allocation2 + $0x5f0] sm:$0xff] }
 0x212   :  { %v9801_v29 = vadd.f32 %v2759_v56, %v2671_v20  ;;  %v9803_v16 = vadd.f32 %v2584_v4, %v2496_v6  ;;  %2534 = vmatmul.bf16.gmra.mxu0 %v9795_v39  ;;  %v8862_v20 = vld [vmem:[#allocation5 + $0x16c] sm:$0xf0]  ;;  %v8418_v56 = vld [vmem:[#allocation5 + $0x5d8] sm:$0xf]  ;;  %3346 = vmatpush.bf16.msrb.mxu2 %v8227_v55 }
 0x213   :  { %2623 = vmatmul.bf16.gmra.mxu1 %v9798_v2  ;;  %v8419_v49 = vor.u32 %v9006_v40, %v8418_v56  ;;  %v15401_v55 = vld [vmem:[#allocation76_spill] sm:$0xff] }
 0x214   :  { %15396 = vst [vmem:[#allocation123_spill] sm:$0xff] %v9803_v16  ;;  %2712 = vmatmul.bf16.gmra.mxu2 %v9526_v58  ;;  %v7843_v16 = vor.u32 %v8862_v20, %v7842_v5 }
 0x215   :  { %2801 = vmatmul.bf16.gmra.mxu3 %v15397_v21  ;;  %v8910_v21 = vld [vmem:[#allocation5 + $0x2ec] sm:$0xf0] }
 0x216   :  { %3168 = vmatpush.bf16.msrb.mxu0 %v7843_v16  ;;  %3435 = vmatpush.bf16.msrb.mxu3 %v8419_v49  ;;  %v15403_v49 = vld [vmem:[#allocation72_spill] sm:$0xff] }
 0x217   :  { %v2673_v35 = vpop.f32.mrf.mxu2  ;;  %v2497_v17 = vpop.f32.mrf.mxu0 }
 0x218   :  { %v2674_v43 = vadd.f32 %v2673_v35, %v9686_v54  ;;  %v2762_v59 = vpop.f32.mrf.mxu3  ;;  %v2498_v6 = vadd.f32 %v2497_v17, %v9553_v3  ;;  %v2586_v4 = vpop.f32.mrf.mxu1  ;;  %v8035_v35 = vor.u32 %v8910_v21, %v8034_v46  ;;  %v9815_v3 = vpack.c.bf16 %v250_v9, %v244_v42  ;;  %v15404_v42 = vld [vmem:[#allocation73_spill] sm:$0xff] }
 0x219   :  { %v9818_v17 = vpack.c.bf16 %v251_v19, %v245_v60 }
 0x21a   :  { %v9811_v28 = vadd.f32 %v2762_v59, %v2674_v43  ;;  %v9813_v58 = vadd.f32 %v2586_v4, %v2498_v6  ;;  %3257 = vmatpush.bf16.msrb.mxu1 %v8035_v35  ;;  %15399 = vst [vmem:[#allocation125_spill] sm:$0xff] %v9815_v3  ;;  %v15405_v6 = vld [vmem:[#allocation79_spill] sm:$0xff] }
 0x21b   :  { %15400 = vst [vmem:[#allocation126_spill] sm:$0xff] %v9818_v17 }
 0x21c   :  { %15398 = vst [vmem:[#allocation124_spill] sm:$0xff] %v9813_v58  ;;  %v15409_v58 = vld [vmem:[#allocation14_spill] sm:$0xff] }
 0x21f   :  { %v2675_v2 = vpop.f32.mrf.mxu2  ;;  %v2500_v59 = vpop.f32.mrf.mxu0 }
 0x220   :  { %v2676_v5 = vadd.f32 %v2675_v2, %v9686_v54  ;;  %v2764_v43 = vpop.f32.mrf.mxu3  ;;  %v2501_v20 = vadd.f32 %v2500_v59, %v15401_v55  ;;  %v2589_v56 = vpop.f32.mrf.mxu1 }
 0x222   :  { %v9821_v16 = vadd.f32 %v2764_v43, %v2676_v5  ;;  %v9823_v46 = vadd.f32 %v2589_v56, %v2501_v20  ;;  %2539 = vmatmul.bf16.gmra.mxu0 %v9815_v3 }
 0x223   :  { %2628 = vmatmul.bf16.gmra.mxu1 %v9818_v17 }
 0x224   :  { %15402 = vst [vmem:[#allocation76_spill] sm:$0xff] %v9823_v46  ;;  %2717 = vmatmul.bf16.gmra.mxu2 %v15403_v49 }
 0x225   :  { %2806 = vmatmul.bf16.gmra.mxu3 %v15404_v42 }
 0x227   :  { %v2678_v2 = vpop.f32.mrf.mxu2  ;;  %v2502_v40 = vpop.f32.mrf.mxu0 }
 0x228   :  { %v2679_v21 = vadd.f32 %v2678_v2, %v9686_v54  ;;  %v2767_v19 = vpop.f32.mrf.mxu3  ;;  %v2503_v4 = vadd.f32 %v2502_v40, %v15405_v6  ;;  %v2591_v35 = vpop.f32.mrf.mxu1  ;;  %v15410_v40 = vld [vmem:[#allocation15_spill] sm:$0xff] }
 0x22a   :  { %v9831_v9 = vadd.f32 %v2767_v19, %v2679_v21  ;;  %v9833_v60 = vadd.f32 %v2591_v35, %v2503_v4  ;;  %v15411_v21 = vld [vmem:[#allocation77_spill] sm:$0xff]  ;;  %v15412_v19 = vld [vmem:[#allocation78_spill] sm:$0xff] }
 0x22b   :  { %v8202_v4 = vld [vmem:[#allocation5 + $0x428] sm:$0xf]  ;;  %v8952_v35 = vld [vmem:[#allocation5 + $0x43c] sm:$0xf0] }
 0x22c   :  { %15406 = vst [vmem:[#allocation79_spill] sm:$0xff] %v9833_v60 }
 0x22f   :  { %v2680_v5 = vpop.f32.mrf.mxu2  ;;  %v2505_v55 = vpop.f32.mrf.mxu0 }
 0x230   :  { %v2681_v43 = vadd.f32 %v2680_v5, %v9686_v54  ;;  %v2769_v59 = vpop.f32.mrf.mxu3  ;;  %v2506_v20 = vadd.f32 %v2505_v55, %v9574_v51  ;;  %v2594_v56 = vpop.f32.mrf.mxu1  ;;  %v7818_v5 = vld [vmem:[#allocation5 + $0x128] sm:$0xf] }
 0x232   :  { %v9837_v46 = vadd.f32 %v2769_v59, %v2681_v43  ;;  %v9839_v2 = vadd.f32 %v2594_v56, %v2506_v20  ;;  %2820 = vmatmul.bf16.vlgmr.msra.gmra.mxu0 %v15409_v58  ;;  %v8203_v43 = vor.u32 %v8952_v35, %v8202_v4  ;;  %v8856_v59 = vld [vmem:[#allocation5 + $0x13c] sm:$0xf0]  ;;  %v8394_v20 = vld [vmem:[#allocation5 + $0x5a8] sm:$0xf] }
 0x233   :  { %2909 = vmatmul.bf16.vlgmr.msra.gmra.mxu1 %v15410_v40  ;;  %v9000_v56 = vld [vmem:[#allocation5 + $0x5bc] sm:$0xf0]  ;;  %v7819_v49 = vor.u32 %v8856_v59, %v7818_v5 }
 0x234   :  { %15407 = vst [vmem:[#allocation127_spill] sm:$0xff] %v9837_v46  ;;  %2998 = vmatmul.bf16.vlgmr.msra.gmra.mxu2 %v15411_v21  ;;  %v8395_v40 = vor.u32 %v9000_v56, %v8394_v20  ;;  %v8904_v58 = vld [vmem:[#allocation5 + $0x2bc] sm:$0xf0] }
 0x235   :  { %15408 = vst [vmem:[#allocation128_spill] sm:$0xff] %v9839_v2  ;;  %3087 = vmatmul.bf16.vlgmr.msra.gmra.mxu3 %v15412_v19  ;;  %3347 = vmatpush.bf16.msrb.mxu2 %v8203_v43  ;;  %v8010_v19 = vld [vmem:[#allocation5 + $0x2a8] sm:$0xf]  ;;  %v15418_v43 = vld [vmem:[#allocation84_spill] sm:$0xff] }
 0x236   :  { %3169 = vmatpush.bf16.msrb.mxu0 %v7819_v49  ;;  %3436 = vmatpush.bf16.msrb.mxu3 %v8395_v40 }
 0x237   :  { %v2683_v6 = vpop.f32.mrf.mxu2  ;;  %v2507_v55 = vpop.f32.mrf.mxu0 }
 0x238   :  { %v2684_v60 = vadd.f32 %v2683_v6, %v9686_v54  ;;  %v2772_v51 = vpop.f32.mrf.mxu3  ;;  %v2508_v2 = vadd.f32 %v2507_v55, %v9581_v41  ;;  %v2596_v42 = vpop.f32.mrf.mxu1  ;;  %v8011_v6 = vor.u32 %v8904_v58, %v8010_v19  ;;  %v15417_v58 = vld [vmem:[#allocation81_spill] sm:$0xff] }
 0x23a   :  { %v9847_v21 = vadd.f32 %v2772_v51, %v2684_v60  ;;  %v9849_v46 = vadd.f32 %v2596_v42, %v2508_v2  ;;  %3258 = vmatpush.bf16.msrb.mxu1 %v8011_v6  ;;  %v15415_v51 = vld [vmem:[#allocation18_spill] sm:$0xff]  ;;  %v15416_v42 = vld [vmem:[#allocation19_spill] sm:$0xff] }
 0x23c   :  { %15413 = vst [vmem:[#allocation129_spill] sm:$0xff] %v9849_v46 }
 0x23f   :  { %v2685_v4 = vpop.f32.mrf.mxu2  ;;  %v2510_v3 = vpop.f32.mrf.mxu0 }
 0x240   :  { %v2686_v35 = vadd.f32 %v2685_v4, %v9686_v54  ;;  %v2774_v17 = vpop.f32.mrf.mxu3  ;;  %v2511_v41 = vadd.f32 %v2510_v3, %v9588_v48  ;;  %v2599_v5 = vpop.f32.mrf.mxu1 }
 0x242   :  { %v9853_v55 = vadd.f32 %v2774_v17, %v2686_v35  ;;  %v9855_v60 = vadd.f32 %v2599_v5, %v2511_v41  ;;  %2825 = vmatmul.bf16.gmra.mxu0 %v15415_v51 }
 0x243   :  { %2914 = vmatmul.bf16.gmra.mxu1 %v15416_v42 }
 0x244   :  { %15414 = vst [vmem:[#allocation130_spill] sm:$0xff] %v9855_v60  ;;  %3003 = vmatmul.bf16.gmra.mxu2 %v9576_v7  ;;  %v15422_v60 = vld [vmem:[#allocation22_spill] sm:$0xff] }
 0x245   :  { %3092 = vmatmul.bf16.gmra.mxu3 %v15417_v58 }
 0x247   :  { %v2688_v49 = vpop.f32.mrf.mxu2  ;;  %v2512_v19 = vpop.f32.mrf.mxu0 }
 0x248   :  { %v2689_v2 = vadd.f32 %v2688_v49, %v9686_v54  ;;  %v2777_v40 = vpop.f32.mrf.mxu3  ;;  %v2513_v48 = vadd.f32 %v2512_v19, %v15418_v43  ;;  %v2601_v3 = vpop.f32.mrf.mxu1  ;;  %v15423_v19 = vld [vmem:[#allocation23_spill] sm:$0xff] }
 0x24a   :  { %v9863_v17 = vadd.f32 %v2777_v40, %v2689_v2  ;;  %v9865_v59 = vadd.f32 %v2601_v3, %v2513_v48  ;;  %v15424_v2 = vld [vmem:[#allocation82_spill] sm:$0xff]  ;;  %v15425_v40 = vld [vmem:[#allocation83_spill] sm:$0xff]  ;;  %v8178_v48 = vld [vmem:[#allocation5 + $0x3f8] sm:$0xf] }
 0x24b   :  { %v8946_v3 = vld [vmem:[#allocation5 + $0x40c] sm:$0xf0] }
 0x24c   :  { %15419 = vst [vmem:[#allocation84_spill] sm:$0xff] %v9865_v59 }
 0x24f   :  { %v2690_v20 = vpop.f32.mrf.mxu2  ;;  %v2515_v4 = vpop.f32.mrf.mxu0 }
 0x250   :  { %v2691_v56 = vadd.f32 %v2690_v20, %v9686_v54  ;;  %v2779_v6 = vpop.f32.mrf.mxu3  ;;  %v2516_v35 = vadd.f32 %v2515_v4, %v9602_v25  ;;  %v2604_v41 = vpop.f32.mrf.mxu1  ;;  %v7794_v20 = vld [vmem:[#allocation5 + $0xf8] sm:$0xf] }
 0x252   :  { %v9869_v5 = vadd.f32 %v2779_v6, %v2691_v56  ;;  %v9871_v49 = vadd.f32 %v2604_v41, %v2516_v35  ;;  %2830 = vmatmul.bf16.gmra.mxu0 %v15422_v60  ;;  %v8179_v56 = vor.u32 %v8946_v3, %v8178_v48  ;;  %v8850_v6 = vld [vmem:[#allocation5 + $0x10c] sm:$0xf0]  ;;  %v8370_v35 = vld [vmem:[#allocation5 + $0x578] sm:$0xf] }
 0x253   :  { %2919 = vmatmul.bf16.gmra.mxu1 %v15423_v19  ;;  %v8994_v41 = vld [vmem:[#allocation5 + $0x58c] sm:$0xf0]  ;;  %v7795_v58 = vor.u32 %v8850_v6, %v7794_v20 }
 0x254   :  { %15420 = vst [vmem:[#allocation131_spill] sm:$0xff] %v9869_v5  ;;  %3008 = vmatmul.bf16.gmra.mxu2 %v15424_v2  ;;  %v8371_v7 = vor.u32 %v8994_v41, %v8370_v35  ;;  %v8898_v19 = vld [vmem:[#allocation5 + $0x28c] sm:$0xf0] }
 0x255   :  { %15421 = vst [vmem:[#allocation132_spill] sm:$0xff] %v9871_v49  ;;  %3097 = vmatmul.bf16.gmra.mxu3 %v15425_v40  ;;  %3348 = vmatpush.bf16.msrb.mxu2 %v8179_v56  ;;  %v7986_v40 = vld [vmem:[#allocation5 + $0x278] sm:$0xf]  ;;  %v15431_v56 = vld [vmem:[#allocation89_spill] sm:$0xff] }
 0x256   :  { %3170 = vmatpush.bf16.msrb.mxu0 %v7795_v58  ;;  %3437 = vmatpush.bf16.msrb.mxu3 %v8371_v7  ;;  %v15430_v7 = vld [vmem:[#allocation86_spill] sm:$0xff] }
 0x257   :  { %v2693_v43 = vpop.f32.mrf.mxu2  ;;  %v2517_v4 = vpop.f32.mrf.mxu0 }
 0x258   :  { %v2694_v59 = vadd.f32 %v2693_v43, %v9686_v54  ;;  %v2782_v25 = vpop.f32.mrf.mxu3  ;;  %v2518_v49 = vadd.f32 %v2517_v4, %v9609_v34  ;;  %v2606_v46 = vpop.f32.mrf.mxu1  ;;  %v7987_v43 = vor.u32 %v8898_v19, %v7986_v40 }
 0x25a   :  { %v9879_v2 = vadd.f32 %v2782_v25, %v2694_v59  ;;  %v9881_v60 = vadd.f32 %v2606_v46, %v2518_v49  ;;  %3259 = vmatpush.bf16.msrb.mxu1 %v7987_v43  ;;  %v15428_v25 = vld [vmem:[#allocation26_spill] sm:$0xff]  ;;  %v15429_v46 = vld [vmem:[#allocation27_spill] sm:$0xff] }
 0x25c   :  { %15426 = vst [vmem:[#allocation133_spill] sm:$0xff] %v9881_v60 }
 0x25f   :  { %v2695_v48 = vpop.f32.mrf.mxu2  ;;  %v2520_v42 = vpop.f32.mrf.mxu0 }
 0x260   :  { %v2696_v3 = vadd.f32 %v2695_v48, %v9686_v54  ;;  %v2784_v5 = vpop.f32.mrf.mxu3  ;;  %v2521_v34 = vadd.f32 %v2520_v42, %v9616_v62  ;;  %v2609_v20 = vpop.f32.mrf.mxu1 }
 0x262   :  { %v9885_v4 = vadd.f32 %v2784_v5, %v2696_v3  ;;  %v9887_v59 = vadd.f32 %v2609_v20, %v2521_v34  ;;  %2835 = vmatmul.bf16.gmra.mxu0 %v15428_v25 }
 0x263   :  { %2924 = vmatmul.bf16.gmra.mxu1 %v15429_v46 }
 0x264   :  { %15427 = vst [vmem:[#allocation134_spill] sm:$0xff] %v9887_v59  ;;  %3013 = vmatmul.bf16.gmra.mxu2 %v9604_v26  ;;  %v15435_v59 = vld [vmem:[#allocation30_spill] sm:$0xff] }
 0x265   :  { %3102 = vmatmul.bf16.gmra.mxu3 %v15430_v7 }
 0x267   :  { %v2698_v58 = vpop.f32.mrf.mxu2  ;;  %v2522_v40 = vpop.f32.mrf.mxu0 }
 0x268   :  { %v2699_v49 = vadd.f32 %v2698_v58, %v9686_v54  ;;  %v2787_v19 = vpop.f32.mrf.mxu3  ;;  %v2523_v62 = vadd.f32 %v2522_v40, %v15431_v56  ;;  %v2611_v42 = vpop.f32.mrf.mxu1  ;;  %v15436_v40 = vld [vmem:[#allocation31_spill] sm:$0xff] }
 0x26a   :  { %v9895_v5 = vadd.f32 %v2787_v19, %v2699_v49  ;;  %v9897_v6 = vadd.f32 %v2611_v42, %v2523_v62  ;;  %v15437_v49 = vld [vmem:[#allocation87_spill] sm:$0xff]  ;;  %v15438_v19 = vld [vmem:[#allocation88_spill] sm:$0xff]  ;;  %v8154_v62 = vld [vmem:[#allocation5 + $0x3c8] sm:$0xf] }
 0x26b   :  { %v8940_v42 = vld [vmem:[#allocation5 + $0x3dc] sm:$0xf0] }
 0x26c   :  { %15432 = vst [vmem:[#allocation89_spill] sm:$0xff] %v9897_v6 }
 0x26f   :  { %v2700_v35 = vpop.f32.mrf.mxu2  ;;  %v2525_v48 = vpop.f32.mrf.mxu0 }
 0x270   :  { %v2701_v41 = vadd.f32 %v2700_v35, %v9686_v54  ;;  %v2789_v43 = vpop.f32.mrf.mxu3  ;;  %v2526_v3 = vadd.f32 %v2525_v48, %v9630_v1  ;;  %v2614_v34 = vpop.f32.mrf.mxu1  ;;  %v7770_v35 = vld [vmem:[#allocation5 + $0xc8] sm:$0xf] }
 0x272   :  { %v9901_v20 = vadd.f32 %v2789_v43, %v2701_v41  ;;  %v9903_v58 = vadd.f32 %v2614_v34, %v2526_v3  ;;  %2840 = vmatmul.bf16.gmra.mxu0 %v15435_v59  ;;  %v8155_v41 = vor.u32 %v8940_v42, %v8154_v62  ;;  %v8844_v43 = vld [vmem:[#allocation5 + $0xdc] sm:$0xf0]  ;;  %v8346_v3 = vld [vmem:[#allocation5 + $0x548] sm:$0xf] }
 0x273   :  { %2929 = vmatmul.bf16.gmra.mxu1 %v15436_v40  ;;  %v8988_v34 = vld [vmem:[#allocation5 + $0x55c] sm:$0xf0]  ;;  %v7771_v7 = vor.u32 %v8844_v43, %v7770_v35  ;;  %v15445_v43 = vld [vmem:[#allocation94_spill] sm:$0xff] }
 0x274   :  { %15433 = vst [vmem:[#allocation135_spill] sm:$0xff] %v9901_v20  ;;  %3018 = vmatmul.bf16.gmra.mxu2 %v15437_v49  ;;  %v8347_v26 = vor.u32 %v8988_v34, %v8346_v3  ;;  %v8892_v40 = vld [vmem:[#allocation5 + $0x25c] sm:$0xf0] }
 0x275   :  { %15434 = vst [vmem:[#allocation136_spill] sm:$0xff] %v9903_v58  ;;  %3107 = vmatmul.bf16.gmra.mxu3 %v15438_v19  ;;  %3349 = vmatpush.bf16.msrb.mxu2 %v8155_v41  ;;  %v7962_v19 = vld [vmem:[#allocation5 + $0x248] sm:$0xf] }
 0x276   :  { %3171 = vmatpush.bf16.msrb.mxu0 %v7771_v7  ;;  %3438 = vmatpush.bf16.msrb.mxu3 %v8347_v26  ;;  %v15443_v7 = vld [vmem:[#allocation90_spill] sm:$0xff]  ;;  %v15444_v26 = vld [vmem:[#allocation91_spill] sm:$0xff] }
 0x277   :  { %v2703_v56 = vpop.f32.mrf.mxu2  ;;  %v2527_v48 = vpop.f32.mrf.mxu0 }
 0x278   :  { %v2704_v6 = vadd.f32 %v2703_v56, %v9686_v54  ;;  %v2792_v1 = vpop.f32.mrf.mxu3  ;;  %v2528_v58 = vadd.f32 %v2527_v48, %v9637_v27  ;;  %v2616_v60 = vpop.f32.mrf.mxu1  ;;  %v7963_v56 = vor.u32 %v8892_v40, %v7962_v19 }
 0x27a   :  { %v9911_v49 = vadd.f32 %v2792_v1, %v2704_v6  ;;  %v9913_v59 = vadd.f32 %v2616_v60, %v2528_v58  ;;  %3260 = vmatpush.bf16.msrb.mxu1 %v7963_v56  ;;  %v15441_v1 = vld [vmem:[#allocation34_spill] sm:$0xff]  ;;  %v15442_v60 = vld [vmem:[#allocation35_spill] sm:$0xff] }
 0x27c   :  { %15439 = vst [vmem:[#allocation137_spill] sm:$0xff] %v9913_v59  ;;  %v15449_v59 = vld [vmem:[#allocation38_spill] sm:$0xff] }
 0x27f   :  { %v2705_v62 = vpop.f32.mrf.mxu2  ;;  %v2530_v46 = vpop.f32.mrf.mxu0 }
 0x280   :  { %v2706_v42 = vadd.f32 %v2705_v62, %v9686_v54  ;;  %v2794_v20 = vpop.f32.mrf.mxu3  ;;  %v2531_v27 = vadd.f32 %v2530_v46, %v9644_v12  ;;  %v2619_v35 = vpop.f32.mrf.mxu1 }
 0x282   :  { %v9917_v48 = vadd.f32 %v2794_v20, %v2706_v42  ;;  %v9919_v6 = vadd.f32 %v2619_v35, %v2531_v27  ;;  %2845 = vmatmul.bf16.gmra.mxu0 %v15441_v1 }
 0x283   :  { %2934 = vmatmul.bf16.gmra.mxu1 %v15442_v60 }
 0x284   :  { %15440 = vst [vmem:[#allocation138_spill] sm:$0xff] %v9919_v6  ;;  %3023 = vmatmul.bf16.gmra.mxu2 %v15443_v7 }
 0x285   :  { %3112 = vmatmul.bf16.gmra.mxu3 %v15444_v26  ;;  %v8322_v26 = vld [vmem:[#allocation5 + $0x518] sm:$0xf] }
 0x287   :  { %v2708_v58 = vpop.f32.mrf.mxu2  ;;  %v2532_v41 = vpop.f32.mrf.mxu0 }
 0x288   :  { %v2709_v40 = vadd.f32 %v2708_v58, %v9686_v54  ;;  %v2797_v19 = vpop.f32.mrf.mxu3  ;;  %v2533_v12 = vadd.f32 %v2532_v41, %v15445_v43  ;;  %v2621_v46 = vpop.f32.mrf.mxu1  ;;  %v15450_v41 = vld [vmem:[#allocation39_spill] sm:$0xff]  ;;  %v8130_v43 = vld [vmem:[#allocation5 + $0x398] sm:$0xf] }
 0x28a   :  { %v9927_v20 = vadd.f32 %v2797_v19, %v2709_v40  ;;  %v9929_v3 = vadd.f32 %v2621_v46, %v2533_v12  ;;  %v15451_v40 = vld [vmem:[#allocation92_spill] sm:$0xff]  ;;  %v15452_v19 = vld [vmem:[#allocation93_spill] sm:$0xff]  ;;  %v8934_v12 = vld [vmem:[#allocation5 + $0x3ac] sm:$0xf0] }
 0x28b   :  { %v8131_v46 = vor.u32 %v8934_v12, %v8130_v43 }
 0x28c   :  { %15446 = vst [vmem:[#allocation94_spill] sm:$0xff] %v9929_v3  ;;  %v8838_v3 = vld [vmem:[#allocation5 + $0xac] sm:$0xf0] }
 0x28d   :  { %3350 = vmatpush.bf16.msrb.mxu2 %v8131_v46 }
 0x28f   :  { %v2710_v34 = vpop.f32.mrf.mxu2  ;;  %v2535_v42 = vpop.f32.mrf.mxu0 }
 0x290   :  { %v2711_v56 = vadd.f32 %v2710_v34, %v9686_v54  ;;  %v2799_v62 = vpop.f32.mrf.mxu3  ;;  %v2536_v27 = vadd.f32 %v2535_v42, %v9658_v33  ;;  %v2624_v35 = vpop.f32.mrf.mxu1  ;;  %v7746_v34 = vld [vmem:[#allocation5 + $0x98] sm:$0xf] }
 0x291   :  { %v7747_v42 = vor.u32 %v8838_v3, %v7746_v34 }
 0x292   :  { %v9933_v6 = vadd.f32 %v2799_v62, %v2711_v56  ;;  %v9935_v58 = vadd.f32 %v2624_v35, %v2536_v27  ;;  %2850 = vmatmul.bf16.gmra.mxu0 %v15449_v59  ;;  %v8982_v56 = vld [vmem:[#allocation5 + $0x52c] sm:$0xf0]  ;;  %v7938_v59 = vld [vmem:[#allocation5 + $0x218] sm:$0xf] }
 0x293   :  { %2939 = vmatmul.bf16.gmra.mxu1 %v15450_v41  ;;  %3172 = vmatpush.bf16.msrb.mxu0 %v7747_v42  ;;  %v15455_v42 = vld [vmem:[#allocation42_spill] sm:$0xff] }
 0x294   :  { %15447 = vst [vmem:[#allocation139_spill] sm:$0xff] %v9933_v6  ;;  %3028 = vmatmul.bf16.gmra.mxu2 %v15451_v40 }
 0x295   :  { %15448 = vst [vmem:[#allocation140_spill] sm:$0xff] %v9935_v58  ;;  %3117 = vmatmul.bf16.gmra.mxu3 %v15452_v19  ;;  %v8323_v58 = vor.u32 %v8982_v56, %v8322_v26 }
 0x297   :  { %v2713_v33 = vpop.f32.mrf.mxu2  ;;  %v2537_v35 = vpop.f32.mrf.mxu0  ;;  %3439 = vmatpush.bf16.msrb.mxu3 %v8323_v58 }
 0x298   :  { %v2714_v62 = vadd.f32 %v2713_v33, %v9686_v54  ;;  %v2802_v27 = vpop.f32.mrf.mxu3  ;;  %v2538_v7 = vadd.f32 %v2537_v35, %v9665_v22  ;;  %v2626_v40 = vpop.f32.mrf.mxu1  ;;  %v8886_v33 = vld [vmem:[#allocation5 + $0x22c] sm:$0xf0] }
 0x299   :  { %v7939_v26 = vor.u32 %v8886_v33, %v7938_v59 }
 0x29a   :  { %v9943_v19 = vadd.f32 %v2802_v27, %v2714_v62  ;;  %v9945_v43 = vadd.f32 %v2626_v40, %v2538_v7  ;;  %v15456_v7 = vld [vmem:[#allocation43_spill] sm:$0xff] }
 0x29b   :  { %3261 = vmatpush.bf16.msrb.mxu1 %v7939_v26 }
 0x29c   :  { %15453 = vst [vmem:[#allocation141_spill] sm:$0xff] %v9945_v43  ;;  %v15460_v43 = vld [vmem:[#allocation47_spill] sm:$0xff] }
 0x29f   :  { %v2715_v12 = vpop.f32.mrf.mxu2  ;;  %v2540_v34 = vpop.f32.mrf.mxu0 }
 0x2a0   :  { %v2716_v41 = vadd.f32 %v2715_v12, %v9686_v54  ;;  %v2804_v3 = vpop.f32.mrf.mxu3  ;;  %v2541_v6 = vadd.f32 %v2540_v34, %v9672_v11  ;;  %v2629_v46 = vpop.f32.mrf.mxu1 }
 0x2a2   :  { %v9949_v56 = vadd.f32 %v2804_v3, %v2716_v41  ;;  %v9951_v22 = vadd.f32 %v2629_v46, %v2541_v6  ;;  %2855 = vmatmul.bf16.gmra.mxu0 %v15455_v42 }
 0x2a3   :  { %2944 = vmatmul.bf16.gmra.mxu1 %v15456_v7  ;;  %v8880_v7 = vld [vmem:[#allocation5 + $0x1fc] sm:$0xf0] }
 0x2a4   :  { %15454 = vst [vmem:[#allocation142_spill] sm:$0xff] %v9951_v22  ;;  %3033 = vmatmul.bf16.gmra.mxu2 %v9660_v14  ;;  %v15459_v22 = vld [vmem:[#allocation46_spill] sm:$0xff] }
 0x2a5   :  { %3122 = vmatmul.bf16.gmra.mxu3 %v9662_v10 }
 0x2a7   :  { %v2718_v58 = vpop.f32.mrf.mxu2  ;;  %v2542_v11 = vpop.f32.mrf.mxu0 }
 0x2a8   :  { %v2719_v40 = vadd.f32 %v2718_v58, %v9686_v54  ;;  %v2807_v62 = vpop.f32.mrf.mxu3  ;;  %v2543_v59 = vadd.f32 %v2542_v11, %v9679_v45  ;;  %v2631_v41 = vpop.f32.mrf.mxu1  ;;  %v15461_v45 = vld [vmem:[#allocation97_spill] sm:$0xff] }
 0x2aa   :  { %v9959_v27 = vadd.f32 %v2807_v62, %v2719_v40  ;;  %v9961_v6 = vadd.f32 %v2631_v41, %v2543_v59  ;;  %v15462_v40 = vld [vmem:[#allocation98_spill] sm:$0xff] }
 0x2ab   :  { %v8106_v41 = vld [vmem:[#allocation5 + $0x368] sm:$0xf] }
 0x2ac   :  { %15457 = vst [vmem:[#allocation143_spill] sm:$0xff] %v9961_v6  ;;  %v7722_v6 = vld [vmem:[#allocation5 + $0x68] sm:$0xf] }
 0x2af   :  { %v2720_v35 = vpop.f32.mrf.mxu2  ;;  %v2821_v34 = vpop.f32.mrf.mxu0 }
 0x2b0   :  { %v2721_v12 = vadd.f32 %v2720_v35, %v9686_v54  ;;  %v2809_v3 = vpop.f32.mrf.mxu3  ;;  %v2822_v33 = vadd.f32 %v2821_v34, %v9691_v23  ;;  %v2910_v46 = vpop.f32.mrf.mxu1  ;;  %v8928_v35 = vld [vmem:[#allocation5 + $0x37c] sm:$0xf0] }
 0x2b1   :  { %v8832_v34 = vld [vmem:[#allocation5 + $0x7c] sm:$0xf0] }
 0x2b2   :  { %v9965_v26 = vadd.f32 %v2809_v3, %v2721_v12  ;;  %v2911_v58 = vadd.f32 %v2910_v46, %v2822_v33  ;;  %2860 = vmatmul.bf16.gmra.mxu0 %v15459_v22  ;;  %v8107_v3 = vor.u32 %v8928_v35, %v8106_v41  ;;  %v8298_v33 = vld [vmem:[#allocation5 + $0x4e8] sm:$0xf]  ;;  %v8976_v46 = vld [vmem:[#allocation5 + $0x4fc] sm:$0xf0]  ;;  %v7723_v14 = vor.u32 %v8832_v34, %v7722_v6  ;;  %v15466_v6 = vld [vmem:[#allocation51_spill] sm:$0xff] }
 0x2b3   :  { %2949 = vmatmul.bf16.gmra.mxu1 %v15460_v43 }
 0x2b4   :  { %15458 = vst [vmem:[#allocation144_spill] sm:$0xff] %v9965_v26  ;;  %3038 = vmatmul.bf16.gmra.mxu2 %v15461_v45  ;;  %v8299_v45 = vor.u32 %v8976_v46, %v8298_v33  ;;  %3173 = vmatpush.bf16.msrb.mxu0 %v7723_v14  ;;  %v7914_v26 = vld [vmem:[#allocation5 + $0x1e8] sm:$0xf] }
 0x2b5   :  { %3127 = vmatmul.bf16.gmra.mxu3 %v15462_v40  ;;  %3351 = vmatpush.bf16.msrb.mxu2 %v8107_v3  ;;  %v7915_v41 = vor.u32 %v8880_v7, %v7914_v26 }
 0x2b6   :  { %3440 = vmatpush.bf16.msrb.mxu3 %v8299_v45 }
 0x2b7   :  { %v2999_v62 = vpop.f32.mrf.mxu2  ;;  %v2823_v54 = vpop.f32.mrf.mxu0  ;;  %3262 = vmatpush.bf16.msrb.mxu1 %v7915_v41 }
 0x2b8   :  { %v3000_v11 = vadd.f32 %v2999_v62, %v2911_v58  ;;  %v3088_v59 = vpop.f32.mrf.mxu3  ;;  %v2824_v23 = vadd.f32 %v2823_v54, %v9701_v47  ;;  %v2912_v12 = vpop.f32.mrf.mxu1 }
 0x2ba   :  { %v9972_v10 = vadd.f32 %v3088_v59, %v3000_v11  ;;  %v2913_v43 = vadd.f32 %v2912_v12, %v2824_v23  ;;  %v15465_v59 = vld [vmem:[#allocation50_spill] sm:$0xff] }
 0x2bc   :  { %15463 = vst [vmem:[#allocation145_spill] sm:$0xff] %v9972_v10  ;;  %v8874_v10 = vld [vmem:[#allocation5 + $0x1cc] sm:$0xf0] }
 0x2bf   :  { %v3001_v58 = vpop.f32.mrf.mxu2  ;;  %v2826_v22 = vpop.f32.mrf.mxu0 }
 0x2c0   :  { %v3002_v62 = vadd.f32 %v3001_v58, %v2913_v43  ;;  %v3090_v40 = vpop.f32.mrf.mxu3  ;;  %v2827_v47 = vadd.f32 %v2826_v22, %v9711_v32  ;;  %v2915_v54 = vpop.f32.mrf.mxu1 }
 0x2c2   :  { %v9975_v35 = vadd.f32 %v3090_v40, %v3002_v62  ;;  %v2916_v11 = vadd.f32 %v2915_v54, %v2827_v47  ;;  %2865 = vmatmul.bf16.gmra.mxu0 %v15465_v59  ;;  %v15469_v47 = vld [vmem:[#allocation54_spill] sm:$0xff]  ;;  %v15470_v54 = vld [vmem:[#allocation55_spill] sm:$0xff] }
 0x2c3   :  { %2954 = vmatmul.bf16.gmra.mxu1 %v15466_v6 }
 0x2c4   :  { %15464 = vst [vmem:[#allocation146_spill] sm:$0xff] %v9975_v35  ;;  %3043 = vmatmul.bf16.gmra.mxu2 %v9695_v18  ;;  %v7890_v35 = vld [vmem:[#allocation5 + $0x1b8] sm:$0xf] }
 0x2c5   :  { %3132 = vmatmul.bf16.gmra.mxu3 %v9698_v53 }
 0x2c7   :  { %v3004_v14 = vpop.f32.mrf.mxu2  ;;  %v2828_v23 = vpop.f32.mrf.mxu0 }
 0x2c8   :  { %v3005_v43 = vadd.f32 %v3004_v14, %v2916_v11  ;;  %v3093_v45 = vpop.f32.mrf.mxu3  ;;  %v2829_v32 = vadd.f32 %v2828_v23, %v9721_v57  ;;  %v2917_v22 = vpop.f32.mrf.mxu1  ;;  %v7698_v23 = vld [vmem:[#allocation5 + $0x38] sm:$0xf] }
 0x2ca   :  { %v9982_v7 = vadd.f32 %v3093_v45, %v3005_v43  ;;  %v2918_v26 = vadd.f32 %v2917_v22, %v2829_v32  ;;  %v8082_v43 = vld [vmem:[#allocation5 + $0x338] sm:$0xf]  ;;  %v8922_v45 = vld [vmem:[#allocation5 + $0x34c] sm:$0xf0] }
 0x2cb   :  { %v8083_v22 = vor.u32 %v8922_v45, %v8082_v43  ;;  %v7891_v43 = vor.u32 %v8874_v10, %v7890_v35 }
 0x2cc   :  { %15467 = vst [vmem:[#allocation147_spill] sm:$0xff] %v9982_v7 }
 0x2cd   :  { %3352 = vmatpush.bf16.msrb.mxu2 %v8083_v22  ;;  %3263 = vmatpush.bf16.msrb.mxu1 %v7891_v43 }
 0x2cf   :  { %v3006_v40 = vpop.f32.mrf.mxu2  ;;  %v2831_v34 = vpop.f32.mrf.mxu0 }
 0x2d0   :  { %v3007_v12 = vadd.f32 %v3006_v40, %v2918_v26  ;;  %v3095_v3 = vpop.f32.mrf.mxu3  ;;  %v2832_v33 = vadd.f32 %v2831_v34, %v9731_v37  ;;  %v2920_v46 = vpop.f32.mrf.mxu1  ;;  %v8826_v26 = vld [vmem:[#allocation5 + $0x4c] sm:$0xf0]  ;;  %v8274_v40 = vld [vmem:[#allocation5 + $0x4b8] sm:$0xf] }
 0x2d1   :  { %v7699_v34 = vor.u32 %v8826_v26, %v7698_v23  ;;  %v15474_v23 = vld [vmem:[#allocation59_spill] sm:$0xff] }
 0x2d2   :  { %v9985_v58 = vadd.f32 %v3095_v3, %v3007_v12  ;;  %v2921_v62 = vadd.f32 %v2920_v46, %v2832_v33  ;;  %2870 = vmatmul.bf16.gmra.mxu0 %v15469_v47  ;;  %v8970_v12 = vld [vmem:[#allocation5 + $0x4cc] sm:$0xf0] }
 0x2d3   :  { %2959 = vmatmul.bf16.gmra.mxu1 %v15470_v54  ;;  %v8275_v33 = vor.u32 %v8970_v12, %v8274_v40  ;;  %3174 = vmatpush.bf16.msrb.mxu0 %v7699_v34 }
 0x2d4   :  { %15468 = vst [vmem:[#allocation148_spill] sm:$0xff] %v9985_v58  ;;  %3048 = vmatmul.bf16.gmra.mxu2 %v9715_v0 }
 0x2d5   :  { %3137 = vmatmul.bf16.gmra.mxu3 %v9718_v13 }
 0x2d6   :  { %3441 = vmatpush.bf16.msrb.mxu3 %v8275_v33 }
 0x2d7   :  { %v3009_v57 = vpop.f32.mrf.mxu2  ;;  %v2833_v14 = vpop.f32.mrf.mxu0 }
 0x2d8   :  { %v3010_v41 = vadd.f32 %v3009_v57, %v2921_v62  ;;  %v3098_v11 = vpop.f32.mrf.mxu3  ;;  %v2834_v37 = vadd.f32 %v2833_v14, %v9741_v30  ;;  %v2922_v32 = vpop.f32.mrf.mxu1 }
 0x2da   :  { %v9992_v3 = vadd.f32 %v3098_v11, %v3010_v41  ;;  %v2923_v46 = vadd.f32 %v2922_v32, %v2834_v37  ;;  %v15473_v11 = vld [vmem:[#allocation58_spill] sm:$0xff] }
 0x2dc   :  { %15471 = vst [vmem:[#allocation149_spill] sm:$0xff] %v9992_v3  ;;  %v8868_v3 = vld [vmem:[#allocation5 + $0x19c] sm:$0xf0] }
 0x2df   :  { %v3011_v62 = vpop.f32.mrf.mxu2  ;;  %v2836_v7 = vpop.f32.mrf.mxu0 }
 0x2e0   :  { %v3012_v57 = vadd.f32 %v3011_v62, %v2923_v46  ;;  %v3100_v58 = vpop.f32.mrf.mxu3  ;;  %v2837_v30 = vadd.f32 %v2836_v7, %v9751_v63  ;;  %v2925_v14 = vpop.f32.mrf.mxu1 }
 0x2e2   :  { %v9995_v45 = vadd.f32 %v3100_v58, %v3012_v57  ;;  %v2926_v41 = vadd.f32 %v2925_v14, %v2837_v30  ;;  %2875 = vmatmul.bf16.gmra.mxu0 %v15473_v11  ;;  %v15477_v30 = vld [vmem:[#allocation62_spill] sm:$0xff]  ;;  %v15478_v14 = vld [vmem:[#allocation63_spill] sm:$0xff] }
 0x2e3   :  { %2964 = vmatmul.bf16.gmra.mxu1 %v15474_v23 }
 0x2e4   :  { %15472 = vst [vmem:[#allocation150_spill] sm:$0xff] %v9995_v45  ;;  %3053 = vmatmul.bf16.gmra.mxu2 %v9735_v31  ;;  %v7866_v45 = vld [vmem:[#allocation5 + $0x188] sm:$0xf] }
 0x2e5   :  { %3142 = vmatmul.bf16.gmra.mxu3 %v9738_v52 }
 0x2e7   :  { %v3014_v37 = vpop.f32.mrf.mxu2  ;;  %v2838_v26 = vpop.f32.mrf.mxu0 }
 0x2e8   :  { %v3015_v32 = vadd.f32 %v3014_v37, %v2926_v41  ;;  %v3103_v22 = vpop.f32.mrf.mxu3  ;;  %v2839_v63 = vadd.f32 %v2838_v26, %v9761_v8  ;;  %v2927_v7 = vpop.f32.mrf.mxu1  ;;  %v7674_v26 = vld [vmem:[#allocation5 + $0x8] sm:$0xf] }
 0x2ea   :  { %v10002_v10 = vadd.f32 %v3103_v22, %v3015_v32  ;;  %v2928_v35 = vadd.f32 %v2927_v7, %v2839_v63  ;;  %v8058_v32 = vld [vmem:[#allocation5 + $0x308] sm:$0xf]  ;;  %v8916_v22 = vld [vmem:[#allocation5 + $0x31c] sm:$0xf0] }
 0x2eb   :  { %v8059_v7 = vor.u32 %v8916_v22, %v8058_v32  ;;  %v7867_v32 = vor.u32 %v8868_v3, %v7866_v45 }
 0x2ec   :  { %15475 = vst [vmem:[#allocation151_spill] sm:$0xff] %v10002_v10 }
 0x2ed   :  { %3353 = vmatpush.bf16.msrb.mxu2 %v8059_v7  ;;  %3264 = vmatpush.bf16.msrb.mxu1 %v7867_v32 }
 0x2ef   :  { %v3016_v58 = vpop.f32.mrf.mxu2  ;;  %v2841_v34 = vpop.f32.mrf.mxu0 }
 0x2f0   :  { %v3017_v40 = vadd.f32 %v3016_v58, %v2928_v35  ;;  %v3105_v12 = vpop.f32.mrf.mxu3  ;;  %v2842_v33 = vadd.f32 %v2841_v34, %v9771_v36  ;;  %v2930_v46 = vpop.f32.mrf.mxu1  ;;  %v8820_v35 = vld [vmem:[#allocation5 + $0x1c] sm:$0xf0]  ;;  %v8250_v58 = vld [vmem:[#allocation5 + $0x488] sm:$0xf] }
 0x2f1   :  { %v7675_v34 = vor.u32 %v8820_v35, %v7674_v26  ;;  %v15482_v26 = vld [vmem:[#allocation67_spill] sm:$0xff] }
 0x2f2   :  { %v10005_v62 = vadd.f32 %v3105_v12, %v3017_v40  ;;  %v2931_v57 = vadd.f32 %v2930_v46, %v2842_v33  ;;  %2880 = vmatmul.bf16.gmra.mxu0 %v15477_v30  ;;  %v8964_v40 = vld [vmem:[#allocation5 + $0x49c] sm:$0xf0] }
 0x2f3   :  { %2969 = vmatmul.bf16.gmra.mxu1 %v15478_v14  ;;  %v8251_v33 = vor.u32 %v8964_v40, %v8250_v58  ;;  %3175 = vmatpush.bf16.msrb.mxu0 %v7675_v34 }
 0x2f4   :  { %15476 = vst [vmem:[#allocation152_spill] sm:$0xff] %v10005_v62  ;;  %3058 = vmatmul.bf16.gmra.mxu2 %v9755_v15 }
 0x2f5   :  { %3147 = vmatmul.bf16.gmra.mxu3 %v9758_v50  ;;  %v9066_v50 = vld [vmem:[#allocation5 + $0x7cc] sm:$0xf0] }
 0x2f6   :  { %3442 = vmatpush.bf16.msrb.mxu3 %v8251_v33 }
 0x2f7   :  { %v3019_v8 = vpop.f32.mrf.mxu2  ;;  %v2843_v37 = vpop.f32.mrf.mxu0 }
 0x2f8   :  { %v3020_v43 = vadd.f32 %v3019_v8, %v2931_v57  ;;  %v3108_v41 = vpop.f32.mrf.mxu3  ;;  %v2844_v36 = vadd.f32 %v2843_v37, %v9781_v44  ;;  %v2932_v63 = vpop.f32.mrf.mxu1 }
 0x2fa   :  { %v10012_v12 = vadd.f32 %v3108_v41, %v3020_v43  ;;  %v2933_v46 = vadd.f32 %v2932_v63, %v2844_v36  ;;  %v15481_v41 = vld [vmem:[#allocation66_spill] sm:$0xff] }
 0x2fc   :  { %15479 = vst [vmem:[#allocation153_spill] sm:$0xff] %v10012_v12  ;;  %v8802_v12 = vld [vmem:[#allocation5 + $0x8d8] sm:$0xf] }
 0x2ff   :  { %v3021_v57 = vpop.f32.mrf.mxu2  ;;  %v2846_v10 = vpop.f32.mrf.mxu0 }
 0x300   :  { %v3022_v8 = vadd.f32 %v3021_v57, %v2933_v46  ;;  %v3110_v62 = vpop.f32.mrf.mxu3  ;;  %v2847_v44 = vadd.f32 %v2846_v10, %v9791_v38  ;;  %v2935_v37 = vpop.f32.mrf.mxu1 }
 0x302   :  { %v10015_v22 = vadd.f32 %v3110_v62, %v3022_v8  ;;  %v2936_v43 = vadd.f32 %v2935_v37, %v2847_v44  ;;  %2885 = vmatmul.bf16.gmra.mxu0 %v15481_v41  ;;  %v15485_v44 = vld [vmem:[#allocation70_spill] sm:$0xff]  ;;  %v15486_v37 = vld [vmem:[#allocation71_spill] sm:$0xff] }
 0x303   :  { %2974 = vmatmul.bf16.gmra.mxu1 %v15482_v26 }
 0x304   :  { %15480 = vst [vmem:[#allocation154_spill] sm:$0xff] %v10015_v22  ;;  %3063 = vmatmul.bf16.gmra.mxu2 %v9775_v61 }
 0x305   :  { %3152 = vmatmul.bf16.gmra.mxu3 %v9778_v24 }
 0x307   :  { %v3024_v36 = vpop.f32.mrf.mxu2  ;;  %v2848_v35 = vpop.f32.mrf.mxu0 }
 0x308   :  { %v3025_v63 = vadd.f32 %v3024_v36, %v2936_v43  ;;  %v3113_v7 = vpop.f32.mrf.mxu3  ;;  %v2849_v38 = vadd.f32 %v2848_v35, %v9801_v29  ;;  %v2937_v10 = vpop.f32.mrf.mxu1  ;;  %v15487_v29 = vld [vmem:[#allocation122_spill] sm:$0xff]  ;;  %v7844_v35 = vld [vmem:[#allocation5 + $0x170] sm:$0xf0] }
 0x30a   :  { %v10022_v3 = vadd.f32 %v3113_v7, %v3025_v63  ;;  %v2938_v45 = vadd.f32 %v2937_v10, %v2849_v38  ;;  %v8859_v7 = vld [vmem:[#allocation5 + $0x15c] sm:$0xf]  ;;  %v8610_v38 = vld [vmem:[#allocation5 + $0x758] sm:$0xf] }
 0x30c   :  { %15483 = vst [vmem:[#allocation155_spill] sm:$0xff] %v10022_v3 }
 0x30f   :  { %v3026_v62 = vpop.f32.mrf.mxu2  ;;  %v2851_v34 = vpop.f32.mrf.mxu0 }
 0x310   :  { %v3027_v58 = vadd.f32 %v3026_v62, %v2938_v45  ;;  %v3115_v40 = vpop.f32.mrf.mxu3  ;;  %v2852_v33 = vadd.f32 %v2851_v34, %v9811_v28  ;;  %v2940_v46 = vpop.f32.mrf.mxu1  ;;  %v7847_v45 = vor.u32 %v8859_v7, %v7844_v35  ;;  %v9054_v62 = vld [vmem:[#allocation5 + $0x76c] sm:$0xf0] }
 0x312   :  { %v10025_v57 = vadd.f32 %v3115_v40, %v3027_v58  ;;  %v2941_v8 = vadd.f32 %v2940_v46, %v2852_v33  ;;  %2890 = vmatmul.bf16.gmra.mxu0 %v15485_v44  ;;  %v8907_v58 = vld [vmem:[#allocation5 + $0x2dc] sm:$0xf]  ;;  %v8036_v40 = vld [vmem:[#allocation5 + $0x2f0] sm:$0xf0]  ;;  %v8611_v33 = vor.u32 %v9054_v62, %v8610_v38  ;;  %3702 = vmatpush.bf16.msra.mxu2 %v7847_v45 }
 0x313   :  { %2979 = vmatmul.bf16.gmra.mxu1 %v15486_v37  ;;  %v8039_v46 = vor.u32 %v8907_v58, %v8036_v40  ;;  %v15491_v38 = vld [vmem:[#allocation75_spill] sm:$0xff] }
 0x314   :  { %15484 = vst [vmem:[#allocation156_spill] sm:$0xff] %v10025_v57  ;;  %3068 = vmatmul.bf16.gmra.mxu2 %v9795_v39  ;;  %3524 = vmatpush.bf16.msra.mxu0 %v8611_v33  ;;  %v15494_v40 = vld [vmem:[#allocation127_spill] sm:$0xff]  ;;  %v9096_v39 = vld [vmem:[#allocation5 + $0x8bc] sm:$0xf0] }
 0x315   :  { %3157 = vmatmul.bf16.gmra.mxu3 %v15487_v29  ;;  %v9102_v29 = vld [vmem:[#allocation5 + $0x8ec] sm:$0xf0] }
 0x316   :  { %3791 = vmatpush.bf16.msra.mxu3 %v8039_v46  ;;  %v8803_v7 = vor.u32 %v9102_v29, %v8802_v12 }
 0x317   :  { %v3029_v32 = vpop.f32.mrf.mxu2  ;;  %v2853_v63 = vpop.f32.mrf.mxu0 }
 0x318   :  { %v3030_v43 = vadd.f32 %v3029_v32, %v2941_v8  ;;  %v3118_v36 = vpop.f32.mrf.mxu3  ;;  %v2854_v28 = vadd.f32 %v2853_v63, %v9821_v16  ;;  %v2942_v10 = vpop.f32.mrf.mxu1  ;;  %3613 = vmatpush.bf16.msra.mxu1 %v8803_v7 }
 0x31a   :  { %v10032_v34 = vadd.f32 %v3118_v36, %v3030_v43  ;;  %v2943_v57 = vadd.f32 %v2942_v10, %v2854_v28  ;;  %v15490_v36 = vld [vmem:[#allocation74_spill] sm:$0xff]  ;;  %v15492_v28 = vld [vmem:[#allocation125_spill] sm:$0xff] }
 0x31b   :  { %v15493_v10 = vld [vmem:[#allocation126_spill] sm:$0xff] }
 0x31c   :  { %15488 = vst [vmem:[#allocation157_spill] sm:$0xff] %v10032_v34 }
 0x31f   :  { %v3031_v8 = vpop.f32.mrf.mxu2  ;;  %v2856_v22 = vpop.f32.mrf.mxu0 }
 0x320   :  { %v3032_v32 = vadd.f32 %v3031_v8, %v2943_v57  ;;  %v3120_v3 = vpop.f32.mrf.mxu3  ;;  %v2857_v16 = vadd.f32 %v2856_v22, %v9831_v9  ;;  %v2945_v63 = vpop.f32.mrf.mxu1 }
 0x322   :  { %v10035_v35 = vadd.f32 %v3120_v3, %v3032_v32  ;;  %v2946_v43 = vadd.f32 %v2945_v63, %v2857_v16  ;;  %2895 = vmatmul.bf16.gmra.mxu0 %v15490_v36 }
 0x323   :  { %2984 = vmatmul.bf16.gmra.mxu1 %v15491_v38 }
 0x324   :  { %15489 = vst [vmem:[#allocation158_spill] sm:$0xff] %v10035_v35  ;;  %3073 = vmatmul.bf16.gmra.mxu2 %v15492_v28  ;;  %v15497_v35 = vld [vmem:[#allocation12_spill] sm:$0xff]  ;;  %v8778_v28 = vld [vmem:[#allocation5 + $0x8a8] sm:$0xf] }
 0x325   :  { %3162 = vmatmul.bf16.gmra.mxu3 %v15493_v10 }
 0x327   :  { %v3034_v57 = vpop.f32.mrf.mxu2  ;;  %v2858_v58 = vpop.f32.mrf.mxu0 }
 0x328   :  { %v3035_v45 = vadd.f32 %v3034_v57, %v2946_v43  ;;  %v3123_v62 = vpop.f32.mrf.mxu3  ;;  %v2859_v9 = vadd.f32 %v2858_v58, %v15494_v40  ;;  %v2947_v22 = vpop.f32.mrf.mxu1  ;;  %v15498_v43 = vld [vmem:[#allocation13_spill] sm:$0xff]  ;;  %v15499_v57 = vld [vmem:[#allocation14_spill] sm:$0xff]  ;;  %v15500_v58 = vld [vmem:[#allocation15_spill] sm:$0xff] }
 0x32a   :  { %v10042_v12 = vadd.f32 %v3123_v62, %v3035_v45  ;;  %v2948_v3 = vadd.f32 %v2947_v22, %v2859_v9  ;;  %v8853_v22 = vld [vmem:[#allocation5 + $0x12c] sm:$0xf] }
 0x32c   :  { %15495 = vst [vmem:[#allocation127_spill] sm:$0xff] %v10042_v12 }
 0x32f   :  { %v3036_v29 = vpop.f32.mrf.mxu2  ;;  %v2861_v8 = vpop.f32.mrf.mxu0 }
 0x330   :  { %v3037_v33 = vadd.f32 %v3036_v29, %v2948_v3  ;;  %v3125_v46 = vpop.f32.mrf.mxu3  ;;  %v2862_v32 = vadd.f32 %v2861_v8, %v9847_v21  ;;  %v2950_v16 = vpop.f32.mrf.mxu1  ;;  %v7820_v3 = vld [vmem:[#allocation5 + $0x140] sm:$0xf0]  ;;  %v8586_v29 = vld [vmem:[#allocation5 + $0x728] sm:$0xf]  ;;  %v9048_v8 = vld [vmem:[#allocation5 + $0x73c] sm:$0xf0] }
 0x331   :  { %v8587_v12 = vor.u32 %v9048_v8, %v8586_v29  ;;  %v15504_v29 = vld [vmem:[#allocation17_spill] sm:$0xff] }
 0x332   :  { %v10045_v63 = vadd.f32 %v3125_v46, %v3037_v33  ;;  %v2951_v7 = vadd.f32 %v2950_v16, %v2862_v32  ;;  %3176 = vmatmul.bf16.vlgmr.msrb.gmra.mxu0 %v15497_v35  ;;  %v7823_v46 = vor.u32 %v8853_v22, %v7820_v3  ;;  %v8901_v32 = vld [vmem:[#allocation5 + $0x2ac] sm:$0xf]  ;;  %v8012_v16 = vld [vmem:[#allocation5 + $0x2c0] sm:$0xf0]  ;;  %v8779_v22 = vor.u32 %v9096_v39, %v8778_v28 }
 0x333   :  { %3265 = vmatmul.bf16.vlgmr.msrb.gmra.mxu1 %v15498_v43  ;;  %v8015_v34 = vor.u32 %v8901_v32, %v8012_v16  ;;  %3525 = vmatpush.bf16.msra.mxu0 %v8587_v12 }
 0x334   :  { %15496 = vst [vmem:[#allocation159_spill] sm:$0xff] %v10045_v63  ;;  %3354 = vmatmul.bf16.vlgmr.msrb.gmra.mxu2 %v15499_v57  ;;  %3614 = vmatpush.bf16.msra.mxu1 %v8779_v22  ;;  %v15509_v22 = vld [vmem:[#allocation20_spill] sm:$0xff] }
 0x335   :  { %3443 = vmatmul.bf16.vlgmr.msrb.gmra.mxu3 %v15500_v58  ;;  %3703 = vmatpush.bf16.msra.mxu2 %v7823_v46  ;;  %v15506_v46 = vld [vmem:[#allocation131_spill] sm:$0xff] }
 0x336   :  { %3792 = vmatpush.bf16.msra.mxu3 %v8015_v34  ;;  %v15505_v34 = vld [vmem:[#allocation19_spill] sm:$0xff] }
 0x337   :  { %v3039_v45 = vpop.f32.mrf.mxu2  ;;  %v2863_v9 = vpop.f32.mrf.mxu0 }
 0x338   :  { %v3040_v62 = vadd.f32 %v3039_v45, %v2951_v7  ;;  %v3128_v40 = vpop.f32.mrf.mxu3  ;;  %v2864_v21 = vadd.f32 %v2863_v9, %v9853_v55  ;;  %v2952_v33 = vpop.f32.mrf.mxu1 }
 0x33a   :  { %v10052_v63 = vadd.f32 %v3128_v40, %v3040_v62  ;;  %v2953_v57 = vadd.f32 %v2952_v33, %v2864_v21  ;;  %v15503_v40 = vld [vmem:[#allocation16_spill] sm:$0xff] }
 0x33c   :  { %15501 = vst [vmem:[#allocation160_spill] sm:$0xff] %v10052_v63 }
 0x33f   :  { %v3041_v7 = vpop.f32.mrf.mxu2  ;;  %v2866_v10 = vpop.f32.mrf.mxu0 }
 0x340   :  { %v3042_v45 = vadd.f32 %v3041_v7, %v2953_v57  ;;  %v3130_v58 = vpop.f32.mrf.mxu3  ;;  %v2867_v55 = vadd.f32 %v2866_v10, %v9863_v17  ;;  %v2955_v9 = vpop.f32.mrf.mxu1 }
 0x342   :  { %v10055_v3 = vadd.f32 %v3130_v58, %v3042_v45  ;;  %v2956_v62 = vadd.f32 %v2955_v9, %v2867_v55  ;;  %3181 = vmatmul.bf16.gmra.mxu0 %v15503_v40 }
 0x343   :  { %3270 = vmatmul.bf16.gmra.mxu1 %v15504_v29 }
 0x344   :  { %15502 = vst [vmem:[#allocation161_spill] sm:$0xff] %v10055_v3  ;;  %3359 = vmatmul.bf16.gmra.mxu2 %v15415_v51  ;;  %v9090_v51 = vld [vmem:[#allocation5 + $0x88c] sm:$0xf0] }
 0x345   :  { %3448 = vmatmul.bf16.gmra.mxu3 %v15505_v34  ;;  %v8754_v34 = vld [vmem:[#allocation5 + $0x878] sm:$0xf] }
 0x347   :  { %v3044_v12 = vpop.f32.mrf.mxu2  ;;  %v2868_v33 = vpop.f32.mrf.mxu0 }
 0x348   :  { %v3045_v57 = vadd.f32 %v3044_v12, %v2956_v62  ;;  %v3133_v21 = vpop.f32.mrf.mxu3  ;;  %v2869_v17 = vadd.f32 %v2868_v33, %v15506_v46  ;;  %v2957_v10 = vpop.f32.mrf.mxu1  ;;  %v15510_v62 = vld [vmem:[#allocation21_spill] sm:$0xff]  ;;  %v15511_v12 = vld [vmem:[#allocation22_spill] sm:$0xff]  ;;  %v15512_v33 = vld [vmem:[#allocation23_spill] sm:$0xff] }
 0x34a   :  { %v10062_v39 = vadd.f32 %v3133_v21, %v3045_v57  ;;  %v2958_v28 = vadd.f32 %v2957_v10, %v2869_v17  ;;  %v8847_v10 = vld [vmem:[#allocation5 + $0xfc] sm:$0xf] }
 0x34c   :  { %15507 = vst [vmem:[#allocation131_spill] sm:$0xff] %v10062_v39 }
 0x34f   :  { %v3046_v58 = vpop.f32.mrf.mxu2  ;;  %v2871_v16 = vpop.f32.mrf.mxu0 }
 0x350   :  { %v3047_v8 = vadd.f32 %v3046_v58, %v2958_v28  ;;  %v3135_v32 = vpop.f32.mrf.mxu3  ;;  %v2872_v7 = vadd.f32 %v2871_v16, %v9879_v2  ;;  %v2960_v45 = vpop.f32.mrf.mxu1  ;;  %v7796_v28 = vld [vmem:[#allocation5 + $0x110] sm:$0xf0]  ;;  %v8562_v58 = vld [vmem:[#allocation5 + $0x6f8] sm:$0xf]  ;;  %v9042_v16 = vld [vmem:[#allocation5 + $0x70c] sm:$0xf0] }
 0x351   :  { %v8563_v39 = vor.u32 %v9042_v16, %v8562_v58  ;;  %v15516_v58 = vld [vmem:[#allocation25_spill] sm:$0xff] }
 0x352   :  { %v10065_v55 = vadd.f32 %v3135_v32, %v3047_v8  ;;  %v2961_v9 = vadd.f32 %v2960_v45, %v2872_v7  ;;  %3186 = vmatmul.bf16.gmra.mxu0 %v15509_v22  ;;  %v7799_v32 = vor.u32 %v8847_v10, %v7796_v28  ;;  %v8895_v7 = vld [vmem:[#allocation5 + $0x27c] sm:$0xf]  ;;  %v7988_v45 = vld [vmem:[#allocation5 + $0x290] sm:$0xf0]  ;;  %v8755_v10 = vor.u32 %v9090_v51, %v8754_v34 }
 0x353   :  { %3275 = vmatmul.bf16.gmra.mxu1 %v15510_v62  ;;  %v7991_v3 = vor.u32 %v8895_v7, %v7988_v45  ;;  %3526 = vmatpush.bf16.msra.mxu0 %v8563_v39 }
 0x354   :  { %15508 = vst [vmem:[#allocation162_spill] sm:$0xff] %v10065_v55  ;;  %3364 = vmatmul.bf16.gmra.mxu2 %v15511_v12  ;;  %3615 = vmatpush.bf16.msra.mxu1 %v8755_v10  ;;  %v15521_v10 = vld [vmem:[#allocation28_spill] sm:$0xff] }
 0x355   :  { %3453 = vmatmul.bf16.gmra.mxu3 %v15512_v33  ;;  %3704 = vmatpush.bf16.msra.mxu2 %v7799_v32  ;;  %v15518_v32 = vld [vmem:[#allocation135_spill] sm:$0xff] }
 0x356   :  { %3793 = vmatpush.bf16.msra.mxu3 %v7991_v3  ;;  %v15517_v3 = vld [vmem:[#allocation27_spill] sm:$0xff] }
 0x357   :  { %v3049_v57 = vpop.f32.mrf.mxu2  ;;  %v2873_v17 = vpop.f32.mrf.mxu0 }
 0x358   :  { %v3050_v21 = vadd.f32 %v3049_v57, %v2961_v9  ;;  %v3138_v46 = vpop.f32.mrf.mxu3  ;;  %v2874_v2 = vadd.f32 %v2873_v17, %v9885_v4  ;;  %v2962_v8 = vpop.f32.mrf.mxu1 }
 0x35a   :  { %v10072_v55 = vadd.f32 %v3138_v46, %v3050_v21  ;;  %v2963_v63 = vadd.f32 %v2962_v8, %v2874_v2  ;;  %v15515_v46 = vld [vmem:[#allocation24_spill] sm:$0xff] }
 0x35c   :  { %15513 = vst [vmem:[#allocation163_spill] sm:$0xff] %v10072_v55 }
 0x35f   :  { %v3051_v9 = vpop.f32.mrf.mxu2  ;;  %v2876_v12 = vpop.f32.mrf.mxu0 }
 0x360   :  { %v3052_v57 = vadd.f32 %v3051_v9, %v2963_v63  ;;  %v3140_v33 = vpop.f32.mrf.mxu3  ;;  %v2877_v4 = vadd.f32 %v2876_v12, %v9895_v5  ;;  %v2965_v17 = vpop.f32.mrf.mxu1 }
 0x362   :  { %v10075_v28 = vadd.f32 %v3140_v33, %v3052_v57  ;;  %v2966_v21 = vadd.f32 %v2965_v17, %v2877_v4  ;;  %3191 = vmatmul.bf16.gmra.mxu0 %v15515_v46 }
 0x363   :  { %3280 = vmatmul.bf16.gmra.mxu1 %v15516_v58 }
 0x364   :  { %15514 = vst [vmem:[#allocation164_spill] sm:$0xff] %v10075_v28  ;;  %3369 = vmatmul.bf16.gmra.mxu2 %v15428_v25  ;;  %v9084_v25 = vld [vmem:[#allocation5 + $0x85c] sm:$0xf0] }
 0x365   :  { %3458 = vmatmul.bf16.gmra.mxu3 %v15517_v3  ;;  %v8730_v3 = vld [vmem:[#allocation5 + $0x848] sm:$0xf] }
 0x367   :  { %v3054_v63 = vpop.f32.mrf.mxu2  ;;  %v2878_v8 = vpop.f32.mrf.mxu0 }
 0x368   :  { %v3055_v39 = vadd.f32 %v3054_v63, %v2966_v21  ;;  %v3143_v2 = vpop.f32.mrf.mxu3  ;;  %v2879_v5 = vadd.f32 %v2878_v8, %v15518_v32  ;;  %v2967_v12 = vpop.f32.mrf.mxu1  ;;  %v15522_v21 = vld [vmem:[#allocation29_spill] sm:$0xff]  ;;  %v15523_v63 = vld [vmem:[#allocation30_spill] sm:$0xff]  ;;  %v15524_v8 = vld [vmem:[#allocation31_spill] sm:$0xff] }
 0x36a   :  { %v10082_v51 = vadd.f32 %v3143_v2, %v3055_v39  ;;  %v2968_v34 = vadd.f32 %v2967_v12, %v2879_v5  ;;  %v8841_v12 = vld [vmem:[#allocation5 + $0xcc] sm:$0xf] }
 0x36c   :  { %15519 = vst [vmem:[#allocation135_spill] sm:$0xff] %v10082_v51 }
 0x36f   :  { %v3056_v33 = vpop.f32.mrf.mxu2  ;;  %v2881_v45 = vpop.f32.mrf.mxu0 }
 0x370   :  { %v3057_v16 = vadd.f32 %v3056_v33, %v2968_v34  ;;  %v3145_v7 = vpop.f32.mrf.mxu3  ;;  %v2882_v9 = vadd.f32 %v2881_v45, %v9911_v49  ;;  %v2970_v57 = vpop.f32.mrf.mxu1  ;;  %v7772_v34 = vld [vmem:[#allocation5 + $0xe0] sm:$0xf0]  ;;  %v8538_v33 = vld [vmem:[#allocation5 + $0x6c8] sm:$0xf]  ;;  %v9036_v45 = vld [vmem:[#allocation5 + $0x6dc] sm:$0xf0] }
 0x371   :  { %v8539_v51 = vor.u32 %v9036_v45, %v8538_v33  ;;  %v15528_v33 = vld [vmem:[#allocation33_spill] sm:$0xff] }
 0x372   :  { %v10085_v4 = vadd.f32 %v3145_v7, %v3057_v16  ;;  %v2971_v17 = vadd.f32 %v2970_v57, %v2882_v9  ;;  %3196 = vmatmul.bf16.gmra.mxu0 %v15521_v10  ;;  %v7775_v7 = vor.u32 %v8841_v12, %v7772_v34  ;;  %v8889_v9 = vld [vmem:[#allocation5 + $0x24c] sm:$0xf]  ;;  %v7964_v57 = vld [vmem:[#allocation5 + $0x260] sm:$0xf0]  ;;  %v8731_v12 = vor.u32 %v9084_v25, %v8730_v3 }
 0x373   :  { %3285 = vmatmul.bf16.gmra.mxu1 %v15522_v21  ;;  %v7967_v28 = vor.u32 %v8889_v9, %v7964_v57  ;;  %3527 = vmatpush.bf16.msra.mxu0 %v8539_v51 }
 0x374   :  { %15520 = vst [vmem:[#allocation165_spill] sm:$0xff] %v10085_v4  ;;  %3374 = vmatmul.bf16.gmra.mxu2 %v15523_v63  ;;  %3616 = vmatpush.bf16.msra.mxu1 %v8731_v12  ;;  %v15533_v12 = vld [vmem:[#allocation37_spill] sm:$0xff] }
 0x375   :  { %3463 = vmatmul.bf16.gmra.mxu3 %v15524_v8  ;;  %3705 = vmatpush.bf16.msra.mxu2 %v7775_v7 }
 0x376   :  { %3794 = vmatpush.bf16.msra.mxu3 %v7967_v28 }
 0x377   :  { %v3059_v39 = vpop.f32.mrf.mxu2  ;;  %v2883_v5 = vpop.f32.mrf.mxu0 }
 0x378   :  { %v3060_v2 = vadd.f32 %v3059_v39, %v2971_v17  ;;  %v3148_v32 = vpop.f32.mrf.mxu3  ;;  %v2884_v49 = vadd.f32 %v2883_v5, %v9917_v48  ;;  %v2972_v16 = vpop.f32.mrf.mxu1 }
 0x37a   :  { %v10092_v4 = vadd.f32 %v3148_v32, %v3060_v2  ;;  %v2973_v55 = vadd.f32 %v2972_v16, %v2884_v49  ;;  %v15527_v32 = vld [vmem:[#allocation32_spill] sm:$0xff]  ;;  %v15529_v16 = vld [vmem:[#allocation139_spill] sm:$0xff] }
 0x37c   :  { %15525 = vst [vmem:[#allocation166_spill] sm:$0xff] %v10092_v4  ;;  %v9078_v4 = vld [vmem:[#allocation5 + $0x82c] sm:$0xf0] }
 0x37f   :  { %v3061_v17 = vpop.f32.mrf.mxu2  ;;  %v2886_v63 = vpop.f32.mrf.mxu0 }
 0x380   :  { %v3062_v39 = vadd.f32 %v3061_v17, %v2973_v55  ;;  %v3150_v8 = vpop.f32.mrf.mxu3  ;;  %v2887_v48 = vadd.f32 %v2886_v63, %v9927_v20  ;;  %v2975_v5 = vpop.f32.mrf.mxu1 }
 0x382   :  { %v10095_v34 = vadd.f32 %v3150_v8, %v3062_v39  ;;  %v2976_v2 = vadd.f32 %v2975_v5, %v2887_v48  ;;  %3201 = vmatmul.bf16.gmra.mxu0 %v15527_v32  ;;  %v15532_v5 = vld [vmem:[#allocation36_spill] sm:$0xff] }
 0x383   :  { %3290 = vmatmul.bf16.gmra.mxu1 %v15528_v33 }
 0x384   :  { %15526 = vst [vmem:[#allocation167_spill] sm:$0xff] %v10095_v34  ;;  %3379 = vmatmul.bf16.gmra.mxu2 %v15441_v1  ;;  %v8706_v34 = vld [vmem:[#allocation5 + $0x818] sm:$0xf] }
 0x385   :  { %3468 = vmatmul.bf16.gmra.mxu3 %v15442_v60 }
 0x387   :  { %v3064_v55 = vpop.f32.mrf.mxu2  ;;  %v2888_v49 = vpop.f32.mrf.mxu0 }
 0x388   :  { %v3065_v28 = vadd.f32 %v3064_v55, %v2976_v2  ;;  %v3153_v51 = vpop.f32.mrf.mxu3  ;;  %v2889_v20 = vadd.f32 %v2888_v49, %v15529_v16  ;;  %v2977_v63 = vpop.f32.mrf.mxu1  ;;  %v15534_v2 = vld [vmem:[#allocation38_spill] sm:$0xff]  ;;  %v15535_v55 = vld [vmem:[#allocation39_spill] sm:$0xff] }
 0x38a   :  { %v10102_v25 = vadd.f32 %v3153_v51, %v3065_v28  ;;  %v2978_v3 = vadd.f32 %v2977_v63, %v2889_v20  ;;  %v8835_v20 = vld [vmem:[#allocation5 + $0x9c] sm:$0xf]  ;;  %v7748_v63 = vld [vmem:[#allocation5 + $0xb0] sm:$0xf0] }
 0x38c   :  { %15530 = vst [vmem:[#allocation139_spill] sm:$0xff] %v10102_v25 }
 0x38f   :  { %v3066_v8 = vpop.f32.mrf.mxu2  ;;  %v2891_v9 = vpop.f32.mrf.mxu0 }
 0x390   :  { %v3067_v7 = vadd.f32 %v3066_v8, %v2978_v3  ;;  %v3155_v45 = vpop.f32.mrf.mxu3  ;;  %v2892_v57 = vadd.f32 %v2891_v9, %v9943_v19  ;;  %v2980_v17 = vpop.f32.mrf.mxu1  ;;  %v8514_v3 = vld [vmem:[#allocation5 + $0x698] sm:$0xf]  ;;  %v8883_v9 = vld [vmem:[#allocation5 + $0x21c] sm:$0xf] }
 0x392   :  { %v10105_v39 = vadd.f32 %v3155_v45, %v3067_v7  ;;  %v2981_v48 = vadd.f32 %v2980_v17, %v2892_v57  ;;  %3206 = vmatmul.bf16.gmra.mxu0 %v15532_v5  ;;  %v7751_v7 = vor.u32 %v8835_v20, %v7748_v63  ;;  %v9030_v45 = vld [vmem:[#allocation5 + $0x6ac] sm:$0xf0]  ;;  %v7940_v57 = vld [vmem:[#allocation5 + $0x230] sm:$0xf0] }
 0x393   :  { %3295 = vmatmul.bf16.gmra.mxu1 %v15533_v12  ;;  %v7943_v25 = vor.u32 %v8883_v9, %v7940_v57 }
 0x394   :  { %15531 = vst [vmem:[#allocation168_spill] sm:$0xff] %v10105_v39  ;;  %3384 = vmatmul.bf16.gmra.mxu2 %v15534_v2  ;;  %v8515_v39 = vor.u32 %v9030_v45, %v8514_v3  ;;  %v15539_v3 = vld [vmem:[#allocation41_spill] sm:$0xff] }
 0x395   :  { %3473 = vmatmul.bf16.gmra.mxu3 %v15535_v55  ;;  %3706 = vmatpush.bf16.msra.mxu2 %v7751_v7 }
 0x396   :  { %3528 = vmatpush.bf16.msra.mxu0 %v8515_v39  ;;  %3795 = vmatpush.bf16.msra.mxu3 %v7943_v25 }
 0x397   :  { %v3069_v28 = vpop.f32.mrf.mxu2  ;;  %v2893_v16 = vpop.f32.mrf.mxu0 }
 0x398   :  { %v3070_v51 = vadd.f32 %v3069_v28, %v2981_v48  ;;  %v3158_v49 = vpop.f32.mrf.mxu3  ;;  %v2894_v19 = vadd.f32 %v2893_v16, %v9949_v56  ;;  %v2982_v8 = vpop.f32.mrf.mxu1  ;;  %v8707_v48 = vor.u32 %v9078_v4, %v8706_v34  ;;  %v15540_v4 = vld [vmem:[#allocation43_spill] sm:$0xff]  ;;  %v10121_v34 = vld [vmem:[#allocation7 + $0x8] sm:$0x77] }
 0x39a   :  { %v10112_v17 = vadd.f32 %v3158_v49, %v3070_v51  ;;  %v2983_v55 = vadd.f32 %v2982_v8, %v2894_v19  ;;  %3617 = vmatpush.bf16.msra.mxu1 %v8707_v48  ;;  %v15538_v49 = vld [vmem:[#allocation40_spill] sm:$0xff] }
 0x39b   :  { %v15541_v8 = vld [vmem:[#allocation144_spill] sm:$0xff] }
 0x39c   :  { %15536 = vst [vmem:[#allocation169_spill] sm:$0xff] %v10112_v17 }
 0x39f   :  { %v3071_v28 = vpop.f32.mrf.mxu2  ;;  %v2896_v16 = vpop.f32.mrf.mxu0 }
 0x3a0   :  { %v3072_v2 = vadd.f32 %v3071_v28, %v2983_v55  ;;  %v3160_v56 = vpop.f32.mrf.mxu3  ;;  %v2897_v20 = vadd.f32 %v2896_v16, %v9959_v27  ;;  %v2985_v63 = vpop.f32.mrf.mxu1 }
 0x3a2   :  { %v10115_v60 = vadd.f32 %v3160_v56, %v3072_v2  ;;  %v2986_v51 = vadd.f32 %v2985_v63, %v2897_v20  ;;  %3211 = vmatmul.bf16.gmra.mxu0 %v15538_v49  ;;  %v644_v2 = vperm.slane %v10121_v34, 0 }
 0x3a3   :  { %3300 = vmatmul.bf16.gmra.mxu1 %v15539_v3 }
 0x3a4   :  { %15537 = vst [vmem:[#allocation170_spill] sm:$0xff] %v10115_v60  ;;  %3389 = vmatmul.bf16.gmra.mxu2 %v15455_v42  ;;  %v10127_v57 = vperm.slane %v644_v2, 0  ;;  %v15544_v60 = vld [vmem:[#allocation44_spill] sm:$0xff]  ;;  %v9072_v42 = vld [vmem:[#allocation5 + $0x7fc] sm:$0xf0] }
 0x3a5   :  { %3478 = vmatmul.bf16.gmra.mxu3 %v15540_v4 }
 0x3a7   :  { %v3074_v25 = vpop.f32.mrf.mxu2  ;;  %v2898_v19 = vpop.f32.mrf.mxu0 }
 0x3a8   :  { %v3075_v39 = vadd.f32 %v3074_v25, %v2986_v51  ;;  %v3163_v55 = vpop.f32.mrf.mxu3  ;;  %v2899_v27 = vadd.f32 %v2898_v19, %v15541_v8  ;;  %v2987_v7 = vpop.f32.mrf.mxu1  ;;  %v15545_v19 = vld [vmem:[#allocation45_spill] sm:$0xff]  ;;  %v15546_v8 = vld [vmem:[#allocation46_spill] sm:$0xff] }
 0x3aa   :  { %v10125_v45 = vadd.f32 %v3163_v55, %v3075_v39  ;;  %v2988_v9 = vadd.f32 %v2987_v7, %v2899_v27  ;;  %v15547_v39 = vld [vmem:[#allocation47_spill] sm:$0xff]  ;;  %v8829_v55 = vld [vmem:[#allocation5 + $0x6c] sm:$0xf]  ;;  %v7724_v27 = vld [vmem:[#allocation5 + $0x80] sm:$0xf0] }
 0x3ab   :  { %v8490_v7 = vld [vmem:[#allocation5 + $0x668] sm:$0xf]  ;;  %v7727_v2 = vor.u32 %v8829_v55, %v7724_v27 }
 0x3ac   :  { %15542 = vst [vmem:[#allocation144_spill] sm:$0xff] %v10125_v45  ;;  %v7916_v45 = vld [vmem:[#allocation5 + $0x200] sm:$0xf0] }
 0x3ad   :  { %3707 = vmatpush.bf16.msra.mxu2 %v7727_v2 }
 0x3af   :  { %v3076_v48 = vpop.f32.mrf.mxu2  ;;  %v3177_v16 = vpop.f32.mrf.mxu0 }
 0x3b0   :  { %v3077_v28 = vadd.f32 %v3076_v48, %v2988_v9  ;;  %v3165_v56 = vpop.f32.mrf.mxu3  ;;  %v3178_v20 = vadd.f32 %v3177_v16, %v10127_v57  ;;  %v3266_v63 = vpop.f32.mrf.mxu1  ;;  %v9024_v9 = vld [vmem:[#allocation5 + $0x67c] sm:$0xf0]  ;;  %v8877_v48 = vld [vmem:[#allocation5 + $0x1ec] sm:$0xf] }
 0x3b1   :  { %v8491_v17 = vor.u32 %v9024_v9, %v8490_v7 }
 0x3b2   :  { %v10130_v51 = vadd.f32 %v3165_v56, %v3077_v28  ;;  %v3267_v25 = vadd.f32 %v3266_v63, %v3178_v20  ;;  %3216 = vmatmul.bf16.gmra.mxu0 %v15544_v60  ;;  %v7919_v28 = vor.u32 %v8877_v48, %v7916_v45 }
 0x3b3   :  { %3305 = vmatmul.bf16.gmra.mxu1 %v15545_v19  ;;  %3529 = vmatpush.bf16.msra.mxu0 %v8491_v17  ;;  %v15549_v17 = vld [vmem:[#allocation49_spill] sm:$0xff] }
 0x3b4   :  { %15543 = vst [vmem:[#allocation171_spill] sm:$0xff] %v10130_v51  ;;  %3394 = vmatmul.bf16.gmra.mxu2 %v15546_v8  ;;  %3796 = vmatpush.bf16.msra.mxu3 %v7919_v28  ;;  %v8682_v8 = vld [vmem:[#allocation5 + $0x7e8] sm:$0xf] }
 0x3b5   :  { %3483 = vmatmul.bf16.gmra.mxu3 %v15547_v39  ;;  %v8683_v27 = vor.u32 %v9072_v42, %v8682_v8 }
 0x3b7   :  { %v3355_v16 = vpop.f32.mrf.mxu2  ;;  %v3179_v63 = vpop.f32.mrf.mxu0  ;;  %3618 = vmatpush.bf16.msra.mxu1 %v8683_v27 }
 0x3b8   :  { %v3356_v56 = vadd.f32 %v3355_v16, %v3267_v25  ;;  %v3444_v20 = vpop.f32.mrf.mxu3  ;;  %v3180_v51 = vadd.f32 %v3179_v63, %v10127_v57  ;;  %v3268_v4 = vpop.f32.mrf.mxu1  ;;  %v15548_v16 = vld [vmem:[#allocation48_spill] sm:$0xff] }
 0x3ba   :  { %v10137_v39 = vadd.f32 %v3444_v20, %v3356_v56  ;;  %v3269_v55 = vadd.f32 %v3268_v4, %v3180_v51 }
 0x3bf   :  { %v3357_v1 = vpop.f32.mrf.mxu2  ;;  %v3182_v45 = vpop.f32.mrf.mxu0 }
 0x3c0   :  { %v3358_v24 = vadd.f32 %v3357_v1, %v3269_v55  ;;  %v3446_v7 = vpop.f32.mrf.mxu3  ;;  %v3183_v25 = vadd.f32 %v3182_v45, %v10127_v57  ;;  %v3271_v9 = vpop.f32.mrf.mxu1 }
 0x3c2   :  { %v10140_v2 = vadd.f32 %v3446_v7, %v3358_v24  ;;  %v3272_v48 = vadd.f32 %v3271_v9, %v3183_v25  ;;  %3221 = vmatmul.bf16.gmra.mxu0 %v15548_v16 }
 0x3c3   :  { %3310 = vmatmul.bf16.gmra.mxu1 %v15549_v17 }
 0x3c4   :  { %3399 = vmatmul.bf16.gmra.mxu2 %v15465_v59 }
 0x3c5   :  { %3488 = vmatmul.bf16.gmra.mxu3 %v15466_v6  ;;  %v15550_v6 = vld [vmem:[#allocation52_spill] sm:$0xff] }
 0x3c7   :  { %v3360_v42 = vpop.f32.mrf.mxu2  ;;  %v3184_v1 = vpop.f32.mrf.mxu0 }
 0x3c8   :  { %v3361_v4 = vadd.f32 %v3360_v42, %v3272_v48  ;;  %v3449_v51 = vpop.f32.mrf.mxu3  ;;  %v3185_v8 = vadd.f32 %v3184_v1, %v10127_v57  ;;  %v3273_v28 = vpop.f32.mrf.mxu1  ;;  %v15551_v48 = vld [vmem:[#allocation53_spill] sm:$0xff]  ;;  %v8823_v42 = vld [vmem:[#allocation5 + $0x3c] sm:$0xf] }
 0x3ca   :  { %v10147_v56 = vadd.f32 %v3449_v51, %v3361_v4  ;;  %v3274_v24 = vadd.f32 %v3273_v28, %v3185_v8  ;;  %v7700_v4 = vld [vmem:[#allocation5 + $0x50] sm:$0xf0]  ;;  %v8466_v51 = vld [vmem:[#allocation5 + $0x638] sm:$0xf]  ;;  %v9018_v8 = vld [vmem:[#allocation5 + $0x64c] sm:$0xf0] }
 0x3cb   :  { %v7703_v1 = vor.u32 %v8823_v42, %v7700_v4  ;;  %v8871_v28 = vld [vmem:[#allocation5 + $0x1bc] sm:$0xf] }
 0x3cd   :  { %3708 = vmatpush.bf16.msra.mxu2 %v7703_v1 }
 0x3cf   :  { %v3362_v20 = vpop.f32.mrf.mxu2  ;;  %v3187_v27 = vpop.f32.mrf.mxu0 }
 0x3d0   :  { %v3363_v63 = vadd.f32 %v3362_v20, %v3274_v24  ;;  %v3451_v55 = vpop.f32.mrf.mxu3  ;;  %v3188_v7 = vadd.f32 %v3187_v27, %v10127_v57  ;;  %v3276_v45 = vpop.f32.mrf.mxu1  ;;  %v7892_v24 = vld [vmem:[#allocation5 + $0x1d0] sm:$0xf0]  ;;  %v8467_v27 = vor.u32 %v9018_v8, %v8466_v51 }
 0x3d2   :  { %v10150_v25 = vadd.f32 %v3451_v55, %v3363_v63  ;;  %v3277_v9 = vadd.f32 %v3276_v45, %v3188_v7  ;;  %3226 = vmatmul.bf16.gmra.mxu0 %v15550_v6  ;;  %v7895_v63 = vor.u32 %v8871_v28, %v7892_v24 }
 0x3d3   :  { %3315 = vmatmul.bf16.gmra.mxu1 %v15551_v48  ;;  %3530 = vmatpush.bf16.msra.mxu0 %v8467_v27  ;;  %v15553_v27 = vld [vmem:[#allocation57_spill] sm:$0xff] }
 0x3d4   :  { %3404 = vmatmul.bf16.gmra.mxu2 %v15469_v47  ;;  %3797 = vmatpush.bf16.msra.mxu3 %v7895_v63  ;;  %v8658_v47 = vld [vmem:[#allocation5 + $0x7b8] sm:$0xf] }
 0x3d5   :  { %3493 = vmatmul.bf16.gmra.mxu3 %v15470_v54  ;;  %v8659_v4 = vor.u32 %v9066_v50, %v8658_v47 }
 0x3d7   :  { %v3365_v20 = vpop.f32.mrf.mxu2  ;;  %v3189_v45 = vpop.f32.mrf.mxu0  ;;  %3619 = vmatpush.bf16.msra.mxu1 %v8659_v4 }
 0x3d8   :  { %v3366_v55 = vadd.f32 %v3365_v20, %v3277_v9  ;;  %v3454_v7 = vpop.f32.mrf.mxu3  ;;  %v3190_v59 = vadd.f32 %v3189_v45, %v10127_v57  ;;  %v3278_v61 = vpop.f32.mrf.mxu1  ;;  %v15552_v20 = vld [vmem:[#allocation56_spill] sm:$0xff] }
 0x3da   :  { %v10157_v54 = vadd.f32 %v3454_v7, %v3366_v55  ;;  %v3279_v42 = vadd.f32 %v3278_v61, %v3190_v59 }
 0x3df   :  { %v3367_v15 = vpop.f32.mrf.mxu2  ;;  %v3192_v8 = vpop.f32.mrf.mxu0 }
 0x3e0   :  { %v3368_v52 = vadd.f32 %v3367_v15, %v3279_v42  ;;  %v3456_v51 = vpop.f32.mrf.mxu3  ;;  %v3193_v9 = vadd.f32 %v3192_v8, %v10127_v57  ;;  %v3281_v28 = vpop.f32.mrf.mxu1 }
 0x3e2   :  { %v10160_v1 = vadd.f32 %v3456_v51, %v3368_v52  ;;  %v3282_v24 = vadd.f32 %v3281_v28, %v3193_v9  ;;  %3231 = vmatmul.bf16.gmra.mxu0 %v15552_v20 }
 0x3e3   :  { %3320 = vmatmul.bf16.gmra.mxu1 %v15553_v27 }
 0x3e4   :  { %3409 = vmatmul.bf16.gmra.mxu2 %v15473_v11 }
 0x3e5   :  { %3498 = vmatmul.bf16.gmra.mxu3 %v15474_v23  ;;  %v15555_v23 = vld [vmem:[#allocation60_spill] sm:$0xff] }
 0x3e7   :  { %v3370_v50 = vpop.f32.mrf.mxu2  ;;  %v3194_v15 = vpop.f32.mrf.mxu0 }
 0x3e8   :  { %v3371_v61 = vadd.f32 %v3370_v50, %v3282_v24  ;;  %v3459_v59 = vpop.f32.mrf.mxu3  ;;  %v3195_v47 = vadd.f32 %v3194_v15, %v10127_v57  ;;  %v3283_v63 = vpop.f32.mrf.mxu1  ;;  %v15556_v24 = vld [vmem:[#allocation61_spill] sm:$0xff]  ;;  %v8817_v50 = vld [vmem:[#allocation5 + $0xc] sm:$0xf] }
 0x3ea   :  { %v10167_v55 = vadd.f32 %v3459_v59, %v3371_v61  ;;  %v3284_v52 = vadd.f32 %v3283_v63, %v3195_v47  ;;  %v7676_v61 = vld [vmem:[#allocation5 + $0x20] sm:$0xf0]  ;;  %v8442_v59 = vld [vmem:[#allocation5 + $0x608] sm:$0xf]  ;;  %v9012_v47 = vld [vmem:[#allocation5 + $0x61c] sm:$0xf0] }
 0x3eb   :  { %v7679_v15 = vor.u32 %v8817_v50, %v7676_v61  ;;  %v8865_v63 = vld [vmem:[#allocation5 + $0x18c] sm:$0xf] }
 0x3ed   :  { %3709 = vmatpush.bf16.msra.mxu2 %v7679_v15 }
 0x3ef   :  { %v3372_v7 = vpop.f32.mrf.mxu2  ;;  %v3197_v4 = vpop.f32.mrf.mxu0 }
 0x3f0   :  { %v3373_v45 = vadd.f32 %v3372_v7, %v3284_v52  ;;  %v3461_v42 = vpop.f32.mrf.mxu3  ;;  %v3198_v51 = vadd.f32 %v3197_v4, %v10127_v57  ;;  %v3286_v8 = vpop.f32.mrf.mxu1  ;;  %v7868_v52 = vld [vmem:[#allocation5 + $0x1a0] sm:$0xf0]  ;;  %v8443_v4 = vor.u32 %v9012_v47, %v8442_v59 }
 0x3f2   :  { %v10170_v9 = vadd.f32 %v3461_v42, %v3373_v45  ;;  %v3287_v28 = vadd.f32 %v3286_v8, %v3198_v51  ;;  %3236 = vmatmul.bf16.gmra.mxu0 %v15555_v23  ;;  %v7871_v45 = vor.u32 %v8865_v63, %v7868_v52  ;;  %v9060_v23 = vld [vmem:[#allocation5 + $0x79c] sm:$0xf0] }
 0x3f3   :  { %3325 = vmatmul.bf16.gmra.mxu1 %v15556_v24  ;;  %3531 = vmatpush.bf16.msra.mxu0 %v8443_v4  ;;  %v15558_v4 = vld [vmem:[#allocation65_spill] sm:$0xff] }
 0x3f4   :  { %15554 = vst [vmem:[#allocation172_spill] sm:$0xff] %v10170_v9  ;;  %3414 = vmatmul.bf16.gmra.mxu2 %v15477_v30  ;;  %3798 = vmatpush.bf16.msra.mxu3 %v7871_v45  ;;  %v8634_v30 = vld [vmem:[#allocation5 + $0x788] sm:$0xf] }
 0x3f5   :  { %3503 = vmatmul.bf16.gmra.mxu3 %v15478_v14  ;;  %v8635_v61 = vor.u32 %v9060_v23, %v8634_v30 }
 0x3f7   :  { %v3375_v7 = vpop.f32.mrf.mxu2  ;;  %v3199_v8 = vpop.f32.mrf.mxu0  ;;  %3620 = vmatpush.bf16.msra.mxu1 %v8635_v61 }
 0x3f8   :  { %v3376_v42 = vadd.f32 %v3375_v7, %v3287_v28  ;;  %v3464_v51 = vpop.f32.mrf.mxu3  ;;  %v3200_v11 = vadd.f32 %v3199_v8, %v10127_v57  ;;  %v3288_v24 = vpop.f32.mrf.mxu1  ;;  %v15557_v7 = vld [vmem:[#allocation64_spill] sm:$0xff] }
 0x3fa   :  { %v10177_v14 = vadd.f32 %v3464_v51, %v3376_v42  ;;  %v3289_v50 = vadd.f32 %v3288_v24, %v3200_v11 }
 0x3ff   :  { %v3377_v9 = vpop.f32.mrf.mxu2  ;;  %v3202_v47 = vpop.f32.mrf.mxu0 }
 0x400   :  { %v3378_v27 = vadd.f32 %v3377_v9, %v3289_v50  ;;  %v3466_v59 = vpop.f32.mrf.mxu3  ;;  %v3203_v28 = vadd.f32 %v3202_v47, %v10127_v57  ;;  %v3291_v63 = vpop.f32.mrf.mxu1 }
 0x402   :  { %v10180_v15 = vadd.f32 %v3466_v59, %v3378_v27  ;;  %v3292_v52 = vadd.f32 %v3291_v63, %v3203_v28  ;;  %3241 = vmatmul.bf16.gmra.mxu0 %v15557_v7 }
 0x403   :  { %3330 = vmatmul.bf16.gmra.mxu1 %v15558_v4 }
 0x404   :  { %3419 = vmatmul.bf16.gmra.mxu2 %v15481_v41 }
 0x405   :  { %3508 = vmatmul.bf16.gmra.mxu3 %v15482_v26  ;;  %v15560_v26 = vld [vmem:[#allocation68_spill] sm:$0xff] }
 0x407   :  { %v3380_v11 = vpop.f32.mrf.mxu2  ;;  %v3204_v9 = vpop.f32.mrf.mxu0 }
 0x408   :  { %v3381_v23 = vadd.f32 %v3380_v11, %v3292_v52  ;;  %v3469_v30 = vpop.f32.mrf.mxu3  ;;  %v3205_v24 = vadd.f32 %v3204_v9, %v10127_v57  ;;  %v3293_v45 = vpop.f32.mrf.mxu1  ;;  %v15561_v52 = vld [vmem:[#allocation69_spill] sm:$0xff]  ;;  %v9051_v11 = vld [vmem:[#allocation5 + $0x75c] sm:$0xf] }
 0x40a   :  { %v10187_v42 = vadd.f32 %v3469_v30, %v3381_v23  ;;  %v3294_v27 = vadd.f32 %v3293_v45, %v3205_v24  ;;  %v8612_v23 = vld [vmem:[#allocation5 + $0x770] sm:$0xf0]  ;;  %v8955_v30 = vld [vmem:[#allocation5 + $0x45c] sm:$0xf] }
 0x40b   :  { %v8615_v9 = vor.u32 %v9051_v11, %v8612_v23  ;;  %v8228_v24 = vld [vmem:[#allocation5 + $0x470] sm:$0xf0]  ;;  %v9099_v45 = vld [vmem:[#allocation5 + $0x8dc] sm:$0xf] }
 0x40d   :  { %4058 = vmatpush.bf16.msrb.mxu2 %v8615_v9 }
 0x40f   :  { %v3382_v51 = vpop.f32.mrf.mxu2  ;;  %v3207_v61 = vpop.f32.mrf.mxu0 }
 0x410   :  { %v3383_v8 = vadd.f32 %v3382_v51, %v3294_v27  ;;  %v3471_v50 = vpop.f32.mrf.mxu3  ;;  %v3208_v59 = vadd.f32 %v3207_v61, %v10127_v57  ;;  %v3296_v47 = vpop.f32.mrf.mxu1  ;;  %v8804_v27 = vld [vmem:[#allocation5 + $0x8f0] sm:$0xf0]  ;;  %v8231_v61 = vor.u32 %v8955_v30, %v8228_v24 }
 0x412   :  { %v10190_v28 = vadd.f32 %v3471_v50, %v3383_v8  ;;  %v3297_v63 = vadd.f32 %v3296_v47, %v3208_v59  ;;  %3246 = vmatmul.bf16.gmra.mxu0 %v15560_v26  ;;  %v8807_v8 = vor.u32 %v9099_v45, %v8804_v27  ;;  %v8420_v26 = vld [vmem:[#allocation5 + $0x5f0] sm:$0xf0] }
 0x413   :  { %3335 = vmatmul.bf16.gmra.mxu1 %v15561_v52  ;;  %3880 = vmatpush.bf16.msrb.mxu0 %v8231_v61  ;;  %v15563_v61 = vld [vmem:[#allocation73_spill] sm:$0xff] }
 0x414   :  { %15559 = vst [vmem:[#allocation173_spill] sm:$0xff] %v10190_v28  ;;  %3424 = vmatmul.bf16.gmra.mxu2 %v15485_v44  ;;  %4147 = vmatpush.bf16.msrb.mxu3 %v8807_v8  ;;  %v9003_v44 = vld [vmem:[#allocation5 + $0x5dc] sm:$0xf] }
 0x415   :  { %3513 = vmatmul.bf16.gmra.mxu3 %v15486_v37  ;;  %v8423_v23 = vor.u32 %v9003_v44, %v8420_v26 }
 0x417   :  { %v3385_v51 = vpop.f32.mrf.mxu2  ;;  %v3209_v47 = vpop.f32.mrf.mxu0  ;;  %3969 = vmatpush.bf16.msrb.mxu1 %v8423_v23 }
 0x418   :  { %v3386_v50 = vadd.f32 %v3385_v51, %v3297_v63  ;;  %v3474_v59 = vpop.f32.mrf.mxu3  ;;  %v3210_v41 = vadd.f32 %v3209_v47, %v10127_v57  ;;  %v3298_v52 = vpop.f32.mrf.mxu1  ;;  %v15562_v51 = vld [vmem:[#allocation72_spill] sm:$0xff] }
 0x41a   :  { %v10197_v37 = vadd.f32 %v3474_v59, %v3386_v50  ;;  %v3299_v11 = vadd.f32 %v3298_v52, %v3210_v41 }
 0x41f   :  { %v3387_v28 = vpop.f32.mrf.mxu2  ;;  %v3212_v24 = vpop.f32.mrf.mxu0 }
 0x420   :  { %v3388_v4 = vadd.f32 %v3387_v28, %v3299_v11  ;;  %v3476_v30 = vpop.f32.mrf.mxu3  ;;  %v3213_v63 = vadd.f32 %v3212_v24, %v10127_v57  ;;  %v3301_v45 = vpop.f32.mrf.mxu1 }
 0x422   :  { %v10200_v9 = vadd.f32 %v3476_v30, %v3388_v4  ;;  %v3302_v27 = vadd.f32 %v3301_v45, %v3213_v63  ;;  %3251 = vmatmul.bf16.gmra.mxu0 %v15562_v51 }
 0x423   :  { %3340 = vmatmul.bf16.gmra.mxu1 %v15563_v61 }
 0x424   :  { %3429 = vmatmul.bf16.gmra.mxu2 %v15490_v36 }
 0x425   :  { %3518 = vmatmul.bf16.gmra.mxu3 %v15491_v38  ;;  %v15565_v38 = vld [vmem:[#allocation77_spill] sm:$0xff] }
 0x427   :  { %v3390_v41 = vpop.f32.mrf.mxu2  ;;  %v3214_v28 = vpop.f32.mrf.mxu0 }
 0x428   :  { %v3391_v26 = vadd.f32 %v3390_v41, %v3302_v27  ;;  %v3479_v44 = vpop.f32.mrf.mxu3  ;;  %v3215_v52 = vadd.f32 %v3214_v28, %v10127_v57  ;;  %v3303_v8 = vpop.f32.mrf.mxu1  ;;  %v15566_v27 = vld [vmem:[#allocation78_spill] sm:$0xff] }
 0x429   :  { %v9045_v41 = vld [vmem:[#allocation5 + $0x72c] sm:$0xf] }
 0x42a   :  { %v10207_v50 = vadd.f32 %v3479_v44, %v3391_v26  ;;  %v3304_v4 = vadd.f32 %v3303_v8, %v3215_v52  ;;  %v8588_v26 = vld [vmem:[#allocation5 + $0x740] sm:$0xf0]  ;;  %v8949_v44 = vld [vmem:[#allocation5 + $0x42c] sm:$0xf] }
 0x42b   :  { %v8591_v28 = vor.u32 %v9045_v41, %v8588_v26  ;;  %v8204_v52 = vld [vmem:[#allocation5 + $0x440] sm:$0xf0]  ;;  %v9093_v8 = vld [vmem:[#allocation5 + $0x8ac] sm:$0xf] }
 0x42d   :  { %4059 = vmatpush.bf16.msrb.mxu2 %v8591_v28 }
 0x42f   :  { %v3392_v59 = vpop.f32.mrf.mxu2  ;;  %v3217_v23 = vpop.f32.mrf.mxu0 }
 0x430   :  { %v3393_v47 = vadd.f32 %v3392_v59, %v3304_v4  ;;  %v3481_v11 = vpop.f32.mrf.mxu3  ;;  %v3218_v30 = vadd.f32 %v3217_v23, %v10127_v57  ;;  %v3306_v24 = vpop.f32.mrf.mxu1  ;;  %v8780_v4 = vld [vmem:[#allocation5 + $0x8c0] sm:$0xf0]  ;;  %v8207_v23 = vor.u32 %v8949_v44, %v8204_v52 }
 0x432   :  { %v10210_v63 = vadd.f32 %v3481_v11, %v3393_v47  ;;  %v3307_v45 = vadd.f32 %v3306_v24, %v3218_v30  ;;  %3532 = vmatmul.bf16.vlgmr.msra.gmra.mxu0 %v15565_v38  ;;  %v8783_v47 = vor.u32 %v9093_v8, %v8780_v4  ;;  %v8396_v38 = vld [vmem:[#allocation5 + $0x5c0] sm:$0xf0] }
 0x433   :  { %3621 = vmatmul.bf16.vlgmr.msra.gmra.mxu1 %v15566_v27  ;;  %3881 = vmatpush.bf16.msrb.mxu0 %v8207_v23  ;;  %v15568_v23 = vld [vmem:[#allocation81_spill] sm:$0xff] }
 0x434   :  { %15564 = vst [vmem:[#allocation174_spill] sm:$0xff] %v10210_v63  ;;  %3710 = vmatmul.bf16.vlgmr.msra.gmra.mxu2 %v15497_v35  ;;  %4148 = vmatpush.bf16.msrb.mxu3 %v8783_v47  ;;  %v8997_v35 = vld [vmem:[#allocation5 + $0x5ac] sm:$0xf] }
 0x435   :  { %3799 = vmatmul.bf16.vlgmr.msra.gmra.mxu3 %v15498_v43  ;;  %v8399_v26 = vor.u32 %v8997_v35, %v8396_v38 }
 0x437   :  { %v3395_v59 = vpop.f32.mrf.mxu2  ;;  %v3219_v24 = vpop.f32.mrf.mxu0  ;;  %3970 = vmatpush.bf16.msrb.mxu1 %v8399_v26 }
 0x438   :  { %v3396_v11 = vadd.f32 %v3395_v59, %v3307_v45  ;;  %v3484_v30 = vpop.f32.mrf.mxu3  ;;  %v3220_v36 = vadd.f32 %v3219_v24, %v10127_v57  ;;  %v3308_v27 = vpop.f32.mrf.mxu1  ;;  %v15567_v59 = vld [vmem:[#allocation80_spill] sm:$0xff] }
 0x43a   :  { %v10217_v43 = vadd.f32 %v3484_v30, %v3396_v11  ;;  %v3309_v41 = vadd.f32 %v3308_v27, %v3220_v36 }
 0x43f   :  { %v3397_v63 = vpop.f32.mrf.mxu2  ;;  %v3222_v52 = vpop.f32.mrf.mxu0 }
 0x440   :  { %v3398_v61 = vadd.f32 %v3397_v63, %v3309_v41  ;;  %v3486_v44 = vpop.f32.mrf.mxu3  ;;  %v3223_v45 = vadd.f32 %v3222_v52, %v10127_v57  ;;  %v3311_v8 = vpop.f32.mrf.mxu1 }
 0x442   :  { %v10220_v28 = vadd.f32 %v3486_v44, %v3398_v61  ;;  %v3312_v4 = vadd.f32 %v3311_v8, %v3223_v45  ;;  %3537 = vmatmul.bf16.gmra.mxu0 %v15567_v59 }
 0x443   :  { %3626 = vmatmul.bf16.gmra.mxu1 %v15568_v23 }
 0x444   :  { %3715 = vmatmul.bf16.gmra.mxu2 %v15503_v40 }
 0x445   :  { %3804 = vmatmul.bf16.gmra.mxu3 %v15504_v29  ;;  %v15570_v29 = vld [vmem:[#allocation82_spill] sm:$0xff] }
 0x447   :  { %v3400_v35 = vpop.f32.mrf.mxu2  ;;  %v3224_v63 = vpop.f32.mrf.mxu0 }
 0x448   :  { %v3401_v36 = vadd.f32 %v3400_v35, %v3312_v4  ;;  %v3489_v38 = vpop.f32.mrf.mxu3  ;;  %v3225_v27 = vadd.f32 %v3224_v63, %v10127_v57  ;;  %v3313_v47 = vpop.f32.mrf.mxu1  ;;  %v15571_v4 = vld [vmem:[#allocation83_spill] sm:$0xff]  ;;  %v9039_v35 = vld [vmem:[#allocation5 + $0x6fc] sm:$0xf] }
 0x44a   :  { %v10227_v11 = vadd.f32 %v3489_v38, %v3401_v36  ;;  %v3314_v61 = vadd.f32 %v3313_v47, %v3225_v27  ;;  %v8564_v36 = vld [vmem:[#allocation5 + $0x710] sm:$0xf0]  ;;  %v8943_v38 = vld [vmem:[#allocation5 + $0x3fc] sm:$0xf] }
 0x44b   :  { %v8567_v63 = vor.u32 %v9039_v35, %v8564_v36  ;;  %v8180_v27 = vld [vmem:[#allocation5 + $0x410] sm:$0xf0]  ;;  %v9087_v47 = vld [vmem:[#allocation5 + $0x87c] sm:$0xf] }
 0x44d   :  { %4060 = vmatpush.bf16.msrb.mxu2 %v8567_v63 }
 0x44f   :  { %v3402_v30 = vpop.f32.mrf.mxu2  ;;  %v3227_v26 = vpop.f32.mrf.mxu0 }
 0x450   :  { %v3403_v24 = vadd.f32 %v3402_v30, %v3314_v61  ;;  %v3491_v41 = vpop.f32.mrf.mxu3  ;;  %v3228_v44 = vadd.f32 %v3227_v26, %v10127_v57  ;;  %v3316_v52 = vpop.f32.mrf.mxu1  ;;  %v8756_v61 = vld [vmem:[#allocation5 + $0x890] sm:$0xf0]  ;;  %v8183_v26 = vor.u32 %v8943_v38, %v8180_v27 }
 0x452   :  { %v10230_v45 = vadd.f32 %v3491_v41, %v3403_v24  ;;  %v3317_v8 = vadd.f32 %v3316_v52, %v3228_v44  ;;  %3542 = vmatmul.bf16.gmra.mxu0 %v15570_v29  ;;  %v8759_v24 = vor.u32 %v9087_v47, %v8756_v61  ;;  %v8372_v29 = vld [vmem:[#allocation5 + $0x590] sm:$0xf0] }
 0x453   :  { %3631 = vmatmul.bf16.gmra.mxu1 %v15571_v4  ;;  %3882 = vmatpush.bf16.msrb.mxu0 %v8183_v26  ;;  %v15573_v26 = vld [vmem:[#allocation86_spill] sm:$0xff] }
 0x454   :  { %15569 = vst [vmem:[#allocation175_spill] sm:$0xff] %v10230_v45  ;;  %3720 = vmatmul.bf16.gmra.mxu2 %v15509_v22  ;;  %4149 = vmatpush.bf16.msrb.mxu3 %v8759_v24  ;;  %v8991_v22 = vld [vmem:[#allocation5 + $0x57c] sm:$0xf] }
 0x455   :  { %3809 = vmatmul.bf16.gmra.mxu3 %v15510_v62  ;;  %v8375_v36 = vor.u32 %v8991_v22, %v8372_v29 }
 0x457   :  { %v3405_v30 = vpop.f32.mrf.mxu2  ;;  %v3229_v52 = vpop.f32.mrf.mxu0  ;;  %3971 = vmatpush.bf16.msrb.mxu1 %v8375_v36 }
 0x458   :  { %v3406_v41 = vadd.f32 %v3405_v30, %v3317_v8  ;;  %v3494_v44 = vpop.f32.mrf.mxu3  ;;  %v3230_v40 = vadd.f32 %v3229_v52, %v10127_v57  ;;  %v3318_v4 = vpop.f32.mrf.mxu1  ;;  %v15572_v30 = vld [vmem:[#allocation85_spill] sm:$0xff] }
 0x45a   :  { %v10237_v62 = vadd.f32 %v3494_v44, %v3406_v41  ;;  %v3319_v35 = vadd.f32 %v3318_v4, %v3230_v40 }
 0x45f   :  { %v3407_v45 = vpop.f32.mrf.mxu2  ;;  %v3232_v27 = vpop.f32.mrf.mxu0 }
 0x460   :  { %v3408_v23 = vadd.f32 %v3407_v45, %v3319_v35  ;;  %v3496_v38 = vpop.f32.mrf.mxu3  ;;  %v3233_v8 = vadd.f32 %v3232_v27, %v10127_v57  ;;  %v3321_v47 = vpop.f32.mrf.mxu1 }
 0x462   :  { %v10240_v63 = vadd.f32 %v3496_v38, %v3408_v23  ;;  %v3322_v61 = vadd.f32 %v3321_v47, %v3233_v8  ;;  %3547 = vmatmul.bf16.gmra.mxu0 %v15572_v30 }
 0x463   :  { %3636 = vmatmul.bf16.gmra.mxu1 %v15573_v26 }
 0x464   :  { %3725 = vmatmul.bf16.gmra.mxu2 %v15515_v46 }
 0x465   :  { %3814 = vmatmul.bf16.gmra.mxu3 %v15516_v58  ;;  %v15575_v58 = vld [vmem:[#allocation87_spill] sm:$0xff] }
 0x467   :  { %v3410_v40 = vpop.f32.mrf.mxu2  ;;  %v3234_v45 = vpop.f32.mrf.mxu0 }
 0x468   :  { %v3411_v29 = vadd.f32 %v3410_v40, %v3322_v61  ;;  %v3499_v22 = vpop.f32.mrf.mxu3  ;;  %v3235_v4 = vadd.f32 %v3234_v45, %v10127_v57  ;;  %v3323_v24 = vpop.f32.mrf.mxu1  ;;  %v15576_v61 = vld [vmem:[#allocation88_spill] sm:$0xff]  ;;  %v9033_v40 = vld [vmem:[#allocation5 + $0x6cc] sm:$0xf] }
 0x46a   :  { %v10247_v41 = vadd.f32 %v3499_v22, %v3411_v29  ;;  %v3324_v23 = vadd.f32 %v3323_v24, %v3235_v4  ;;  %v8540_v29 = vld [vmem:[#allocation5 + $0x6e0] sm:$0xf0]  ;;  %v8937_v22 = vld [vmem:[#allocation5 + $0x3cc] sm:$0xf] }
 0x46b   :  { %v8543_v45 = vor.u32 %v9033_v40, %v8540_v29  ;;  %v8156_v4 = vld [vmem:[#allocation5 + $0x3e0] sm:$0xf0]  ;;  %v9081_v24 = vld [vmem:[#allocation5 + $0x84c] sm:$0xf] }
 0x46d   :  { %4061 = vmatpush.bf16.msrb.mxu2 %v8543_v45 }
 0x46f   :  { %v3412_v44 = vpop.f32.mrf.mxu2  ;;  %v3237_v36 = vpop.f32.mrf.mxu0 }
 0x470   :  { %v3413_v52 = vadd.f32 %v3412_v44, %v3324_v23  ;;  %v3501_v35 = vpop.f32.mrf.mxu3  ;;  %v3238_v38 = vadd.f32 %v3237_v36, %v10127_v57  ;;  %v3326_v27 = vpop.f32.mrf.mxu1  ;;  %v8732_v23 = vld [vmem:[#allocation5 + $0x860] sm:$0xf0]  ;;  %v8159_v36 = vor.u32 %v8937_v22, %v8156_v4 }
 0x472   :  { %v10250_v8 = vadd.f32 %v3501_v35, %v3413_v52  ;;  %v3327_v47 = vadd.f32 %v3326_v27, %v3238_v38  ;;  %3552 = vmatmul.bf16.gmra.mxu0 %v15575_v58  ;;  %v8735_v52 = vor.u32 %v9081_v24, %v8732_v23  ;;  %v8348_v58 = vld [vmem:[#allocation5 + $0x560] sm:$0xf0] }
 0x473   :  { %3641 = vmatmul.bf16.gmra.mxu1 %v15576_v61  ;;  %3883 = vmatpush.bf16.msrb.mxu0 %v8159_v36  ;;  %v15578_v36 = vld [vmem:[#allocation91_spill] sm:$0xff] }
 0x474   :  { %15574 = vst [vmem:[#allocation176_spill] sm:$0xff] %v10250_v8  ;;  %3730 = vmatmul.bf16.gmra.mxu2 %v15521_v10  ;;  %4150 = vmatpush.bf16.msrb.mxu3 %v8735_v52  ;;  %v8985_v10 = vld [vmem:[#allocation5 + $0x54c] sm:$0xf] }
 0x475   :  { %3819 = vmatmul.bf16.gmra.mxu3 %v15522_v21  ;;  %v8351_v29 = vor.u32 %v8985_v10, %v8348_v58 }
 0x477   :  { %v3415_v44 = vpop.f32.mrf.mxu2  ;;  %v3239_v27 = vpop.f32.mrf.mxu0  ;;  %3972 = vmatpush.bf16.msrb.mxu1 %v8351_v29 }
 0x478   :  { %v3416_v35 = vadd.f32 %v3415_v44, %v3327_v47  ;;  %v3504_v38 = vpop.f32.mrf.mxu3  ;;  %v3240_v46 = vadd.f32 %v3239_v27, %v10127_v57  ;;  %v3328_v61 = vpop.f32.mrf.mxu1  ;;  %v15577_v44 = vld [vmem:[#allocation90_spill] sm:$0xff] }
 0x47a   :  { %v10257_v21 = vadd.f32 %v3504_v38, %v3416_v35  ;;  %v3329_v40 = vadd.f32 %v3328_v61, %v3240_v46 }
 0x47f   :  { %v3417_v8 = vpop.f32.mrf.mxu2  ;;  %v3242_v4 = vpop.f32.mrf.mxu0 }
 0x480   :  { %v3418_v26 = vadd.f32 %v3417_v8, %v3329_v40  ;;  %v3506_v22 = vpop.f32.mrf.mxu3  ;;  %v3243_v47 = vadd.f32 %v3242_v4, %v10127_v57  ;;  %v3331_v24 = vpop.f32.mrf.mxu1 }
 0x482   :  { %v10260_v45 = vadd.f32 %v3506_v22, %v3418_v26  ;;  %v3332_v23 = vadd.f32 %v3331_v24, %v3243_v47  ;;  %3557 = vmatmul.bf16.gmra.mxu0 %v15577_v44 }
 0x483   :  { %3646 = vmatmul.bf16.gmra.mxu1 %v15578_v36 }
 0x484   :  { %3735 = vmatmul.bf16.gmra.mxu2 %v15527_v32 }
 0x485   :  { %3824 = vmatmul.bf16.gmra.mxu3 %v15528_v33  ;;  %v15581_v33 = vld [vmem:[#allocation92_spill] sm:$0xff] }
 0x487   :  { %v3420_v46 = vpop.f32.mrf.mxu2  ;;  %v3244_v8 = vpop.f32.mrf.mxu0 }
 0x488   :  { %v3421_v58 = vadd.f32 %v3420_v46, %v3332_v23  ;;  %v3509_v10 = vpop.f32.mrf.mxu3  ;;  %v3245_v61 = vadd.f32 %v3244_v8, %v10127_v57  ;;  %v3333_v52 = vpop.f32.mrf.mxu1  ;;  %v15582_v23 = vld [vmem:[#allocation93_spill] sm:$0xff]  ;;  %v8931_v8 = vld [vmem:[#allocation5 + $0x39c] sm:$0xf] }
 0x48a   :  { %v10267_v35 = vadd.f32 %v3509_v10, %v3421_v58  ;;  %v3334_v26 = vadd.f32 %v3333_v52, %v3245_v61  ;;  %v9027_v58 = vld [vmem:[#allocation5 + $0x69c] sm:$0xf]  ;;  %v8516_v10 = vld [vmem:[#allocation5 + $0x6b0] sm:$0xf0] }
 0x48c   :  { %15579 = vst [vmem:[#allocation177_spill] sm:$0xff] %v10267_v35 }
 0x48f   :  { %v3422_v38 = vpop.f32.mrf.mxu2  ;;  %v3247_v29 = vpop.f32.mrf.mxu0 }
 0x490   :  { %v3423_v27 = vadd.f32 %v3422_v38, %v3334_v26  ;;  %v3511_v40 = vpop.f32.mrf.mxu3  ;;  %v3248_v22 = vadd.f32 %v3247_v29, %v10127_v57  ;;  %v3336_v4 = vpop.f32.mrf.mxu1  ;;  %v8519_v38 = vor.u32 %v9027_v58, %v8516_v10  ;;  %v8132_v29 = vld [vmem:[#allocation5 + $0x3b0] sm:$0xf0] }
 0x491   :  { %v8135_v32 = vor.u32 %v8931_v8, %v8132_v29 }
 0x492   :  { %v10270_v47 = vadd.f32 %v3511_v40, %v3423_v27  ;;  %v3337_v24 = vadd.f32 %v3336_v4, %v3248_v22  ;;  %3562 = vmatmul.bf16.gmra.mxu0 %v15581_v33  ;;  %v9075_v27 = vld [vmem:[#allocation5 + $0x81c] sm:$0xf]  ;;  %v8708_v40 = vld [vmem:[#allocation5 + $0x830] sm:$0xf0]  ;;  %4062 = vmatpush.bf16.msrb.mxu2 %v8519_v38 }
 0x493   :  { %3651 = vmatmul.bf16.gmra.mxu1 %v15582_v23  ;;  %v8711_v23 = vor.u32 %v9075_v27, %v8708_v40  ;;  %3884 = vmatpush.bf16.msrb.mxu0 %v8135_v32 }
 0x494   :  { %15580 = vst [vmem:[#allocation178_spill] sm:$0xff] %v10270_v47  ;;  %3740 = vmatmul.bf16.gmra.mxu2 %v15532_v5  ;;  %v8324_v5 = vld [vmem:[#allocation5 + $0x530] sm:$0xf0] }
 0x495   :  { %3829 = vmatmul.bf16.gmra.mxu3 %v15533_v12  ;;  %v8979_v12 = vld [vmem:[#allocation5 + $0x51c] sm:$0xf] }
 0x496   :  { %4151 = vmatpush.bf16.msrb.mxu3 %v8711_v23 }
 0x497   :  { %v3425_v46 = vpop.f32.mrf.mxu2  ;;  %v3249_v26 = vpop.f32.mrf.mxu0 }
 0x498   :  { %v3426_v61 = vadd.f32 %v3425_v46, %v3337_v24  ;;  %v3514_v52 = vpop.f32.mrf.mxu3  ;;  %v3250_v22 = vadd.f32 %v3249_v26, %v10127_v57  ;;  %v3338_v4 = vpop.f32.mrf.mxu1  ;;  %v8327_v24 = vor.u32 %v8979_v12, %v8324_v5 }
 0x49a   :  { %v10277_v33 = vadd.f32 %v3514_v52, %v3426_v61  ;;  %v3339_v47 = vadd.f32 %v3338_v4, %v3250_v22  ;;  %3973 = vmatpush.bf16.msrb.mxu1 %v8327_v24  ;;  %v15583_v61 = vld [vmem:[#allocation95_spill] sm:$0xff]  ;;  %v15584_v52 = vld [vmem:[#allocation96_spill] sm:$0xff]  ;;  %v645_v4 = vperm.slane %v10121_v34, 4  ;;  %v8492_v34 = vld [vmem:[#allocation5 + $0x680] sm:$0xf0] }
 0x49f   :  { %v3427_v46 = vpop.f32.mrf.mxu2  ;;  %v3252_v36 = vpop.f32.mrf.mxu0 }
 0x4a0   :  { %v3428_v58 = vadd.f32 %v3427_v46, %v3339_v47  ;;  %v3516_v10 = vpop.f32.mrf.mxu3  ;;  %v3253_v44 = vadd.f32 %v3252_v36, %v10127_v57  ;;  %v3341_v26 = vpop.f32.mrf.mxu1 }
 0x4a2   :  { %v10280_v35 = vadd.f32 %v3516_v10, %v3428_v58  ;;  %v3342_v8 = vadd.f32 %v3341_v26, %v3253_v44  ;;  %3567 = vmatmul.bf16.gmra.mxu0 %v15583_v61  ;;  %v15586_v26 = vld [vmem:[#allocation97_spill] sm:$0xff] }
 0x4a3   :  { %3656 = vmatmul.bf16.gmra.mxu1 %v15584_v52 }
 0x4a4   :  { %3745 = vmatmul.bf16.gmra.mxu2 %v15538_v49 }
 0x4a5   :  { %3834 = vmatmul.bf16.gmra.mxu3 %v15539_v3 }
 0x4a7   :  { %v3430_v32 = vpop.f32.mrf.mxu2  ;;  %v3254_v47 = vpop.f32.mrf.mxu0 }
 0x4a8   :  { %v3431_v5 = vadd.f32 %v3430_v32, %v3342_v8  ;;  %v3519_v12 = vpop.f32.mrf.mxu3  ;;  %v3255_v23 = vadd.f32 %v3254_v47, %v10127_v57  ;;  %v3343_v38 = vpop.f32.mrf.mxu1  ;;  %v15587_v57 = vld [vmem:[#allocation98_spill] sm:$0xff]  ;;  %v10298_v8 = vperm.slane %v645_v4, 0 }
 0x4aa   :  { %v10287_v36 = vadd.f32 %v3519_v12, %v3431_v5  ;;  %v3344_v29 = vadd.f32 %v3343_v38, %v3255_v23  ;;  %v9021_v5 = vld [vmem:[#allocation5 + $0x66c] sm:$0xf] }
 0x4ab   :  { %v8925_v12 = vld [vmem:[#allocation5 + $0x36c] sm:$0xf]  ;;  %v8495_v38 = vor.u32 %v9021_v5, %v8492_v34 }
 0x4ad   :  { %4063 = vmatpush.bf16.msrb.mxu2 %v8495_v38 }
 0x4af   :  { %v3432_v27 = vpop.f32.mrf.mxu2  ;;  %v3533_v22 = vpop.f32.mrf.mxu0 }
 0x4b0   :  { %v3433_v44 = vadd.f32 %v3432_v27, %v3344_v29  ;;  %v3521_v40 = vpop.f32.mrf.mxu3  ;;  %v3534_v24 = vadd.f32 %v3533_v22, %v10137_v39  ;;  %v3622_v46 = vpop.f32.mrf.mxu1  ;;  %v8108_v29 = vld [vmem:[#allocation5 + $0x380] sm:$0xf0]  ;;  %v9069_v27 = vld [vmem:[#allocation5 + $0x7ec] sm:$0xf] }
 0x4b2   :  { %v10291_v58 = vadd.f32 %v3521_v40, %v3433_v44  ;;  %v10293_v10 = vadd.f32 %v3622_v46, %v3534_v24  ;;  %3572 = vmatmul.bf16.gmra.mxu0 %v15586_v26  ;;  %v8684_v44 = vld [vmem:[#allocation5 + $0x800] sm:$0xf0]  ;;  %v8111_v24 = vor.u32 %v8925_v12, %v8108_v29 }
 0x4b3   :  { %3661 = vmatmul.bf16.gmra.mxu1 %v15587_v57  ;;  %v8687_v4 = vor.u32 %v9069_v27, %v8684_v44 }
 0x4b4   :  { %15585 = vst [vmem:[#allocation179_spill] sm:$0xff] %v10293_v10  ;;  %3750 = vmatmul.bf16.gmra.mxu2 %v15544_v60  ;;  %v8973_v10 = vld [vmem:[#allocation5 + $0x4ec] sm:$0xf]  ;;  %3885 = vmatpush.bf16.msrb.mxu0 %v8111_v24 }
 0x4b5   :  { %3839 = vmatmul.bf16.gmra.mxu3 %v15545_v19  ;;  %v8300_v19 = vld [vmem:[#allocation5 + $0x500] sm:$0xf0] }
 0x4b6   :  { %4152 = vmatpush.bf16.msrb.mxu3 %v8687_v4 }
 0x4b7   :  { %v3711_v32 = vpop.f32.mrf.mxu2  ;;  %v3535_v23 = vpop.f32.mrf.mxu0 }
 0x4b8   :  { %v3712_v39 = vadd.f32 %v3711_v32, %v10298_v8  ;;  %v3800_v47 = vpop.f32.mrf.mxu3  ;;  %v3536_v40 = vadd.f32 %v3535_v23, %v10140_v2  ;;  %v3624_v22 = vpop.f32.mrf.mxu1  ;;  %v8303_v32 = vor.u32 %v8973_v10, %v8300_v19 }
 0x4ba   :  { %v10303_v46 = vadd.f32 %v3800_v47, %v3712_v39  ;;  %v10305_v60 = vadd.f32 %v3624_v22, %v3536_v40  ;;  %3974 = vmatpush.bf16.msrb.mxu1 %v8303_v32 }
 0x4bc   :  { %15588 = vst [vmem:[#allocation180_spill] sm:$0xff] %v10305_v60 }
 0x4bf   :  { %v3713_v5 = vpop.f32.mrf.mxu2  ;;  %v3538_v49 = vpop.f32.mrf.mxu0 }
 0x4c0   :  { %v3714_v34 = vadd.f32 %v3713_v5, %v10298_v8  ;;  %v3802_v3 = vpop.f32.mrf.mxu3  ;;  %v3539_v2 = vadd.f32 %v3538_v49, %v10147_v56  ;;  %v3627_v12 = vpop.f32.mrf.mxu1 }
 0x4c2   :  { %v10309_v23 = vadd.f32 %v3802_v3, %v3714_v34  ;;  %v10311_v39 = vadd.f32 %v3627_v12, %v3539_v2  ;;  %3577 = vmatmul.bf16.gmra.mxu0 %v9695_v18  ;;  %v9015_v34 = vld [vmem:[#allocation5 + $0x63c] sm:$0xf]  ;;  %v8468_v2 = vld [vmem:[#allocation5 + $0x650] sm:$0xf0] }
 0x4c3   :  { %3666 = vmatmul.bf16.gmra.mxu1 %v9698_v53  ;;  %v8919_v12 = vld [vmem:[#allocation5 + $0x33c] sm:$0xf] }
 0x4c4   :  { %15589 = vst [vmem:[#allocation181_spill] sm:$0xff] %v10311_v39  ;;  %3755 = vmatmul.bf16.gmra.mxu2 %v15548_v16  ;;  %v8911_v16 = vld [vmem:[#allocation5 + $0x2f4] sm:$0xf0] }
 0x4c5   :  { %3844 = vmatmul.bf16.gmra.mxu3 %v15549_v17 }
 0x4c7   :  { %v3716_v19 = vpop.f32.mrf.mxu2  ;;  %v3540_v38 = vpop.f32.mrf.mxu0 }
 0x4c8   :  { %v3717_v10 = vadd.f32 %v3716_v19, %v10298_v8  ;;  %v3805_v47 = vpop.f32.mrf.mxu3  ;;  %v3541_v49 = vadd.f32 %v3540_v38, %v10150_v25  ;;  %v3629_v56 = vpop.f32.mrf.mxu1  ;;  %v8084_v38 = vld [vmem:[#allocation5 + $0x350] sm:$0xf0] }
 0x4ca   :  { %v10319_v3 = vadd.f32 %v3805_v47, %v3717_v10  ;;  %v10321_v29 = vadd.f32 %v3629_v56, %v3541_v49  ;;  %v8471_v47 = vor.u32 %v9015_v34, %v8468_v2  ;;  %v9063_v49 = vld [vmem:[#allocation5 + $0x7bc] sm:$0xf]  ;;  %v8660_v56 = vld [vmem:[#allocation5 + $0x7d0] sm:$0xf0] }
 0x4cc   :  { %15590 = vst [vmem:[#allocation182_spill] sm:$0xff] %v10321_v29  ;;  %4064 = vmatpush.bf16.msrb.mxu2 %v8471_v47 }
 0x4cf   :  { %v3718_v27 = vpop.f32.mrf.mxu2  ;;  %v3543_v22 = vpop.f32.mrf.mxu0 }
 0x4d0   :  { %v3719_v44 = vadd.f32 %v3718_v27, %v10298_v8  ;;  %v3807_v40 = vpop.f32.mrf.mxu3  ;;  %v3544_v24 = vadd.f32 %v3543_v22, %v10157_v54  ;;  %v3632_v4 = vpop.f32.mrf.mxu1  ;;  %v8663_v22 = vor.u32 %v9063_v49, %v8660_v56 }
 0x4d2   :  { %v10325_v32 = vadd.f32 %v3807_v40, %v3719_v44  ;;  %v10327_v5 = vadd.f32 %v3632_v4, %v3544_v24  ;;  %3582 = vmatmul.bf16.gmra.mxu0 %v9715_v0  ;;  %v8087_v40 = vor.u32 %v8919_v12, %v8084_v38  ;;  %v8967_v4 = vld [vmem:[#allocation5 + $0x4bc] sm:$0xf]  ;;  %4153 = vmatpush.bf16.msrb.mxu3 %v8663_v22 }
 0x4d3   :  { %3671 = vmatmul.bf16.gmra.mxu1 %v9718_v13 }
 0x4d4   :  { %15591 = vst [vmem:[#allocation183_spill] sm:$0xff] %v10327_v5  ;;  %3760 = vmatmul.bf16.gmra.mxu2 %v15550_v6  ;;  %v8276_v5 = vld [vmem:[#allocation5 + $0x4d0] sm:$0xf0]  ;;  %3886 = vmatpush.bf16.msrb.mxu0 %v8087_v40 }
 0x4d5   :  { %3849 = vmatmul.bf16.gmra.mxu3 %v15551_v48 }
 0x4d7   :  { %v3721_v25 = vpop.f32.mrf.mxu2  ;;  %v3545_v10 = vpop.f32.mrf.mxu0 }
 0x4d8   :  { %v3722_v19 = vadd.f32 %v3721_v25, %v10298_v8  ;;  %v3810_v54 = vpop.f32.mrf.mxu3  ;;  %v3546_v27 = vadd.f32 %v3545_v10, %v10160_v1  ;;  %v3634_v44 = vpop.f32.mrf.mxu1  ;;  %v8279_v25 = vor.u32 %v8967_v4, %v8276_v5  ;;  %v15595_v5 = vld [vmem:[#allocation57_spill] sm:$0xff] }
 0x4da   :  { %v10335_v24 = vadd.f32 %v3810_v54, %v3722_v19  ;;  %v10337_v29 = vadd.f32 %v3634_v44, %v3546_v27  ;;  %3975 = vmatpush.bf16.msrb.mxu1 %v8279_v25  ;;  %v15594_v54 = vld [vmem:[#allocation110_spill] sm:$0xff]  ;;  %v15596_v27 = vld [vmem:[#allocation172_spill] sm:$0xff] }
 0x4dc   :  { %15592 = vst [vmem:[#allocation184_spill] sm:$0xff] %v10337_v29 }
 0x4df   :  { %v3723_v34 = vpop.f32.mrf.mxu2  ;;  %v3548_v60 = vpop.f32.mrf.mxu0 }
 0x4e0   :  { %v3724_v2 = vadd.f32 %v3723_v34, %v10298_v8  ;;  %v3812_v39 = vpop.f32.mrf.mxu3  ;;  %v3549_v1 = vadd.f32 %v3548_v60, %v10167_v55  ;;  %v3637_v12 = vpop.f32.mrf.mxu1 }
 0x4e2   :  { %v10341_v10 = vadd.f32 %v3812_v39, %v3724_v2  ;;  %v10343_v19 = vadd.f32 %v3637_v12, %v3549_v1  ;;  %3587 = vmatmul.bf16.gmra.mxu0 %v9735_v31 }
 0x4e3   :  { %3676 = vmatmul.bf16.gmra.mxu1 %v15594_v54 }
 0x4e4   :  { %15593 = vst [vmem:[#allocation185_spill] sm:$0xff] %v10343_v19  ;;  %3765 = vmatmul.bf16.gmra.mxu2 %v15552_v20  ;;  %v8252_v20 = vld [vmem:[#allocation5 + $0x4a0] sm:$0xf0] }
 0x4e5   :  { %3854 = vmatmul.bf16.gmra.mxu3 %v15595_v5 }
 0x4e7   :  { %v3726_v47 = vpop.f32.mrf.mxu2  ;;  %v3550_v56 = vpop.f32.mrf.mxu0 }
 0x4e8   :  { %v3727_v38 = vadd.f32 %v3726_v47, %v10298_v8  ;;  %v3815_v49 = vpop.f32.mrf.mxu3  ;;  %v3551_v60 = vadd.f32 %v3550_v56, %v15596_v27  ;;  %v3639_v55 = vpop.f32.mrf.mxu1  ;;  %v15599_v47 = vld [vmem:[#allocation113_spill] sm:$0xff]  ;;  %v15600_v56 = vld [vmem:[#allocation114_spill] sm:$0xff] }
 0x4ea   :  { %v10351_v39 = vadd.f32 %v3815_v49, %v3727_v38  ;;  %v10353_v44 = vadd.f32 %v3639_v55, %v3551_v60  ;;  %v15601_v38 = vld [vmem:[#allocation60_spill] sm:$0xff]  ;;  %v15602_v49 = vld [vmem:[#allocation61_spill] sm:$0xff]  ;;  %v9009_v60 = vld [vmem:[#allocation5 + $0x60c] sm:$0xf] }
 0x4eb   :  { %v8444_v55 = vld [vmem:[#allocation5 + $0x620] sm:$0xf0] }
 0x4ec   :  { %15597 = vst [vmem:[#allocation172_spill] sm:$0xff] %v10353_v44 }
 0x4ef   :  { %v3728_v40 = vpop.f32.mrf.mxu2  ;;  %v3553_v25 = vpop.f32.mrf.mxu0 }
 0x4f0   :  { %v3729_v22 = vadd.f32 %v3728_v40, %v10298_v8  ;;  %v3817_v4 = vpop.f32.mrf.mxu3  ;;  %v3554_v34 = vadd.f32 %v3553_v25, %v10177_v14  ;;  %v3642_v2 = vpop.f32.mrf.mxu1  ;;  %v8913_v40 = vld [vmem:[#allocation5 + $0x30c] sm:$0xf] }
 0x4f2   :  { %v10357_v1 = vadd.f32 %v3817_v4, %v3729_v22  ;;  %v10359_v12 = vadd.f32 %v3642_v2, %v3554_v34  ;;  %3592 = vmatmul.bf16.gmra.mxu0 %v15599_v47  ;;  %v8447_v22 = vor.u32 %v9009_v60, %v8444_v55  ;;  %v8060_v4 = vld [vmem:[#allocation5 + $0x320] sm:$0xf0]  ;;  %v9057_v34 = vld [vmem:[#allocation5 + $0x78c] sm:$0xf] }
 0x4f3   :  { %3681 = vmatmul.bf16.gmra.mxu1 %v15600_v56  ;;  %v8636_v2 = vld [vmem:[#allocation5 + $0x7a0] sm:$0xf0]  ;;  %v8063_v29 = vor.u32 %v8913_v40, %v8060_v4 }
 0x4f4   :  { %15598 = vst [vmem:[#allocation186_spill] sm:$0xff] %v10359_v12  ;;  %3770 = vmatmul.bf16.gmra.mxu2 %v15601_v38  ;;  %v8639_v5 = vor.u32 %v9057_v34, %v8636_v2 }
 0x4f5   :  { %3859 = vmatmul.bf16.gmra.mxu3 %v15602_v49  ;;  %4065 = vmatpush.bf16.msrb.mxu2 %v8447_v22  ;;  %v8961_v49 = vld [vmem:[#allocation5 + $0x48c] sm:$0xf]  ;;  %v15608_v22 = vld [vmem:[#allocation173_spill] sm:$0xff] }
 0x4f6   :  { %3887 = vmatpush.bf16.msrb.mxu0 %v8063_v29  ;;  %4154 = vmatpush.bf16.msrb.mxu3 %v8639_v5 }
 0x4f7   :  { %v3731_v27 = vpop.f32.mrf.mxu2  ;;  %v3555_v25 = vpop.f32.mrf.mxu0 }
 0x4f8   :  { %v3732_v44 = vadd.f32 %v3731_v27, %v10298_v8  ;;  %v3820_v14 = vpop.f32.mrf.mxu3  ;;  %v3556_v12 = vadd.f32 %v3555_v25, %v10180_v15  ;;  %v3644_v19 = vpop.f32.mrf.mxu1  ;;  %v8255_v27 = vor.u32 %v8961_v49, %v8252_v20  ;;  %v15607_v20 = vld [vmem:[#allocation65_spill] sm:$0xff] }
 0x4fa   :  { %v10367_v38 = vadd.f32 %v3820_v14, %v3732_v44  ;;  %v10369_v48 = vadd.f32 %v3644_v19, %v3556_v12  ;;  %3976 = vmatpush.bf16.msrb.mxu1 %v8255_v27  ;;  %v15605_v14 = vld [vmem:[#allocation117_spill] sm:$0xff]  ;;  %v15606_v19 = vld [vmem:[#allocation118_spill] sm:$0xff] }
 0x4fc   :  { %15603 = vst [vmem:[#allocation187_spill] sm:$0xff] %v10369_v48 }
 0x4ff   :  { %v3733_v60 = vpop.f32.mrf.mxu2  ;;  %v3558_v17 = vpop.f32.mrf.mxu0 }
 0x500   :  { %v3734_v55 = vadd.f32 %v3733_v60, %v10298_v8  ;;  %v3822_v6 = vpop.f32.mrf.mxu3  ;;  %v3559_v15 = vadd.f32 %v3558_v17, %v10187_v42  ;;  %v3647_v40 = vpop.f32.mrf.mxu1 }
 0x502   :  { %v10373_v25 = vadd.f32 %v3822_v6, %v3734_v55  ;;  %v10375_v44 = vadd.f32 %v3647_v40, %v3559_v15  ;;  %3597 = vmatmul.bf16.gmra.mxu0 %v15605_v14 }
 0x503   :  { %3686 = vmatmul.bf16.gmra.mxu1 %v15606_v19 }
 0x504   :  { %15604 = vst [vmem:[#allocation188_spill] sm:$0xff] %v10375_v44  ;;  %3775 = vmatmul.bf16.gmra.mxu2 %v15557_v7  ;;  %v15612_v44 = vld [vmem:[#allocation121_spill] sm:$0xff] }
 0x505   :  { %3864 = vmatmul.bf16.gmra.mxu3 %v15607_v20 }
 0x507   :  { %v3736_v29 = vpop.f32.mrf.mxu2  ;;  %v3560_v49 = vpop.f32.mrf.mxu0 }
 0x508   :  { %v3737_v5 = vadd.f32 %v3736_v29, %v10298_v8  ;;  %v3825_v12 = vpop.f32.mrf.mxu3  ;;  %v3561_v17 = vadd.f32 %v3560_v49, %v15608_v22  ;;  %v3649_v42 = vpop.f32.mrf.mxu1  ;;  %v15613_v49 = vld [vmem:[#allocation122_spill] sm:$0xff] }
 0x50a   :  { %v10383_v6 = vadd.f32 %v3825_v12, %v3737_v5  ;;  %v10385_v4 = vadd.f32 %v3649_v42, %v3561_v17  ;;  %v15614_v5 = vld [vmem:[#allocation68_spill] sm:$0xff]  ;;  %v15615_v12 = vld [vmem:[#allocation69_spill] sm:$0xff] }
 0x50b   :  { %v8234_v17 = vld [vmem:[#allocation5 + $0x460] sm:$0xf]  ;;  %v8959_v42 = vld [vmem:[#allocation5 + $0x474] sm:$0xf0] }
 0x50c   :  { %15609 = vst [vmem:[#allocation173_spill] sm:$0xff] %v10385_v4 }
 0x50f   :  { %v3738_v34 = vpop.f32.mrf.mxu2  ;;  %v3563_v60 = vpop.f32.mrf.mxu0 }
 0x510   :  { %v3739_v2 = vadd.f32 %v3738_v34, %v10298_v8  ;;  %v3827_v27 = vpop.f32.mrf.mxu3  ;;  %v3564_v55 = vadd.f32 %v3563_v60, %v10197_v37  ;;  %v3652_v15 = vpop.f32.mrf.mxu1  ;;  %v7850_v34 = vld [vmem:[#allocation5 + $0x160] sm:$0xf] }
 0x512   :  { %v10389_v40 = vadd.f32 %v3827_v27, %v3739_v2  ;;  %v10391_v29 = vadd.f32 %v3652_v15, %v3564_v55  ;;  %3602 = vmatmul.bf16.gmra.mxu0 %v15612_v44  ;;  %v8235_v2 = vor.u32 %v8959_v42, %v8234_v17  ;;  %v8863_v27 = vld [vmem:[#allocation5 + $0x174] sm:$0xf0]  ;;  %v8426_v55 = vld [vmem:[#allocation5 + $0x5e0] sm:$0xf] }
 0x513   :  { %3691 = vmatmul.bf16.gmra.mxu1 %v15613_v49  ;;  %v9007_v15 = vld [vmem:[#allocation5 + $0x5f4] sm:$0xf0]  ;;  %v7851_v20 = vor.u32 %v8863_v27, %v7850_v34 }
 0x514   :  { %15610 = vst [vmem:[#allocation189_spill] sm:$0xff] %v10389_v40  ;;  %3780 = vmatmul.bf16.gmra.mxu2 %v15614_v5  ;;  %v8427_v7 = vor.u32 %v9007_v15, %v8426_v55 }
 0x515   :  { %15611 = vst [vmem:[#allocation190_spill] sm:$0xff] %v10391_v29  ;;  %3869 = vmatmul.bf16.gmra.mxu3 %v15615_v12  ;;  %4414 = vmatpush.bf16.msra.mxu2 %v8235_v2  ;;  %v8042_v12 = vld [vmem:[#allocation5 + $0x2e0] sm:$0xf]  ;;  %v15621_v2 = vld [vmem:[#allocation174_spill] sm:$0xff] }
 0x516   :  { %4236 = vmatpush.bf16.msra.mxu0 %v7851_v20  ;;  %4503 = vmatpush.bf16.msra.mxu3 %v8427_v7 }
 0x517   :  { %v3741_v22 = vpop.f32.mrf.mxu2  ;;  %v3565_v60 = vpop.f32.mrf.mxu0 }
 0x518   :  { %v3742_v4 = vadd.f32 %v3741_v22, %v10298_v8  ;;  %v3830_v37 = vpop.f32.mrf.mxu3  ;;  %v3566_v29 = vadd.f32 %v3565_v60, %v10200_v9  ;;  %v3654_v48 = vpop.f32.mrf.mxu1  ;;  %v8043_v22 = vor.u32 %v8911_v16, %v8042_v12  ;;  %v15620_v16 = vld [vmem:[#allocation73_spill] sm:$0xff] }
 0x51a   :  { %v10399_v5 = vadd.f32 %v3830_v37, %v3742_v4  ;;  %v10401_v49 = vadd.f32 %v3654_v48, %v3566_v29  ;;  %4325 = vmatpush.bf16.msra.mxu1 %v8043_v22  ;;  %v15618_v37 = vld [vmem:[#allocation125_spill] sm:$0xff]  ;;  %v15619_v48 = vld [vmem:[#allocation126_spill] sm:$0xff] }
 0x51c   :  { %15616 = vst [vmem:[#allocation191_spill] sm:$0xff] %v10401_v49 }
 0x51f   :  { %v3743_v17 = vpop.f32.mrf.mxu2  ;;  %v3568_v40 = vpop.f32.mrf.mxu0 }
 0x520   :  { %v3744_v42 = vadd.f32 %v3743_v17, %v10298_v8  ;;  %v3832_v44 = vpop.f32.mrf.mxu3  ;;  %v3569_v9 = vadd.f32 %v3568_v40, %v10207_v50  ;;  %v3657_v34 = vpop.f32.mrf.mxu1 }
 0x522   :  { %v10405_v60 = vadd.f32 %v3832_v44, %v3744_v42  ;;  %v10407_v4 = vadd.f32 %v3657_v34, %v3569_v9  ;;  %3607 = vmatmul.bf16.gmra.mxu0 %v15618_v37 }
 0x523   :  { %3696 = vmatmul.bf16.gmra.mxu1 %v15619_v48 }
 0x524   :  { %15617 = vst [vmem:[#allocation192_spill] sm:$0xff] %v10407_v4  ;;  %3785 = vmatmul.bf16.gmra.mxu2 %v15562_v51  ;;  %v15625_v4 = vld [vmem:[#allocation14_spill] sm:$0xff] }
 0x525   :  { %3874 = vmatmul.bf16.gmra.mxu3 %v15620_v16 }
 0x527   :  { %v3746_v7 = vpop.f32.mrf.mxu2  ;;  %v3570_v12 = vpop.f32.mrf.mxu0 }
 0x528   :  { %v3747_v20 = vadd.f32 %v3746_v7, %v10298_v8  ;;  %v3835_v29 = vpop.f32.mrf.mxu3  ;;  %v3571_v50 = vadd.f32 %v3570_v12, %v15621_v2  ;;  %v3659_v40 = vpop.f32.mrf.mxu1  ;;  %v15626_v12 = vld [vmem:[#allocation15_spill] sm:$0xff] }
 0x52a   :  { %v10415_v44 = vadd.f32 %v3835_v29, %v3747_v20  ;;  %v10417_v27 = vadd.f32 %v3659_v40, %v3571_v50  ;;  %v15627_v20 = vld [vmem:[#allocation77_spill] sm:$0xff]  ;;  %v15628_v29 = vld [vmem:[#allocation78_spill] sm:$0xff]  ;;  %v8210_v50 = vld [vmem:[#allocation5 + $0x430] sm:$0xf] }
 0x52b   :  { %v8953_v40 = vld [vmem:[#allocation5 + $0x444] sm:$0xf0] }
 0x52c   :  { %15622 = vst [vmem:[#allocation174_spill] sm:$0xff] %v10417_v27 }
 0x52f   :  { %v3748_v55 = vpop.f32.mrf.mxu2  ;;  %v3573_v17 = vpop.f32.mrf.mxu0 }
 0x530   :  { %v3749_v15 = vadd.f32 %v3748_v55, %v10298_v8  ;;  %v3837_v22 = vpop.f32.mrf.mxu3  ;;  %v3574_v42 = vadd.f32 %v3573_v17, %v10217_v43  ;;  %v3662_v9 = vpop.f32.mrf.mxu1  ;;  %v7826_v55 = vld [vmem:[#allocation5 + $0x130] sm:$0xf] }
 0x532   :  { %v10421_v34 = vadd.f32 %v3837_v22, %v3749_v15  ;;  %v10423_v7 = vadd.f32 %v3662_v9, %v3574_v42  ;;  %3888 = vmatmul.bf16.vlgmr.msrb.gmra.mxu0 %v15625_v4  ;;  %v8211_v15 = vor.u32 %v8953_v40, %v8210_v50  ;;  %v8857_v22 = vld [vmem:[#allocation5 + $0x144] sm:$0xf0]  ;;  %v8402_v42 = vld [vmem:[#allocation5 + $0x5b0] sm:$0xf] }
 0x533   :  { %3977 = vmatmul.bf16.vlgmr.msrb.gmra.mxu1 %v15626_v12  ;;  %v9001_v9 = vld [vmem:[#allocation5 + $0x5c4] sm:$0xf0]  ;;  %v7827_v16 = vor.u32 %v8857_v22, %v7826_v55 }
 0x534   :  { %15623 = vst [vmem:[#allocation193_spill] sm:$0xff] %v10421_v34  ;;  %4066 = vmatmul.bf16.vlgmr.msrb.gmra.mxu2 %v15627_v20  ;;  %v8403_v51 = vor.u32 %v9001_v9, %v8402_v42  ;;  %v8905_v12 = vld [vmem:[#allocation5 + $0x2c4] sm:$0xf0] }
 0x535   :  { %15624 = vst [vmem:[#allocation194_spill] sm:$0xff] %v10423_v7  ;;  %4155 = vmatmul.bf16.vlgmr.msrb.gmra.mxu3 %v15628_v29  ;;  %4415 = vmatpush.bf16.msra.mxu2 %v8211_v15  ;;  %v8018_v29 = vld [vmem:[#allocation5 + $0x2b0] sm:$0xf] }
 0x536   :  { %4237 = vmatpush.bf16.msra.mxu0 %v7827_v16  ;;  %4504 = vmatpush.bf16.msra.mxu3 %v8403_v51  ;;  %v15633_v51 = vld [vmem:[#allocation81_spill] sm:$0xff]  ;;  %v15634_v15 = vld [vmem:[#allocation175_spill] sm:$0xff] }
 0x537   :  { %v3751_v2 = vpop.f32.mrf.mxu2  ;;  %v3575_v17 = vpop.f32.mrf.mxu0 }
 0x538   :  { %v3752_v27 = vadd.f32 %v3751_v2, %v10298_v8  ;;  %v3840_v43 = vpop.f32.mrf.mxu3  ;;  %v3576_v7 = vadd.f32 %v3575_v17, %v10220_v28  ;;  %v3664_v49 = vpop.f32.mrf.mxu1  ;;  %v8019_v2 = vor.u32 %v8905_v12, %v8018_v29 }
 0x53a   :  { %v10431_v20 = vadd.f32 %v3840_v43, %v3752_v27  ;;  %v10433_v4 = vadd.f32 %v3664_v49, %v3576_v7  ;;  %4326 = vmatpush.bf16.msra.mxu1 %v8019_v2  ;;  %v15631_v43 = vld [vmem:[#allocation18_spill] sm:$0xff]  ;;  %v15632_v49 = vld [vmem:[#allocation19_spill] sm:$0xff] }
 0x53c   :  { %15629 = vst [vmem:[#allocation195_spill] sm:$0xff] %v10433_v4 }
 0x53f   :  { %v3753_v50 = vpop.f32.mrf.mxu2  ;;  %v3578_v48 = vpop.f32.mrf.mxu0 }
 0x540   :  { %v3754_v40 = vadd.f32 %v3753_v50, %v10298_v8  ;;  %v3842_v34 = vpop.f32.mrf.mxu3  ;;  %v3579_v28 = vadd.f32 %v3578_v48, %v10227_v11  ;;  %v3667_v55 = vpop.f32.mrf.mxu1 }
 0x542   :  { %v10437_v17 = vadd.f32 %v3842_v34, %v3754_v40  ;;  %v10439_v27 = vadd.f32 %v3667_v55, %v3579_v28  ;;  %3893 = vmatmul.bf16.gmra.mxu0 %v15631_v43 }
 0x543   :  { %3982 = vmatmul.bf16.gmra.mxu1 %v15632_v49 }
 0x544   :  { %15630 = vst [vmem:[#allocation196_spill] sm:$0xff] %v10439_v27  ;;  %4071 = vmatmul.bf16.gmra.mxu2 %v15567_v59  ;;  %v15638_v27 = vld [vmem:[#allocation22_spill] sm:$0xff] }
 0x545   :  { %4160 = vmatmul.bf16.gmra.mxu3 %v15633_v51 }
 0x547   :  { %v3756_v16 = vpop.f32.mrf.mxu2  ;;  %v3580_v29 = vpop.f32.mrf.mxu0 }
 0x548   :  { %v3757_v7 = vadd.f32 %v3756_v16, %v10298_v8  ;;  %v3845_v12 = vpop.f32.mrf.mxu3  ;;  %v3581_v11 = vadd.f32 %v3580_v29, %v15634_v15  ;;  %v3669_v48 = vpop.f32.mrf.mxu1  ;;  %v15639_v29 = vld [vmem:[#allocation23_spill] sm:$0xff] }
 0x54a   :  { %v10447_v34 = vadd.f32 %v3845_v12, %v3757_v7  ;;  %v10449_v22 = vadd.f32 %v3669_v48, %v3581_v11  ;;  %v15640_v7 = vld [vmem:[#allocation82_spill] sm:$0xff]  ;;  %v15641_v12 = vld [vmem:[#allocation83_spill] sm:$0xff]  ;;  %v8186_v11 = vld [vmem:[#allocation5 + $0x400] sm:$0xf] }
 0x54b   :  { %v8947_v48 = vld [vmem:[#allocation5 + $0x414] sm:$0xf0] }
 0x54c   :  { %15635 = vst [vmem:[#allocation175_spill] sm:$0xff] %v10449_v22 }
 0x54f   :  { %v3758_v42 = vpop.f32.mrf.mxu2  ;;  %v3583_v50 = vpop.f32.mrf.mxu0 }
 0x550   :  { %v3759_v9 = vadd.f32 %v3758_v42, %v10298_v8  ;;  %v3847_v2 = vpop.f32.mrf.mxu3  ;;  %v3584_v40 = vadd.f32 %v3583_v50, %v10237_v62  ;;  %v3672_v28 = vpop.f32.mrf.mxu1  ;;  %v7802_v42 = vld [vmem:[#allocation5 + $0x100] sm:$0xf] }
 0x552   :  { %v10453_v55 = vadd.f32 %v3847_v2, %v3759_v9  ;;  %v10455_v16 = vadd.f32 %v3672_v28, %v3584_v40  ;;  %3898 = vmatmul.bf16.gmra.mxu0 %v15638_v27  ;;  %v8187_v9 = vor.u32 %v8947_v48, %v8186_v11  ;;  %v8851_v2 = vld [vmem:[#allocation5 + $0x114] sm:$0xf0]  ;;  %v8378_v40 = vld [vmem:[#allocation5 + $0x580] sm:$0xf] }
 0x553   :  { %3987 = vmatmul.bf16.gmra.mxu1 %v15639_v29  ;;  %v8995_v28 = vld [vmem:[#allocation5 + $0x594] sm:$0xf0]  ;;  %v7803_v51 = vor.u32 %v8851_v2, %v7802_v42 }
 0x554   :  { %15636 = vst [vmem:[#allocation197_spill] sm:$0xff] %v10453_v55  ;;  %4076 = vmatmul.bf16.gmra.mxu2 %v15640_v7  ;;  %v8379_v59 = vor.u32 %v8995_v28, %v8378_v40  ;;  %v8899_v29 = vld [vmem:[#allocation5 + $0x294] sm:$0xf0] }
 0x555   :  { %15637 = vst [vmem:[#allocation198_spill] sm:$0xff] %v10455_v16  ;;  %4165 = vmatmul.bf16.gmra.mxu3 %v15641_v12  ;;  %4416 = vmatpush.bf16.msra.mxu2 %v8187_v9  ;;  %v7994_v12 = vld [vmem:[#allocation5 + $0x280] sm:$0xf]  ;;  %v15647_v9 = vld [vmem:[#allocation176_spill] sm:$0xff] }
 0x556   :  { %4238 = vmatpush.bf16.msra.mxu0 %v7803_v51  ;;  %4505 = vmatpush.bf16.msra.mxu3 %v8379_v59  ;;  %v15646_v59 = vld [vmem:[#allocation86_spill] sm:$0xff] }
 0x557   :  { %v3761_v15 = vpop.f32.mrf.mxu2  ;;  %v3585_v50 = vpop.f32.mrf.mxu0 }
 0x558   :  { %v3762_v22 = vadd.f32 %v3761_v15, %v10298_v8  ;;  %v3850_v62 = vpop.f32.mrf.mxu3  ;;  %v3586_v16 = vadd.f32 %v3585_v50, %v10240_v63  ;;  %v3674_v4 = vpop.f32.mrf.mxu1  ;;  %v7995_v15 = vor.u32 %v8899_v29, %v7994_v12 }
 0x55a   :  { %v10463_v7 = vadd.f32 %v3850_v62, %v3762_v22  ;;  %v10465_v27 = vadd.f32 %v3674_v4, %v3586_v16  ;;  %4327 = vmatpush.bf16.msra.mxu1 %v7995_v15  ;;  %v15644_v62 = vld [vmem:[#allocation26_spill] sm:$0xff]  ;;  %v15645_v4 = vld [vmem:[#allocation27_spill] sm:$0xff] }
 0x55c   :  { %15642 = vst [vmem:[#allocation199_spill] sm:$0xff] %v10465_v27 }
 0x55f   :  { %v3763_v11 = vpop.f32.mrf.mxu2  ;;  %v3588_v49 = vpop.f32.mrf.mxu0 }
 0x560   :  { %v3764_v48 = vadd.f32 %v3763_v11, %v10298_v8  ;;  %v3852_v55 = vpop.f32.mrf.mxu3  ;;  %v3589_v63 = vadd.f32 %v3588_v49, %v10247_v41  ;;  %v3677_v42 = vpop.f32.mrf.mxu1 }
 0x562   :  { %v10469_v50 = vadd.f32 %v3852_v55, %v3764_v48  ;;  %v10471_v22 = vadd.f32 %v3677_v42, %v3589_v63  ;;  %3903 = vmatmul.bf16.gmra.mxu0 %v15644_v62 }
 0x563   :  { %3992 = vmatmul.bf16.gmra.mxu1 %v15645_v4 }
 0x564   :  { %15643 = vst [vmem:[#allocation200_spill] sm:$0xff] %v10471_v22  ;;  %4081 = vmatmul.bf16.gmra.mxu2 %v15572_v30  ;;  %v15651_v22 = vld [vmem:[#allocation30_spill] sm:$0xff] }
 0x565   :  { %4170 = vmatmul.bf16.gmra.mxu3 %v15646_v59 }
 0x567   :  { %v3766_v51 = vpop.f32.mrf.mxu2  ;;  %v3590_v12 = vpop.f32.mrf.mxu0 }
 0x568   :  { %v3767_v16 = vadd.f32 %v3766_v51, %v10298_v8  ;;  %v3855_v29 = vpop.f32.mrf.mxu3  ;;  %v3591_v41 = vadd.f32 %v3590_v12, %v15647_v9  ;;  %v3679_v49 = vpop.f32.mrf.mxu1  ;;  %v15652_v12 = vld [vmem:[#allocation31_spill] sm:$0xff] }
 0x56a   :  { %v10479_v55 = vadd.f32 %v3855_v29, %v3767_v16  ;;  %v10481_v2 = vadd.f32 %v3679_v49, %v3591_v41  ;;  %v15653_v16 = vld [vmem:[#allocation87_spill] sm:$0xff]  ;;  %v15654_v29 = vld [vmem:[#allocation88_spill] sm:$0xff]  ;;  %v8941_v49 = vld [vmem:[#allocation5 + $0x3e4] sm:$0xf0] }
 0x56b   :  { %v8162_v41 = vld [vmem:[#allocation5 + $0x3d0] sm:$0xf] }
 0x56c   :  { %15648 = vst [vmem:[#allocation176_spill] sm:$0xff] %v10481_v2 }
 0x56f   :  { %v3768_v40 = vpop.f32.mrf.mxu2  ;;  %v3593_v11 = vpop.f32.mrf.mxu0 }
 0x570   :  { %v3769_v28 = vadd.f32 %v3768_v40, %v10298_v8  ;;  %v3857_v15 = vpop.f32.mrf.mxu3  ;;  %v3594_v48 = vadd.f32 %v3593_v11, %v10257_v21  ;;  %v3682_v63 = vpop.f32.mrf.mxu1  ;;  %v7778_v40 = vld [vmem:[#allocation5 + $0xd0] sm:$0xf] }
 0x572   :  { %v10485_v42 = vadd.f32 %v3857_v15, %v3769_v28  ;;  %v10487_v51 = vadd.f32 %v3682_v63, %v3594_v48  ;;  %3908 = vmatmul.bf16.gmra.mxu0 %v15651_v22  ;;  %v8163_v28 = vor.u32 %v8941_v49, %v8162_v41  ;;  %v8845_v15 = vld [vmem:[#allocation5 + $0xe4] sm:$0xf0]  ;;  %v8354_v48 = vld [vmem:[#allocation5 + $0x550] sm:$0xf] }
 0x573   :  { %3997 = vmatmul.bf16.gmra.mxu1 %v15652_v12  ;;  %v8989_v63 = vld [vmem:[#allocation5 + $0x564] sm:$0xf0]  ;;  %v7779_v59 = vor.u32 %v8845_v15, %v7778_v40 }
 0x574   :  { %15649 = vst [vmem:[#allocation201_spill] sm:$0xff] %v10485_v42  ;;  %4086 = vmatmul.bf16.gmra.mxu2 %v15653_v16  ;;  %v8355_v30 = vor.u32 %v8989_v63, %v8354_v48  ;;  %v8893_v12 = vld [vmem:[#allocation5 + $0x264] sm:$0xf0] }
 0x575   :  { %15650 = vst [vmem:[#allocation202_spill] sm:$0xff] %v10487_v51  ;;  %4175 = vmatmul.bf16.gmra.mxu3 %v15654_v29  ;;  %4417 = vmatpush.bf16.msra.mxu2 %v8163_v28  ;;  %v7970_v29 = vld [vmem:[#allocation5 + $0x250] sm:$0xf]  ;;  %v15662_v48 = vld [vmem:[#allocation178_spill] sm:$0xff] }
 0x576   :  { %4239 = vmatpush.bf16.msra.mxu0 %v7779_v59  ;;  %4506 = vmatpush.bf16.msra.mxu3 %v8355_v30  ;;  %v15660_v59 = vld [vmem:[#allocation90_spill] sm:$0xff]  ;;  %v15661_v30 = vld [vmem:[#allocation91_spill] sm:$0xff] }
 0x577   :  { %v3771_v9 = vpop.f32.mrf.mxu2  ;;  %v3595_v11 = vpop.f32.mrf.mxu0 }
 0x578   :  { %v3772_v2 = vadd.f32 %v3771_v9, %v10298_v8  ;;  %v3860_v21 = vpop.f32.mrf.mxu3  ;;  %v3596_v51 = vadd.f32 %v3595_v11, %v10260_v45  ;;  %v3684_v27 = vpop.f32.mrf.mxu1  ;;  %v7971_v9 = vor.u32 %v8893_v12, %v7970_v29  ;;  %v15656_v45 = vld [vmem:[#allocation177_spill] sm:$0xff] }
 0x57a   :  { %v10495_v16 = vadd.f32 %v3860_v21, %v3772_v2  ;;  %v10497_v22 = vadd.f32 %v3684_v27, %v3596_v51  ;;  %4328 = vmatpush.bf16.msra.mxu1 %v7971_v9  ;;  %v15658_v21 = vld [vmem:[#allocation34_spill] sm:$0xff]  ;;  %v15659_v27 = vld [vmem:[#allocation35_spill] sm:$0xff] }
 0x57c   :  { %15655 = vst [vmem:[#allocation203_spill] sm:$0xff] %v10497_v22 }
 0x57f   :  { %v3773_v41 = vpop.f32.mrf.mxu2  ;;  %v3598_v4 = vpop.f32.mrf.mxu0 }
 0x580   :  { %v3774_v49 = vadd.f32 %v3773_v41, %v10298_v8  ;;  %v3862_v42 = vpop.f32.mrf.mxu3  ;;  %v3599_v11 = vadd.f32 %v3598_v4, %v15656_v45  ;;  %v3687_v40 = vpop.f32.mrf.mxu1 }
 0x582   :  { %v10501_v15 = vadd.f32 %v3862_v42, %v3774_v49  ;;  %v10503_v2 = vadd.f32 %v3687_v40, %v3599_v11  ;;  %3913 = vmatmul.bf16.gmra.mxu0 %v15658_v21 }
 0x583   :  { %4002 = vmatmul.bf16.gmra.mxu1 %v15659_v27 }
 0x584   :  { %15657 = vst [vmem:[#allocation177_spill] sm:$0xff] %v10503_v2  ;;  %4091 = vmatmul.bf16.gmra.mxu2 %v15660_v59  ;;  %v8330_v59 = vld [vmem:[#allocation5 + $0x520] sm:$0xf] }
 0x585   :  { %4180 = vmatmul.bf16.gmra.mxu3 %v15661_v30  ;;  %v15666_v30 = vld [vmem:[#allocation38_spill] sm:$0xff] }
 0x587   :  { %v3776_v51 = vpop.f32.mrf.mxu2  ;;  %v3600_v28 = vpop.f32.mrf.mxu0 }
 0x588   :  { %v3777_v12 = vadd.f32 %v3776_v51, %v10298_v8  ;;  %v3865_v29 = vpop.f32.mrf.mxu3  ;;  %v3601_v4 = vadd.f32 %v3600_v28, %v15662_v48  ;;  %v3689_v63 = vpop.f32.mrf.mxu1  ;;  %v15667_v28 = vld [vmem:[#allocation39_spill] sm:$0xff]  ;;  %v8138_v48 = vld [vmem:[#allocation5 + $0x3a0] sm:$0xf] }
 0x58a   :  { %v10511_v42 = vadd.f32 %v3865_v29, %v3777_v12  ;;  %v10513_v9 = vadd.f32 %v3689_v63, %v3601_v4  ;;  %v15668_v12 = vld [vmem:[#allocation92_spill] sm:$0xff]  ;;  %v15669_v29 = vld [vmem:[#allocation93_spill] sm:$0xff] }
 0x58b   :  { %v8935_v4 = vld [vmem:[#allocation5 + $0x3b4] sm:$0xf0] }
 0x58c   :  { %15663 = vst [vmem:[#allocation178_spill] sm:$0xff] %v10513_v9  ;;  %v8139_v63 = vor.u32 %v8935_v4, %v8138_v48  ;;  %v8839_v9 = vld [vmem:[#allocation5 + $0xb4] sm:$0xf0]  ;;  %v7946_v4 = vld [vmem:[#allocation5 + $0x220] sm:$0xf] }
 0x58e   :  { %4418 = vmatpush.bf16.msra.mxu2 %v8139_v63 }
 0x58f   :  { %v3778_v41 = vpop.f32.mrf.mxu2  ;;  %v3603_v11 = vpop.f32.mrf.mxu0 }
 0x590   :  { %v3779_v49 = vadd.f32 %v3778_v41, %v10298_v8  ;;  %v3867_v45 = vpop.f32.mrf.mxu3  ;;  %v3604_v40 = vadd.f32 %v3603_v11, %v10277_v33  ;;  %v3692_v2 = vpop.f32.mrf.mxu1  ;;  %v7754_v41 = vld [vmem:[#allocation5 + $0xa0] sm:$0xf] }
 0x591   :  { %v7755_v11 = vor.u32 %v8839_v9, %v7754_v41 }
 0x592   :  { %v10517_v22 = vadd.f32 %v3867_v45, %v3779_v49  ;;  %v10519_v51 = vadd.f32 %v3692_v2, %v3604_v40  ;;  %3918 = vmatmul.bf16.gmra.mxu0 %v15666_v30  ;;  %v8983_v49 = vld [vmem:[#allocation5 + $0x534] sm:$0xf0] }
 0x593   :  { %4007 = vmatmul.bf16.gmra.mxu1 %v15667_v28  ;;  %4240 = vmatpush.bf16.msra.mxu0 %v7755_v11  ;;  %v8887_v30 = vld [vmem:[#allocation5 + $0x234] sm:$0xf0] }
 0x594   :  { %15664 = vst [vmem:[#allocation204_spill] sm:$0xff] %v10517_v22  ;;  %4096 = vmatmul.bf16.gmra.mxu2 %v15668_v12  ;;  %v7947_v9 = vor.u32 %v8887_v30, %v7946_v4 }
 0x595   :  { %15665 = vst [vmem:[#allocation205_spill] sm:$0xff] %v10519_v51  ;;  %4185 = vmatmul.bf16.gmra.mxu3 %v15669_v29  ;;  %v8331_v51 = vor.u32 %v8983_v49, %v8330_v59  ;;  %v15672_v49 = vld [vmem:[#allocation42_spill] sm:$0xff] }
 0x596   :  { %4329 = vmatpush.bf16.msra.mxu1 %v7947_v9 }
 0x597   :  { %v3781_v33 = vpop.f32.mrf.mxu2  ;;  %v3605_v40 = vpop.f32.mrf.mxu0  ;;  %4507 = vmatpush.bf16.msra.mxu3 %v8331_v51  ;;  %v15673_v51 = vld [vmem:[#allocation43_spill] sm:$0xff] }
 0x598   :  { %v3782_v2 = vadd.f32 %v3781_v33, %v10298_v8  ;;  %v3870_v45 = vpop.f32.mrf.mxu3  ;;  %v3606_v28 = vadd.f32 %v3605_v40, %v10280_v35  ;;  %v3694_v12 = vpop.f32.mrf.mxu1 }
 0x59a   :  { %v10527_v29 = vadd.f32 %v3870_v45, %v3782_v2  ;;  %v10529_v48 = vadd.f32 %v3694_v12, %v3606_v28 }
 0x59c   :  { %15670 = vst [vmem:[#allocation206_spill] sm:$0xff] %v10529_v48  ;;  %v15676_v48 = vld [vmem:[#allocation47_spill] sm:$0xff] }
 0x59f   :  { %v3783_v22 = vpop.f32.mrf.mxu2  ;;  %v3608_v27 = vpop.f32.mrf.mxu0 }
 0x5a0   :  { %v3784_v41 = vadd.f32 %v3783_v22, %v10298_v8  ;;  %v3872_v33 = vpop.f32.mrf.mxu3  ;;  %v3609_v63 = vadd.f32 %v3608_v27, %v10287_v36  ;;  %v3697_v59 = vpop.f32.mrf.mxu1 }
 0x5a2   :  { %v10533_v35 = vadd.f32 %v3872_v33, %v3784_v41  ;;  %v10535_v11 = vadd.f32 %v3697_v59, %v3609_v63  ;;  %3923 = vmatmul.bf16.gmra.mxu0 %v15672_v49 }
 0x5a3   :  { %4012 = vmatmul.bf16.gmra.mxu1 %v15673_v51 }
 0x5a4   :  { %15671 = vst [vmem:[#allocation207_spill] sm:$0xff] %v10535_v11  ;;  %4101 = vmatmul.bf16.gmra.mxu2 %v15583_v61  ;;  %v15675_v11 = vld [vmem:[#allocation46_spill] sm:$0xff] }
 0x5a5   :  { %4190 = vmatmul.bf16.gmra.mxu3 %v15584_v52  ;;  %v7922_v52 = vld [vmem:[#allocation5 + $0x1f0] sm:$0xf]  ;;  %v8881_v61 = vld [vmem:[#allocation5 + $0x204] sm:$0xf0] }
 0x5a7   :  { %v3786_v30 = vpop.f32.mrf.mxu2  ;;  %v3610_v12 = vpop.f32.mrf.mxu0 }
 0x5a8   :  { %v3787_v22 = vadd.f32 %v3786_v30, %v10298_v8  ;;  %v3875_v28 = vpop.f32.mrf.mxu3  ;;  %v3611_v36 = vadd.f32 %v3610_v12, %v10291_v58  ;;  %v3699_v27 = vpop.f32.mrf.mxu1  ;;  %v8114_v58 = vld [vmem:[#allocation5 + $0x370] sm:$0xf] }
 0x5aa   :  { %v10543_v2 = vadd.f32 %v3875_v28, %v3787_v22  ;;  %v10545_v45 = vadd.f32 %v3699_v27, %v3611_v36  ;;  %v8929_v22 = vld [vmem:[#allocation5 + $0x384] sm:$0xf0]  ;;  %v7730_v28 = vld [vmem:[#allocation5 + $0x70] sm:$0xf] }
 0x5ab   :  { %v8115_v12 = vor.u32 %v8929_v22, %v8114_v58  ;;  %v8833_v36 = vld [vmem:[#allocation5 + $0x84] sm:$0xf0]  ;;  %v8306_v27 = vld [vmem:[#allocation5 + $0x4f0] sm:$0xf]  ;;  %v7923_v22 = vor.u32 %v8881_v61, %v7922_v52 }
 0x5ac   :  { %15674 = vst [vmem:[#allocation208_spill] sm:$0xff] %v10545_v45 }
 0x5ad   :  { %4419 = vmatpush.bf16.msra.mxu2 %v8115_v12  ;;  %4330 = vmatpush.bf16.msra.mxu1 %v7923_v22  ;;  %v15679_v12 = vld [vmem:[#allocation50_spill] sm:$0xff] }
 0x5af   :  { %v3788_v40 = vpop.f32.mrf.mxu2  ;;  %v3889_v41 = vpop.f32.mrf.mxu0 }
 0x5b0   :  { %v3789_v4 = vadd.f32 %v3788_v40, %v10298_v8  ;;  %v3877_v9 = vpop.f32.mrf.mxu3  ;;  %v3890_v33 = vadd.f32 %v3889_v41, %v10303_v46  ;;  %v3978_v63 = vpop.f32.mrf.mxu1  ;;  %v8977_v46 = vld [vmem:[#allocation5 + $0x504] sm:$0xf0]  ;;  %v7731_v41 = vor.u32 %v8833_v36, %v7730_v28 }
 0x5b2   :  { %v10549_v59 = vadd.f32 %v3877_v9, %v3789_v4  ;;  %v3979_v30 = vadd.f32 %v3978_v63, %v3890_v33  ;;  %3928 = vmatmul.bf16.gmra.mxu0 %v15675_v11  ;;  %v8307_v33 = vor.u32 %v8977_v46, %v8306_v27  ;;  %v15680_v27 = vld [vmem:[#allocation51_spill] sm:$0xff] }
 0x5b3   :  { %4017 = vmatmul.bf16.gmra.mxu1 %v15676_v48  ;;  %4241 = vmatpush.bf16.msra.mxu0 %v7731_v41 }
 0x5b4   :  { %4106 = vmatmul.bf16.gmra.mxu2 %v15586_v26  ;;  %4508 = vmatpush.bf16.msra.mxu3 %v8307_v33 }
 0x5b5   :  { %4195 = vmatmul.bf16.gmra.mxu3 %v15587_v57 }
 0x5b7   :  { %v4067_v8 = vpop.f32.mrf.mxu2  ;;  %v3891_v9 = vpop.f32.mrf.mxu0 }
 0x5b8   :  { %v4068_v40 = vadd.f32 %v4067_v8, %v3979_v30  ;;  %v4156_v4 = vpop.f32.mrf.mxu3  ;;  %v3892_v63 = vadd.f32 %v3891_v9, %v10309_v23  ;;  %v3980_v45 = vpop.f32.mrf.mxu1 }
 0x5ba   :  { %v10556_v26 = vadd.f32 %v4156_v4, %v4068_v40  ;;  %v3981_v57 = vadd.f32 %v3980_v45, %v3892_v63 }
 0x5bc   :  { %15677 = vst [vmem:[#allocation209_spill] sm:$0xff] %v10556_v26 }
 0x5bf   :  { %v4069_v58 = vpop.f32.mrf.mxu2  ;;  %v3894_v30 = vpop.f32.mrf.mxu0 }
 0x5c0   :  { %v4070_v48 = vadd.f32 %v4069_v58, %v3981_v57  ;;  %v4158_v11 = vpop.f32.mrf.mxu3  ;;  %v3895_v8 = vadd.f32 %v3894_v30, %v10319_v3  ;;  %v3983_v28 = vpop.f32.mrf.mxu1  ;;  %v15683_v30 = vld [vmem:[#allocation54_spill] sm:$0xff] }
 0x5c2   :  { %v10559_v36 = vadd.f32 %v4158_v11, %v4070_v48  ;;  %v3984_v23 = vadd.f32 %v3983_v28, %v3895_v8  ;;  %3933 = vmatmul.bf16.gmra.mxu0 %v15679_v12  ;;  %v15684_v8 = vld [vmem:[#allocation55_spill] sm:$0xff]  ;;  %v8923_v28 = vld [vmem:[#allocation5 + $0x354] sm:$0xf0] }
 0x5c3   :  { %4022 = vmatmul.bf16.gmra.mxu1 %v15680_v27 }
 0x5c4   :  { %15678 = vst [vmem:[#allocation210_spill] sm:$0xff] %v10559_v36  ;;  %4111 = vmatmul.bf16.gmra.mxu2 %v9695_v18 }
 0x5c5   :  { %4200 = vmatmul.bf16.gmra.mxu3 %v9698_v53 }
 0x5c7   :  { %v4072_v45 = vpop.f32.mrf.mxu2  ;;  %v3896_v57 = vpop.f32.mrf.mxu0 }
 0x5c8   :  { %v4073_v61 = vadd.f32 %v4072_v45, %v3984_v23  ;;  %v4161_v52 = vpop.f32.mrf.mxu3  ;;  %v3897_v46 = vadd.f32 %v3896_v57, %v10325_v32  ;;  %v3985_v3 = vpop.f32.mrf.mxu1  ;;  %v8090_v32 = vld [vmem:[#allocation5 + $0x340] sm:$0xf] }
 0x5c9   :  { %v7706_v23 = vld [vmem:[#allocation5 + $0x40] sm:$0xf] }
 0x5ca   :  { %v10566_v40 = vadd.f32 %v4161_v52, %v4073_v61  ;;  %v3986_v48 = vadd.f32 %v3985_v3, %v3897_v46  ;;  %v8091_v61 = vor.u32 %v8923_v28, %v8090_v32  ;;  %v8827_v52 = vld [vmem:[#allocation5 + $0x54] sm:$0xf0]  ;;  %v8282_v57 = vld [vmem:[#allocation5 + $0x4c0] sm:$0xf] }
 0x5cc   :  { %15681 = vst [vmem:[#allocation211_spill] sm:$0xff] %v10566_v40  ;;  %4420 = vmatpush.bf16.msra.mxu2 %v8091_v61  ;;  %v8875_v40 = vld [vmem:[#allocation5 + $0x1d4] sm:$0xf0]  ;;  %v15687_v61 = vld [vmem:[#allocation58_spill] sm:$0xff] }
 0x5cf   :  { %v4074_v11 = vpop.f32.mrf.mxu2  ;;  %v3899_v41 = vpop.f32.mrf.mxu0 }
 0x5d0   :  { %v4075_v4 = vadd.f32 %v4074_v11, %v3986_v48  ;;  %v4163_v9 = vpop.f32.mrf.mxu3  ;;  %v3900_v33 = vadd.f32 %v3899_v41, %v10335_v24  ;;  %v3988_v63 = vpop.f32.mrf.mxu1  ;;  %v8971_v24 = vld [vmem:[#allocation5 + $0x4d4] sm:$0xf0]  ;;  %v7707_v11 = vor.u32 %v8827_v52, %v7706_v23 }
 0x5d2   :  { %v10569_v58 = vadd.f32 %v4163_v9, %v4075_v4  ;;  %v3989_v22 = vadd.f32 %v3988_v63, %v3900_v33  ;;  %3938 = vmatmul.bf16.gmra.mxu0 %v15683_v30  ;;  %v8283_v4 = vor.u32 %v8971_v24, %v8282_v57  ;;  %v15688_v57 = vld [vmem:[#allocation59_spill] sm:$0xff] }
 0x5d3   :  { %4027 = vmatmul.bf16.gmra.mxu1 %v15684_v8  ;;  %4242 = vmatpush.bf16.msra.mxu0 %v7707_v11 }
 0x5d4   :  { %15682 = vst [vmem:[#allocation212_spill] sm:$0xff] %v10569_v58  ;;  %4116 = vmatmul.bf16.gmra.mxu2 %v9715_v0  ;;  %4509 = vmatpush.bf16.msra.mxu3 %v8283_v4  ;;  %v7898_v58 = vld [vmem:[#allocation5 + $0x1c0] sm:$0xf] }
 0x5d5   :  { %4205 = vmatmul.bf16.gmra.mxu3 %v9718_v13  ;;  %v7899_v28 = vor.u32 %v8875_v40, %v7898_v58 }
 0x5d7   :  { %v4077_v45 = vpop.f32.mrf.mxu2  ;;  %v3901_v48 = vpop.f32.mrf.mxu0  ;;  %4331 = vmatpush.bf16.msra.mxu1 %v7899_v28 }
 0x5d8   :  { %v4078_v46 = vadd.f32 %v4077_v45, %v3989_v22  ;;  %v4166_v3 = vpop.f32.mrf.mxu3  ;;  %v3902_v9 = vadd.f32 %v3901_v48, %v10341_v10  ;;  %v3990_v41 = vpop.f32.mrf.mxu1 }
 0x5da   :  { %v10576_v33 = vadd.f32 %v4166_v3, %v4078_v46  ;;  %v3991_v63 = vadd.f32 %v3990_v41, %v3902_v9 }
 0x5dc   :  { %15685 = vst [vmem:[#allocation213_spill] sm:$0xff] %v10576_v33 }
 0x5df   :  { %v4079_v32 = vpop.f32.mrf.mxu2  ;;  %v3904_v22 = vpop.f32.mrf.mxu0 }
 0x5e0   :  { %v4080_v36 = vadd.f32 %v4079_v32, %v3991_v63  ;;  %v4168_v26 = vpop.f32.mrf.mxu3  ;;  %v3905_v45 = vadd.f32 %v3904_v22, %v10351_v39  ;;  %v3993_v23 = vpop.f32.mrf.mxu1  ;;  %v15691_v22 = vld [vmem:[#allocation62_spill] sm:$0xff] }
 0x5e2   :  { %v10579_v52 = vadd.f32 %v4168_v26, %v4080_v36  ;;  %v3994_v10 = vadd.f32 %v3993_v23, %v3905_v45  ;;  %3943 = vmatmul.bf16.gmra.mxu0 %v15687_v61  ;;  %v15692_v45 = vld [vmem:[#allocation63_spill] sm:$0xff]  ;;  %v8917_v23 = vld [vmem:[#allocation5 + $0x324] sm:$0xf0] }
 0x5e3   :  { %4032 = vmatmul.bf16.gmra.mxu1 %v15688_v57 }
 0x5e4   :  { %15686 = vst [vmem:[#allocation214_spill] sm:$0xff] %v10579_v52  ;;  %4121 = vmatmul.bf16.gmra.mxu2 %v9735_v31 }
 0x5e5   :  { %4210 = vmatmul.bf16.gmra.mxu3 %v15594_v54 }
 0x5e7   :  { %v4082_v24 = vpop.f32.mrf.mxu2  ;;  %v3906_v46 = vpop.f32.mrf.mxu0 }
 0x5e8   :  { %v4083_v40 = vadd.f32 %v4082_v24, %v3994_v10  ;;  %v4171_v58 = vpop.f32.mrf.mxu3  ;;  %v3907_v3 = vadd.f32 %v3906_v46, %v10357_v1  ;;  %v3995_v39 = vpop.f32.mrf.mxu1  ;;  %v8066_v1 = vld [vmem:[#allocation5 + $0x310] sm:$0xf] }
 0x5e9   :  { %v7682_v10 = vld [vmem:[#allocation5 + $0x10] sm:$0xf] }
 0x5ea   :  { %v10586_v48 = vadd.f32 %v4171_v58, %v4083_v40  ;;  %v3996_v26 = vadd.f32 %v3995_v39, %v3907_v3  ;;  %v8067_v40 = vor.u32 %v8917_v23, %v8066_v1  ;;  %v8821_v58 = vld [vmem:[#allocation5 + $0x24] sm:$0xf0]  ;;  %v8258_v46 = vld [vmem:[#allocation5 + $0x490] sm:$0xf] }
 0x5ec   :  { %15689 = vst [vmem:[#allocation215_spill] sm:$0xff] %v10586_v48  ;;  %4421 = vmatpush.bf16.msra.mxu2 %v8067_v40  ;;  %v8869_v48 = vld [vmem:[#allocation5 + $0x1a4] sm:$0xf0] }
 0x5ed   :  { %v15695_v40 = vld [vmem:[#allocation66_spill] sm:$0xff] }
 0x5ef   :  { %v4084_v36 = vpop.f32.mrf.mxu2  ;;  %v3909_v9 = vpop.f32.mrf.mxu0 }
 0x5f0   :  { %v4085_v11 = vadd.f32 %v4084_v36, %v3996_v26  ;;  %v4173_v4 = vpop.f32.mrf.mxu3  ;;  %v3910_v41 = vadd.f32 %v3909_v9, %v10367_v38  ;;  %v3998_v63 = vpop.f32.mrf.mxu1  ;;  %v8965_v38 = vld [vmem:[#allocation5 + $0x4a4] sm:$0xf0]  ;;  %v7683_v36 = vor.u32 %v8821_v58, %v7682_v10 }
 0x5f2   :  { %v10589_v32 = vadd.f32 %v4173_v4, %v4085_v11  ;;  %v3999_v28 = vadd.f32 %v3998_v63, %v3910_v41  ;;  %3948 = vmatmul.bf16.gmra.mxu0 %v15691_v22  ;;  %v8259_v11 = vor.u32 %v8965_v38, %v8258_v46  ;;  %v15696_v46 = vld [vmem:[#allocation67_spill] sm:$0xff] }
 0x5f3   :  { %4037 = vmatmul.bf16.gmra.mxu1 %v15692_v45  ;;  %4243 = vmatpush.bf16.msra.mxu0 %v7683_v36 }
 0x5f4   :  { %15690 = vst [vmem:[#allocation216_spill] sm:$0xff] %v10589_v32  ;;  %4126 = vmatmul.bf16.gmra.mxu2 %v15599_v47  ;;  %4510 = vmatpush.bf16.msra.mxu3 %v8259_v11  ;;  %v7874_v32 = vld [vmem:[#allocation5 + $0x190] sm:$0xf] }
 0x5f5   :  { %4215 = vmatmul.bf16.gmra.mxu3 %v15600_v56  ;;  %v7875_v23 = vor.u32 %v8869_v48, %v7874_v32  ;;  %v9067_v56 = vld [vmem:[#allocation5 + $0x7d4] sm:$0xf0] }
 0x5f7   :  { %v4087_v24 = vpop.f32.mrf.mxu2  ;;  %v3911_v26 = vpop.f32.mrf.mxu0  ;;  %4332 = vmatpush.bf16.msra.mxu1 %v7875_v23 }
 0x5f8   :  { %v4088_v3 = vadd.f32 %v4087_v24, %v3999_v28  ;;  %v4176_v39 = vpop.f32.mrf.mxu3  ;;  %v3912_v4 = vadd.f32 %v3911_v26, %v10373_v25  ;;  %v4000_v9 = vpop.f32.mrf.mxu1 }
 0x5fa   :  { %v10596_v41 = vadd.f32 %v4176_v39, %v4088_v3  ;;  %v4001_v63 = vadd.f32 %v4000_v9, %v3912_v4  ;;  %v15697_v39 = vld [vmem:[#allocation189_spill] sm:$0xff] }
 0x5fc   :  { %15693 = vst [vmem:[#allocation217_spill] sm:$0xff] %v10596_v41  ;;  %v8810_v41 = vld [vmem:[#allocation5 + $0x8e0] sm:$0xf] }
 0x5ff   :  { %v4089_v1 = vpop.f32.mrf.mxu2  ;;  %v3914_v28 = vpop.f32.mrf.mxu0 }
 0x600   :  { %v4090_v52 = vadd.f32 %v4089_v1, %v4001_v63  ;;  %v4178_v33 = vpop.f32.mrf.mxu3  ;;  %v3915_v24 = vadd.f32 %v3914_v28, %v10383_v6  ;;  %v4003_v10 = vpop.f32.mrf.mxu1 }
 0x602   :  { %v10599_v58 = vadd.f32 %v4178_v33, %v4090_v52  ;;  %v4004_v25 = vadd.f32 %v4003_v10, %v3915_v24  ;;  %3953 = vmatmul.bf16.gmra.mxu0 %v15695_v40  ;;  %v15700_v24 = vld [vmem:[#allocation70_spill] sm:$0xff]  ;;  %v15701_v10 = vld [vmem:[#allocation71_spill] sm:$0xff] }
 0x603   :  { %4042 = vmatmul.bf16.gmra.mxu1 %v15696_v46 }
 0x604   :  { %15694 = vst [vmem:[#allocation218_spill] sm:$0xff] %v10599_v58  ;;  %4131 = vmatmul.bf16.gmra.mxu2 %v15605_v14 }
 0x605   :  { %4220 = vmatmul.bf16.gmra.mxu3 %v15606_v19 }
 0x607   :  { %v4092_v38 = vpop.f32.mrf.mxu2  ;;  %v3916_v3 = vpop.f32.mrf.mxu0 }
 0x608   :  { %v4093_v48 = vadd.f32 %v4092_v38, %v4004_v25  ;;  %v4181_v32 = vpop.f32.mrf.mxu3  ;;  %v3917_v26 = vadd.f32 %v3916_v3, %v15697_v39  ;;  %v4005_v6 = vpop.f32.mrf.mxu1  ;;  %v15702_v25 = vld [vmem:[#allocation121_spill] sm:$0xff]  ;;  %v15703_v38 = vld [vmem:[#allocation122_spill] sm:$0xff] }
 0x609   :  { %v8618_v3 = vld [vmem:[#allocation5 + $0x760] sm:$0xf] }
 0x60a   :  { %v10606_v36 = vadd.f32 %v4181_v32, %v4093_v48  ;;  %v4006_v33 = vadd.f32 %v4005_v6, %v3917_v26  ;;  %v8860_v48 = vld [vmem:[#allocation5 + $0x164] sm:$0xf]  ;;  %v7852_v32 = vld [vmem:[#allocation5 + $0x178] sm:$0xf0]  ;;  %v9055_v6 = vld [vmem:[#allocation5 + $0x774] sm:$0xf0] }
 0x60b   :  { %v7855_v26 = vor.u32 %v8860_v48, %v7852_v32 }
 0x60c   :  { %15698 = vst [vmem:[#allocation189_spill] sm:$0xff] %v10606_v36 }
 0x60d   :  { %4770 = vmatpush.bf16.msrb.mxu2 %v7855_v26  ;;  %v15706_v26 = vld [vmem:[#allocation74_spill] sm:$0xff] }
 0x60f   :  { %v4094_v52 = vpop.f32.mrf.mxu2  ;;  %v3919_v9 = vpop.f32.mrf.mxu0 }
 0x610   :  { %v4095_v11 = vadd.f32 %v4094_v52, %v4006_v33  ;;  %v4183_v4 = vpop.f32.mrf.mxu3  ;;  %v3920_v63 = vadd.f32 %v3919_v9, %v10399_v5  ;;  %v4008_v1 = vpop.f32.mrf.mxu1  ;;  %v8908_v33 = vld [vmem:[#allocation5 + $0x2e4] sm:$0xf]  ;;  %v8044_v5 = vld [vmem:[#allocation5 + $0x2f8] sm:$0xf0]  ;;  %v8619_v9 = vor.u32 %v9055_v6, %v8618_v3 }
 0x612   :  { %v10609_v23 = vadd.f32 %v4183_v4, %v4095_v11  ;;  %v4009_v28 = vadd.f32 %v4008_v1, %v3920_v63  ;;  %3958 = vmatmul.bf16.gmra.mxu0 %v15700_v24  ;;  %v8047_v63 = vor.u32 %v8908_v33, %v8044_v5  ;;  %v15707_v33 = vld [vmem:[#allocation75_spill] sm:$0xff] }
 0x613   :  { %4047 = vmatmul.bf16.gmra.mxu1 %v15701_v10  ;;  %4592 = vmatpush.bf16.msrb.mxu0 %v8619_v9 }
 0x614   :  { %15699 = vst [vmem:[#allocation219_spill] sm:$0xff] %v10609_v23  ;;  %4136 = vmatmul.bf16.gmra.mxu2 %v15702_v25  ;;  %4859 = vmatpush.bf16.msrb.mxu3 %v8047_v63 }
 0x615   :  { %4225 = vmatmul.bf16.gmra.mxu3 %v15703_v38  ;;  %v9103_v38 = vld [vmem:[#allocation5 + $0x8f4] sm:$0xf0] }
 0x616   :  { %v8811_v32 = vor.u32 %v9103_v38, %v8810_v41 }
 0x617   :  { %v4097_v39 = vpop.f32.mrf.mxu2  ;;  %v3921_v4 = vpop.f32.mrf.mxu0 }
 0x618   :  { %v4098_v52 = vadd.f32 %v4097_v39, %v4009_v28  ;;  %v4186_v11 = vpop.f32.mrf.mxu3  ;;  %v3922_v1 = vadd.f32 %v3921_v4, %v10405_v60  ;;  %v4010_v23 = vpop.f32.mrf.mxu1  ;;  %4681 = vmatpush.bf16.msrb.mxu1 %v8811_v32 }
 0x61a   :  { %v10616_v36 = vadd.f32 %v4186_v11, %v4098_v52  ;;  %v4011_v58 = vadd.f32 %v4010_v23, %v3922_v1  ;;  %v15708_v23 = vld [vmem:[#allocation126_spill] sm:$0xff]  ;;  %v15709_v52 = vld [vmem:[#allocation193_spill] sm:$0xff] }
 0x61c   :  { %15704 = vst [vmem:[#allocation220_spill] sm:$0xff] %v10616_v36 }
 0x61f   :  { %v4099_v48 = vpop.f32.mrf.mxu2  ;;  %v3924_v28 = vpop.f32.mrf.mxu0 }
 0x620   :  { %v4100_v25 = vadd.f32 %v4099_v48, %v4011_v58  ;;  %v4188_v19 = vpop.f32.mrf.mxu3  ;;  %v3925_v39 = vadd.f32 %v3924_v28, %v10415_v44  ;;  %v4013_v3 = vpop.f32.mrf.mxu1 }
 0x622   :  { %v10619_v6 = vadd.f32 %v4188_v19, %v4100_v25  ;;  %v4014_v60 = vadd.f32 %v4013_v3, %v3925_v39  ;;  %3963 = vmatmul.bf16.gmra.mxu0 %v15706_v26  ;;  %v15712_v3 = vld [vmem:[#allocation12_spill] sm:$0xff] }
 0x623   :  { %4052 = vmatmul.bf16.gmra.mxu1 %v15707_v33 }
 0x624   :  { %15705 = vst [vmem:[#allocation221_spill] sm:$0xff] %v10619_v6  ;;  %4141 = vmatmul.bf16.gmra.mxu2 %v15618_v37 }
 0x625   :  { %4230 = vmatmul.bf16.gmra.mxu3 %v15708_v23 }
 0x627   :  { %v4102_v5 = vpop.f32.mrf.mxu2  ;;  %v3926_v38 = vpop.f32.mrf.mxu0 }
 0x628   :  { %v4103_v41 = vadd.f32 %v4102_v5, %v4014_v60  ;;  %v4191_v58 = vpop.f32.mrf.mxu3  ;;  %v3927_v11 = vadd.f32 %v3926_v38, %v15709_v52  ;;  %v4015_v44 = vpop.f32.mrf.mxu1  ;;  %v15713_v60 = vld [vmem:[#allocation13_spill] sm:$0xff]  ;;  %v15714_v5 = vld [vmem:[#allocation14_spill] sm:$0xff]  ;;  %v15715_v38 = vld [vmem:[#allocation15_spill] sm:$0xff] }
 0x629   :  { %v8594_v52 = vld [vmem:[#allocation5 + $0x730] sm:$0xf] }
 0x62a   :  { %v10626_v4 = vadd.f32 %v4191_v58, %v4103_v41  ;;  %v4016_v19 = vadd.f32 %v4015_v44, %v3927_v11  ;;  %v8854_v41 = vld [vmem:[#allocation5 + $0x134] sm:$0xf]  ;;  %v7828_v58 = vld [vmem:[#allocation5 + $0x148] sm:$0xf0] }
 0x62b   :  { %v7831_v44 = vor.u32 %v8854_v41, %v7828_v58 }
 0x62c   :  { %15710 = vst [vmem:[#allocation193_spill] sm:$0xff] %v10626_v4 }
 0x62d   :  { %4771 = vmatpush.bf16.msrb.mxu2 %v7831_v44  ;;  %v15718_v44 = vld [vmem:[#allocation16_spill] sm:$0xff] }
 0x62f   :  { %v4104_v25 = vpop.f32.mrf.mxu2  ;;  %v3929_v1 = vpop.f32.mrf.mxu0 }
 0x630   :  { %v4105_v9 = vadd.f32 %v4104_v25, %v4016_v19  ;;  %v4193_v63 = vpop.f32.mrf.mxu3  ;;  %v3930_v48 = vadd.f32 %v3929_v1, %v10431_v20  ;;  %v4018_v32 = vpop.f32.mrf.mxu1  ;;  %v9049_v19 = vld [vmem:[#allocation5 + $0x744] sm:$0xf0]  ;;  %v8902_v25 = vld [vmem:[#allocation5 + $0x2b4] sm:$0xf]  ;;  %v8020_v20 = vld [vmem:[#allocation5 + $0x2c8] sm:$0xf0] }
 0x632   :  { %v10629_v28 = vadd.f32 %v4193_v63, %v4105_v9  ;;  %v4019_v39 = vadd.f32 %v4018_v32, %v3930_v48  ;;  %4244 = vmatmul.bf16.vlgmr.msra.gmra.mxu0 %v15712_v3  ;;  %v8595_v48 = vor.u32 %v9049_v19, %v8594_v52  ;;  %v8023_v32 = vor.u32 %v8902_v25, %v8020_v20  ;;  %v15719_v25 = vld [vmem:[#allocation17_spill] sm:$0xff] }
 0x633   :  { %4333 = vmatmul.bf16.vlgmr.msra.gmra.mxu1 %v15713_v60  ;;  %v15721_v20 = vld [vmem:[#allocation197_spill] sm:$0xff] }
 0x634   :  { %15711 = vst [vmem:[#allocation222_spill] sm:$0xff] %v10629_v28  ;;  %4422 = vmatmul.bf16.vlgmr.msra.gmra.mxu2 %v15714_v5  ;;  %4593 = vmatpush.bf16.msrb.mxu0 %v8595_v48  ;;  %v9097_v5 = vld [vmem:[#allocation5 + $0x8c4] sm:$0xf0] }
 0x635   :  { %4511 = vmatmul.bf16.vlgmr.msra.gmra.mxu3 %v15715_v38  ;;  %v8786_v38 = vld [vmem:[#allocation5 + $0x8b0] sm:$0xf] }
 0x636   :  { %4860 = vmatpush.bf16.msrb.mxu3 %v8023_v32  ;;  %v8787_v58 = vor.u32 %v9097_v5, %v8786_v38 }
 0x637   :  { %v4107_v11 = vpop.f32.mrf.mxu2  ;;  %v3931_v63 = vpop.f32.mrf.mxu0 }
 0x638   :  { %v4108_v1 = vadd.f32 %v4107_v11, %v4019_v39  ;;  %v4196_v9 = vpop.f32.mrf.mxu3  ;;  %v3932_v28 = vadd.f32 %v3931_v63, %v10437_v17  ;;  %v4020_v4 = vpop.f32.mrf.mxu1  ;;  %4682 = vmatpush.bf16.msrb.mxu1 %v8787_v58 }
 0x63a   :  { %v10636_v6 = vadd.f32 %v4196_v9, %v4108_v1  ;;  %v4021_v36 = vadd.f32 %v4020_v4, %v3932_v28  ;;  %v15720_v4 = vld [vmem:[#allocation19_spill] sm:$0xff] }
 0x63c   :  { %15716 = vst [vmem:[#allocation12_spill] sm:$0xff] %v10636_v6 }
 0x63f   :  { %v4109_v41 = vpop.f32.mrf.mxu2  ;;  %v3934_v39 = vpop.f32.mrf.mxu0 }
 0x640   :  { %v4110_v23 = vadd.f32 %v4109_v41, %v4021_v36  ;;  %v4198_v37 = vpop.f32.mrf.mxu3  ;;  %v3935_v11 = vadd.f32 %v3934_v39, %v10447_v34  ;;  %v4023_v52 = vpop.f32.mrf.mxu1 }
 0x642   :  { %v10639_v19 = vadd.f32 %v4198_v37, %v4110_v23  ;;  %v4024_v17 = vadd.f32 %v4023_v52, %v3935_v11  ;;  %4249 = vmatmul.bf16.gmra.mxu0 %v15718_v44  ;;  %v15724_v52 = vld [vmem:[#allocation20_spill] sm:$0xff] }
 0x643   :  { %4338 = vmatmul.bf16.gmra.mxu1 %v15719_v25 }
 0x644   :  { %15717 = vst [vmem:[#allocation13_spill] sm:$0xff] %v10639_v19  ;;  %4427 = vmatmul.bf16.gmra.mxu2 %v15631_v43 }
 0x645   :  { %4516 = vmatmul.bf16.gmra.mxu3 %v15720_v4 }
 0x647   :  { %v4112_v28 = vpop.f32.mrf.mxu2  ;;  %v3936_v38 = vpop.f32.mrf.mxu0 }
 0x648   :  { %v4113_v5 = vadd.f32 %v4112_v28, %v4024_v17  ;;  %v4201_v36 = vpop.f32.mrf.mxu3  ;;  %v3937_v1 = vadd.f32 %v3936_v38, %v15721_v20  ;;  %v4025_v34 = vpop.f32.mrf.mxu1  ;;  %v15725_v17 = vld [vmem:[#allocation21_spill] sm:$0xff]  ;;  %v15726_v28 = vld [vmem:[#allocation22_spill] sm:$0xff]  ;;  %v15727_v38 = vld [vmem:[#allocation23_spill] sm:$0xff] }
 0x649   :  { %v8570_v20 = vld [vmem:[#allocation5 + $0x700] sm:$0xf] }
 0x64a   :  { %v10646_v9 = vadd.f32 %v4201_v36, %v4113_v5  ;;  %v4026_v37 = vadd.f32 %v4025_v34, %v3937_v1  ;;  %v8848_v5 = vld [vmem:[#allocation5 + $0x104] sm:$0xf]  ;;  %v7804_v36 = vld [vmem:[#allocation5 + $0x118] sm:$0xf0] }
 0x64b   :  { %v7807_v34 = vor.u32 %v8848_v5, %v7804_v36 }
 0x64c   :  { %15722 = vst [vmem:[#allocation16_spill] sm:$0xff] %v10646_v9 }
 0x64d   :  { %4772 = vmatpush.bf16.msrb.mxu2 %v7807_v34  ;;  %v15730_v34 = vld [vmem:[#allocation24_spill] sm:$0xff] }
 0x64f   :  { %v4114_v23 = vpop.f32.mrf.mxu2  ;;  %v3939_v32 = vpop.f32.mrf.mxu0 }
 0x650   :  { %v4115_v63 = vadd.f32 %v4114_v23, %v4026_v37  ;;  %v4203_v48 = vpop.f32.mrf.mxu3  ;;  %v3940_v41 = vadd.f32 %v3939_v32, %v10463_v7  ;;  %v4028_v58 = vpop.f32.mrf.mxu1  ;;  %v9043_v37 = vld [vmem:[#allocation5 + $0x714] sm:$0xf0]  ;;  %v8896_v23 = vld [vmem:[#allocation5 + $0x284] sm:$0xf]  ;;  %v7996_v7 = vld [vmem:[#allocation5 + $0x298] sm:$0xf0] }
 0x652   :  { %v10649_v39 = vadd.f32 %v4203_v48, %v4115_v63  ;;  %v4029_v11 = vadd.f32 %v4028_v58, %v3940_v41  ;;  %4254 = vmatmul.bf16.gmra.mxu0 %v15724_v52  ;;  %v8571_v41 = vor.u32 %v9043_v37, %v8570_v20  ;;  %v7999_v58 = vor.u32 %v8896_v23, %v7996_v7  ;;  %v15731_v23 = vld [vmem:[#allocation25_spill] sm:$0xff] }
 0x653   :  { %4343 = vmatmul.bf16.gmra.mxu1 %v15725_v17  ;;  %v15733_v7 = vld [vmem:[#allocation201_spill] sm:$0xff] }
 0x654   :  { %15723 = vst [vmem:[#allocation17_spill] sm:$0xff] %v10649_v39  ;;  %4432 = vmatmul.bf16.gmra.mxu2 %v15726_v28  ;;  %4594 = vmatpush.bf16.msrb.mxu0 %v8571_v41  ;;  %v9091_v28 = vld [vmem:[#allocation5 + $0x894] sm:$0xf0] }
 0x655   :  { %4521 = vmatmul.bf16.gmra.mxu3 %v15727_v38  ;;  %v8762_v38 = vld [vmem:[#allocation5 + $0x880] sm:$0xf] }
 0x656   :  { %4861 = vmatpush.bf16.msrb.mxu3 %v7999_v58  ;;  %v8763_v36 = vor.u32 %v9091_v28, %v8762_v38 }
 0x657   :  { %v4117_v1 = vpop.f32.mrf.mxu2  ;;  %v3941_v48 = vpop.f32.mrf.mxu0 }
 0x658   :  { %v4118_v32 = vadd.f32 %v4117_v1, %v4029_v11  ;;  %v4206_v63 = vpop.f32.mrf.mxu3  ;;  %v3942_v39 = vadd.f32 %v3941_v48, %v10469_v50  ;;  %v4030_v9 = vpop.f32.mrf.mxu1  ;;  %4683 = vmatpush.bf16.msrb.mxu1 %v8763_v36 }
 0x65a   :  { %v10656_v19 = vadd.f32 %v4206_v63, %v4118_v32  ;;  %v4031_v6 = vadd.f32 %v4030_v9, %v3942_v39  ;;  %v15732_v9 = vld [vmem:[#allocation27_spill] sm:$0xff] }
 0x65c   :  { %15728 = vst [vmem:[#allocation197_spill] sm:$0xff] %v10656_v19 }
 0x65f   :  { %v4119_v5 = vpop.f32.mrf.mxu2  ;;  %v3944_v11 = vpop.f32.mrf.mxu0 }
 0x660   :  { %v4120_v4 = vadd.f32 %v4119_v5, %v4031_v6  ;;  %v4208_v43 = vpop.f32.mrf.mxu3  ;;  %v3945_v1 = vadd.f32 %v3944_v11, %v10479_v55  ;;  %v4033_v20 = vpop.f32.mrf.mxu1 }
 0x662   :  { %v10659_v37 = vadd.f32 %v4208_v43, %v4120_v4  ;;  %v4034_v50 = vadd.f32 %v4033_v20, %v3945_v1  ;;  %4259 = vmatmul.bf16.gmra.mxu0 %v15730_v34  ;;  %v15736_v20 = vld [vmem:[#allocation28_spill] sm:$0xff] }
 0x663   :  { %4348 = vmatmul.bf16.gmra.mxu1 %v15731_v23 }
 0x664   :  { %15729 = vst [vmem:[#allocation20_spill] sm:$0xff] %v10659_v37  ;;  %4437 = vmatmul.bf16.gmra.mxu2 %v15644_v62 }
 0x665   :  { %4526 = vmatmul.bf16.gmra.mxu3 %v15732_v9 }
 0x667   :  { %v4122_v39 = vpop.f32.mrf.mxu2  ;;  %v3946_v38 = vpop.f32.mrf.mxu0 }
 0x668   :  { %v4123_v28 = vadd.f32 %v4122_v39, %v4034_v50  ;;  %v4211_v6 = vpop.f32.mrf.mxu3  ;;  %v3947_v32 = vadd.f32 %v3946_v38, %v15733_v7  ;;  %v4035_v55 = vpop.f32.mrf.mxu1  ;;  %v15737_v50 = vld [vmem:[#allocation29_spill] sm:$0xff]  ;;  %v15738_v39 = vld [vmem:[#allocation30_spill] sm:$0xff]  ;;  %v15739_v38 = vld [vmem:[#allocation31_spill] sm:$0xff] }
 0x669   :  { %v8546_v7 = vld [vmem:[#allocation5 + $0x6d0] sm:$0xf] }
 0x66a   :  { %v10666_v63 = vadd.f32 %v4211_v6, %v4123_v28  ;;  %v4036_v43 = vadd.f32 %v4035_v55, %v3947_v32  ;;  %v8842_v28 = vld [vmem:[#allocation5 + $0xd4] sm:$0xf]  ;;  %v7780_v6 = vld [vmem:[#allocation5 + $0xe8] sm:$0xf0] }
 0x66b   :  { %v7783_v55 = vor.u32 %v8842_v28, %v7780_v6 }
 0x66c   :  { %15734 = vst [vmem:[#allocation21_spill] sm:$0xff] %v10666_v63 }
 0x66d   :  { %4773 = vmatpush.bf16.msrb.mxu2 %v7783_v55  ;;  %v15742_v55 = vld [vmem:[#allocation32_spill] sm:$0xff] }
 0x66f   :  { %v4124_v4 = vpop.f32.mrf.mxu2  ;;  %v3949_v58 = vpop.f32.mrf.mxu0 }
 0x670   :  { %v4125_v48 = vadd.f32 %v4124_v4, %v4036_v43  ;;  %v4213_v41 = vpop.f32.mrf.mxu3  ;;  %v3950_v5 = vadd.f32 %v3949_v58, %v10495_v16  ;;  %v4038_v36 = vpop.f32.mrf.mxu1  ;;  %v9037_v43 = vld [vmem:[#allocation5 + $0x6e4] sm:$0xf0]  ;;  %v8890_v4 = vld [vmem:[#allocation5 + $0x254] sm:$0xf]  ;;  %v7972_v16 = vld [vmem:[#allocation5 + $0x268] sm:$0xf0] }
 0x672   :  { %v10669_v11 = vadd.f32 %v4213_v41, %v4125_v48  ;;  %v4039_v1 = vadd.f32 %v4038_v36, %v3950_v5  ;;  %4264 = vmatmul.bf16.gmra.mxu0 %v15736_v20  ;;  %v8547_v5 = vor.u32 %v9037_v43, %v8546_v7  ;;  %v7975_v36 = vor.u32 %v8890_v4, %v7972_v16  ;;  %v15743_v4 = vld [vmem:[#allocation33_spill] sm:$0xff]  ;;  %v15745_v16 = vld [vmem:[#allocation204_spill] sm:$0xff] }
 0x673   :  { %4353 = vmatmul.bf16.gmra.mxu1 %v15737_v50 }
 0x674   :  { %15735 = vst [vmem:[#allocation24_spill] sm:$0xff] %v10669_v11  ;;  %4442 = vmatmul.bf16.gmra.mxu2 %v15738_v39  ;;  %4595 = vmatpush.bf16.msrb.mxu0 %v8547_v5  ;;  %v9085_v39 = vld [vmem:[#allocation5 + $0x864] sm:$0xf0] }
 0x675   :  { %4531 = vmatmul.bf16.gmra.mxu3 %v15739_v38  ;;  %v8738_v38 = vld [vmem:[#allocation5 + $0x850] sm:$0xf] }
 0x676   :  { %4862 = vmatpush.bf16.msrb.mxu3 %v7975_v36  ;;  %v8739_v6 = vor.u32 %v9085_v39, %v8738_v38 }
 0x677   :  { %v4127_v32 = vpop.f32.mrf.mxu2  ;;  %v3951_v41 = vpop.f32.mrf.mxu0 }
 0x678   :  { %v4128_v58 = vadd.f32 %v4127_v32, %v4039_v1  ;;  %v4216_v48 = vpop.f32.mrf.mxu3  ;;  %v3952_v11 = vadd.f32 %v3951_v41, %v10501_v15  ;;  %v4040_v63 = vpop.f32.mrf.mxu1  ;;  %4684 = vmatpush.bf16.msrb.mxu1 %v8739_v6 }
 0x67a   :  { %v10676_v37 = vadd.f32 %v4216_v48, %v4128_v58  ;;  %v4041_v19 = vadd.f32 %v4040_v63, %v3952_v11  ;;  %v15744_v63 = vld [vmem:[#allocation35_spill] sm:$0xff] }
 0x67c   :  { %15740 = vst [vmem:[#allocation25_spill] sm:$0xff] %v10676_v37  ;;  %v8714_v37 = vld [vmem:[#allocation5 + $0x820] sm:$0xf] }
 0x67f   :  { %v4129_v28 = vpop.f32.mrf.mxu2  ;;  %v3954_v1 = vpop.f32.mrf.mxu0 }
 0x680   :  { %v4130_v9 = vadd.f32 %v4129_v28, %v4041_v19  ;;  %v4218_v62 = vpop.f32.mrf.mxu3  ;;  %v3955_v32 = vadd.f32 %v3954_v1, %v10511_v42  ;;  %v4043_v7 = vpop.f32.mrf.mxu1 }
 0x682   :  { %v10679_v43 = vadd.f32 %v4218_v62, %v4130_v9  ;;  %v4044_v15 = vadd.f32 %v4043_v7, %v3955_v32  ;;  %4269 = vmatmul.bf16.gmra.mxu0 %v15742_v55  ;;  %v15748_v7 = vld [vmem:[#allocation36_spill] sm:$0xff] }
 0x683   :  { %4358 = vmatmul.bf16.gmra.mxu1 %v15743_v4 }
 0x684   :  { %15741 = vst [vmem:[#allocation201_spill] sm:$0xff] %v10679_v43  ;;  %4447 = vmatmul.bf16.gmra.mxu2 %v15658_v21 }
 0x685   :  { %4536 = vmatmul.bf16.gmra.mxu3 %v15744_v63 }
 0x687   :  { %v4132_v11 = vpop.f32.mrf.mxu2  ;;  %v3956_v38 = vpop.f32.mrf.mxu0 }
 0x688   :  { %v4133_v39 = vadd.f32 %v4132_v11, %v4044_v15  ;;  %v4221_v19 = vpop.f32.mrf.mxu3  ;;  %v3957_v58 = vadd.f32 %v3956_v38, %v15745_v16  ;;  %v4045_v42 = vpop.f32.mrf.mxu1  ;;  %v15749_v15 = vld [vmem:[#allocation37_spill] sm:$0xff]  ;;  %v15750_v11 = vld [vmem:[#allocation38_spill] sm:$0xff]  ;;  %v15751_v38 = vld [vmem:[#allocation39_spill] sm:$0xff] }
 0x689   :  { %v8522_v16 = vld [vmem:[#allocation5 + $0x6a0] sm:$0xf] }
 0x68a   :  { %v10686_v48 = vadd.f32 %v4221_v19, %v4133_v39  ;;  %v4046_v62 = vadd.f32 %v4045_v42, %v3957_v58  ;;  %v8836_v39 = vld [vmem:[#allocation5 + $0xa4] sm:$0xf]  ;;  %v7756_v19 = vld [vmem:[#allocation5 + $0xb8] sm:$0xf0] }
 0x68b   :  { %v7759_v42 = vor.u32 %v8836_v39, %v7756_v19 }
 0x68c   :  { %15746 = vst [vmem:[#allocation28_spill] sm:$0xff] %v10686_v48 }
 0x68d   :  { %4774 = vmatpush.bf16.msrb.mxu2 %v7759_v42  ;;  %v15754_v42 = vld [vmem:[#allocation40_spill] sm:$0xff] }
 0x68f   :  { %v4134_v9 = vpop.f32.mrf.mxu2  ;;  %v3959_v36 = vpop.f32.mrf.mxu0 }
 0x690   :  { %v4135_v41 = vadd.f32 %v4134_v9, %v4046_v62  ;;  %v4223_v5 = vpop.f32.mrf.mxu3  ;;  %v3960_v28 = vadd.f32 %v3959_v36, %v10527_v29  ;;  %v4048_v6 = vpop.f32.mrf.mxu1  ;;  %v9031_v62 = vld [vmem:[#allocation5 + $0x6b4] sm:$0xf0]  ;;  %v8884_v9 = vld [vmem:[#allocation5 + $0x224] sm:$0xf]  ;;  %v7948_v29 = vld [vmem:[#allocation5 + $0x238] sm:$0xf0] }
 0x692   :  { %v10689_v1 = vadd.f32 %v4223_v5, %v4135_v41  ;;  %v4049_v32 = vadd.f32 %v4048_v6, %v3960_v28  ;;  %4274 = vmatmul.bf16.gmra.mxu0 %v15748_v7  ;;  %v8523_v28 = vor.u32 %v9031_v62, %v8522_v16  ;;  %v7951_v6 = vor.u32 %v8884_v9, %v7948_v29  ;;  %v15755_v29 = vld [vmem:[#allocation41_spill] sm:$0xff] }
 0x693   :  { %4363 = vmatmul.bf16.gmra.mxu1 %v15749_v15 }
 0x694   :  { %15747 = vst [vmem:[#allocation29_spill] sm:$0xff] %v10689_v1  ;;  %4452 = vmatmul.bf16.gmra.mxu2 %v15750_v11  ;;  %4596 = vmatpush.bf16.msrb.mxu0 %v8523_v28 }
 0x695   :  { %4541 = vmatmul.bf16.gmra.mxu3 %v15751_v38  ;;  %v9079_v38 = vld [vmem:[#allocation5 + $0x834] sm:$0xf0] }
 0x696   :  { %4863 = vmatpush.bf16.msrb.mxu3 %v7951_v6  ;;  %v8715_v39 = vor.u32 %v9079_v38, %v8714_v37  ;;  %v10705_v37 = vld [vmem:[#allocation7 + $0x10] sm:$0x77] }
 0x697   :  { %v4137_v58 = vpop.f32.mrf.mxu2  ;;  %v3961_v5 = vpop.f32.mrf.mxu0 }
 0x698   :  { %v4138_v36 = vadd.f32 %v4137_v58, %v4049_v32  ;;  %v4226_v41 = vpop.f32.mrf.mxu3  ;;  %v3962_v1 = vadd.f32 %v3961_v5, %v10533_v35  ;;  %v4050_v48 = vpop.f32.mrf.mxu1  ;;  %4685 = vmatpush.bf16.msrb.mxu1 %v8715_v39 }
 0x69a   :  { %v10696_v43 = vadd.f32 %v4226_v41, %v4138_v36  ;;  %v4051_v11 = vadd.f32 %v4050_v48, %v3962_v1 }
 0x69c   :  { %15752 = vst [vmem:[#allocation32_spill] sm:$0xff] %v10696_v43 }
 0x69f   :  { %v4139_v19 = vpop.f32.mrf.mxu2  ;;  %v3964_v58 = vpop.f32.mrf.mxu0 }
 0x6a0   :  { %v4140_v63 = vadd.f32 %v4139_v19, %v4051_v11  ;;  %v4228_v32 = vpop.f32.mrf.mxu3  ;;  %v3965_v16 = vadd.f32 %v3964_v58, %v10543_v2  ;;  %v4053_v62 = vpop.f32.mrf.mxu1 }
 0x6a2   :  { %v10699_v9 = vadd.f32 %v4228_v32, %v4140_v63  ;;  %v4054_v35 = vadd.f32 %v4053_v62, %v3965_v16  ;;  %4279 = vmatmul.bf16.gmra.mxu0 %v15754_v42  ;;  %v646_v63 = vperm.slane %v10705_v37, 0 }
 0x6a3   :  { %4368 = vmatmul.bf16.gmra.mxu1 %v15755_v29 }
 0x6a4   :  { %15753 = vst [vmem:[#allocation33_spill] sm:$0xff] %v10699_v9  ;;  %4457 = vmatmul.bf16.gmra.mxu2 %v15672_v49  ;;  %v10711_v28 = vperm.slane %v646_v63, 0 }
 0x6a5   :  { %4546 = vmatmul.bf16.gmra.mxu3 %v15673_v51  ;;  %v9073_v51 = vld [vmem:[#allocation5 + $0x804] sm:$0xf0] }
 0x6a7   :  { %v4142_v48 = vpop.f32.mrf.mxu2  ;;  %v3966_v38 = vpop.f32.mrf.mxu0 }
 0x6a8   :  { %v4143_v1 = vadd.f32 %v4142_v48, %v4054_v35  ;;  %v4231_v11 = vpop.f32.mrf.mxu3  ;;  %v3967_v2 = vadd.f32 %v3966_v38, %v10549_v59  ;;  %v4055_v36 = vpop.f32.mrf.mxu1  ;;  %v15758_v48 = vld [vmem:[#allocation44_spill] sm:$0xff]  ;;  %v15759_v59 = vld [vmem:[#allocation45_spill] sm:$0xff]  ;;  %v15760_v38 = vld [vmem:[#allocation46_spill] sm:$0xff] }
 0x6aa   :  { %v10709_v41 = vadd.f32 %v4231_v11, %v4143_v1  ;;  %v4056_v5 = vadd.f32 %v4055_v36, %v3967_v2  ;;  %v15761_v1 = vld [vmem:[#allocation47_spill] sm:$0xff]  ;;  %v7732_v2 = vld [vmem:[#allocation5 + $0x88] sm:$0xf0] }
 0x6ab   :  { %v8830_v11 = vld [vmem:[#allocation5 + $0x74] sm:$0xf]  ;;  %v8498_v36 = vld [vmem:[#allocation5 + $0x670] sm:$0xf] }
 0x6ac   :  { %15756 = vst [vmem:[#allocation204_spill] sm:$0xff] %v10709_v41  ;;  %v7735_v63 = vor.u32 %v8830_v11, %v7732_v2  ;;  %v7924_v41 = vld [vmem:[#allocation5 + $0x208] sm:$0xf0] }
 0x6ae   :  { %4775 = vmatpush.bf16.msrb.mxu2 %v7735_v63 }
 0x6af   :  { %v4144_v6 = vpop.f32.mrf.mxu2  ;;  %v4245_v32 = vpop.f32.mrf.mxu0 }
 0x6b0   :  { %v4145_v39 = vadd.f32 %v4144_v6, %v4056_v5  ;;  %v4233_v19 = vpop.f32.mrf.mxu3  ;;  %v4246_v58 = vadd.f32 %v4245_v32, %v10711_v28  ;;  %v4334_v16 = vpop.f32.mrf.mxu1  ;;  %v9025_v5 = vld [vmem:[#allocation5 + $0x684] sm:$0xf0]  ;;  %v8878_v6 = vld [vmem:[#allocation5 + $0x1f4] sm:$0xf] }
 0x6b1   :  { %v8499_v9 = vor.u32 %v9025_v5, %v8498_v36 }
 0x6b2   :  { %v10714_v62 = vadd.f32 %v4233_v19, %v4145_v39  ;;  %v4335_v35 = vadd.f32 %v4334_v16, %v4246_v58  ;;  %4284 = vmatmul.bf16.gmra.mxu0 %v15758_v48  ;;  %v7927_v39 = vor.u32 %v8878_v6, %v7924_v41 }
 0x6b3   :  { %4373 = vmatmul.bf16.gmra.mxu1 %v15759_v59  ;;  %4597 = vmatpush.bf16.msrb.mxu0 %v8499_v9  ;;  %v15763_v9 = vld [vmem:[#allocation49_spill] sm:$0xff] }
 0x6b4   :  { %15757 = vst [vmem:[#allocation36_spill] sm:$0xff] %v10714_v62  ;;  %4462 = vmatmul.bf16.gmra.mxu2 %v15760_v38  ;;  %4864 = vmatpush.bf16.msrb.mxu3 %v7927_v39  ;;  %v8690_v38 = vld [vmem:[#allocation5 + $0x7f0] sm:$0xf] }
 0x6b5   :  { %4551 = vmatmul.bf16.gmra.mxu3 %v15761_v1  ;;  %v8691_v2 = vor.u32 %v9073_v51, %v8690_v38 }
 0x6b7   :  { %v4423_v32 = vpop.f32.mrf.mxu2  ;;  %v4247_v16 = vpop.f32.mrf.mxu0  ;;  %4686 = vmatpush.bf16.msrb.mxu1 %v8691_v2 }
 0x6b8   :  { %v4424_v19 = vadd.f32 %v4423_v32, %v4335_v35  ;;  %v4512_v58 = vpop.f32.mrf.mxu3  ;;  %v4248_v62 = vadd.f32 %v4247_v16, %v10711_v28  ;;  %v4336_v43 = vpop.f32.mrf.mxu1  ;;  %v15762_v32 = vld [vmem:[#allocation48_spill] sm:$0xff] }
 0x6ba   :  { %v10721_v1 = vadd.f32 %v4512_v58, %v4424_v19  ;;  %v4337_v11 = vadd.f32 %v4336_v43, %v4248_v62 }
 0x6bf   :  { %v4425_v49 = vpop.f32.mrf.mxu2  ;;  %v4250_v41 = vpop.f32.mrf.mxu0 }
 0x6c0   :  { %v4426_v21 = vadd.f32 %v4425_v49, %v4337_v11  ;;  %v4514_v36 = vpop.f32.mrf.mxu3  ;;  %v4251_v35 = vadd.f32 %v4250_v41, %v10711_v28  ;;  %v4339_v5 = vpop.f32.mrf.mxu1 }
 0x6c2   :  { %v10724_v63 = vadd.f32 %v4514_v36, %v4426_v21  ;;  %v4340_v6 = vadd.f32 %v4339_v5, %v4251_v35  ;;  %4289 = vmatmul.bf16.gmra.mxu0 %v15762_v32 }
 0x6c3   :  { %4378 = vmatmul.bf16.gmra.mxu1 %v15763_v9 }
 0x6c4   :  { %4467 = vmatmul.bf16.gmra.mxu2 %v15679_v12 }
 0x6c5   :  { %4556 = vmatmul.bf16.gmra.mxu3 %v15680_v27  ;;  %v15764_v27 = vld [vmem:[#allocation52_spill] sm:$0xff] }
 0x6c7   :  { %v4428_v51 = vpop.f32.mrf.mxu2  ;;  %v4252_v49 = vpop.f32.mrf.mxu0 }
 0x6c8   :  { %v4429_v43 = vadd.f32 %v4428_v51, %v4340_v6  ;;  %v4517_v62 = vpop.f32.mrf.mxu3  ;;  %v4253_v38 = vadd.f32 %v4252_v49, %v10711_v28  ;;  %v4341_v39 = vpop.f32.mrf.mxu1  ;;  %v15765_v6 = vld [vmem:[#allocation53_spill] sm:$0xff] }
 0x6c9   :  { %v8824_v51 = vld [vmem:[#allocation5 + $0x44] sm:$0xf] }
 0x6ca   :  { %v10731_v19 = vadd.f32 %v4517_v62, %v4429_v43  ;;  %v4342_v21 = vadd.f32 %v4341_v39, %v4253_v38  ;;  %v7708_v43 = vld [vmem:[#allocation5 + $0x58] sm:$0xf0]  ;;  %v8474_v62 = vld [vmem:[#allocation5 + $0x640] sm:$0xf]  ;;  %v9019_v38 = vld [vmem:[#allocation5 + $0x654] sm:$0xf0] }
 0x6cb   :  { %v7711_v49 = vor.u32 %v8824_v51, %v7708_v43  ;;  %v8872_v39 = vld [vmem:[#allocation5 + $0x1c4] sm:$0xf] }
 0x6cd   :  { %4776 = vmatpush.bf16.msrb.mxu2 %v7711_v49 }
 0x6cf   :  { %v4430_v58 = vpop.f32.mrf.mxu2  ;;  %v4255_v2 = vpop.f32.mrf.mxu0 }
 0x6d0   :  { %v4431_v16 = vadd.f32 %v4430_v58, %v4342_v21  ;;  %v4519_v11 = vpop.f32.mrf.mxu3  ;;  %v4256_v36 = vadd.f32 %v4255_v2, %v10711_v28  ;;  %v4344_v41 = vpop.f32.mrf.mxu1  ;;  %v7900_v21 = vld [vmem:[#allocation5 + $0x1d8] sm:$0xf0]  ;;  %v8475_v2 = vor.u32 %v9019_v38, %v8474_v62 }
 0x6d2   :  { %v10734_v35 = vadd.f32 %v4519_v11, %v4431_v16  ;;  %v4345_v5 = vadd.f32 %v4344_v41, %v4256_v36  ;;  %4294 = vmatmul.bf16.gmra.mxu0 %v15764_v27  ;;  %v7903_v16 = vor.u32 %v8872_v39, %v7900_v21 }
 0x6d3   :  { %4383 = vmatmul.bf16.gmra.mxu1 %v15765_v6  ;;  %4598 = vmatpush.bf16.msrb.mxu0 %v8475_v2  ;;  %v15767_v2 = vld [vmem:[#allocation57_spill] sm:$0xff] }
 0x6d4   :  { %4472 = vmatmul.bf16.gmra.mxu2 %v15683_v30  ;;  %4865 = vmatpush.bf16.msrb.mxu3 %v7903_v16  ;;  %v8666_v30 = vld [vmem:[#allocation5 + $0x7c0] sm:$0xf] }
 0x6d5   :  { %4561 = vmatmul.bf16.gmra.mxu3 %v15684_v8  ;;  %v8667_v43 = vor.u32 %v9067_v56, %v8666_v30 }
 0x6d7   :  { %v4433_v58 = vpop.f32.mrf.mxu2  ;;  %v4257_v41 = vpop.f32.mrf.mxu0  ;;  %4687 = vmatpush.bf16.msrb.mxu1 %v8667_v43 }
 0x6d8   :  { %v4434_v11 = vadd.f32 %v4433_v58, %v4345_v5  ;;  %v4522_v36 = vpop.f32.mrf.mxu3  ;;  %v4258_v12 = vadd.f32 %v4257_v41, %v10711_v28  ;;  %v4346_v14 = vpop.f32.mrf.mxu1  ;;  %v15766_v58 = vld [vmem:[#allocation56_spill] sm:$0xff] }
 0x6da   :  { %v10741_v8 = vadd.f32 %v4522_v36, %v4434_v11  ;;  %v4347_v51 = vadd.f32 %v4346_v14, %v4258_v12 }
 0x6df   :  { %v4435_v47 = vpop.f32.mrf.mxu2  ;;  %v4260_v38 = vpop.f32.mrf.mxu0 }
 0x6e0   :  { %v4436_v54 = vadd.f32 %v4435_v47, %v4347_v51  ;;  %v4524_v62 = vpop.f32.mrf.mxu3  ;;  %v4261_v5 = vadd.f32 %v4260_v38, %v10711_v28  ;;  %v4349_v39 = vpop.f32.mrf.mxu1 }
 0x6e2   :  { %v10744_v49 = vadd.f32 %v4524_v62, %v4436_v54  ;;  %v4350_v21 = vadd.f32 %v4349_v39, %v4261_v5  ;;  %4299 = vmatmul.bf16.gmra.mxu0 %v15766_v58 }
 0x6e3   :  { %4388 = vmatmul.bf16.gmra.mxu1 %v15767_v2 }
 0x6e4   :  { %4477 = vmatmul.bf16.gmra.mxu2 %v15687_v61 }
 0x6e5   :  { %4566 = vmatmul.bf16.gmra.mxu3 %v15688_v57  ;;  %v15769_v57 = vld [vmem:[#allocation60_spill] sm:$0xff] }
 0x6e7   :  { %v4438_v56 = vpop.f32.mrf.mxu2  ;;  %v4262_v47 = vpop.f32.mrf.mxu0 }
 0x6e8   :  { %v4439_v14 = vadd.f32 %v4438_v56, %v4350_v21  ;;  %v4527_v12 = vpop.f32.mrf.mxu3  ;;  %v4263_v30 = vadd.f32 %v4262_v47, %v10711_v28  ;;  %v4351_v16 = vpop.f32.mrf.mxu1  ;;  %v15770_v21 = vld [vmem:[#allocation61_spill] sm:$0xff]  ;;  %v8818_v56 = vld [vmem:[#allocation5 + $0x14] sm:$0xf] }
 0x6ea   :  { %v10751_v11 = vadd.f32 %v4527_v12, %v4439_v14  ;;  %v4352_v54 = vadd.f32 %v4351_v16, %v4263_v30  ;;  %v7684_v14 = vld [vmem:[#allocation5 + $0x28] sm:$0xf0]  ;;  %v8450_v12 = vld [vmem:[#allocation5 + $0x610] sm:$0xf]  ;;  %v9013_v30 = vld [vmem:[#allocation5 + $0x624] sm:$0xf0] }
 0x6eb   :  { %v7687_v47 = vor.u32 %v8818_v56, %v7684_v14  ;;  %v8866_v16 = vld [vmem:[#allocation5 + $0x194] sm:$0xf] }
 0x6ed   :  { %4777 = vmatpush.bf16.msrb.mxu2 %v7687_v47 }
 0x6ef   :  { %v4440_v36 = vpop.f32.mrf.mxu2  ;;  %v4265_v43 = vpop.f32.mrf.mxu0 }
 0x6f0   :  { %v4441_v41 = vadd.f32 %v4440_v36, %v4352_v54  ;;  %v4529_v51 = vpop.f32.mrf.mxu3  ;;  %v4266_v62 = vadd.f32 %v4265_v43, %v10711_v28  ;;  %v4354_v38 = vpop.f32.mrf.mxu1  ;;  %v7876_v54 = vld [vmem:[#allocation5 + $0x1a8] sm:$0xf0]  ;;  %v8451_v43 = vor.u32 %v9013_v30, %v8450_v12 }
 0x6f2   :  { %v10754_v5 = vadd.f32 %v4529_v51, %v4441_v41  ;;  %v4355_v39 = vadd.f32 %v4354_v38, %v4266_v62  ;;  %4304 = vmatmul.bf16.gmra.mxu0 %v15769_v57  ;;  %v7879_v41 = vor.u32 %v8866_v16, %v7876_v54  ;;  %v9061_v57 = vld [vmem:[#allocation5 + $0x7a4] sm:$0xf0] }
 0x6f3   :  { %4393 = vmatmul.bf16.gmra.mxu1 %v15770_v21  ;;  %4599 = vmatpush.bf16.msrb.mxu0 %v8451_v43  ;;  %v15772_v43 = vld [vmem:[#allocation65_spill] sm:$0xff] }
 0x6f4   :  { %15768 = vst [vmem:[#allocation37_spill] sm:$0xff] %v10754_v5  ;;  %4482 = vmatmul.bf16.gmra.mxu2 %v15691_v22  ;;  %4866 = vmatpush.bf16.msrb.mxu3 %v7879_v41  ;;  %v8642_v22 = vld [vmem:[#allocation5 + $0x790] sm:$0xf] }
 0x6f5   :  { %4571 = vmatmul.bf16.gmra.mxu3 %v15692_v45  ;;  %v8643_v14 = vor.u32 %v9061_v57, %v8642_v22 }
 0x6f7   :  { %v4443_v36 = vpop.f32.mrf.mxu2  ;;  %v4267_v38 = vpop.f32.mrf.mxu0  ;;  %4688 = vmatpush.bf16.msrb.mxu1 %v8643_v14 }
 0x6f8   :  { %v4444_v51 = vadd.f32 %v4443_v36, %v4355_v39  ;;  %v4532_v62 = vpop.f32.mrf.mxu3  ;;  %v4268_v61 = vadd.f32 %v4267_v38, %v10711_v28  ;;  %v4356_v21 = vpop.f32.mrf.mxu1  ;;  %v15771_v36 = vld [vmem:[#allocation64_spill] sm:$0xff] }
 0x6fa   :  { %v10761_v45 = vadd.f32 %v4532_v62, %v4444_v51  ;;  %v4357_v56 = vadd.f32 %v4356_v21, %v4268_v61 }
 0x6ff   :  { %v4445_v5 = vpop.f32.mrf.mxu2  ;;  %v4270_v30 = vpop.f32.mrf.mxu0 }
 0x700   :  { %v4446_v2 = vadd.f32 %v4445_v5, %v4357_v56  ;;  %v4534_v12 = vpop.f32.mrf.mxu3  ;;  %v4271_v39 = vadd.f32 %v4270_v30, %v10711_v28  ;;  %v4359_v16 = vpop.f32.mrf.mxu1 }
 0x702   :  { %v10764_v47 = vadd.f32 %v4534_v12, %v4446_v2  ;;  %v4360_v54 = vadd.f32 %v4359_v16, %v4271_v39  ;;  %4309 = vmatmul.bf16.gmra.mxu0 %v15771_v36 }
 0x703   :  { %4398 = vmatmul.bf16.gmra.mxu1 %v15772_v43 }
 0x704   :  { %4487 = vmatmul.bf16.gmra.mxu2 %v15695_v40 }
 0x705   :  { %4576 = vmatmul.bf16.gmra.mxu3 %v15696_v46  ;;  %v15774_v46 = vld [vmem:[#allocation68_spill] sm:$0xff] }
 0x707   :  { %v4448_v61 = vpop.f32.mrf.mxu2  ;;  %v4272_v5 = vpop.f32.mrf.mxu0 }
 0x708   :  { %v4449_v57 = vadd.f32 %v4448_v61, %v4360_v54  ;;  %v4537_v22 = vpop.f32.mrf.mxu3  ;;  %v4273_v21 = vadd.f32 %v4272_v5, %v10711_v28  ;;  %v4361_v41 = vpop.f32.mrf.mxu1  ;;  %v15775_v54 = vld [vmem:[#allocation69_spill] sm:$0xff] }
 0x709   :  { %v9052_v61 = vld [vmem:[#allocation5 + $0x764] sm:$0xf] }
 0x70a   :  { %v10771_v51 = vadd.f32 %v4537_v22, %v4449_v57  ;;  %v4362_v2 = vadd.f32 %v4361_v41, %v4273_v21  ;;  %v8620_v57 = vld [vmem:[#allocation5 + $0x778] sm:$0xf0]  ;;  %v8956_v22 = vld [vmem:[#allocation5 + $0x464] sm:$0xf] }
 0x70b   :  { %v8623_v5 = vor.u32 %v9052_v61, %v8620_v57  ;;  %v8236_v21 = vld [vmem:[#allocation5 + $0x478] sm:$0xf0]  ;;  %v9100_v41 = vld [vmem:[#allocation5 + $0x8e4] sm:$0xf] }
 0x70d   :  { %5126 = vmatpush.bf16.msra.mxu2 %v8623_v5 }
 0x70f   :  { %v4450_v62 = vpop.f32.mrf.mxu2  ;;  %v4275_v14 = vpop.f32.mrf.mxu0 }
 0x710   :  { %v4451_v38 = vadd.f32 %v4450_v62, %v4362_v2  ;;  %v4539_v56 = vpop.f32.mrf.mxu3  ;;  %v4276_v12 = vadd.f32 %v4275_v14, %v10711_v28  ;;  %v4364_v30 = vpop.f32.mrf.mxu1  ;;  %v8812_v2 = vld [vmem:[#allocation5 + $0x8f8] sm:$0xf0]  ;;  %v8239_v14 = vor.u32 %v8956_v22, %v8236_v21 }
 0x712   :  { %v10774_v39 = vadd.f32 %v4539_v56, %v4451_v38  ;;  %v4365_v16 = vadd.f32 %v4364_v30, %v4276_v12  ;;  %4314 = vmatmul.bf16.gmra.mxu0 %v15774_v46  ;;  %v8815_v38 = vor.u32 %v9100_v41, %v8812_v2  ;;  %v8428_v46 = vld [vmem:[#allocation5 + $0x5f8] sm:$0xf0] }
 0x713   :  { %4403 = vmatmul.bf16.gmra.mxu1 %v15775_v54  ;;  %4948 = vmatpush.bf16.msra.mxu0 %v8239_v14  ;;  %v15777_v14 = vld [vmem:[#allocation73_spill] sm:$0xff] }
 0x714   :  { %15773 = vst [vmem:[#allocation40_spill] sm:$0xff] %v10774_v39  ;;  %4492 = vmatmul.bf16.gmra.mxu2 %v15700_v24  ;;  %5215 = vmatpush.bf16.msra.mxu3 %v8815_v38  ;;  %v9004_v24 = vld [vmem:[#allocation5 + $0x5e4] sm:$0xf] }
 0x715   :  { %4581 = vmatmul.bf16.gmra.mxu3 %v15701_v10  ;;  %v8431_v57 = vor.u32 %v9004_v24, %v8428_v46 }
 0x717   :  { %v4453_v62 = vpop.f32.mrf.mxu2  ;;  %v4277_v30 = vpop.f32.mrf.mxu0  ;;  %5037 = vmatpush.bf16.msra.mxu1 %v8431_v57 }
 0x718   :  { %v4454_v56 = vadd.f32 %v4453_v62, %v4365_v16  ;;  %v4542_v12 = vpop.f32.mrf.mxu3  ;;  %v4278_v40 = vadd.f32 %v4277_v30, %v10711_v28  ;;  %v4366_v54 = vpop.f32.mrf.mxu1  ;;  %v15776_v62 = vld [vmem:[#allocation72_spill] sm:$0xff] }
 0x71a   :  { %v10781_v10 = vadd.f32 %v4542_v12, %v4454_v56  ;;  %v4367_v61 = vadd.f32 %v4366_v54, %v4278_v40 }
 0x71f   :  { %v4455_v39 = vpop.f32.mrf.mxu2  ;;  %v4280_v21 = vpop.f32.mrf.mxu0 }
 0x720   :  { %v4456_v43 = vadd.f32 %v4455_v39, %v4367_v61  ;;  %v4544_v22 = vpop.f32.mrf.mxu3  ;;  %v4281_v16 = vadd.f32 %v4280_v21, %v10711_v28  ;;  %v4369_v41 = vpop.f32.mrf.mxu1 }
 0x722   :  { %v10784_v5 = vadd.f32 %v4544_v22, %v4456_v43  ;;  %v4370_v2 = vadd.f32 %v4369_v41, %v4281_v16  ;;  %4319 = vmatmul.bf16.gmra.mxu0 %v15776_v62 }
 0x723   :  { %4408 = vmatmul.bf16.gmra.mxu1 %v15777_v14 }
 0x724   :  { %4497 = vmatmul.bf16.gmra.mxu2 %v15706_v26 }
 0x725   :  { %4586 = vmatmul.bf16.gmra.mxu3 %v15707_v33  ;;  %v15779_v33 = vld [vmem:[#allocation77_spill] sm:$0xff] }
 0x727   :  { %v4458_v40 = vpop.f32.mrf.mxu2  ;;  %v4282_v39 = vpop.f32.mrf.mxu0 }
 0x728   :  { %v4459_v46 = vadd.f32 %v4458_v40, %v4370_v2  ;;  %v4547_v24 = vpop.f32.mrf.mxu3  ;;  %v4283_v54 = vadd.f32 %v4282_v39, %v10711_v28  ;;  %v4371_v38 = vpop.f32.mrf.mxu1  ;;  %v15780_v2 = vld [vmem:[#allocation78_spill] sm:$0xff]  ;;  %v9046_v40 = vld [vmem:[#allocation5 + $0x734] sm:$0xf] }
 0x72a   :  { %v10791_v56 = vadd.f32 %v4547_v24, %v4459_v46  ;;  %v4372_v43 = vadd.f32 %v4371_v38, %v4283_v54  ;;  %v8596_v46 = vld [vmem:[#allocation5 + $0x748] sm:$0xf0]  ;;  %v8950_v24 = vld [vmem:[#allocation5 + $0x434] sm:$0xf] }
 0x72b   :  { %v8599_v39 = vor.u32 %v9046_v40, %v8596_v46  ;;  %v8212_v54 = vld [vmem:[#allocation5 + $0x448] sm:$0xf0]  ;;  %v9094_v38 = vld [vmem:[#allocation5 + $0x8b4] sm:$0xf] }
 0x72d   :  { %5127 = vmatpush.bf16.msra.mxu2 %v8599_v39 }
 0x72f   :  { %v4460_v12 = vpop.f32.mrf.mxu2  ;;  %v4285_v57 = vpop.f32.mrf.mxu0 }
 0x730   :  { %v4461_v30 = vadd.f32 %v4460_v12, %v4372_v43  ;;  %v4549_v61 = vpop.f32.mrf.mxu3  ;;  %v4286_v22 = vadd.f32 %v4285_v57, %v10711_v28  ;;  %v4374_v21 = vpop.f32.mrf.mxu1  ;;  %v8788_v43 = vld [vmem:[#allocation5 + $0x8c8] sm:$0xf0]  ;;  %v8215_v57 = vor.u32 %v8950_v24, %v8212_v54 }
 0x732   :  { %v10794_v16 = vadd.f32 %v4549_v61, %v4461_v30  ;;  %v4375_v41 = vadd.f32 %v4374_v21, %v4286_v22  ;;  %4600 = vmatmul.bf16.vlgmr.msrb.gmra.mxu0 %v15779_v33  ;;  %v8791_v30 = vor.u32 %v9094_v38, %v8788_v43  ;;  %v8404_v33 = vld [vmem:[#allocation5 + $0x5c8] sm:$0xf0] }
 0x733   :  { %4689 = vmatmul.bf16.vlgmr.msrb.gmra.mxu1 %v15780_v2  ;;  %4949 = vmatpush.bf16.msra.mxu0 %v8215_v57  ;;  %v15782_v57 = vld [vmem:[#allocation81_spill] sm:$0xff] }
 0x734   :  { %15778 = vst [vmem:[#allocation41_spill] sm:$0xff] %v10794_v16  ;;  %4778 = vmatmul.bf16.vlgmr.msrb.gmra.mxu2 %v15712_v3  ;;  %5216 = vmatpush.bf16.msra.mxu3 %v8791_v30 }
 0x735   :  { %4867 = vmatmul.bf16.vlgmr.msrb.gmra.mxu3 %v15713_v60  ;;  %v8998_v60 = vld [vmem:[#allocation5 + $0x5b4] sm:$0xf] }
 0x736   :  { %v8407_v46 = vor.u32 %v8998_v60, %v8404_v33 }
 0x737   :  { %v4463_v12 = vpop.f32.mrf.mxu2  ;;  %v4287_v21 = vpop.f32.mrf.mxu0 }
 0x738   :  { %v4464_v61 = vadd.f32 %v4463_v12, %v4375_v41  ;;  %v4552_v22 = vpop.f32.mrf.mxu3  ;;  %v4288_v26 = vadd.f32 %v4287_v21, %v10711_v28  ;;  %v4376_v2 = vpop.f32.mrf.mxu1  ;;  %5038 = vmatpush.bf16.msra.mxu1 %v8407_v46  ;;  %v15781_v12 = vld [vmem:[#allocation80_spill] sm:$0xff] }
 0x73a   :  { %v10801_v3 = vadd.f32 %v4552_v22, %v4464_v61  ;;  %v4377_v40 = vadd.f32 %v4376_v2, %v4288_v26 }
 0x73f   :  { %v4465_v16 = vpop.f32.mrf.mxu2  ;;  %v4290_v54 = vpop.f32.mrf.mxu0 }
 0x740   :  { %v4466_v14 = vadd.f32 %v4465_v16, %v4377_v40  ;;  %v4554_v24 = vpop.f32.mrf.mxu3  ;;  %v4291_v41 = vadd.f32 %v4290_v54, %v10711_v28  ;;  %v4379_v38 = vpop.f32.mrf.mxu1 }
 0x742   :  { %v10804_v39 = vadd.f32 %v4554_v24, %v4466_v14  ;;  %v4380_v43 = vadd.f32 %v4379_v38, %v4291_v41  ;;  %4605 = vmatmul.bf16.gmra.mxu0 %v15781_v12  ;;  %v15784_v41 = vld [vmem:[#allocation82_spill] sm:$0xff]  ;;  %v15785_v38 = vld [vmem:[#allocation83_spill] sm:$0xff] }
 0x743   :  { %4694 = vmatmul.bf16.gmra.mxu1 %v15782_v57 }
 0x744   :  { %4783 = vmatmul.bf16.gmra.mxu2 %v15718_v44 }
 0x745   :  { %4872 = vmatmul.bf16.gmra.mxu3 %v15719_v25 }
 0x747   :  { %v4468_v26 = vpop.f32.mrf.mxu2  ;;  %v4292_v16 = vpop.f32.mrf.mxu0 }
 0x748   :  { %v4469_v33 = vadd.f32 %v4468_v26, %v4380_v43  ;;  %v4557_v2 = vpop.f32.mrf.mxu3  ;;  %v4293_v30 = vadd.f32 %v4292_v16, %v10711_v28  ;;  %v4381_v61 = vpop.f32.mrf.mxu1  ;;  %v9040_v43 = vld [vmem:[#allocation5 + $0x704] sm:$0xf]  ;;  %v8572_v26 = vld [vmem:[#allocation5 + $0x718] sm:$0xf0] }
 0x749   :  { %v8188_v16 = vld [vmem:[#allocation5 + $0x418] sm:$0xf0] }
 0x74a   :  { %v10811_v22 = vadd.f32 %v4557_v2, %v4469_v33  ;;  %v4382_v14 = vadd.f32 %v4381_v61, %v4293_v30  ;;  %v8944_v33 = vld [vmem:[#allocation5 + $0x404] sm:$0xf]  ;;  %v8575_v2 = vor.u32 %v9040_v43, %v8572_v26  ;;  %v8764_v61 = vld [vmem:[#allocation5 + $0x898] sm:$0xf0] }
 0x74b   :  { %v9088_v30 = vld [vmem:[#allocation5 + $0x884] sm:$0xf] }
 0x74c   :  { %5128 = vmatpush.bf16.msra.mxu2 %v8575_v2 }
 0x74f   :  { %v4470_v21 = vpop.f32.mrf.mxu2  ;;  %v4295_v46 = vpop.f32.mrf.mxu0 }
 0x750   :  { %v4471_v60 = vadd.f32 %v4470_v21, %v4382_v14  ;;  %v4559_v40 = vpop.f32.mrf.mxu3  ;;  %v4296_v24 = vadd.f32 %v4295_v46, %v10711_v28  ;;  %v4384_v54 = vpop.f32.mrf.mxu1  ;;  %v8191_v21 = vor.u32 %v8944_v33, %v8188_v16 }
 0x752   :  { %v10814_v44 = vadd.f32 %v4559_v40, %v4471_v60  ;;  %v4385_v25 = vadd.f32 %v4384_v54, %v4296_v24  ;;  %4610 = vmatmul.bf16.gmra.mxu0 %v15784_v41  ;;  %v8767_v60 = vor.u32 %v9088_v30, %v8764_v61  ;;  %v8380_v41 = vld [vmem:[#allocation5 + $0x598] sm:$0xf0] }
 0x753   :  { %4699 = vmatmul.bf16.gmra.mxu1 %v15785_v38  ;;  %4950 = vmatpush.bf16.msra.mxu0 %v8191_v21  ;;  %v15787_v21 = vld [vmem:[#allocation86_spill] sm:$0xff] }
 0x754   :  { %15783 = vst [vmem:[#allocation44_spill] sm:$0xff] %v10814_v44  ;;  %4788 = vmatmul.bf16.gmra.mxu2 %v15724_v52  ;;  %5217 = vmatpush.bf16.msra.mxu3 %v8767_v60 }
 0x755   :  { %4877 = vmatmul.bf16.gmra.mxu3 %v15725_v17  ;;  %v8992_v17 = vld [vmem:[#allocation5 + $0x584] sm:$0xf] }
 0x756   :  { %v8383_v26 = vor.u32 %v8992_v17, %v8380_v41 }
 0x757   :  { %v4473_v14 = vpop.f32.mrf.mxu2  ;;  %v4297_v24 = vpop.f32.mrf.mxu0 }
 0x758   :  { %v4474_v40 = vadd.f32 %v4473_v14, %v4385_v25  ;;  %v4562_v46 = vpop.f32.mrf.mxu3  ;;  %v4298_v54 = vadd.f32 %v4297_v24, %v10711_v28  ;;  %v4386_v38 = vpop.f32.mrf.mxu1  ;;  %5039 = vmatpush.bf16.msra.mxu1 %v8383_v26  ;;  %v15786_v14 = vld [vmem:[#allocation85_spill] sm:$0xff] }
 0x75a   :  { %v10821_v52 = vadd.f32 %v4562_v46, %v4474_v40  ;;  %v4387_v43 = vadd.f32 %v4386_v38, %v4298_v54 }
 0x75f   :  { %v4475_v44 = vpop.f32.mrf.mxu2  ;;  %v4300_v16 = vpop.f32.mrf.mxu0 }
 0x760   :  { %v4476_v57 = vadd.f32 %v4475_v44, %v4387_v43  ;;  %v4564_v33 = vpop.f32.mrf.mxu3  ;;  %v4301_v25 = vadd.f32 %v4300_v16, %v10711_v28  ;;  %v4389_v30 = vpop.f32.mrf.mxu1 }
 0x762   :  { %v10824_v2 = vadd.f32 %v4564_v33, %v4476_v57  ;;  %v4390_v61 = vadd.f32 %v4389_v30, %v4301_v25  ;;  %4615 = vmatmul.bf16.gmra.mxu0 %v15786_v14  ;;  %v15789_v25 = vld [vmem:[#allocation87_spill] sm:$0xff]  ;;  %v15790_v30 = vld [vmem:[#allocation88_spill] sm:$0xff] }
 0x763   :  { %4704 = vmatmul.bf16.gmra.mxu1 %v15787_v21 }
 0x764   :  { %4793 = vmatmul.bf16.gmra.mxu2 %v15730_v34 }
 0x765   :  { %4882 = vmatmul.bf16.gmra.mxu3 %v15731_v23 }
 0x767   :  { %v4478_v41 = vpop.f32.mrf.mxu2  ;;  %v4302_v44 = vpop.f32.mrf.mxu0 }
 0x768   :  { %v4479_v38 = vadd.f32 %v4478_v41, %v4390_v61  ;;  %v4567_v60 = vpop.f32.mrf.mxu3  ;;  %v4303_v40 = vadd.f32 %v4302_v44, %v10711_v28  ;;  %v4391_v46 = vpop.f32.mrf.mxu1  ;;  %v9034_v61 = vld [vmem:[#allocation5 + $0x6d4] sm:$0xf]  ;;  %v8548_v41 = vld [vmem:[#allocation5 + $0x6e8] sm:$0xf0] }
 0x769   :  { %v8164_v44 = vld [vmem:[#allocation5 + $0x3e8] sm:$0xf0] }
 0x76a   :  { %v10831_v24 = vadd.f32 %v4567_v60, %v4479_v38  ;;  %v4392_v57 = vadd.f32 %v4391_v46, %v4303_v40  ;;  %v8938_v38 = vld [vmem:[#allocation5 + $0x3d4] sm:$0xf]  ;;  %v8551_v60 = vor.u32 %v9034_v61, %v8548_v41  ;;  %v8740_v46 = vld [vmem:[#allocation5 + $0x868] sm:$0xf0] }
 0x76b   :  { %v9082_v40 = vld [vmem:[#allocation5 + $0x854] sm:$0xf] }
 0x76c   :  { %5129 = vmatpush.bf16.msra.mxu2 %v8551_v60 }
 0x76f   :  { %v4480_v54 = vpop.f32.mrf.mxu2  ;;  %v4305_v26 = vpop.f32.mrf.mxu0 }
 0x770   :  { %v4481_v17 = vadd.f32 %v4480_v54, %v4392_v57  ;;  %v4569_v43 = vpop.f32.mrf.mxu3  ;;  %v4306_v33 = vadd.f32 %v4305_v26, %v10711_v28  ;;  %v4394_v16 = vpop.f32.mrf.mxu1  ;;  %v8167_v54 = vor.u32 %v8938_v38, %v8164_v44 }
 0x772   :  { %v10834_v34 = vadd.f32 %v4569_v43, %v4481_v17  ;;  %v4395_v23 = vadd.f32 %v4394_v16, %v4306_v33  ;;  %4620 = vmatmul.bf16.gmra.mxu0 %v15789_v25  ;;  %v8743_v17 = vor.u32 %v9082_v40, %v8740_v46  ;;  %v8356_v25 = vld [vmem:[#allocation5 + $0x568] sm:$0xf0] }
 0x773   :  { %4709 = vmatmul.bf16.gmra.mxu1 %v15790_v30  ;;  %4951 = vmatpush.bf16.msra.mxu0 %v8167_v54  ;;  %v15792_v54 = vld [vmem:[#allocation91_spill] sm:$0xff] }
 0x774   :  { %15788 = vst [vmem:[#allocation45_spill] sm:$0xff] %v10834_v34  ;;  %4798 = vmatmul.bf16.gmra.mxu2 %v15736_v20  ;;  %5218 = vmatpush.bf16.msra.mxu3 %v8743_v17 }
 0x775   :  { %4887 = vmatmul.bf16.gmra.mxu3 %v15737_v50  ;;  %v8986_v50 = vld [vmem:[#allocation5 + $0x554] sm:$0xf] }
 0x776   :  { %v8359_v41 = vor.u32 %v8986_v50, %v8356_v25 }
 0x777   :  { %v4483_v57 = vpop.f32.mrf.mxu2  ;;  %v4307_v33 = vpop.f32.mrf.mxu0 }
 0x778   :  { %v4484_v43 = vadd.f32 %v4483_v57, %v4395_v23  ;;  %v4572_v26 = vpop.f32.mrf.mxu3  ;;  %v4308_v16 = vadd.f32 %v4307_v33, %v10711_v28  ;;  %v4396_v30 = vpop.f32.mrf.mxu1  ;;  %5040 = vmatpush.bf16.msra.mxu1 %v8359_v41  ;;  %v15791_v57 = vld [vmem:[#allocation90_spill] sm:$0xff] }
 0x77a   :  { %v10841_v20 = vadd.f32 %v4572_v26, %v4484_v43  ;;  %v4397_v61 = vadd.f32 %v4396_v30, %v4308_v16 }
 0x77f   :  { %v4485_v34 = vpop.f32.mrf.mxu2  ;;  %v4310_v44 = vpop.f32.mrf.mxu0 }
 0x780   :  { %v4486_v21 = vadd.f32 %v4485_v34, %v4397_v61  ;;  %v4574_v38 = vpop.f32.mrf.mxu3  ;;  %v4311_v23 = vadd.f32 %v4310_v44, %v10711_v28  ;;  %v4399_v40 = vpop.f32.mrf.mxu1 }
 0x782   :  { %v10844_v60 = vadd.f32 %v4574_v38, %v4486_v21  ;;  %v4400_v46 = vadd.f32 %v4399_v40, %v4311_v23  ;;  %4625 = vmatmul.bf16.gmra.mxu0 %v15791_v57  ;;  %v15794_v23 = vld [vmem:[#allocation92_spill] sm:$0xff]  ;;  %v15795_v40 = vld [vmem:[#allocation93_spill] sm:$0xff] }
 0x783   :  { %4714 = vmatmul.bf16.gmra.mxu1 %v15792_v54 }
 0x784   :  { %4803 = vmatmul.bf16.gmra.mxu2 %v15742_v55 }
 0x785   :  { %4892 = vmatmul.bf16.gmra.mxu3 %v15743_v4 }
 0x787   :  { %v4488_v25 = vpop.f32.mrf.mxu2  ;;  %v4312_v34 = vpop.f32.mrf.mxu0 }
 0x788   :  { %v4489_v30 = vadd.f32 %v4488_v25, %v4400_v46  ;;  %v4577_v17 = vpop.f32.mrf.mxu3  ;;  %v4313_v43 = vadd.f32 %v4312_v34, %v10711_v28  ;;  %v4401_v26 = vpop.f32.mrf.mxu1  ;;  %v9028_v46 = vld [vmem:[#allocation5 + $0x6a4] sm:$0xf]  ;;  %v8524_v25 = vld [vmem:[#allocation5 + $0x6b8] sm:$0xf0] }
 0x789   :  { %v8140_v34 = vld [vmem:[#allocation5 + $0x3b8] sm:$0xf0] }
 0x78a   :  { %v10851_v33 = vadd.f32 %v4577_v17, %v4489_v30  ;;  %v4402_v21 = vadd.f32 %v4401_v26, %v4313_v43  ;;  %v8932_v30 = vld [vmem:[#allocation5 + $0x3a4] sm:$0xf]  ;;  %v8527_v17 = vor.u32 %v9028_v46, %v8524_v25  ;;  %v8716_v26 = vld [vmem:[#allocation5 + $0x838] sm:$0xf0] }
 0x78b   :  { %v9076_v43 = vld [vmem:[#allocation5 + $0x824] sm:$0xf] }
 0x78c   :  { %5130 = vmatpush.bf16.msra.mxu2 %v8527_v17 }
 0x78f   :  { %v4490_v16 = vpop.f32.mrf.mxu2  ;;  %v4315_v41 = vpop.f32.mrf.mxu0 }
 0x790   :  { %v4491_v50 = vadd.f32 %v4490_v16, %v4402_v21  ;;  %v4579_v61 = vpop.f32.mrf.mxu3  ;;  %v4316_v38 = vadd.f32 %v4315_v41, %v10711_v28  ;;  %v4404_v44 = vpop.f32.mrf.mxu1  ;;  %v8143_v16 = vor.u32 %v8932_v30, %v8140_v34 }
 0x792   :  { %v10854_v55 = vadd.f32 %v4579_v61, %v4491_v50  ;;  %v4405_v4 = vadd.f32 %v4404_v44, %v4316_v38  ;;  %4630 = vmatmul.bf16.gmra.mxu0 %v15794_v23  ;;  %v8719_v50 = vor.u32 %v9076_v43, %v8716_v26  ;;  %v8332_v23 = vld [vmem:[#allocation5 + $0x538] sm:$0xf0] }
 0x793   :  { %4719 = vmatmul.bf16.gmra.mxu1 %v15795_v40  ;;  %4952 = vmatpush.bf16.msra.mxu0 %v8143_v16  ;;  %v15797_v16 = vld [vmem:[#allocation96_spill] sm:$0xff] }
 0x794   :  { %15793 = vst [vmem:[#allocation48_spill] sm:$0xff] %v10854_v55  ;;  %4808 = vmatmul.bf16.gmra.mxu2 %v15748_v7  ;;  %5219 = vmatpush.bf16.msra.mxu3 %v8719_v50 }
 0x795   :  { %4897 = vmatmul.bf16.gmra.mxu3 %v15749_v15  ;;  %v8980_v15 = vld [vmem:[#allocation5 + $0x524] sm:$0xf] }
 0x796   :  { %v8335_v25 = vor.u32 %v8980_v15, %v8332_v23 }
 0x797   :  { %v4493_v21 = vpop.f32.mrf.mxu2  ;;  %v4317_v38 = vpop.f32.mrf.mxu0 }
 0x798   :  { %v4494_v61 = vadd.f32 %v4493_v21, %v4405_v4  ;;  %v4582_v41 = vpop.f32.mrf.mxu3  ;;  %v4318_v44 = vadd.f32 %v4317_v38, %v10711_v28  ;;  %v4406_v40 = vpop.f32.mrf.mxu1  ;;  %5041 = vmatpush.bf16.msra.mxu1 %v8335_v25  ;;  %v15796_v21 = vld [vmem:[#allocation95_spill] sm:$0xff] }
 0x79a   :  { %v10861_v7 = vadd.f32 %v4582_v41, %v4494_v61  ;;  %v4407_v46 = vadd.f32 %v4406_v40, %v4318_v44 }
 0x79f   :  { %v4495_v55 = vpop.f32.mrf.mxu2  ;;  %v4320_v34 = vpop.f32.mrf.mxu0 }
 0x7a0   :  { %v4496_v54 = vadd.f32 %v4495_v55, %v4407_v46  ;;  %v4584_v30 = vpop.f32.mrf.mxu3  ;;  %v4321_v4 = vadd.f32 %v4320_v34, %v10711_v28  ;;  %v4409_v43 = vpop.f32.mrf.mxu1 }
 0x7a2   :  { %v10864_v17 = vadd.f32 %v4584_v30, %v4496_v54  ;;  %v4410_v26 = vadd.f32 %v4409_v43, %v4321_v4  ;;  %4635 = vmatmul.bf16.gmra.mxu0 %v15796_v21  ;;  %v647_v30 = vperm.slane %v10705_v37, 4  ;;  %v15799_v43 = vld [vmem:[#allocation97_spill] sm:$0xff] }
 0x7a3   :  { %4724 = vmatmul.bf16.gmra.mxu1 %v15797_v16 }
 0x7a4   :  { %4813 = vmatmul.bf16.gmra.mxu2 %v15754_v42 }
 0x7a5   :  { %4902 = vmatmul.bf16.gmra.mxu3 %v15755_v29 }
 0x7a7   :  { %v4498_v23 = vpop.f32.mrf.mxu2  ;;  %v4322_v55 = vpop.f32.mrf.mxu0 }
 0x7a8   :  { %v4499_v40 = vadd.f32 %v4498_v23, %v4410_v26  ;;  %v4587_v50 = vpop.f32.mrf.mxu3  ;;  %v4323_v61 = vadd.f32 %v4322_v55, %v10711_v28  ;;  %v4411_v41 = vpop.f32.mrf.mxu1  ;;  %v15800_v28 = vld [vmem:[#allocation98_spill] sm:$0xff]  ;;  %v10882_v26 = vperm.slane %v647_v30, 0  ;;  %v9022_v23 = vld [vmem:[#allocation5 + $0x674] sm:$0xf] }
 0x7a9   :  { %v9070_v55 = vld [vmem:[#allocation5 + $0x7f4] sm:$0xf] }
 0x7aa   :  { %v10871_v38 = vadd.f32 %v4587_v50, %v4499_v40  ;;  %v4412_v54 = vadd.f32 %v4411_v41, %v4323_v61  ;;  %v8500_v40 = vld [vmem:[#allocation5 + $0x688] sm:$0xf0]  ;;  %v8926_v50 = vld [vmem:[#allocation5 + $0x374] sm:$0xf] }
 0x7ab   :  { %v8503_v37 = vor.u32 %v9022_v23, %v8500_v40 }
 0x7ad   :  { %5131 = vmatpush.bf16.msra.mxu2 %v8503_v37 }
 0x7af   :  { %v4500_v44 = vpop.f32.mrf.mxu2  ;;  %v4601_v25 = vpop.f32.mrf.mxu0 }
 0x7b0   :  { %v4501_v15 = vadd.f32 %v4500_v44, %v4412_v54  ;;  %v4589_v46 = vpop.f32.mrf.mxu3  ;;  %v4602_v42 = vadd.f32 %v4601_v25, %v10721_v1  ;;  %v4690_v34 = vpop.f32.mrf.mxu1  ;;  %v8116_v1 = vld [vmem:[#allocation5 + $0x388] sm:$0xf0] }
 0x7b1   :  { %v8119_v41 = vor.u32 %v8926_v50, %v8116_v1  ;;  %v8692_v54 = vld [vmem:[#allocation5 + $0x808] sm:$0xf0] }
 0x7b2   :  { %v10875_v29 = vadd.f32 %v4589_v46, %v4501_v15  ;;  %v10877_v4 = vadd.f32 %v4690_v34, %v4602_v42  ;;  %4640 = vmatmul.bf16.gmra.mxu0 %v15799_v43  ;;  %v8695_v25 = vor.u32 %v9070_v55, %v8692_v54  ;;  %v8974_v42 = vld [vmem:[#allocation5 + $0x4f4] sm:$0xf]  ;;  %v8308_v34 = vld [vmem:[#allocation5 + $0x508] sm:$0xf0] }
 0x7b3   :  { %4729 = vmatmul.bf16.gmra.mxu1 %v15800_v28  ;;  %4953 = vmatpush.bf16.msra.mxu0 %v8119_v41  ;;  %v8311_v40 = vor.u32 %v8974_v42, %v8308_v34  ;;  %v15953_v43 = vld [vmem:[#allocation138_spill] sm:$0xff] }
 0x7b4   :  { %15798 = vst [vmem:[#allocation49_spill] sm:$0xff] %v10877_v4  ;;  %4818 = vmatmul.bf16.gmra.mxu2 %v15758_v48  ;;  %5220 = vmatpush.bf16.msra.mxu3 %v8695_v25 }
 0x7b5   :  { %4907 = vmatmul.bf16.gmra.mxu3 %v15759_v59  ;;  %5042 = vmatpush.bf16.msra.mxu1 %v8311_v40 }
 0x7b7   :  { %v4779_v61 = vpop.f32.mrf.mxu2  ;;  %v4603_v46 = vpop.f32.mrf.mxu0 }
 0x7b8   :  { %v4780_v44 = vadd.f32 %v4779_v61, %v10882_v26  ;;  %v4868_v15 = vpop.f32.mrf.mxu3  ;;  %v4604_v48 = vadd.f32 %v4603_v46, %v10724_v63  ;;  %v4692_v30 = vpop.f32.mrf.mxu1 }
 0x7ba   :  { %v10887_v59 = vadd.f32 %v4868_v15, %v4780_v44  ;;  %v10889_v23 = vadd.f32 %v4692_v30, %v4604_v48 }
 0x7bc   :  { %15801 = vst [vmem:[#allocation52_spill] sm:$0xff] %v10887_v59  ;;  %v11264_v59 = vmax.f32 %v15953_v43, 0.0 }
 0x7bd   :  { %15802 = vst [vmem:[#allocation53_spill] sm:$0xff] %v10889_v23 }
 0x7be   :  { %15954 = vst [vmem:[#allocation138_spill] sm:$0xff] %v11264_v59 }
 0x7bf   :  { %v4781_v50 = vpop.f32.mrf.mxu2  ;;  %v4606_v4 = vpop.f32.mrf.mxu0 }
 0x7c0   :  { %v4782_v1 = vadd.f32 %v4781_v50, %v10882_v26  ;;  %v4870_v61 = vpop.f32.mrf.mxu3  ;;  %v4607_v37 = vadd.f32 %v4606_v4, %v10731_v19  ;;  %v4695_v55 = vpop.f32.mrf.mxu1 }
 0x7c2   :  { %v10893_v63 = vadd.f32 %v4870_v61, %v4782_v1  ;;  %v10895_v41 = vadd.f32 %v4695_v55, %v4607_v37  ;;  %4645 = vmatmul.bf16.gmra.mxu0 %v9695_v18  ;;  %v8476_v61 = vld [vmem:[#allocation5 + $0x658] sm:$0xf0]  ;;  %v8920_v55 = vld [vmem:[#allocation5 + $0x344] sm:$0xf] }
 0x7c3   :  { %4734 = vmatmul.bf16.gmra.mxu1 %v9698_v53  ;;  %v15946_v53 = vld [vmem:[#allocation89_spill] sm:$0xff] }
 0x7c4   :  { %15803 = vst [vmem:[#allocation56_spill] sm:$0xff] %v10893_v63  ;;  %4823 = vmatmul.bf16.gmra.mxu2 %v15762_v32  ;;  %v11250_v18 = vmax.f32 %v15946_v53, 0.0  ;;  %v15956_v53 = vld [vmem:[#allocation94_spill] sm:$0xff] }
 0x7c5   :  { %15804 = vst [vmem:[#allocation64_spill] sm:$0xff] %v10895_v41  ;;  %4912 = vmatmul.bf16.gmra.mxu3 %v15763_v9 }
 0x7c6   :  { %15947 = vst [vmem:[#allocation89_spill] sm:$0xff] %v11250_v18 }
 0x7c7   :  { %v4784_v54 = vpop.f32.mrf.mxu2  ;;  %v4608_v46 = vpop.f32.mrf.mxu0 }
 0x7c8   :  { %v4785_v44 = vadd.f32 %v4784_v54, %v10882_v26  ;;  %v4873_v15 = vpop.f32.mrf.mxu3  ;;  %v4609_v19 = vadd.f32 %v4608_v46, %v10734_v35  ;;  %v4697_v4 = vpop.f32.mrf.mxu1  ;;  %v9016_v35 = vld [vmem:[#allocation5 + $0x644] sm:$0xf]  ;;  %v8092_v54 = vld [vmem:[#allocation5 + $0x358] sm:$0xf0] }
 0x7c9   :  { %v8479_v37 = vor.u32 %v9016_v35, %v8476_v61  ;;  %v8668_v46 = vld [vmem:[#allocation5 + $0x7d8] sm:$0xf0] }
 0x7ca   :  { %v10903_v25 = vadd.f32 %v4873_v15, %v4785_v44  ;;  %v10905_v48 = vadd.f32 %v4697_v4, %v4609_v19  ;;  %v9064_v44 = vld [vmem:[#allocation5 + $0x7c4] sm:$0xf]  ;;  %v8095_v15 = vor.u32 %v8920_v55, %v8092_v54 }
 0x7cb   :  { %5132 = vmatpush.bf16.msra.mxu2 %v8479_v37 }
 0x7cc   :  { %15805 = vst [vmem:[#allocation72_spill] sm:$0xff] %v10903_v25  ;;  %4954 = vmatpush.bf16.msra.mxu0 %v8095_v15  ;;  %v15948_v25 = vld [vmem:[#allocation136_spill] sm:$0xff] }
 0x7cd   :  { %15806 = vst [vmem:[#allocation80_spill] sm:$0xff] %v10905_v48  ;;  %v11253_v23 = vmax.f32 %v15948_v25, 0.0  ;;  %v15958_v25 = vld [vmem:[#allocation140_spill] sm:$0xff] }
 0x7cf   :  { %v4786_v30 = vpop.f32.mrf.mxu2  ;;  %v4611_v40 = vpop.f32.mrf.mxu0  ;;  %15949 = vst [vmem:[#allocation136_spill] sm:$0xff] %v11253_v23 }
 0x7d0   :  { %v4787_v42 = vadd.f32 %v4786_v30, %v10882_v26  ;;  %v4875_v34 = vpop.f32.mrf.mxu3  ;;  %v4612_v32 = vadd.f32 %v4611_v40, %v10741_v8  ;;  %v4700_v9 = vpop.f32.mrf.mxu1  ;;  %v8968_v40 = vld [vmem:[#allocation5 + $0x4c4] sm:$0xf] }
 0x7d2   :  { %v10909_v50 = vadd.f32 %v4875_v34, %v4787_v42  ;;  %v10911_v1 = vadd.f32 %v4700_v9, %v4612_v32  ;;  %4650 = vmatmul.bf16.gmra.mxu0 %v9715_v0  ;;  %v8671_v42 = vor.u32 %v9064_v44, %v8668_v46  ;;  %v8284_v32 = vld [vmem:[#allocation5 + $0x4d8] sm:$0xf0]  ;;  %v15813_v46 = vld [vmem:[#allocation110_spill] sm:$0xff] }
 0x7d3   :  { %4739 = vmatmul.bf16.gmra.mxu1 %v9718_v13  ;;  %v8287_v35 = vor.u32 %v8968_v40, %v8284_v32 }
 0x7d4   :  { %15807 = vst [vmem:[#allocation85_spill] sm:$0xff] %v10909_v50  ;;  %4828 = vmatmul.bf16.gmra.mxu2 %v15764_v27  ;;  %5221 = vmatpush.bf16.msra.mxu3 %v8671_v42 }
 0x7d5   :  { %15808 = vst [vmem:[#allocation90_spill] sm:$0xff] %v10911_v1  ;;  %4917 = vmatmul.bf16.gmra.mxu3 %v15765_v6  ;;  %5043 = vmatpush.bf16.msra.mxu1 %v8287_v35  ;;  %v15943_v1 = vld [vmem:[#allocation134_spill] sm:$0xff] }
 0x7d6   :  { %v11242_v0 = vmax.f32 %v15943_v1, 0.0 }
 0x7d7   :  { %v4789_v8 = vpop.f32.mrf.mxu2  ;;  %v4613_v30 = vpop.f32.mrf.mxu0 }
 0x7d8   :  { %v4790_v19 = vadd.f32 %v4789_v8, %v10882_v26  ;;  %v4878_v4 = vpop.f32.mrf.mxu3  ;;  %v4614_v34 = vadd.f32 %v4613_v30, %v10744_v49  ;;  %v4702_v27 = vpop.f32.mrf.mxu1  ;;  %v11286_v43 = vmul.f32 %v11242_v0, %v11242_v0 }
 0x7da   :  { %v10919_v6 = vadd.f32 %v4878_v4, %v4790_v19  ;;  %v10921_v9 = vadd.f32 %v4702_v27, %v4614_v34  ;;  %v15814_v19 = vld [vmem:[#allocation57_spill] sm:$0xff]  ;;  %15965 = vst [vmem:[#allocation238_spill] sm:$0xff] %v11286_v43 }
 0x7db   :  { %v15815_v27 = vld [vmem:[#allocation37_spill] sm:$0xff] }
 0x7dc   :  { %15809 = vst [vmem:[#allocation95_spill] sm:$0xff] %v10919_v6 }
 0x7dd   :  { %15810 = vst [vmem:[#allocation96_spill] sm:$0xff] %v10921_v9 }
 0x7df   :  { %v4791_v61 = vpop.f32.mrf.mxu2  ;;  %v4616_v8 = vpop.f32.mrf.mxu0 }
 0x7e0   :  { %v4792_v55 = vadd.f32 %v4791_v61, %v10882_v26  ;;  %v4880_v54 = vpop.f32.mrf.mxu3  ;;  %v4617_v37 = vadd.f32 %v4616_v8, %v10751_v11  ;;  %v4705_v44 = vpop.f32.mrf.mxu1 }
 0x7e2   :  { %v10925_v49 = vadd.f32 %v4880_v54, %v4792_v55  ;;  %v10927_v15 = vadd.f32 %v4705_v44, %v4617_v37  ;;  %4655 = vmatmul.bf16.gmra.mxu0 %v9735_v31 }
 0x7e3   :  { %4744 = vmatmul.bf16.gmra.mxu1 %v15813_v46 }
 0x7e4   :  { %15811 = vst [vmem:[#allocation223_spill] sm:$0xff] %v10925_v49  ;;  %4833 = vmatmul.bf16.gmra.mxu2 %v15766_v58  ;;  %v15941_v49 = vld [vmem:[#allocation133_spill] sm:$0xff] }
 0x7e5   :  { %15812 = vst [vmem:[#allocation224_spill] sm:$0xff] %v10927_v15  ;;  %4922 = vmatmul.bf16.gmra.mxu3 %v15814_v19  ;;  %v9058_v15 = vld [vmem:[#allocation5 + $0x794] sm:$0xf]  ;;  %v11239_v13 = vmax.f32 %v15941_v49, 0.0 }
 0x7e6   :  { %15944 = vst [vmem:[#allocation133_spill] sm:$0xff] %v11242_v0 }
 0x7e7   :  { %v4794_v4 = vpop.f32.mrf.mxu2  ;;  %v4618_v34 = vpop.f32.mrf.mxu0 }
 0x7e8   :  { %v4795_v30 = vadd.f32 %v4794_v4, %v10882_v26  ;;  %v4883_v42 = vpop.f32.mrf.mxu3  ;;  %v4619_v11 = vadd.f32 %v4618_v34, %v15815_v27  ;;  %v4707_v40 = vpop.f32.mrf.mxu1  ;;  %v15820_v4 = vld [vmem:[#allocation113_spill] sm:$0xff]  ;;  %v15821_v34 = vld [vmem:[#allocation114_spill] sm:$0xff]  ;;  %v9010_v27 = vld [vmem:[#allocation5 + $0x614] sm:$0xf] }
 0x7ea   :  { %v10935_v32 = vadd.f32 %v4883_v42, %v4795_v30  ;;  %v10937_v35 = vadd.f32 %v4707_v40, %v4619_v11  ;;  %v15822_v30 = vld [vmem:[#allocation60_spill] sm:$0xff]  ;;  %v15823_v42 = vld [vmem:[#allocation61_spill] sm:$0xff]  ;;  %v8452_v11 = vld [vmem:[#allocation5 + $0x628] sm:$0xf0] }
 0x7eb   :  { %v8455_v40 = vor.u32 %v9010_v27, %v8452_v11  ;;  %v8962_v27 = vld [vmem:[#allocation5 + $0x494] sm:$0xf]  ;;  %v8260_v11 = vld [vmem:[#allocation5 + $0x4a8] sm:$0xf0] }
 0x7ec   :  { %15816 = vst [vmem:[#allocation57_spill] sm:$0xff] %v10935_v32 }
 0x7ed   :  { %15817 = vst [vmem:[#allocation37_spill] sm:$0xff] %v10937_v35  ;;  %v8068_v35 = vld [vmem:[#allocation5 + $0x328] sm:$0xf0]  ;;  %5133 = vmatpush.bf16.msra.mxu2 %v8455_v40 }
 0x7ef   :  { %v4796_v61 = vpop.f32.mrf.mxu2  ;;  %v4621_v8 = vpop.f32.mrf.mxu0 }
 0x7f0   :  { %v4797_v55 = vadd.f32 %v4796_v61, %v10882_v26  ;;  %v4885_v54 = vpop.f32.mrf.mxu3  ;;  %v4622_v58 = vadd.f32 %v4621_v8, %v10761_v45  ;;  %v4710_v37 = vpop.f32.mrf.mxu1  ;;  %v8914_v61 = vld [vmem:[#allocation5 + $0x314] sm:$0xf] }
 0x7f1   :  { %v8071_v8 = vor.u32 %v8914_v61, %v8068_v35 }
 0x7f2   :  { %v10941_v44 = vadd.f32 %v4885_v54, %v4797_v55  ;;  %v10943_v19 = vadd.f32 %v4710_v37, %v4622_v58  ;;  %4660 = vmatmul.bf16.gmra.mxu0 %v15820_v4  ;;  %v8644_v55 = vld [vmem:[#allocation5 + $0x7a8] sm:$0xf0] }
 0x7f3   :  { %4749 = vmatmul.bf16.gmra.mxu1 %v15821_v34  ;;  %4955 = vmatpush.bf16.msra.mxu0 %v8071_v8 }
 0x7f4   :  { %15818 = vst [vmem:[#allocation225_spill] sm:$0xff] %v10941_v44  ;;  %4838 = vmatmul.bf16.gmra.mxu2 %v15822_v30  ;;  %v8263_v44 = vor.u32 %v8962_v27, %v8260_v11 }
 0x7f5   :  { %15819 = vst [vmem:[#allocation226_spill] sm:$0xff] %v10943_v19  ;;  %4927 = vmatmul.bf16.gmra.mxu3 %v15823_v42  ;;  %v8647_v19 = vor.u32 %v9058_v15, %v8644_v55  ;;  %v15828_v55 = vld [vmem:[#allocation117_spill] sm:$0xff] }
 0x7f6   :  { %5044 = vmatpush.bf16.msra.mxu1 %v8263_v44 }
 0x7f7   :  { %v4799_v45 = vpop.f32.mrf.mxu2  ;;  %v4623_v37 = vpop.f32.mrf.mxu0  ;;  %5222 = vmatpush.bf16.msra.mxu3 %v8647_v19  ;;  %v15829_v19 = vld [vmem:[#allocation118_spill] sm:$0xff] }
 0x7f8   :  { %v4800_v54 = vadd.f32 %v4799_v45, %v10882_v26  ;;  %v4888_v58 = vpop.f32.mrf.mxu3  ;;  %v4624_v34 = vadd.f32 %v4623_v37, %v10764_v47  ;;  %v4712_v30 = vpop.f32.mrf.mxu1 }
 0x7fa   :  { %v10951_v42 = vadd.f32 %v4888_v58, %v4800_v54  ;;  %v10953_v4 = vadd.f32 %v4712_v30, %v4624_v34  ;;  %v15830_v34 = vld [vmem:[#allocation65_spill] sm:$0xff]  ;;  %v15831_v30 = vld [vmem:[#allocation40_spill] sm:$0xff] }
 0x7fc   :  { %15824 = vst [vmem:[#allocation60_spill] sm:$0xff] %v10951_v42 }
 0x7fd   :  { %15825 = vst [vmem:[#allocation61_spill] sm:$0xff] %v10953_v4  ;;  %v15938_v4 = vld [vmem:[#allocation132_spill] sm:$0xff] }
 0x7fe   :  { %15942 = vst [vmem:[#allocation132_spill] sm:$0xff] %v11239_v13 }
 0x7ff   :  { %v4801_v35 = vpop.f32.mrf.mxu2  ;;  %v4626_v46 = vpop.f32.mrf.mxu0 }
 0x800   :  { %v4802_v61 = vadd.f32 %v4801_v35, %v10882_v26  ;;  %v4890_v45 = vpop.f32.mrf.mxu3  ;;  %v4627_v15 = vadd.f32 %v4626_v46, %v10771_v51  ;;  %v4715_v40 = vpop.f32.mrf.mxu1 }
 0x802   :  { %v10957_v47 = vadd.f32 %v4890_v45, %v4802_v61  ;;  %v10959_v8 = vadd.f32 %v4715_v40, %v4627_v15  ;;  %4665 = vmatmul.bf16.gmra.mxu0 %v15828_v55  ;;  %v15929_v55 = vld [vmem:[#allocation128_spill] sm:$0xff] }
 0x803   :  { %4754 = vmatmul.bf16.gmra.mxu1 %v15829_v19  ;;  %v15927_v19 = vld [vmem:[#allocation79_spill] sm:$0xff] }
 0x804   :  { %15826 = vst [vmem:[#allocation227_spill] sm:$0xff] %v10957_v47  ;;  %4843 = vmatmul.bf16.gmra.mxu2 %v15771_v36  ;;  %v11216_v47 = vmax.f32 %v15938_v4, 0.0 }
 0x805   :  { %15827 = vst [vmem:[#allocation228_spill] sm:$0xff] %v10959_v8  ;;  %4932 = vmatmul.bf16.gmra.mxu3 %v15830_v34  ;;  %v15836_v8 = vld [vmem:[#allocation121_spill] sm:$0xff] }
 0x806   :  { %v11258_v1 = vmul.f32 %v11216_v47, %v11216_v47 }
 0x807   :  { %v4804_v44 = vpop.f32.mrf.mxu2  ;;  %v4628_v37 = vpop.f32.mrf.mxu0 }
 0x808   :  { %v4805_v54 = vadd.f32 %v4804_v44, %v10882_v26  ;;  %v4893_v58 = vpop.f32.mrf.mxu3  ;;  %v4629_v51 = vadd.f32 %v4628_v37, %v15831_v30  ;;  %v4717_v46 = vpop.f32.mrf.mxu1  ;;  %v15837_v37 = vld [vmem:[#allocation122_spill] sm:$0xff]  ;;  %15950 = vst [vmem:[#allocation235_spill] sm:$0xff] %v11258_v1 }
 0x809   :  { %v15963_v1 = vld [vmem:[#allocation38_spill] sm:$0xff] }
 0x80a   :  { %v10967_v27 = vadd.f32 %v4893_v58, %v4805_v54  ;;  %v10969_v11 = vadd.f32 %v4717_v46, %v4629_v51  ;;  %v15838_v54 = vld [vmem:[#allocation68_spill] sm:$0xff]  ;;  %v15839_v58 = vld [vmem:[#allocation69_spill] sm:$0xff] }
 0x80c   :  { %15832 = vst [vmem:[#allocation65_spill] sm:$0xff] %v10967_v27  ;;  %v15931_v27 = vld [vmem:[#allocation129_spill] sm:$0xff] }
 0x80d   :  { %15833 = vst [vmem:[#allocation40_spill] sm:$0xff] %v10969_v11  ;;  %v15844_v11 = vld [vmem:[#allocation125_spill] sm:$0xff] }
 0x80f   :  { %v4806_v35 = vpop.f32.mrf.mxu2  ;;  %v4631_v15 = vpop.f32.mrf.mxu0 }
 0x810   :  { %v4807_v61 = vadd.f32 %v4806_v35, %v10882_v26  ;;  %v4895_v45 = vpop.f32.mrf.mxu3  ;;  %v4632_v36 = vadd.f32 %v4631_v15, %v10781_v10  ;;  %v4720_v40 = vpop.f32.mrf.mxu1 }
 0x812   :  { %v10973_v34 = vadd.f32 %v4895_v45, %v4807_v61  ;;  %v10975_v44 = vadd.f32 %v4720_v40, %v4632_v36  ;;  %4670 = vmatmul.bf16.gmra.mxu0 %v15836_v8 }
 0x813   :  { %4759 = vmatmul.bf16.gmra.mxu1 %v15837_v37 }
 0x814   :  { %15834 = vst [vmem:[#allocation229_spill] sm:$0xff] %v10973_v34  ;;  %4848 = vmatmul.bf16.gmra.mxu2 %v15838_v54 }
 0x815   :  { %15835 = vst [vmem:[#allocation230_spill] sm:$0xff] %v10975_v44  ;;  %4937 = vmatmul.bf16.gmra.mxu3 %v15839_v58 }
 0x817   :  { %v4809_v30 = vpop.f32.mrf.mxu2  ;;  %v4633_v35 = vpop.f32.mrf.mxu0 }
 0x818   :  { %v4810_v51 = vadd.f32 %v4809_v30, %v10882_v26  ;;  %v4898_v46 = vpop.f32.mrf.mxu3  ;;  %v4634_v10 = vadd.f32 %v4633_v35, %v10784_v5  ;;  %v4722_v15 = vpop.f32.mrf.mxu1  ;;  %v15845_v5 = vld [vmem:[#allocation126_spill] sm:$0xff] }
 0x81a   :  { %v10983_v61 = vadd.f32 %v4898_v46, %v4810_v51  ;;  %v10985_v45 = vadd.f32 %v4722_v15, %v4634_v10  ;;  %v15846_v51 = vld [vmem:[#allocation73_spill] sm:$0xff] }
 0x81c   :  { %15840 = vst [vmem:[#allocation68_spill] sm:$0xff] %v10983_v61 }
 0x81d   :  { %15841 = vst [vmem:[#allocation69_spill] sm:$0xff] %v10985_v45  ;;  %v15852_v45 = vld [vmem:[#allocation14_spill] sm:$0xff] }
 0x81f   :  { %v4811_v36 = vpop.f32.mrf.mxu2  ;;  %v4636_v37 = vpop.f32.mrf.mxu0 }
 0x820   :  { %v4812_v40 = vadd.f32 %v4811_v36, %v10882_v26  ;;  %v4900_v44 = vpop.f32.mrf.mxu3  ;;  %v4637_v54 = vadd.f32 %v4636_v37, %v10791_v56  ;;  %v4725_v58 = vpop.f32.mrf.mxu1  ;;  %v15847_v36 = vld [vmem:[#allocation41_spill] sm:$0xff] }
 0x822   :  { %v10989_v8 = vadd.f32 %v4900_v44, %v4812_v40  ;;  %v10991_v30 = vadd.f32 %v4725_v58, %v4637_v54  ;;  %4675 = vmatmul.bf16.gmra.mxu0 %v15844_v11 }
 0x823   :  { %4764 = vmatmul.bf16.gmra.mxu1 %v15845_v5 }
 0x824   :  { %15842 = vst [vmem:[#allocation231_spill] sm:$0xff] %v10989_v8  ;;  %4853 = vmatmul.bf16.gmra.mxu2 %v15776_v62 }
 0x825   :  { %15843 = vst [vmem:[#allocation232_spill] sm:$0xff] %v10991_v30  ;;  %4942 = vmatmul.bf16.gmra.mxu3 %v15846_v51 }
 0x827   :  { %v4814_v46 = vpop.f32.mrf.mxu2  ;;  %v4638_v15 = vpop.f32.mrf.mxu0 }
 0x828   :  { %v4815_v35 = vadd.f32 %v4814_v46, %v10882_v26  ;;  %v4903_v10 = vpop.f32.mrf.mxu3  ;;  %v4639_v56 = vadd.f32 %v4638_v15, %v15847_v36  ;;  %v4727_v37 = vpop.f32.mrf.mxu1  ;;  %v15853_v15 = vld [vmem:[#allocation15_spill] sm:$0xff] }
 0x82a   :  { %v10999_v44 = vadd.f32 %v4903_v10, %v4815_v35  ;;  %v11001_v40 = vadd.f32 %v4727_v37, %v4639_v56  ;;  %v15854_v35 = vld [vmem:[#allocation77_spill] sm:$0xff]  ;;  %v15855_v10 = vld [vmem:[#allocation78_spill] sm:$0xff] }
 0x82c   :  { %15848 = vst [vmem:[#allocation73_spill] sm:$0xff] %v10999_v44 }
 0x82d   :  { %15849 = vst [vmem:[#allocation41_spill] sm:$0xff] %v11001_v40  ;;  %v15920_v40 = vld [vmem:[#allocation123_spill] sm:$0xff] }
 0x82e   :  { %v11152_v8 = vmax.f32 %v15920_v40, 0.0 }
 0x82f   :  { %v4816_v54 = vpop.f32.mrf.mxu2  ;;  %v4641_v11 = vpop.f32.mrf.mxu0 }
 0x830   :  { %v4817_v58 = vadd.f32 %v4816_v54, %v10882_v26  ;;  %v4905_v5 = vpop.f32.mrf.mxu3  ;;  %v4642_v62 = vadd.f32 %v4641_v11, %v10801_v3  ;;  %v4730_v51 = vpop.f32.mrf.mxu1 }
 0x832   :  { %v11005_v30 = vadd.f32 %v4905_v5, %v4817_v58  ;;  %v11007_v46 = vadd.f32 %v4730_v51, %v4642_v62  ;;  %4956 = vmatmul.bf16.vlgmr.msra.gmra.mxu0 %v15852_v45 }
 0x833   :  { %5045 = vmatmul.bf16.vlgmr.msra.gmra.mxu1 %v15853_v15 }
 0x834   :  { %15850 = vst [vmem:[#allocation233_spill] sm:$0xff] %v11005_v30  ;;  %5134 = vmatmul.bf16.vlgmr.msra.gmra.mxu2 %v15854_v35 }
 0x835   :  { %15851 = vst [vmem:[#allocation234_spill] sm:$0xff] %v11007_v46  ;;  %5223 = vmatmul.bf16.vlgmr.msra.gmra.mxu3 %v15855_v10  ;;  %v15860_v46 = vld [vmem:[#allocation18_spill] sm:$0xff] }
 0x837   :  { %v4819_v36 = vpop.f32.mrf.mxu2  ;;  %v4643_v54 = vpop.f32.mrf.mxu0 }
 0x838   :  { %v4820_v56 = vadd.f32 %v4819_v36, %v10882_v26  ;;  %v4908_v37 = vpop.f32.mrf.mxu3  ;;  %v4644_v3 = vadd.f32 %v4643_v54, %v10804_v39  ;;  %v4732_v11 = vpop.f32.mrf.mxu1  ;;  %v15861_v39 = vld [vmem:[#allocation19_spill] sm:$0xff] }
 0x83a   :  { %v11015_v5 = vadd.f32 %v4908_v37, %v4820_v56  ;;  %v11017_v58 = vadd.f32 %v4732_v11, %v4644_v3  ;;  %v15862_v56 = vld [vmem:[#allocation81_spill] sm:$0xff] }
 0x83c   :  { %15856 = vst [vmem:[#allocation14_spill] sm:$0xff] %v11015_v5  ;;  %v15868_v5 = vld [vmem:[#allocation22_spill] sm:$0xff] }
 0x83d   :  { %15857 = vst [vmem:[#allocation15_spill] sm:$0xff] %v11017_v58 }
 0x83f   :  { %v4821_v62 = vpop.f32.mrf.mxu2  ;;  %v4646_v15 = vpop.f32.mrf.mxu0 }
 0x840   :  { %v4822_v45 = vadd.f32 %v4821_v62, %v10882_v26  ;;  %v4910_v51 = vpop.f32.mrf.mxu3  ;;  %v4647_v35 = vadd.f32 %v4646_v15, %v10811_v22  ;;  %v4735_v10 = vpop.f32.mrf.mxu1  ;;  %v15863_v62 = vld [vmem:[#allocation44_spill] sm:$0xff] }
 0x842   :  { %v11021_v30 = vadd.f32 %v4910_v51, %v4822_v45  ;;  %v11023_v36 = vadd.f32 %v4735_v10, %v4647_v35  ;;  %4961 = vmatmul.bf16.gmra.mxu0 %v15860_v46 }
 0x843   :  { %5050 = vmatmul.bf16.gmra.mxu1 %v15861_v39 }
 0x844   :  { %15858 = vst [vmem:[#allocation77_spill] sm:$0xff] %v11021_v30  ;;  %5139 = vmatmul.bf16.gmra.mxu2 %v15781_v12 }
 0x845   :  { %15859 = vst [vmem:[#allocation78_spill] sm:$0xff] %v11023_v36  ;;  %5228 = vmatmul.bf16.gmra.mxu3 %v15862_v56  ;;  %v15917_v36 = vld [vmem:[#allocation120_spill] sm:$0xff] }
 0x846   :  { %v11148_v58 = vmax.f32 %v15917_v36, 0.0  ;;  %v11166_v36 = vmax.f32 %v15929_v55, 0.0 }
 0x847   :  { %v4824_v37 = vpop.f32.mrf.mxu2  ;;  %v4648_v11 = vpop.f32.mrf.mxu0 }
 0x848   :  { %v4825_v54 = vadd.f32 %v4824_v37, %v10882_v26  ;;  %v4913_v3 = vpop.f32.mrf.mxu3  ;;  %v4649_v22 = vadd.f32 %v4648_v11, %v15863_v62  ;;  %v4737_v15 = vpop.f32.mrf.mxu1  ;;  %v15869_v11 = vld [vmem:[#allocation23_spill] sm:$0xff]  ;;  %v11228_v31 = vmul.f32 %v11166_v36, %v11166_v36 }
 0x84a   :  { %v11031_v45 = vadd.f32 %v4913_v3, %v4825_v54  ;;  %v11033_v51 = vadd.f32 %v4737_v15, %v4649_v22  ;;  %v15870_v54 = vld [vmem:[#allocation82_spill] sm:$0xff]  ;;  %v15871_v3 = vld [vmem:[#allocation83_spill] sm:$0xff] }
 0x84c   :  { %15864 = vst [vmem:[#allocation18_spill] sm:$0xff] %v11031_v45  ;;  %v15876_v45 = vld [vmem:[#allocation26_spill] sm:$0xff] }
 0x84d   :  { %15865 = vst [vmem:[#allocation19_spill] sm:$0xff] %v11033_v51  ;;  %v15915_v51 = vld [vmem:[#allocation119_spill] sm:$0xff] }
 0x84f   :  { %v4826_v35 = vpop.f32.mrf.mxu2  ;;  %v4651_v39 = vpop.f32.mrf.mxu0 }
 0x850   :  { %v4827_v46 = vadd.f32 %v4826_v35, %v10882_v26  ;;  %v4915_v10 = vpop.f32.mrf.mxu3  ;;  %v4652_v12 = vadd.f32 %v4651_v39, %v10821_v52  ;;  %v4740_v56 = vpop.f32.mrf.mxu1 }
 0x852   :  { %v11037_v30 = vadd.f32 %v4915_v10, %v4827_v46  ;;  %v11039_v37 = vadd.f32 %v4740_v56, %v4652_v12  ;;  %4966 = vmatmul.bf16.gmra.mxu0 %v15868_v5 }
 0x853   :  { %5055 = vmatmul.bf16.gmra.mxu1 %v15869_v11 }
 0x854   :  { %15866 = vst [vmem:[#allocation81_spill] sm:$0xff] %v11037_v30  ;;  %5144 = vmatmul.bf16.gmra.mxu2 %v15870_v54 }
 0x855   :  { %15867 = vst [vmem:[#allocation44_spill] sm:$0xff] %v11039_v37  ;;  %5233 = vmatmul.bf16.gmra.mxu3 %v15871_v3 }
 0x857   :  { %v4829_v62 = vpop.f32.mrf.mxu2  ;;  %v4653_v35 = vpop.f32.mrf.mxu0 }
 0x858   :  { %v4830_v22 = vadd.f32 %v4829_v62, %v10882_v26  ;;  %v4918_v15 = vpop.f32.mrf.mxu3  ;;  %v4654_v52 = vadd.f32 %v4653_v35, %v10824_v2  ;;  %v4742_v39 = vpop.f32.mrf.mxu1  ;;  %v15877_v2 = vld [vmem:[#allocation27_spill] sm:$0xff] }
 0x85a   :  { %v11047_v46 = vadd.f32 %v4918_v15, %v4830_v22  ;;  %v11049_v10 = vadd.f32 %v4742_v39, %v4654_v52  ;;  %v15878_v22 = vld [vmem:[#allocation86_spill] sm:$0xff] }
 0x85c   :  { %15872 = vst [vmem:[#allocation22_spill] sm:$0xff] %v11047_v46  ;;  %v15884_v46 = vld [vmem:[#allocation30_spill] sm:$0xff] }
 0x85d   :  { %15873 = vst [vmem:[#allocation23_spill] sm:$0xff] %v11049_v10  ;;  %v15913_v10 = vld [vmem:[#allocation116_spill] sm:$0xff] }
 0x85e   :  { %v11142_v37 = vmax.f32 %v15913_v10, 0.0  ;;  %15921 = vst [vmem:[#allocation116_spill] sm:$0xff] %v11152_v8 }
 0x85f   :  { %v4831_v12 = vpop.f32.mrf.mxu2  ;;  %v4656_v11 = vpop.f32.mrf.mxu0 }
 0x860   :  { %v4832_v5 = vadd.f32 %v4831_v12, %v10882_v26  ;;  %v4920_v56 = vpop.f32.mrf.mxu3  ;;  %v4657_v54 = vadd.f32 %v4656_v11, %v10831_v24  ;;  %v4745_v3 = vpop.f32.mrf.mxu1  ;;  %v15879_v12 = vld [vmem:[#allocation45_spill] sm:$0xff] }
 0x862   :  { %v11053_v30 = vadd.f32 %v4920_v56, %v4832_v5  ;;  %v11055_v62 = vadd.f32 %v4745_v3, %v4657_v54  ;;  %4971 = vmatmul.bf16.gmra.mxu0 %v15876_v45 }
 0x863   :  { %5060 = vmatmul.bf16.gmra.mxu1 %v15877_v2 }
 0x864   :  { %15874 = vst [vmem:[#allocation82_spill] sm:$0xff] %v11053_v30  ;;  %5149 = vmatmul.bf16.gmra.mxu2 %v15786_v14 }
 0x865   :  { %15875 = vst [vmem:[#allocation83_spill] sm:$0xff] %v11055_v62  ;;  %5238 = vmatmul.bf16.gmra.mxu3 %v15878_v22 }
 0x867   :  { %v4834_v15 = vpop.f32.mrf.mxu2  ;;  %v4658_v39 = vpop.f32.mrf.mxu0 }
 0x868   :  { %v4835_v35 = vadd.f32 %v4834_v15, %v10882_v26  ;;  %v4923_v52 = vpop.f32.mrf.mxu3  ;;  %v4659_v24 = vadd.f32 %v4658_v39, %v15879_v12  ;;  %v4747_v11 = vpop.f32.mrf.mxu1  ;;  %v15885_v39 = vld [vmem:[#allocation31_spill] sm:$0xff] }
 0x86a   :  { %v11063_v5 = vadd.f32 %v4923_v52, %v4835_v35  ;;  %v11065_v56 = vadd.f32 %v4747_v11, %v4659_v24  ;;  %v15886_v35 = vld [vmem:[#allocation87_spill] sm:$0xff]  ;;  %v15887_v52 = vld [vmem:[#allocation88_spill] sm:$0xff] }
 0x86c   :  { %15880 = vst [vmem:[#allocation26_spill] sm:$0xff] %v11063_v5 }
 0x86d   :  { %15881 = vst [vmem:[#allocation27_spill] sm:$0xff] %v11065_v56 }
 0x86f   :  { %v4836_v54 = vpop.f32.mrf.mxu2  ;;  %v4661_v2 = vpop.f32.mrf.mxu0 }
 0x870   :  { %v4837_v45 = vadd.f32 %v4836_v54, %v10882_v26  ;;  %v4925_v3 = vpop.f32.mrf.mxu3  ;;  %v4662_v14 = vadd.f32 %v4661_v2, %v10841_v20  ;;  %v4750_v22 = vpop.f32.mrf.mxu1 }
 0x872   :  { %v11069_v30 = vadd.f32 %v4925_v3, %v4837_v45  ;;  %v11071_v15 = vadd.f32 %v4750_v22, %v4662_v14  ;;  %4976 = vmatmul.bf16.gmra.mxu0 %v15884_v46 }
 0x873   :  { %5065 = vmatmul.bf16.gmra.mxu1 %v15885_v39 }
 0x874   :  { %15882 = vst [vmem:[#allocation86_spill] sm:$0xff] %v11069_v30  ;;  %5154 = vmatmul.bf16.gmra.mxu2 %v15886_v35  ;;  %v15890_v30 = vld [vmem:[#allocation99_spill] sm:$0xff] }
 0x875   :  { %15883 = vst [vmem:[#allocation45_spill] sm:$0xff] %v11071_v15  ;;  %5243 = vmatmul.bf16.gmra.mxu3 %v15887_v52  ;;  %v11086_v5 = vmax.f32 %v15890_v30, 0.0  ;;  %v15903_v30 = vld [vmem:[#allocation35_spill] sm:$0xff] }
 0x877   :  { %v4839_v12 = vpop.f32.mrf.mxu2  ;;  %v4663_v54 = vpop.f32.mrf.mxu0  ;;  %15891 = vst [vmem:[#allocation87_spill] sm:$0xff] %v11086_v5 }
 0x878   :  { %v4840_v24 = vadd.f32 %v4839_v12, %v10882_v26  ;;  %v4928_v11 = vpop.f32.mrf.mxu3  ;;  %v4664_v20 = vadd.f32 %v4663_v54, %v10844_v60  ;;  %v4752_v2 = vpop.f32.mrf.mxu1  ;;  %v15892_v12 = vld [vmem:[#allocation100_spill] sm:$0xff] }
 0x879   :  { %v11089_v15 = vmax.f32 %v15892_v12, 0.0  ;;  %v15897_v54 = vld [vmem:[#allocation104_spill] sm:$0xff] }
 0x87a   :  { %v11079_v45 = vadd.f32 %v4928_v11, %v4840_v24  ;;  %v11081_v3 = vadd.f32 %v4752_v2, %v4664_v20  ;;  %v15895_v24 = vld [vmem:[#allocation103_spill] sm:$0xff]  ;;  %v11097_v20 = vmax.f32 %v15897_v54, 0.0  ;;  %v15905_v12 = vld [vmem:[#allocation108_spill] sm:$0xff] }
 0x87b   :  { %15893 = vst [vmem:[#allocation88_spill] sm:$0xff] %v11089_v15  ;;  %v11094_v11 = vmax.f32 %v15895_v24, 0.0  ;;  %v15899_v2 = vld [vmem:[#allocation107_spill] sm:$0xff]  ;;  %v11129_v24 = vmax.f32 %v15905_v12, 0.0  ;;  %v11145_v12 = vmax.f32 %v15915_v51, 0.0  ;;  %v11163_v51 = vmax.f32 %v15927_v19, 0.0 }
 0x87c   :  { %15888 = vst [vmem:[#allocation30_spill] sm:$0xff] %v11079_v45 }
 0x87d   :  { %15889 = vst [vmem:[#allocation31_spill] sm:$0xff] %v11081_v3  ;;  %v11175_v40 = vmul.f32 %v11129_v24, %v11129_v24 }
 0x87e   :  { %15896 = vst [vmem:[#allocation100_spill] sm:$0xff] %v11094_v11 }
 0x87f   :  { %v4841_v14 = vpop.f32.mrf.mxu2  ;;  %v4666_v39 = vpop.f32.mrf.mxu0  ;;  %15898 = vst [vmem:[#allocation103_spill] sm:$0xff] %v11097_v20 }
 0x880   :  { %v4842_v46 = vadd.f32 %v4841_v14, %v10882_v26  ;;  %v4930_v22 = vpop.f32.mrf.mxu3  ;;  %v4667_v35 = vadd.f32 %v4666_v39, %v10851_v33  ;;  %v4755_v52 = vpop.f32.mrf.mxu1  ;;  %v11100_v14 = vmax.f32 %v15899_v2, 0.0  ;;  %v15902_v33 = vld [vmem:[#allocation34_spill] sm:$0xff]  ;;  %v15904_v39 = vld [vmem:[#allocation91_spill] sm:$0xff]  ;;  %15928 = vst [vmem:[#allocation123_spill] sm:$0xff] %v11163_v51 }
 0x881   :  { %15906 = vst [vmem:[#allocation34_spill] sm:$0xff] %v11129_v24  ;;  %v15907_v2 = vld [vmem:[#allocation111_spill] sm:$0xff] }
 0x882   :  { %v11091_v60 = vadd.f32 %v4930_v22, %v4842_v46  ;;  %15900 = vst [vmem:[#allocation104_spill] sm:$0xff] %v11100_v14  ;;  %v11102_v45 = vadd.f32 %v4755_v52, %v4667_v35  ;;  %4981 = vmatmul.bf16.gmra.mxu0 %v15902_v33  ;;  %v11110_v46 = vmul.f32 %v11086_v5, %v11086_v5  ;;  %v11132_v33 = vmax.f32 %v15907_v2, 0.0  ;;  %v15919_v2 = vld [vmem:[#allocation48_spill] sm:$0xff] }
 0x883   :  { %5070 = vmatmul.bf16.gmra.mxu1 %v15903_v30  ;;  %v11114_v22 = vmul.f32 %v11089_v15, %v11089_v15  ;;  %v11118_v35 = vmul.f32 %v11094_v11, %v11094_v11  ;;  %v11122_v52 = vmul.f32 %v11097_v20, %v11097_v20  ;;  %v15909_v30 = vld [vmem:[#allocation112_spill] sm:$0xff]  ;;  %15914 = vst [vmem:[#allocation111_spill] sm:$0xff] %v11142_v37 }
 0x884   :  { %15894 = vst [vmem:[#allocation99_spill] sm:$0xff] %v11091_v60  ;;  %5159 = vmatmul.bf16.gmra.mxu2 %v15791_v57  ;;  %v11126_v57 = vmul.f32 %v11100_v14, %v11100_v14  ;;  %v15911_v60 = vld [vmem:[#allocation115_spill] sm:$0xff] }
 0x885   :  { %15901 = vst [vmem:[#allocation107_spill] sm:$0xff] %v11102_v45  ;;  %5248 = vmatmul.bf16.gmra.mxu3 %v15904_v39  ;;  %v11135_v39 = vmax.f32 %v15909_v30, 0.0  ;;  %v11138_v45 = vmax.f32 %v15911_v60, 0.0  ;;  %v15922_v60 = vld [vmem:[#allocation124_spill] sm:$0xff] }
 0x886   :  { %15908 = vst [vmem:[#allocation35_spill] sm:$0xff] %v11132_v33  ;;  %v11155_v61 = vmax.f32 %v15922_v60, 0.0  ;;  %v11179_v60 = vmul.f32 %v11132_v33, %v11132_v33 }
 0x887   :  { %v4844_v54 = vpop.f32.mrf.mxu2  ;;  %15910 = vst [vmem:[#allocation91_spill] sm:$0xff] %v11135_v39  ;;  %v4668_v62 = vpop.f32.mrf.mxu0  ;;  %v11183_v19 = vmul.f32 %v11135_v39, %v11135_v39 }
 0x888   :  { %15912 = vst [vmem:[#allocation108_spill] sm:$0xff] %v11138_v45  ;;  %v4845_v3 = vadd.f32 %v4844_v54, %v10882_v26  ;;  %v4933_v56 = vpop.f32.mrf.mxu3  ;;  %v4669_v44 = vadd.f32 %v4668_v62, %v15919_v2  ;;  %v4757_v30 = vpop.f32.mrf.mxu1  ;;  %v15924_v54 = vld [vmem:[#allocation76_spill] sm:$0xff]  ;;  %v11169_v62 = vmax.f32 %v15931_v27, 0.0  ;;  %v11190_v27 = vmul.f32 %v11138_v45, %v11138_v45 }
 0x889   :  { %15916 = vst [vmem:[#allocation112_spill] sm:$0xff] %v11145_v12  ;;  %v11158_v34 = vmax.f32 %v15924_v54, 0.0 }
 0x88a   :  { %15918 = vst [vmem:[#allocation115_spill] sm:$0xff] %v11148_v58  ;;  %v11160_v10 = vadd.f32 %v4933_v56, %v4845_v3  ;;  %v11171_v2 = vadd.f32 %v4757_v30, %v4669_v44  ;;  %v15934_v56 = vld [vmem:[#allocation130_spill] sm:$0xff]  ;;  %v11194_v44 = vmul.f32 %v11142_v37, %v11142_v37  ;;  %v11198_v3 = vmul.f32 %v11145_v12, %v11145_v12  ;;  %v15936_v30 = vld [vmem:[#allocation84_spill] sm:$0xff] }
 0x88b   :  { %15923 = vst [vmem:[#allocation119_spill] sm:$0xff] %v11155_v61  ;;  %v11186_v55 = vmax.f32 %v15934_v56, 0.0  ;;  %v11201_v54 = vmax.f32 %v15936_v30, 0.0  ;;  %v11209_v56 = vmul.f32 %v11152_v8, %v11152_v8  ;;  %v11220_v42 = vmul.f32 %v11158_v34, %v11158_v34 }
 0x88c   :  { %15925 = vst [vmem:[#allocation120_spill] sm:$0xff] %v11158_v34  ;;  %v11224_v30 = vmul.f32 %v11163_v51, %v11163_v51  ;;  %v11232_v32 = vmul.f32 %v11169_v62, %v11169_v62 }
 0x88d   :  { %15926 = vst [vmem:[#allocation48_spill] sm:$0xff] %v11160_v10  ;;  %v11205_v10 = vmul.f32 %v11148_v58, %v11148_v58  ;;  %v11236_v4 = vmul.f32 %v11186_v55, %v11186_v55  ;;  %v11247_v41 = vmul.f32 %v11201_v54, %v11201_v54 }
 0x88e   :  { %15930 = vst [vmem:[#allocation124_spill] sm:$0xff] %v11166_v36 }
 0x88f   :  { %15932 = vst [vmem:[#allocation76_spill] sm:$0xff] %v11169_v62  ;;  %v4846_v9 = vpop.f32.mrf.mxu2  ;;  %v4671_v50 = vpop.f32.mrf.mxu0 }
 0x890   :  { %15933 = vst [vmem:[#allocation79_spill] sm:$0xff] %v11171_v2  ;;  %v11213_v2 = vmul.f32 %v11155_v61, %v11155_v61  ;;  %v4847_v6 = vadd.f32 %v4846_v9, %v10882_v26  ;;  %v4935_v48 = vpop.f32.mrf.mxu3  ;;  %v4672_v49 = vadd.f32 %v4671_v50, %v10861_v7  ;;  %v4760_v63 = vpop.f32.mrf.mxu1  ;;  %v15951_v9 = vld [vmem:[#allocation137_spill] sm:$0xff] }
 0x891   :  { %15935 = vst [vmem:[#allocation128_spill] sm:$0xff] %v11186_v55  ;;  %v11261_v28 = vmax.f32 %v15951_v9, 0.0  ;;  %v15960_v7 = vld [vmem:[#allocation145_spill] sm:$0xff]  ;;  %v11282_v9 = vmul.f32 %v11239_v13, %v11239_v13 }
 0x892   :  { %15937 = vst [vmem:[#allocation129_spill] sm:$0xff] %v11201_v54  ;;  %v11269_v54 = vmax.f32 %v15956_v53, 0.0  ;;  %v11275_v50 = vmax.f32 %v15960_v7, 0.0  ;;  %v11277_v55 = vadd.f32 %v4760_v63, %v4672_v49  ;;  %4986 = vmatmul.bf16.gmra.mxu0 %v15963_v1  ;;  %v15968_v53 = vld [vmem:[#allocation146_spill] sm:$0xff]  ;;  %v15970_v7 = vld [vmem:[#allocation39_spill] sm:$0xff]  ;;  %v15971_v63 = vld [vmem:[#allocation92_spill] sm:$0xff]  ;;  %v11298_v49 = vmul.f32 %v11250_v18, %v11250_v18 }
 0x893   :  { %15939 = vst [vmem:[#allocation130_spill] sm:$0xff] %v11216_v47  ;;  %5075 = vmatmul.bf16.gmra.mxu1 %v15970_v7  ;;  %v11302_v1 = vmul.f32 %v11253_v23, %v11253_v23  ;;  %v11313_v7 = vmul.f32 %v11261_v28, %v11261_v28 }
 0x894   :  { %15940 = vst [vmem:[#allocation84_spill] sm:$0xff] %v11236_v4  ;;  %v11272_v4 = vmax.f32 %v15958_v25, 0.0  ;;  %v11292_v25 = vmax.f32 %v15968_v53, 0.0  ;;  %5164 = vmatmul.bf16.gmra.mxu2 %v15971_v63  ;;  %v15978_v53 = vld [vmem:[#allocation93_spill] sm:$0xff]  ;;  %v11317_v63 = vmul.f32 %v11264_v59, %v11264_v59 }
 0x895   :  { %15945 = vst [vmem:[#allocation134_spill] sm:$0xff] %v11247_v41  ;;  %v11266_v41 = vadd.f32 %v4935_v48, %v4847_v6  ;;  %v15966_v48 = vld [vmem:[#allocation141_spill] sm:$0xff]  ;;  %5253 = vmatmul.bf16.gmra.mxu3 %v15978_v53  ;;  %v5753_v53 = vmul.f32 %v11275_v50, %v11275_v50 }
 0x896   :  { %15952 = vst [vmem:[#allocation137_spill] sm:$0xff] %v11261_v28  ;;  %v11289_v6 = vmax.f32 %v15966_v48, 0.0  ;;  %v15976_v48 = vld [vmem:[#allocation147_spill] sm:$0xff] }
 0x897   :  { %15955 = vst [vmem:[#allocation236_spill] sm:$0xff] %v11266_v41  ;;  %v15974_v41 = vld [vmem:[#allocation142_spill] sm:$0xff]  ;;  %v11308_v43 = vmax.f32 %v15976_v48, 0.0  ;;  %v11331_v48 = vmul.f32 %v11272_v4, %v11272_v4  ;;  %v4673_v28 = vpop.f32.mrf.mxu0  ;;  %v11371_v47 = vadd.f32 %v5753_v53, %v11110_v46  ;;  %v15999_v46 = vld [vmem:[#allocation153_spill] sm:$0xff] }
 0x898   :  { %15957 = vst [vmem:[#allocation94_spill] sm:$0xff] %v11269_v54  ;;  %v4762_v13 = vpop.f32.mrf.mxu1 }
 0x899   :  { %15959 = vst [vmem:[#allocation140_spill] sm:$0xff] %v11272_v4  ;;  %v11394_v53 = vadd.f32 %v11308_v43, %v11094_v11 }
 0x89a   :  { %15961 = vst [vmem:[#allocation145_spill] sm:$0xff] %v11275_v50 }
 0x89b   :  { %15962 = vst [vmem:[#allocation237_spill] sm:$0xff] %v11277_v55  ;;  %v11305_v55 = vmax.f32 %v15974_v41, 0.0  ;;  %v11327_v41 = vmul.f32 %v11269_v54, %v11269_v54  ;;  %v15990_v54 = vld [vmem:[#allocation150_spill] sm:$0xff] }
 0x89c   :  { %15964 = vst [vmem:[#allocation38_spill] sm:$0xff] %v11282_v9  ;;  %v15993_v9 = vld [vmem:[#allocation151_spill] sm:$0xff] }
 0x89d   :  { %15967 = vst [vmem:[#allocation141_spill] sm:$0xff] %v11289_v6  ;;  %v11350_v0 = vmul.f32 %v11305_v55, %v11305_v55 }
 0x89e   :  { %15969 = vst [vmem:[#allocation146_spill] sm:$0xff] %v11292_v25 }
 0x89f   :  { %15972 = vst [vmem:[#allocation39_spill] sm:$0xff] %v11298_v49  ;;  %v15981_v49 = vld [vmem:[#allocation143_spill] sm:$0xff] }
 0x8a0   :  { %15973 = vst [vmem:[#allocation92_spill] sm:$0xff] %v11302_v1  ;;  %v11320_v18 = vmax.f32 %v15981_v49, 0.0  ;;  %v15983_v1 = vld [vmem:[#allocation148_spill] sm:$0xff]  ;;  %v11340_v49 = vmul.f32 %v11289_v6, %v11289_v6  ;;  %v11355_v6 = vmax.f32 %v15993_v9, 0.0 }
 0x8a1   :  { %15975 = vst [vmem:[#allocation142_spill] sm:$0xff] %v11305_v55  ;;  %v11323_v23 = vmax.f32 %v15983_v1, 0.0  ;;  %v5759_v1 = vmul.f32 %v11292_v25, %v11292_v25 }
 0x8a2   :  { %15977 = vst [vmem:[#allocation147_spill] sm:$0xff] %v11308_v43  ;;  %v11441_v11 = vadd.f32 %v11355_v6, %v11132_v33 }
 0x8a3   :  { %15979 = vst [vmem:[#allocation93_spill] sm:$0xff] %v11313_v7  ;;  %v15987_v7 = vld [vmem:[#allocation149_spill] sm:$0xff] }
 0x8a4   :  { %15980 = vst [vmem:[#allocation239_spill] sm:$0xff] %v11317_v63  ;;  %v11336_v59 = vmax.f32 %v15987_v7, 0.0  ;;  %v4849_v63 = vpop.f32.mrf.mxu2  ;;  %v5765_v7 = vmul.f32 %v11308_v43, %v11308_v43  ;;  %v16003_v43 = vld [vmem:[#allocation155_spill] sm:$0xff]  ;;  %5169 = vmatmul.bf16.gmra.mxu2 %v15796_v21 }
 0x8a5   :  { %15982 = vst [vmem:[#allocation143_spill] sm:$0xff] %v11320_v18  ;;  %v4850_v4 = vadd.f32 %v4849_v63, %v10882_v26  ;;  %v11364_v63 = vadd.f32 %v11275_v50, %v11086_v5  ;;  %v11382_v50 = vadd.f32 %v11292_v25, %v11089_v15  ;;  %v11385_v5 = vadd.f32 %v5759_v1, %v11114_v22  ;;  %v4765_v25 = vpop.f32.mrf.mxu1  ;;  %v16009_v15 = vld [vmem:[#allocation158_spill] sm:$0xff] }
 0x8a6   :  { %15984 = vst [vmem:[#allocation148_spill] sm:$0xff] %v11323_v23  ;;  %v11406_v22 = vadd.f32 %v11323_v23, %v11097_v20  ;;  %v16005_v20 = vld [vmem:[#allocation156_spill] sm:$0xff]  ;;  %5258 = vmatmul.bf16.gmra.mxu3 %v15797_v16 }
 0x8a7   :  { %15985 = vst [vmem:[#allocation240_spill] sm:$0xff] %v11327_v41  ;;  %v11345_v41 = vmax.f32 %v15990_v54, 0.0  ;;  %v11360_v54 = vmul.f32 %v11320_v18, %v11320_v18 }
 0x8a8   :  { %15986 = vst [vmem:[#allocation241_spill] sm:$0xff] %v11331_v48  ;;  %v4938_v48 = vpop.f32.mrf.mxu3 }
 0x8a9   :  { %15988 = vst [vmem:[#allocation149_spill] sm:$0xff] %v11336_v59  ;;  %v11368_v55 = vadd.f32 %v4938_v48, %v4850_v4  ;;  %v5783_v4 = vmul.f32 %v11345_v41, %v11345_v41  ;;  %v11390_v48 = vmax.f32 %v15999_v46, 0.0  ;;  %v11413_v46 = vadd.f32 %v11336_v59, %v11100_v14  ;;  %v16007_v14 = vld [vmem:[#allocation157_spill] sm:$0xff] }
 0x8aa   :  { %15989 = vst [vmem:[#allocation242_spill] sm:$0xff] %v11340_v49  ;;  %v4674_v49 = vadd.f32 %v4673_v28, %v10864_v17  ;;  %v5777_v17 = vmul.f32 %v11336_v59, %v11336_v59  ;;  %v15996_v28 = vld [vmem:[#allocation152_spill] sm:$0xff] }
 0x8ab   :  { %15991 = vst [vmem:[#allocation150_spill] sm:$0xff] %v11345_v41  ;;  %v11376_v9 = vmax.f32 %v15996_v28, 0.0  ;;  %v16001_v28 = vld [vmem:[#allocation154_spill] sm:$0xff]  ;;  %v11431_v59 = vadd.f32 %v5783_v4, %v11175_v40 }
 0x8ac   :  { %15992 = vst [vmem:[#allocation243_spill] sm:$0xff] %v11350_v0  ;;  %v5771_v0 = vmul.f32 %v11323_v23, %v11323_v23  ;;  %v11378_v18 = vadd.f32 %v4762_v13, %v4674_v49  ;;  %v11397_v13 = vadd.f32 %v5765_v7, %v11118_v35  ;;  %v5789_v49 = vmul.f32 %v11355_v6, %v11355_v6 }
 0x8ad   :  { %15994 = vst [vmem:[#allocation151_spill] sm:$0xff] %v11355_v6  ;;  %v11416_v35 = vmax.f32 %v16003_v43, 0.0  ;;  %v11419_v7 = vadd.f32 %v5777_v17, %v11126_v57  ;;  %v5795_v23 = vmul.f32 %v11376_v9, %v11376_v9  ;;  %v5801_v43 = vmul.f32 %v11390_v48, %v11390_v48 }
 0x8ae   :  { %15995 = vst [vmem:[#allocation244_spill] sm:$0xff] %v11368_v55  ;;  %v11402_v55 = vmax.f32 %v16001_v28, 0.0  ;;  %v11409_v1 = vadd.f32 %v5771_v0, %v11122_v52  ;;  %v11423_v28 = vadd.f32 %v11345_v41, %v11129_v24  ;;  %v11428_v0 = vmax.f32 %v16005_v20, 0.0  ;;  %v4851_v52 = vpop.f32.mrf.mxu2  ;;  %v4676_v24 = vpop.f32.mrf.mxu0 }
 0x8af   :  { %15997 = vst [vmem:[#allocation152_spill] sm:$0xff] %v11376_v9  ;;  %v11436_v57 = vmax.f32 %v16007_v14, 0.0  ;;  %v4852_v17 = vadd.f32 %v4851_v52, %v10882_v26  ;;  %v11444_v20 = vadd.f32 %v5789_v49, %v11179_v60  ;;  %v4677_v4 = vadd.f32 %v4676_v24, %v10871_v38  ;;  %v16012_v38 = vld [vmem:[#allocation127_spill] sm:$0xff] }
 0x8b0   :  { %15998 = vst [vmem:[#allocation245_spill] sm:$0xff] %v11378_v18  ;;  %v4940_v41 = vpop.f32.mrf.mxu3  ;;  %v5807_v40 = vmul.f32 %v11402_v55, %v11402_v55  ;;  %v11451_v14 = vadd.f32 %v11376_v9, %v11135_v39  ;;  %v5813_v52 = vmul.f32 %v11416_v35, %v11416_v35  ;;  %v11456_v18 = vmax.f32 %v16009_v15, 0.0  ;;  %v16015_v9 = vld [vmem:[#allocation42_spill] sm:$0xff] }
 0x8b1   :  { %16000 = vst [vmem:[#allocation153_spill] sm:$0xff] %v11390_v48  ;;  %v11458_v6 = vadd.f32 %v4940_v41, %v4852_v17  ;;  %v11461_v60 = vadd.f32 %v5795_v23, %v11183_v19  ;;  %v5819_v49 = vmul.f32 %v11428_v0, %v11428_v0  ;;  %v11466_v24 = vmax.f32 %v16012_v38, 0.0  ;;  %4991 = vmatmul.bf16.gmra.mxu0 %v16015_v9  ;;  %v16016_v19 = vld [vmem:[#allocation159_spill] sm:$0xff] }
 0x8b2   :  { %16002 = vst [vmem:[#allocation154_spill] sm:$0xff] %v11402_v55  ;;  %v11468_v33 = vadd.f32 %v4765_v25, %v4677_v4  ;;  %v11473_v39 = vadd.f32 %v11390_v48, %v11138_v45  ;;  %v11476_v15 = vadd.f32 %v5801_v43, %v11190_v27  ;;  %v5825_v23 = vmul.f32 %v11436_v57, %v11436_v57  ;;  %v16018_v17 = vld [vmem:[#allocation43_spill] sm:$0xff]  ;;  %v16019_v43 = vld [vmem:[#allocation160_spill] sm:$0xff] }
 0x8b3   :  { %16004 = vst [vmem:[#allocation155_spill] sm:$0xff] %v11416_v35  ;;  %v11481_v41 = vmax.f32 %v16016_v19, 0.0  ;;  %5080 = vmatmul.bf16.gmra.mxu1 %v16018_v17  ;;  %v11487_v25 = vadd.f32 %v11402_v55, %v11142_v37  ;;  %v11490_v9 = vadd.f32 %v5807_v40, %v11194_v44  ;;  %v11494_v27 = vadd.f32 %v11416_v35, %v11145_v12  ;;  %v16021_v40 = vld [vmem:[#allocation161_spill] sm:$0xff]  ;;  %v16027_v12 = vld [vmem:[#allocation163_spill] sm:$0xff]  ;;  %v4767_v55 = vpop.f32.mrf.mxu1 }
 0x8b4   :  { %16006 = vst [vmem:[#allocation156_spill] sm:$0xff] %v11428_v0  ;;  %v11497_v4 = vmax.f32 %v16019_v43, 0.0  ;;  %v11501_v38 = vadd.f32 %v5813_v52, %v11198_v3  ;;  %v11505_v21 = vadd.f32 %v11428_v0, %v11148_v58  ;;  %v5831_v44 = vmul.f32 %v11456_v18, %v11456_v18  ;;  %v16023_v3 = vld [vmem:[#allocation131_spill] sm:$0xff]  ;;  %v16025_v58 = vld [vmem:[#allocation162_spill] sm:$0xff] }
 0x8b5   :  { %16008 = vst [vmem:[#allocation157_spill] sm:$0xff] %v11436_v57  ;;  %v11510_v19 = vmax.f32 %v16021_v40, 0.0  ;;  %v11513_v17 = vadd.f32 %v5819_v49, %v11205_v10  ;;  %v11517_v43 = vadd.f32 %v11436_v57, %v11152_v8  ;;  %v5837_v16 = vmul.f32 %v11466_v24, %v11466_v24 }
 0x8b6   :  { %16010 = vst [vmem:[#allocation158_spill] sm:$0xff] %v11456_v18  ;;  %v11522_v52 = vmax.f32 %v16023_v3, 0.0  ;;  %v11525_v0 = vadd.f32 %v5825_v23, %v11209_v56  ;;  %v5843_v40 = vmul.f32 %v11481_v41, %v11481_v41  ;;  %v11530_v10 = vmax.f32 %v16025_v58, 0.0  ;;  %v4678_v8 = vpop.f32.mrf.mxu0 }
 0x8b7   :  { %16011 = vst [vmem:[#allocation246_spill] sm:$0xff] %v11458_v6  ;;  %v4854_v6 = vpop.f32.mrf.mxu2  ;;  %v11535_v35 = vadd.f32 %v11456_v18, %v11155_v61  ;;  %v5849_v3 = vmul.f32 %v11497_v4, %v11497_v4  ;;  %v11540_v56 = vmax.f32 %v16027_v12, 0.0  ;;  %v4679_v23 = vadd.f32 %v4678_v8, %v10875_v29  ;;  %v16030_v29 = vld [vmem:[#allocation164_spill] sm:$0xff] }
 0x8b8   :  { %16013 = vst [vmem:[#allocation127_spill] sm:$0xff] %v11466_v24  ;;  %v4855_v49 = vadd.f32 %v4854_v6, %v10882_v26  ;;  %v4943_v57 = vpop.f32.mrf.mxu3  ;;  %v11544_v58 = vadd.f32 %v5831_v44, %v11213_v2  ;;  %v11548_v6 = vadd.f32 %v11466_v24, %v11158_v34  ;;  %v5855_v18 = vmul.f32 %v11510_v19, %v11510_v19  ;;  %v16043_v34 = vld [vmem:[#allocation167_spill] sm:$0xff] }
 0x8b9   :  { %16014 = vst [vmem:[#allocation247_spill] sm:$0xff] %v11468_v33  ;;  %v11555_v37 = vadd.f32 %v5837_v16, %v11220_v42  ;;  %v5861_v12 = vmul.f32 %v11522_v52, %v11522_v52  ;;  %v11560_v8 = vmax.f32 %v16030_v29, 0.0  ;;  %v11562_v2 = vadd.f32 %v4767_v55, %v4679_v23  ;;  %v16033_v42 = vld [vmem:[#allocation135_spill] sm:$0xff]  ;;  %v16035_v29 = vld [vmem:[#allocation165_spill] sm:$0xff] }
 0x8ba   :  { %16017 = vst [vmem:[#allocation42_spill] sm:$0xff] %v11481_v41  ;;  %v11552_v61 = vadd.f32 %v4943_v57, %v4855_v49  ;;  %v11566_v44 = vadd.f32 %v11481_v41, %v11163_v51  ;;  %v11569_v24 = vadd.f32 %v5843_v40, %v11224_v30  ;;  %v5867_v57 = vmul.f32 %v11530_v10, %v11530_v10 }
 0x8bb   :  { %16020 = vst [vmem:[#allocation159_spill] sm:$0xff] %v11497_v4  ;;  %v11574_v16 = vmax.f32 %v16033_v42, 0.0  ;;  %v11578_v49 = vadd.f32 %v11497_v4, %v11166_v36  ;;  %v11581_v55 = vadd.f32 %v5849_v3, %v11228_v31  ;;  %v5873_v23 = vmul.f32 %v11540_v56, %v11540_v56  ;;  %v16037_v42 = vld [vmem:[#allocation128_spill] sm:$0xff]  ;;  %v16039_v36 = vld [vmem:[#allocation166_spill] sm:$0xff] }
 0x8bc   :  { %16022 = vst [vmem:[#allocation43_spill] sm:$0xff] %v11510_v19  ;;  %v11586_v41 = vmax.f32 %v16035_v29, 0.0  ;;  %v11590_v30 = vadd.f32 %v11510_v19, %v11169_v62  ;;  %v11593_v40 = vadd.f32 %v5855_v18, %v11232_v32  ;;  %v11597_v4 = vadd.f32 %v11522_v52, %v16037_v42  ;;  %v16041_v3 = vld [vmem:[#allocation84_spill] sm:$0xff]  ;;  %v16045_v19 = vld [vmem:[#allocation139_spill] sm:$0xff]  ;;  %v16047_v32 = vld [vmem:[#allocation129_spill] sm:$0xff] }
 0x8bd   :  { %16024 = vst [vmem:[#allocation160_spill] sm:$0xff] %v11522_v52  ;;  %v11600_v31 = vmax.f32 %v16039_v36, 0.0  ;;  %v11603_v51 = vadd.f32 %v5861_v12, %v16041_v3  ;;  %v5879_v29 = vmul.f32 %v11560_v8, %v11560_v8  ;;  %v11611_v62 = vmax.f32 %v16045_v19, 0.0  ;;  %v16049_v42 = vld [vmem:[#allocation134_spill] sm:$0xff]  ;;  %v16053_v19 = vld [vmem:[#allocation235_spill] sm:$0xff] }
 0x8be   :  { %16026 = vst [vmem:[#allocation161_spill] sm:$0xff] %v11530_v10  ;;  %v11615_v52 = vadd.f32 %v11530_v10, %v16047_v32  ;;  %v11618_v36 = vadd.f32 %v5867_v57, %v16049_v42  ;;  %v5885_v12 = vmul.f32 %v11574_v16, %v11574_v16  ;;  %v4957_v45 = vpop.f32.mrf.mxu0  ;;  %v11628_v33 = vadd.f32 %v5873_v23, %v16053_v19  ;;  %v16055_v32 = vld [vmem:[#allocation179_spill] sm:$0xff]  ;;  %v5046_v42 = vpop.f32.mrf.mxu1  ;;  %v16061_v23 = vld [vmem:[#allocation38_spill] sm:$0xff] }
 0x8bf   :  { %16028 = vst [vmem:[#allocation131_spill] sm:$0xff] %v11540_v56  ;;  %v4856_v18 = vpop.f32.mrf.mxu2  ;;  %v5891_v10 = vmul.f32 %v11586_v41, %v11586_v41  ;;  %v11633_v57 = vmax.f32 %v16055_v32, 0.0  ;;  %v11645_v19 = vadd.f32 %v5879_v29, %v16061_v23  ;;  %v5909_v32 = vmul.f32 %v11611_v62, %v11611_v62  ;;  %v16071_v23 = vld [vmem:[#allocation209_spill] sm:$0xff] }
 0x8c0   :  { %16029 = vst [vmem:[#allocation162_spill] sm:$0xff] %v11552_v61  ;;  %v11608_v61 = vmax.f32 %v16043_v34, 0.0  ;;  %v4857_v3 = vadd.f32 %v4856_v18, %v10882_v26  ;;  %v4945_v48 = vpop.f32.mrf.mxu3  ;;  %v16051_v34 = vld [vmem:[#allocation130_spill] sm:$0xff]  ;;  %v5897_v26 = vmul.f32 %v11600_v31, %v11600_v31 }
 0x8c1   :  { %16031 = vst [vmem:[#allocation163_spill] sm:$0xff] %v11560_v8 }
 0x8c2   :  { %16032 = vst [vmem:[#allocation164_spill] sm:$0xff] %v11562_v2  ;;  %v11625_v2 = vadd.f32 %v11540_v56, %v16051_v34  ;;  %v11641_v18 = vadd.f32 %v4945_v48, %v4857_v3  ;;  %v16060_v56 = vld [vmem:[#allocation52_spill] sm:$0xff]  ;;  %v16067_v3 = vld [vmem:[#allocation238_spill] sm:$0xff] }
 0x8c3   :  { %16034 = vst [vmem:[#allocation135_spill] sm:$0xff] %v11574_v16  ;;  %v4958_v34 = vadd.f32 %v4957_v45, %v16060_v56  ;;  %v11660_v45 = vadd.f32 %v5885_v12, %v16067_v3  ;;  %v16069_v56 = vld [vmem:[#allocation169_spill] sm:$0xff]  ;;  %v5754_v3 = vmul.f32 %v11633_v57, %v11633_v57 }
 0x8c4   :  { %16036 = vst [vmem:[#allocation165_spill] sm:$0xff] %v11586_v41  ;;  %v11663_v29 = vmax.f32 %v16069_v56, 0.0  ;;  %v16081_v56 = vld [vmem:[#allocation98_spill] sm:$0xff] }
 0x8c5   :  { %16038 = vst [vmem:[#allocation248_spill] sm:$0xff] %v11597_v4  ;;  %v16077_v4 = vld [vmem:[#allocation39_spill] sm:$0xff]  ;;  %5263 = vmatmul.bf16.gmra.mxu3 %v16081_v56 }
 0x8c6   :  { %16040 = vst [vmem:[#allocation166_spill] sm:$0xff] %v11600_v31 }
 0x8c7   :  { %16042 = vst [vmem:[#allocation84_spill] sm:$0xff] %v11603_v51 }
 0x8c8   :  { %16044 = vst [vmem:[#allocation167_spill] sm:$0xff] %v11608_v61 }
 0x8c9   :  { %16046 = vst [vmem:[#allocation139_spill] sm:$0xff] %v11611_v62 }
 0x8ca   :  { %16048 = vst [vmem:[#allocation249_spill] sm:$0xff] %v11615_v52 }
 0x8cb   :  { %16050 = vst [vmem:[#allocation134_spill] sm:$0xff] %v11618_v36  ;;  %v16057_v36 = vld [vmem:[#allocation132_spill] sm:$0xff] }
 0x8cc   :  { %16052 = vst [vmem:[#allocation250_spill] sm:$0xff] %v11625_v2  ;;  %v11637_v52 = vadd.f32 %v11560_v8, %v16057_v36  ;;  %v16063_v2 = vld [vmem:[#allocation168_spill] sm:$0xff]  ;;  %v16065_v8 = vld [vmem:[#allocation46_spill] sm:$0xff]  ;;  %v16066_v36 = vld [vmem:[#allocation133_spill] sm:$0xff] }
 0x8cd   :  { %16054 = vst [vmem:[#allocation235_spill] sm:$0xff] %v11628_v33  ;;  %v5903_v33 = vmul.f32 %v11608_v61, %v11608_v61  ;;  %v11652_v51 = vmax.f32 %v16063_v2, 0.0  ;;  %4996 = vmatmul.bf16.gmra.mxu0 %v16065_v8  ;;  %v11657_v48 = vadd.f32 %v11574_v16, %v16066_v36  ;;  %v16075_v2 = vld [vmem:[#allocation89_spill] sm:$0xff]  ;;  %v11675_v16 = vadd.f32 %v5891_v10, %v16077_v4  ;;  %v16079_v36 = vld [vmem:[#allocation136_spill] sm:$0xff] }
 0x8ce   :  { %16056 = vst [vmem:[#allocation179_spill] sm:$0xff] %v11633_v57  ;;  %v11672_v8 = vadd.f32 %v11586_v41, %v16075_v2  ;;  %v11679_v12 = vadd.f32 %v11600_v31, %v16079_v36  ;;  %v16086_v41 = vld [vmem:[#allocation49_spill] sm:$0xff]  ;;  %v5047_v4 = vadd.f32 %v5046_v42, %v4958_v34  ;;  %v16090_v31 = vld [vmem:[#allocation138_spill] sm:$0xff]  ;;  %v5224_v42 = vpop.f32.mrf.mxu3 }
 0x8cf   :  { %16058 = vst [vmem:[#allocation251_spill] sm:$0xff] %v11637_v52  ;;  %v16074_v52 = vld [vmem:[#allocation97_spill] sm:$0xff]  ;;  %v11692_v2 = vmax.f32 %v16086_v41, 0.0  ;;  %v11699_v36 = vadd.f32 %v11611_v62, %v16090_v31  ;;  %v5497_v41 = vadd.f32 %v11364_v63, %v11633_v57  ;;  %v16094_v62 = vld [vmem:[#allocation94_spill] sm:$0xff]  ;;  %v16100_v57 = vld [vmem:[#allocation56_spill] sm:$0xff] }
 0x8d0   :  { %16059 = vst [vmem:[#allocation252_spill] sm:$0xff] %v11641_v18  ;;  %v11666_v18 = vmax.f32 %v16071_v23, 0.0  ;;  %5174 = vmatmul.bf16.gmra.mxu2 %v16074_v52  ;;  %v16082_v23 = vld [vmem:[#allocation92_spill] sm:$0xff]  ;;  %v16084_v52 = vld [vmem:[#allocation137_spill] sm:$0xff] }
 0x8d1   :  { %16062 = vst [vmem:[#allocation52_spill] sm:$0xff] %v11645_v19  ;;  %v16073_v19 = vld [vmem:[#allocation47_spill] sm:$0xff]  ;;  %v16088_v10 = vld [vmem:[#allocation93_spill] sm:$0xff] }
 0x8d2   :  { %16064 = vst [vmem:[#allocation38_spill] sm:$0xff] %v11652_v51  ;;  %5085 = vmatmul.bf16.gmra.mxu1 %v16073_v19  ;;  %v11685_v19 = vadd.f32 %v5897_v26, %v16082_v23  ;;  %v5915_v26 = vmul.f32 %v11652_v51, %v11652_v51  ;;  %v5135_v23 = vpop.f32.mrf.mxu2 }
 0x8d3   :  { %16068 = vst [vmem:[#allocation168_spill] sm:$0xff] %v11660_v45  ;;  %v11689_v45 = vadd.f32 %v11608_v61, %v16084_v52  ;;  %v5921_v61 = vmul.f32 %v11663_v29, %v11663_v29  ;;  %v5136_v34 = vadd.f32 %v5135_v23, %v5047_v4  ;;  %v16098_v52 = vld [vmem:[#allocation144_spill] sm:$0xff]  ;;  %v5498_v4 = vadd.f32 %v5497_v41, %v11666_v18 }
 0x8d4   :  { %16070 = vst [vmem:[#allocation46_spill] sm:$0xff] %v11663_v29  ;;  %v5756_v23 = vmul.f32 %v11692_v2, %v11692_v2 }
 0x8d5   :  { %16072 = vst [vmem:[#allocation238_spill] sm:$0xff] %v11666_v18  ;;  %v5225_v63 = vadd.f32 %v5224_v42, %v5136_v34  ;;  %v5499_v34 = vadd.f32 %v5498_v4, %v11692_v2 }
 0x8d6   :  { %16076 = vst [vmem:[#allocation169_spill] sm:$0xff] %v11672_v8  ;;  %v16107_v8 = vld [vmem:[#allocation180_spill] sm:$0xff] }
 0x8d7   :  { %16078 = vst [vmem:[#allocation209_spill] sm:$0xff] %v11675_v16  ;;  %v11695_v16 = vadd.f32 %v5903_v33, %v16088_v10  ;;  %v5755_v33 = vmul.f32 %v11666_v18, %v11666_v18  ;;  %v4959_v10 = vpop.f32.mrf.mxu0  ;;  %v11743_v41 = vmax.f32 %v5225_v63, 0.0  ;;  %v16122_v18 = vld [vmem:[#allocation242_spill] sm:$0xff] }
 0x8d8   :  { %16080 = vst [vmem:[#allocation47_spill] sm:$0xff] %v11679_v12  ;;  %v16092_v12 = vld [vmem:[#allocation239_spill] sm:$0xff] }
 0x8d9   :  { %16083 = vst [vmem:[#allocation97_spill] sm:$0xff] %v11685_v19  ;;  %v11702_v56 = vadd.f32 %v5909_v32, %v16092_v12  ;;  %v11714_v32 = vadd.f32 %v11652_v51, %v16094_v62  ;;  %v16096_v12 = vld [vmem:[#allocation170_spill] sm:$0xff]  ;;  %v4960_v19 = vadd.f32 %v4959_v10, %v16100_v57  ;;  %v16103_v62 = vld [vmem:[#allocation140_spill] sm:$0xff]  ;;  %v16112_v10 = vld [vmem:[#allocation181_spill] sm:$0xff]  ;;  %v5757_v63 = vmul.f32 %v11743_v41, %v11743_v41 }
 0x8da   :  { %16085 = vst [vmem:[#allocation39_spill] sm:$0xff] %v11689_v45  ;;  %v11717_v31 = vmax.f32 %v16096_v12, 0.0  ;;  %v16101_v45 = vld [vmem:[#allocation240_spill] sm:$0xff]  ;;  %v11732_v12 = vadd.f32 %v11663_v29, %v16103_v62  ;;  %v16114_v29 = vld [vmem:[#allocation210_spill] sm:$0xff] }
 0x8db   :  { %16087 = vst [vmem:[#allocation98_spill] sm:$0xff] %v11692_v2  ;;  %v11728_v51 = vadd.f32 %v5915_v26, %v16101_v45  ;;  %v16118_v2 = vld [vmem:[#allocation182_spill] sm:$0xff] }
 0x8dc   :  { %16089 = vst [vmem:[#allocation92_spill] sm:$0xff] %v11695_v16  ;;  %v5048_v16 = vpop.f32.mrf.mxu1  ;;  %v5927_v45 = vmul.f32 %v11717_v31, %v11717_v31 }
 0x8dd   :  { %16091 = vst [vmem:[#allocation49_spill] sm:$0xff] %v11699_v36  ;;  %v5945_v36 = vadd.f32 %v11371_v47, %v5754_v3  ;;  %v11738_v47 = vmax.f32 %v16107_v8, 0.0  ;;  %v16109_v3 = vld [vmem:[#allocation241_spill] sm:$0xff]  ;;  %v11754_v8 = vmax.f32 %v16114_v29, 0.0  ;;  %v5049_v62 = vadd.f32 %v5048_v16, %v4960_v19  ;;  %v5137_v16 = vpop.f32.mrf.mxu2 }
 0x8de   :  { %16093 = vst [vmem:[#allocation93_spill] sm:$0xff] %v11702_v56  ;;  %v11720_v56 = vmax.f32 %v16098_v52, 0.0  ;;  %v16105_v52 = vld [vmem:[#allocation171_spill] sm:$0xff]  ;;  %v11741_v57 = vadd.f32 %v5921_v61, %v16109_v3  ;;  %v5500_v61 = vadd.f32 %v5499_v34, %v11743_v41  ;;  %v11768_v29 = vmax.f32 %v16118_v2, 0.0  ;;  %v16120_v34 = vld [vmem:[#allocation53_spill] sm:$0xff] }
 0x8df   :  { %16095 = vst [vmem:[#allocation239_spill] sm:$0xff] %v11714_v32  ;;  %v11735_v32 = vmax.f32 %v16105_v52, 0.0  ;;  %v5946_v42 = vadd.f32 %v5945_v36, %v5755_v33  ;;  %v11751_v52 = vmax.f32 %v16112_v10, 0.0  ;;  %v16116_v36 = vld [vmem:[#allocation141_spill] sm:$0xff]  ;;  %v5504_v10 = vadd.f32 %v11382_v50, %v11738_v47 }
 0x8e0   :  { %16097 = vst [vmem:[#allocation170_spill] sm:$0xff] %v11717_v31  ;;  %v5933_v26 = vmul.f32 %v11720_v56, %v11720_v56  ;;  %v11761_v33 = vadd.f32 %v11717_v31, %v16116_v36  ;;  %v5760_v19 = vmul.f32 %v11738_v47, %v11738_v47  ;;  %5501 = vadd.xlane.f32.xlu0 %v5500_v61  ;;  %v4962_v31 = vpop.f32.mrf.mxu0 }
 0x8e1   :  { %16099 = vst [vmem:[#allocation144_spill] sm:$0xff] %v11720_v56  ;;  %v5947_v4 = vadd.f32 %v5946_v42, %v5756_v23  ;;  %v5939_v3 = vmul.f32 %v11735_v32, %v11735_v32  ;;  %v5138_v23 = vadd.f32 %v5137_v16, %v5049_v62  ;;  %v5226_v42 = vpop.f32.mrf.mxu3  ;;  %v5766_v2 = vmul.f32 %v11751_v52, %v11751_v52  ;;  %v16129_v16 = vld [vmem:[#allocation72_spill] sm:$0xff] }
 0x8e2   :  { %16102 = vst [vmem:[#allocation56_spill] sm:$0xff] %v11728_v51  ;;  %v16124_v51 = vld [vmem:[#allocation142_spill] sm:$0xff] }
 0x8e3   :  { %16104 = vst [vmem:[#allocation240_spill] sm:$0xff] %v11732_v12  ;;  %v5948_v36 = vadd.f32 %v5947_v4, %v5757_v63  ;;  %v11780_v50 = vadd.f32 %v11720_v56, %v16124_v51  ;;  %v16128_v12 = vld [vmem:[#allocation243_spill] sm:$0xff]  ;;  %v5227_v61 = vadd.f32 %v5226_v42, %v5138_v23  ;;  %v4963_v63 = vadd.f32 %v4962_v31, %v16129_v16  ;;  %v16131_v51 = vld [vmem:[#allocation184_spill] sm:$0xff] }
 0x8e4   :  { %16106 = vst [vmem:[#allocation171_spill] sm:$0xff] %v11735_v32  ;;  %v11788_v62 = vadd.f32 %v5933_v26, %v16128_v12  ;;  %v5772_v56 = vmul.f32 %v11768_v29, %v11768_v29  ;;  %v16135_v12 = vld [vmem:[#allocation50_spill] sm:$0xff]  ;;  %v11806_v31 = vadd.f32 %v5939_v3, %v11360_v54  ;;  %v5952_v42 = vadd.f32 %v11385_v5, %v5760_v19 }
 0x8e5   :  { %16108 = vst [vmem:[#allocation180_spill] sm:$0xff] %v11738_v47  ;;  %5949 = vadd.xlane.f32.xlu2 %v5948_v36  ;;  %5001 = vmatmul.bf16.gmra.mxu0 %v16135_v12  ;;  %v11808_v26 = vmax.f32 %v5227_v61, 0.0  ;;  %v16137_v36 = vld [vmem:[#allocation51_spill] sm:$0xff]  ;;  %v5761_v54 = vmul.f32 %v11754_v8, %v11754_v8  ;;  %v16139_v3 = vld [vmem:[#allocation102_spill] sm:$0xff]  ;;  %v5959_v61 = vadd.f32 %v11397_v13, %v5766_v2  ;;  %v5140_v13 = vpop.f32.mrf.mxu2 }
 0x8e6   :  { %16110 = vst [vmem:[#allocation241_spill] sm:$0xff] %v11741_v57  ;;  %v11776_v57 = vadd.f32 %v5927_v45, %v16122_v18  ;;  %v5505_v18 = vadd.f32 %v5504_v10, %v11754_v8  ;;  %v16130_v45 = vld [vmem:[#allocation143_spill] sm:$0xff]  ;;  %5090 = vmatmul.bf16.gmra.mxu1 %v16137_v36  ;;  %v16138_v10 = vld [vmem:[#allocation101_spill] sm:$0xff]  ;;  %5268 = vmatmul.bf16.gmra.mxu3 %v16139_v3 }
 0x8e7   :  { %16111 = vst [vmem:[#allocation253_spill] sm:$0xff] %v11743_v41  ;;  %v11773_v41 = vmax.f32 %v16120_v34, 0.0  ;;  %v5051_v34 = vpop.f32.mrf.mxu1  ;;  %v11794_v4 = vadd.f32 %v11735_v32, %v16130_v45  ;;  %5179 = vmatmul.bf16.gmra.mxu2 %v16138_v10  ;;  %v11824_v16 = vadd.f32 %v11406_v22, %v11768_v29  ;;  %v16142_v10 = vld [vmem:[#allocation172_spill] sm:$0xff]  ;;  %v11838_v2 = vadd.f32 %v11409_v1, %v5772_v56  ;;  %v16146_v1 = vld [vmem:[#allocation186_spill] sm:$0xff] }
 0x8e8   :  { %16113 = vst [vmem:[#allocation181_spill] sm:$0xff] %v11751_v52  ;;  %v5052_v5 = vadd.f32 %v5051_v34, %v4963_v63  ;;  %v11835_v3 = vmax.f32 %v16142_v10, 0.0  ;;  %v16144_v34 = vld [vmem:[#allocation64_spill] sm:$0xff]  ;;  %v4964_v32 = vpop.f32.mrf.mxu0  ;;  %v11854_v56 = vmax.f32 %v16146_v1, 0.0 }
 0x8e9   :  { %16115 = vst [vmem:[#allocation210_spill] sm:$0xff] %v11754_v8  ;;  %v5506_v23 = vadd.f32 %v5505_v18, %v11773_v41  ;;  %v16140_v18 = vld [vmem:[#allocation211_spill] sm:$0xff]  ;;  %v11845_v63 = vmax.f32 %v16144_v34, 0.0  ;;  %v5762_v45 = vmul.f32 %v11773_v41, %v11773_v41 }
 0x8ea   :  { %16117 = vst [vmem:[#allocation254_spill] sm:$0xff] %v11761_v33  ;;  %v16126_v33 = vld [vmem:[#allocation183_spill] sm:$0xff]  ;;  %v11827_v12 = vmax.f32 %v16140_v18, 0.0  ;;  %v5229_v18 = vpop.f32.mrf.mxu3  ;;  %v5796_v1 = vmul.f32 %v11835_v3, %v11835_v3 }
 0x8eb   :  { %16119 = vst [vmem:[#allocation182_spill] sm:$0xff] %v11768_v29  ;;  %v11785_v47 = vmax.f32 %v16126_v33, 0.0  ;;  %v11799_v33 = vmax.f32 %v16131_v51, 0.0  ;;  %v5511_v51 = vadd.f32 %v11394_v53, %v11751_v52  ;;  %v5507_v53 = vadd.f32 %v5506_v23, %v11808_v26 }
 0x8ec   :  { %16121 = vst [vmem:[#allocation53_spill] sm:$0xff] %v11773_v41  ;;  %v5141_v23 = vadd.f32 %v5140_v13, %v5052_v5  ;;  %v16148_v5 = vld [vmem:[#allocation85_spill] sm:$0xff]  ;;  %v5763_v52 = vmul.f32 %v11808_v26, %v11808_v26 }
 0x8ed   :  { %16123 = vst [vmem:[#allocation242_spill] sm:$0xff] %v11776_v57  ;;  %v16133_v57 = vld [vmem:[#allocation185_spill] sm:$0xff]  ;;  %v5784_v19 = vmul.f32 %v11799_v33, %v11799_v33  ;;  %v11842_v22 = vadd.f32 %v11413_v46, %v11785_v47  ;;  %5508 = vadd.xlane.f32.xlu0 %v5507_v53  ;;  %v11851_v10 = vadd.f32 %v11423_v28, %v11799_v33 }
 0x8ee   :  { %16125 = vst [vmem:[#allocation255_spill] sm:$0xff] %v11780_v50  ;;  %v11802_v50 = vmax.f32 %v16133_v57, 0.0  ;;  %v5778_v57 = vmul.f32 %v11785_v47, %v11785_v47  ;;  %v5953_v46 = vadd.f32 %v5952_v42, %v5761_v54  ;;  %v5230_v34 = vadd.f32 %v5229_v18, %v5141_v23 }
 0x8ef   :  { %16127 = vst [vmem:[#allocation183_spill] sm:$0xff] %v11785_v47  ;;  %v5053_v29 = vpop.f32.mrf.mxu1  ;;  %v4965_v13 = vadd.f32 %v4964_v32, %v16148_v5  ;;  %v5512_v53 = vadd.f32 %v5511_v51, %v11827_v12  ;;  %v11870_v42 = vadd.f32 %v11431_v59, %v5784_v19  ;;  %v5802_v18 = vmul.f32 %v11854_v56, %v11854_v56  ;;  %v16152_v59 = vld [vmem:[#allocation187_spill] sm:$0xff] }
 0x8f0   :  { %16132 = vst [vmem:[#allocation243_spill] sm:$0xff] %v11799_v33  ;;  %v5790_v36 = vmul.f32 %v11802_v50, %v11802_v50  ;;  %v11857_v47 = vadd.f32 %v11419_v7, %v5778_v57  ;;  %v11865_v28 = vadd.f32 %v11441_v11, %v11802_v50  ;;  %v16149_v57 = vld [vmem:[#allocation212_spill] sm:$0xff]  ;;  %v11878_v51 = vmax.f32 %v5230_v34, 0.0 }
 0x8f1   :  { %16134 = vst [vmem:[#allocation72_spill] sm:$0xff] %v11802_v50  ;;  %v11876_v32 = vmax.f32 %v16149_v57, 0.0  ;;  %v5513_v54 = vadd.f32 %v5512_v53, %v11845_v63  ;;  %v5954_v23 = vadd.f32 %v5953_v46, %v5762_v45  ;;  %v11883_v11 = vadd.f32 %v11451_v14, %v11835_v3  ;;  %v16156_v46 = vld [vmem:[#allocation188_spill] sm:$0xff]  ;;  %v5142_v50 = vpop.f32.mrf.mxu2 }
 0x8f2   :  { %16136 = vst [vmem:[#allocation184_spill] sm:$0xff] %v11808_v26  ;;  %v11873_v7 = vadd.f32 %v11444_v20, %v5790_v36  ;;  %v11888_v19 = vmax.f32 %v16152_v59, 0.0  ;;  %v5767_v20 = vmul.f32 %v11827_v12, %v11827_v12  ;;  %v16154_v36 = vld [vmem:[#allocation80_spill] sm:$0xff]  ;;  %v5054_v34 = vadd.f32 %v5053_v29, %v4965_v13 }
 0x8f3   :  { %16141 = vst [vmem:[#allocation185_spill] sm:$0xff] %v11827_v12  ;;  %v11893_v5 = vmax.f32 %v16154_v36, 0.0  ;;  %v5514_v53 = vadd.f32 %v5513_v54, %v11878_v51  ;;  %v5955_v45 = vadd.f32 %v5954_v23, %v5763_v52  ;;  %v11898_v14 = vadd.f32 %v11473_v39, %v11854_v56  ;;  %v5231_v54 = vpop.f32.mrf.mxu3  ;;  %v4967_v52 = vpop.f32.mrf.mxu0 }
 0x8f4   :  { %16143 = vst [vmem:[#allocation50_spill] sm:$0xff] %v11835_v3  ;;  %v11901_v57 = vmax.f32 %v16156_v46, 0.0  ;;  %v16158_v3 = vld [vmem:[#allocation173_spill] sm:$0xff]  ;;  %v11907_v33 = vadd.f32 %v11461_v60, %v5796_v1  ;;  %v5773_v29 = vmul.f32 %v11876_v32, %v11876_v32  ;;  %v5143_v13 = vadd.f32 %v5142_v50, %v5054_v34  ;;  %v16162_v50 = vld [vmem:[#allocation95_spill] sm:$0xff] }
 0x8f5   :  { %16145 = vst [vmem:[#allocation51_spill] sm:$0xff] %v11845_v63  ;;  %v11904_v59 = vmax.f32 %v16158_v3, 0.0  ;;  %5515 = vadd.xlane.f32.xlu1 %v5514_v53  ;;  %5956 = vadd.xlane.f32.xlu0 %v5955_v45  ;;  %v5768_v39 = vmul.f32 %v11845_v63, %v11845_v63  ;;  %v5808_v23 = vmul.f32 %v11888_v19, %v11888_v19  ;;  %v16160_v3 = vld [vmem:[#allocation190_spill] sm:$0xff] }
 0x8f6   :  { %16147 = vst [vmem:[#allocation101_spill] sm:$0xff] %v11854_v56  ;;  %v11916_v36 = vmax.f32 %v16160_v3, 0.0  ;;  %v5960_v60 = vadd.f32 %v5959_v61, %v5767_v20  ;;  %v11919_v1 = vadd.f32 %v11476_v15, %v5802_v18  ;;  %v5232_v56 = vadd.f32 %v5231_v54, %v5143_v13  ;;  %v16163_v61 = vld [vmem:[#allocation213_spill] sm:$0xff]  ;;  %v16165_v20 = vld [vmem:[#allocation54_spill] sm:$0xff]  ;;  %v16166_v13 = vld [vmem:[#allocation191_spill] sm:$0xff] }
 0x8f7   :  { %16150 = vst [vmem:[#allocation102_spill] sm:$0xff] %v11876_v32  ;;  %v5056_v46 = vpop.f32.mrf.mxu1  ;;  %v4968_v34 = vadd.f32 %v4967_v52, %v16162_v50  ;;  %v5769_v53 = vmul.f32 %v11878_v51, %v11878_v51  ;;  %v5774_v45 = vmul.f32 %v11893_v5, %v11893_v5  ;;  %v11928_v63 = vadd.f32 %v11487_v25, %v11888_v19  ;;  %v16169_v50 = vld [vmem:[#allocation55_spill] sm:$0xff]  ;;  %v16170_v25 = vld [vmem:[#allocation105_spill] sm:$0xff] }
 0x8f8   :  { %16151 = vst [vmem:[#allocation211_spill] sm:$0xff] %v11878_v51  ;;  %v5814_v3 = vmul.f32 %v11901_v57, %v11901_v57  ;;  %v5820_v15 = vmul.f32 %v11904_v59, %v11904_v59  ;;  %v11935_v18 = vmax.f32 %v16163_v61, 0.0  ;;  %5006 = vmatmul.bf16.gmra.mxu0 %v16165_v20  ;;  %v11939_v54 = vmax.f32 %v16166_v13, 0.0  ;;  %5095 = vmatmul.bf16.gmra.mxu1 %v16169_v50  ;;  %v16171_v20 = vld [vmem:[#allocation90_spill] sm:$0xff] }
 0x8f9   :  { %16153 = vst [vmem:[#allocation172_spill] sm:$0xff] %v11888_v19  ;;  %v11941_v52 = vmax.f32 %v5232_v56, 0.0  ;;  %5184 = vmatmul.bf16.gmra.mxu2 %v16170_v25  ;;  %v5961_v19 = vadd.f32 %v5960_v60, %v5768_v39  ;;  %v5967_v51 = vadd.f32 %v11838_v2, %v5773_v29  ;;  %v11948_v12 = vadd.f32 %v11494_v27, %v11901_v57  ;;  %v16173_v13 = vld [vmem:[#allocation106_spill] sm:$0xff]  ;;  %v16174_v39 = vld [vmem:[#allocation192_spill] sm:$0xff] }
 0x8fa   :  { %16155 = vst [vmem:[#allocation64_spill] sm:$0xff] %v11893_v5  ;;  %v5826_v61 = vmul.f32 %v11916_v36, %v11916_v36  ;;  %v11953_v26 = vmax.f32 %v16171_v20, 0.0  ;;  %5273 = vmatmul.bf16.gmra.mxu3 %v16173_v13  ;;  %v11957_v56 = vadd.f32 %v11490_v9, %v5808_v23  ;;  %v5057_v50 = vadd.f32 %v5056_v46, %v4968_v34  ;;  %v5145_v13 = vpop.f32.mrf.mxu2 }
 0x8fb   :  { %16157 = vst [vmem:[#allocation186_spill] sm:$0xff] %v11901_v57  ;;  %v5962_v25 = vadd.f32 %v5961_v19, %v5769_v53  ;;  %v5775_v2 = vmul.f32 %v11941_v52, %v11941_v52  ;;  %v5968_v29 = vadd.f32 %v5967_v51, %v5774_v45  ;;  %v11963_v27 = vadd.f32 %v11505_v21, %v11904_v59  ;;  %v5234_v46 = vpop.f32.mrf.mxu3  ;;  %v4969_v51 = vpop.f32.mrf.mxu0  ;;  %v16176_v45 = vld [vmem:[#allocation174_spill] sm:$0xff] }
 0x8fc   :  { %16159 = vst [vmem:[#allocation85_spill] sm:$0xff] %v11904_v59  ;;  %v11966_v60 = vmax.f32 %v16174_v39, 0.0  ;;  %v5779_v20 = vmul.f32 %v11935_v18, %v11935_v18  ;;  %v11971_v9 = vadd.f32 %v11501_v38, %v5814_v3  ;;  %v5832_v19 = vmul.f32 %v11939_v54, %v11939_v54  ;;  %v16190_v59 = vld [vmem:[#allocation175_spill] sm:$0xff] }
 0x8fd   :  { %16161 = vst [vmem:[#allocation212_spill] sm:$0xff] %v11916_v36  ;;  %v5146_v23 = vadd.f32 %v5145_v13, %v5057_v50  ;;  %5963 = vadd.xlane.f32.xlu1 %v5962_v25  ;;  %v5969_v34 = vadd.f32 %v5968_v29, %v5775_v2  ;;  %v11976_v21 = vadd.f32 %v11513_v17, %v5820_v15  ;;  %v11983_v39 = vmax.f32 %v16176_v45, 0.0  ;;  %v16178_v15 = vld [vmem:[#allocation223_spill] sm:$0xff]  ;;  %v16179_v13 = vld [vmem:[#allocation194_spill] sm:$0xff] }
 0x8fe   :  { %16164 = vst [vmem:[#allocation187_spill] sm:$0xff] %v11935_v18  ;;  %v11980_v53 = vadd.f32 %v11517_v43, %v11916_v36  ;;  %v5780_v3 = vmul.f32 %v11953_v26, %v11953_v26  ;;  %v11988_v50 = vadd.f32 %v11525_v0, %v5826_v61  ;;  %v11992_v25 = vadd.f32 %v11535_v35, %v11939_v54  ;;  %v16181_v35 = vld [vmem:[#allocation214_spill] sm:$0xff] }
 0x8ff   :  { %16167 = vst [vmem:[#allocation80_spill] sm:$0xff] %v11939_v54  ;;  %v5058_v38 = vpop.f32.mrf.mxu1  ;;  %v5235_v17 = vadd.f32 %v5234_v46, %v5146_v23  ;;  %v4970_v2 = vadd.f32 %v4969_v51, %v16178_v15  ;;  %5970 = vadd.xlane.f32.xlu2 %v5969_v34  ;;  %v5519_v43 = vadd.f32 %v11824_v16, %v11876_v32  ;;  %v12000_v45 = vmax.f32 %v16179_v13, 0.0  ;;  %v16184_v34 = vld [vmem:[#allocation195_spill] sm:$0xff]  ;;  %v16236_v32 = vld [vmem:[#allocation62_spill] sm:$0xff] }
 0x900   :  { %16168 = vst [vmem:[#allocation188_spill] sm:$0xff] %v11941_v52  ;;  %v5838_v29 = vmul.f32 %v11966_v60, %v11966_v60  ;;  %v5526_v0 = vadd.f32 %v11842_v22, %v11935_v18  ;;  %v5974_v61 = vadd.f32 %v11857_v47, %v5779_v20  ;;  %v12006_v54 = vmax.f32 %v16181_v35, 0.0  ;;  %v16186_v47 = vld [vmem:[#allocation96_spill] sm:$0xff]  ;;  %v16229_v18 = vld [vmem:[#allocation177_spill] sm:$0xff] }
 0x901   :  { %16172 = vst [vmem:[#allocation173_spill] sm:$0xff] %v11953_v26  ;;  %v12008_v23 = vmax.f32 %v5235_v17, 0.0  ;;  %v5520_v46 = vadd.f32 %v5519_v43, %v11893_v5  ;;  %v12012_v16 = vadd.f32 %v11544_v58, %v5832_v19  ;;  %v5844_v51 = vmul.f32 %v11983_v39, %v11983_v39 }
 0x902   :  { %16175 = vst [vmem:[#allocation190_spill] sm:$0xff] %v11966_v60  ;;  %v12017_v15 = vmax.f32 %v16184_v34, 0.0  ;;  %v5527_v22 = vadd.f32 %v5526_v0, %v11953_v26  ;;  %v5975_v13 = vadd.f32 %v5974_v61, %v5780_v3  ;;  %v12021_v20 = vmax.f32 %v16186_v47, 0.0  ;;  %v16188_v34 = vld [vmem:[#allocation196_spill] sm:$0xff]  ;;  %v5147_v3 = vpop.f32.mrf.mxu2 }
 0x903   :  { %16177 = vst [vmem:[#allocation95_spill] sm:$0xff] %v11983_v39  ;;  %v5059_v35 = vadd.f32 %v5058_v38, %v4970_v2  ;;  %v5521_v17 = vadd.f32 %v5520_v46, %v11941_v52  ;;  %v5781_v43 = vmul.f32 %v12008_v23, %v12008_v23  ;;  %v12028_v58 = vadd.f32 %v11548_v6, %v11966_v60  ;;  %v5236_v61 = vpop.f32.mrf.mxu3  ;;  %v4972_v46 = vpop.f32.mrf.mxu0 }
 0x904   :  { %16180 = vst [vmem:[#allocation213_spill] sm:$0xff] %v12000_v45  ;;  %v5850_v19 = vmul.f32 %v12000_v45, %v12000_v45  ;;  %v12033_v36 = vmax.f32 %v16188_v34, 0.0  ;;  %v12036_v0 = vadd.f32 %v11555_v37, %v5838_v29  ;;  %v5785_v38 = vmul.f32 %v12006_v54, %v12006_v54 }
 0x905   :  { %16182 = vst [vmem:[#allocation54_spill] sm:$0xff] %v12006_v54  ;;  %v5148_v2 = vadd.f32 %v5147_v3, %v5059_v35  ;;  %5522 = vadd.xlane.f32.xlu1 %v5521_v17  ;;  %v5528_v6 = vadd.f32 %v5527_v22, %v12008_v23  ;;  %v5976_v47 = vadd.f32 %v5975_v13, %v5781_v43  ;;  %v12048_v37 = vmax.f32 %v16190_v59, 0.0  ;;  %v16192_v17 = vld [vmem:[#allocation57_spill] sm:$0xff]  ;;  %v16193_v13 = vld [vmem:[#allocation198_spill] sm:$0xff] }
 0x906   :  { %16183 = vst [vmem:[#allocation191_spill] sm:$0xff] %v12008_v23  ;;  %v12043_v60 = vadd.f32 %v11566_v44, %v11983_v39  ;;  %v5856_v34 = vmul.f32 %v12017_v15, %v12017_v15  ;;  %v12051_v57 = vadd.f32 %v11569_v24, %v5844_v51  ;;  %v4973_v3 = vadd.f32 %v4972_v46, %v16192_v17  ;;  %v16195_v24 = vld [vmem:[#allocation58_spill] sm:$0xff] }
 0x907   :  { %16185 = vst [vmem:[#allocation55_spill] sm:$0xff] %v12017_v15  ;;  %v5061_v29 = vpop.f32.mrf.mxu1  ;;  %v5237_v35 = vadd.f32 %v5236_v61, %v5148_v2  ;;  %5529 = vadd.xlane.f32.xlu2 %v5528_v6  ;;  %5977 = vadd.xlane.f32.xlu0 %v5976_v47  ;;  %v5786_v22 = vmul.f32 %v12021_v20, %v12021_v20  ;;  %v12063_v43 = vmax.f32 %v16193_v13, 0.0  ;;  %v16196_v2 = vld [vmem:[#allocation215_spill] sm:$0xff]  ;;  %v12180_v52 = vmax.f32 %v16229_v18, 0.0 }
 0x908   :  { %16187 = vst [vmem:[#allocation105_spill] sm:$0xff] %v12021_v20  ;;  %v12058_v44 = vadd.f32 %v11578_v49, %v12000_v45  ;;  %v5862_v59 = vmul.f32 %v12033_v36, %v12033_v36  ;;  %5011 = vmatmul.bf16.gmra.mxu0 %v16195_v24  ;;  %v5533_v51 = vadd.f32 %v11851_v10, %v12006_v54  ;;  %v12069_v61 = vmax.f32 %v16196_v2, 0.0  ;;  %v16199_v6 = vld [vmem:[#allocation59_spill] sm:$0xff]  ;;  %v16200_v49 = vld [vmem:[#allocation109_spill] sm:$0xff]  ;;  %v16201_v24 = vld [vmem:[#allocation110_spill] sm:$0xff] }
 0x909   :  { %16189 = vst [vmem:[#allocation90_spill] sm:$0xff] %v12033_v36  ;;  %v12071_v46 = vmax.f32 %v5237_v35, 0.0  ;;  %5100 = vmatmul.bf16.gmra.mxu1 %v16199_v6  ;;  %5189 = vmatmul.bf16.gmra.mxu2 %v16200_v49  ;;  %v5981_v47 = vadd.f32 %v11870_v42, %v5785_v38  ;;  %v12077_v17 = vadd.f32 %v11581_v55, %v5850_v19  ;;  %v16202_v6 = vld [vmem:[#allocation224_spill] sm:$0xff] }
 0x90a   :  { %16191 = vst [vmem:[#allocation106_spill] sm:$0xff] %v12048_v37  ;;  %v12081_v13 = vadd.f32 %v11590_v30, %v12017_v15  ;;  %v5868_v10 = vmul.f32 %v12048_v37, %v12048_v37  ;;  %5278 = vmatmul.bf16.gmra.mxu3 %v16201_v24  ;;  %v5534_v35 = vadd.f32 %v5533_v51, %v12021_v20  ;;  %v12091_v49 = vmax.f32 %v16202_v6, 0.0  ;;  %v16204_v30 = vld [vmem:[#allocation248_spill] sm:$0xff]  ;;  %v16205_v15 = vld [vmem:[#allocation199_spill] sm:$0xff] }
 0x90b   :  { %16194 = vst [vmem:[#allocation192_spill] sm:$0xff] %v12063_v43  ;;  %v12088_v2 = vadd.f32 %v11593_v40, %v5856_v34  ;;  %v5062_v42 = vadd.f32 %v5061_v29, %v4973_v3  ;;  %v5787_v55 = vmul.f32 %v12071_v46, %v12071_v46  ;;  %v5982_v19 = vadd.f32 %v5981_v47, %v5786_v22  ;;  %v5150_v40 = vpop.f32.mrf.mxu2  ;;  %v16207_v34 = vld [vmem:[#allocation84_spill] sm:$0xff]  ;;  %v5239_v6 = vpop.f32.mrf.mxu3 }
 0x90c   :  { %16197 = vst [vmem:[#allocation174_spill] sm:$0xff] %v12069_v61  ;;  %v12097_v38 = vadd.f32 %v16204_v30, %v12033_v36  ;;  %v5874_v24 = vmul.f32 %v12063_v43, %v12063_v43  ;;  %v12102_v51 = vmax.f32 %v16205_v15, 0.0  ;;  %v12105_v45 = vadd.f32 %v16207_v34, %v5862_v59  ;;  %v4974_v22 = vpop.f32.mrf.mxu0  ;;  %v16208_v36 = vld [vmem:[#allocation249_spill] sm:$0xff]  ;;  %v16209_v20 = vld [vmem:[#allocation200_spill] sm:$0xff]  ;;  %v16211_v34 = vld [vmem:[#allocation134_spill] sm:$0xff] }
 0x90d   :  { %16198 = vst [vmem:[#allocation223_spill] sm:$0xff] %v12071_v46  ;;  %v5791_v29 = vmul.f32 %v12069_v61, %v12069_v61  ;;  %v5151_v3 = vadd.f32 %v5150_v40, %v5062_v42  ;;  %v5983_v47 = vadd.f32 %v5982_v19, %v5787_v55  ;;  %v5535_v30 = vadd.f32 %v5534_v35, %v12071_v46  ;;  %v16212_v40 = vld [vmem:[#allocation225_spill] sm:$0xff]  ;;  %v16214_v19 = vld [vmem:[#allocation176_spill] sm:$0xff] }
 0x90e   :  { %16203 = vst [vmem:[#allocation194_spill] sm:$0xff] %v12091_v49  ;;  %v12112_v39 = vadd.f32 %v16208_v36, %v12048_v37  ;;  %v12115_v15 = vmax.f32 %v16209_v20, 0.0  ;;  %v5540_v59 = vadd.f32 %v11865_v28, %v12069_v61  ;;  %v12120_v23 = vadd.f32 %v16211_v34, %v5868_v10  ;;  %v16213_v36 = vld [vmem:[#allocation250_spill] sm:$0xff]  ;;  %v16216_v10 = vld [vmem:[#allocation216_spill] sm:$0xff] }
 0x90f   :  { %16206 = vst [vmem:[#allocation214_spill] sm:$0xff] %v12102_v51  ;;  %v5063_v54 = vpop.f32.mrf.mxu1  ;;  %v5240_v42 = vadd.f32 %v5239_v6, %v5151_v3  ;;  %v4975_v26 = vadd.f32 %v4974_v22, %v16212_v40  ;;  %5984 = vadd.xlane.f32.xlu1 %v5983_v47  ;;  %5536 = vadd.xlane.f32.xlu2 %v5535_v30  ;;  %v12132_v28 = vmax.f32 %v16214_v19, 0.0  ;;  %v12135_v34 = vmax.f32 %v16216_v10, 0.0  ;;  %v16219_v47 = vld [vmem:[#allocation235_spill] sm:$0xff]  ;;  %v16223_v10 = vld [vmem:[#allocation37_spill] sm:$0xff] }
 0x910   :  { %16210 = vst [vmem:[#allocation195_spill] sm:$0xff] %v12115_v15  ;;  %v5792_v35 = vmul.f32 %v12091_v49, %v12091_v49  ;;  %v12127_v55 = vadd.f32 %v16213_v36, %v12063_v43  ;;  %v5880_v20 = vmul.f32 %v12102_v51, %v12102_v51  ;;  %v5541_v6 = vadd.f32 %v5540_v59, %v12091_v49  ;;  %v16220_v40 = vld [vmem:[#allocation251_spill] sm:$0xff]  ;;  %v16221_v43 = vld [vmem:[#allocation202_spill] sm:$0xff]  ;;  %v16227_v49 = vld [vmem:[#allocation52_spill] sm:$0xff] }
 0x911   :  { %16215 = vst [vmem:[#allocation96_spill] sm:$0xff] %v12132_v28  ;;  %v12137_v3 = vmax.f32 %v5240_v42, 0.0  ;;  %v5988_v22 = vadd.f32 %v11873_v7, %v5791_v29  ;;  %v12142_v30 = vadd.f32 %v16219_v47, %v5874_v24  ;;  %v12146_v36 = vadd.f32 %v16220_v40, %v12102_v51  ;;  %v16225_v47 = vld [vmem:[#allocation203_spill] sm:$0xff] }
 0x912   :  { %16217 = vst [vmem:[#allocation196_spill] sm:$0xff] %v12135_v34  ;;  %v5886_v19 = vmul.f32 %v12115_v15, %v12115_v15  ;;  %v12151_v37 = vmax.f32 %v16221_v43, 0.0  ;;  %v12154_v42 = vmax.f32 %v16223_v10, 0.0  ;;  %v5064_v61 = vadd.f32 %v5063_v54, %v4975_v26  ;;  %v16228_v54 = vld [vmem:[#allocation169_spill] sm:$0xff] }
 0x913   :  { %16218 = vst [vmem:[#allocation175_spill] sm:$0xff] %v12137_v3  ;;  %v5542_v59 = vadd.f32 %v5541_v6, %v12137_v3  ;;  %v5793_v7 = vmul.f32 %v12137_v3, %v12137_v3  ;;  %v5989_v24 = vadd.f32 %v5988_v22, %v5792_v35  ;;  %v5892_v29 = vmul.f32 %v12132_v28, %v12132_v28  ;;  %v5152_v51 = vpop.f32.mrf.mxu2  ;;  %v5241_v22 = vpop.f32.mrf.mxu3 }
 0x914   :  { %16222 = vst [vmem:[#allocation57_spill] sm:$0xff] %v12151_v37  ;;  %v12162_v40 = vmax.f32 %v16225_v47, 0.0  ;;  %v5797_v43 = vmul.f32 %v12135_v34, %v12135_v34  ;;  %v12167_v10 = vadd.f32 %v16227_v49, %v5880_v20  ;;  %v12171_v26 = vadd.f32 %v11657_v48, %v12115_v15  ;;  %v4977_v47 = vpop.f32.mrf.mxu0  ;;  %v16231_v20 = vld [vmem:[#allocation168_spill] sm:$0xff] }
 0x915   :  { %16224 = vst [vmem:[#allocation198_spill] sm:$0xff] %v12154_v42  ;;  %v12175_v35 = vadd.f32 %v16228_v54, %v12132_v28  ;;  %v5153_v6 = vadd.f32 %v5152_v51, %v5064_v61  ;;  %5543 = vadd.xlane.f32.xlu0 %v5542_v59  ;;  %v5990_v3 = vadd.f32 %v5989_v24, %v5793_v7  ;;  %v16232_v54 = vld [vmem:[#allocation47_spill] sm:$0xff]  ;;  %v16233_v59 = vld [vmem:[#allocation60_spill] sm:$0xff]  ;;  %v16234_v28 = vld [vmem:[#allocation178_spill] sm:$0xff] }
 0x916   :  { %16226 = vst [vmem:[#allocation58_spill] sm:$0xff] %v12162_v40  ;;  %v5898_v46 = vmul.f32 %v12151_v37, %v12151_v37  ;;  %v5798_v48 = vmul.f32 %v12154_v42, %v12154_v42  ;;  %v12185_v15 = vadd.f32 %v16231_v20, %v5886_v19  ;;  %v12189_v61 = vadd.f32 %v16232_v54, %v12151_v37  ;;  %v16237_v20 = vld [vmem:[#allocation209_spill] sm:$0xff] }
 0x917   :  { %16230 = vst [vmem:[#allocation215_spill] sm:$0xff] %v12180_v52  ;;  %v5066_v49 = vpop.f32.mrf.mxu1  ;;  %v5242_v51 = vadd.f32 %v5241_v22, %v5153_v6  ;;  %v4978_v7 = vadd.f32 %v4977_v47, %v16233_v59  ;;  %5991 = vadd.xlane.f32.xlu2 %v5990_v3  ;;  %v5547_v24 = vadd.f32 %v11883_v11, %v12135_v34  ;;  %v12197_v5 = vmax.f32 %v16234_v28, 0.0  ;;  %v16238_v6 = vld [vmem:[#allocation39_spill] sm:$0xff]  ;;  %v16239_v3 = vld [vmem:[#allocation217_spill] sm:$0xff] }
 0x918   :  { %v5904_v18 = vmul.f32 %v12162_v40, %v12162_v40  ;;  %5016 = vmatmul.bf16.gmra.mxu0 %v16236_v32  ;;  %v5995_v19 = vadd.f32 %v11907_v33, %v5797_v43  ;;  %v12202_v54 = vadd.f32 %v16237_v20, %v5892_v29  ;;  %v12206_v22 = vadd.f32 %v16238_v6, %v12162_v40  ;;  %v16242_v59 = vld [vmem:[#allocation63_spill] sm:$0xff]  ;;  %v16243_v28 = vld [vmem:[#allocation113_spill] sm:$0xff]  ;;  %v16246_v20 = vld [vmem:[#allocation114_spill] sm:$0xff] }
 0x919   :  { %16235 = vst [vmem:[#allocation59_spill] sm:$0xff] %v12197_v5  ;;  %v12209_v47 = vmax.f32 %v16239_v3, 0.0  ;;  %v12211_v11 = vmax.f32 %v5242_v51, 0.0  ;;  %5105 = vmatmul.bf16.gmra.mxu1 %v16242_v59  ;;  %5194 = vmatmul.bf16.gmra.mxu2 %v16243_v28  ;;  %v5548_v32 = vadd.f32 %v5547_v24, %v12154_v42  ;;  %v5910_v33 = vmul.f32 %v12180_v52, %v12180_v52  ;;  %v16244_v29 = vld [vmem:[#allocation205_spill] sm:$0xff]  ;;  %v16248_v51 = vld [vmem:[#allocation226_spill] sm:$0xff] }
 0x91a   :  { %v12219_v43 = vmax.f32 %v16244_v29, 0.0  ;;  %5283 = vmatmul.bf16.gmra.mxu3 %v16246_v20  ;;  %v5996_v6 = vadd.f32 %v5995_v19, %v5798_v48  ;;  %v16247_v40 = vld [vmem:[#allocation97_spill] sm:$0xff]  ;;  %v12226_v37 = vmax.f32 %v16248_v51, 0.0  ;;  %v5067_v59 = vadd.f32 %v5066_v49, %v4978_v7  ;;  %v16252_v29 = vld [vmem:[#allocation239_spill] sm:$0xff]  ;;  %v16254_v48 = vld [vmem:[#allocation206_spill] sm:$0xff] }
 0x91b   :  { %16240 = vst [vmem:[#allocation109_spill] sm:$0xff] %v12209_v47  ;;  %v12223_v3 = vadd.f32 %v16247_v40, %v5898_v46  ;;  %v5549_v28 = vadd.f32 %v5548_v32, %v12211_v11  ;;  %v5799_v24 = vmul.f32 %v12211_v11, %v12211_v11  ;;  %v16250_v42 = vld [vmem:[#allocation49_spill] sm:$0xff]  ;;  %v12237_v20 = vadd.f32 %v16252_v29, %v12197_v5  ;;  %v5155_v40 = vpop.f32.mrf.mxu2  ;;  %v16256_v19 = vld [vmem:[#allocation92_spill] sm:$0xff] }
 0x91c   :  { %16241 = vst [vmem:[#allocation110_spill] sm:$0xff] %v12211_v11  ;;  %v12233_v34 = vadd.f32 %v16250_v42, %v12180_v52  ;;  %v12240_v46 = vmax.f32 %v16254_v48, 0.0  ;;  %v12243_v51 = vadd.f32 %v16256_v19, %v5904_v18  ;;  %v5916_v49 = vmul.f32 %v12197_v5, %v12197_v5  ;;  %v5244_v42 = vpop.f32.mrf.mxu3  ;;  %v4979_v52 = vpop.f32.mrf.mxu0  ;;  %v16257_v29 = vld [vmem:[#allocation240_spill] sm:$0xff]  ;;  %v16259_v18 = vld [vmem:[#allocation207_spill] sm:$0xff]  ;;  %v16261_v5 = vld [vmem:[#allocation93_spill] sm:$0xff] }
 0x91d   :  { %16245 = vst [vmem:[#allocation224_spill] sm:$0xff] %v12219_v43  ;;  %v5803_v7 = vmul.f32 %v12209_v47, %v12209_v47  ;;  %v5156_v32 = vadd.f32 %v5155_v40, %v5067_v59  ;;  %5550 = vadd.xlane.f32.xlu1 %v5549_v28  ;;  %v5997_v11 = vadd.f32 %v5996_v6, %v5799_v24  ;;  %v12256_v19 = vmax.f32 %v16259_v18, 0.0  ;;  %v16263_v59 = vld [vmem:[#allocation227_spill] sm:$0xff]  ;;  %v16264_v24 = vld [vmem:[#allocation254_spill] sm:$0xff] }
 0x91e   :  { %16249 = vst [vmem:[#allocation248_spill] sm:$0xff] %v12226_v37  ;;  %v12251_v41 = vadd.f32 %v16257_v29, %v12219_v43  ;;  %v5922_v48 = vmul.f32 %v12219_v43, %v12219_v43  ;;  %v4980_v40 = vadd.f32 %v4979_v52, %v16263_v59  ;;  %v5554_v6 = vadd.f32 %v11898_v14, %v12209_v47  ;;  %v16266_v43 = vld [vmem:[#allocation208_spill] sm:$0xff] }
 0x91f   :  { %16251 = vst [vmem:[#allocation199_spill] sm:$0xff] %v12233_v34  ;;  %v5068_v8 = vpop.f32.mrf.mxu1  ;;  %v5245_v34 = vadd.f32 %v5244_v42, %v5156_v32  ;;  %5998 = vadd.xlane.f32.xlu0 %v5997_v11  ;;  %v5804_v28 = vmul.f32 %v12226_v37, %v12226_v37  ;;  %v12268_v29 = vadd.f32 %v16264_v24, %v12240_v46  ;;  %v16271_v42 = vld [vmem:[#allocation56_spill] sm:$0xff]  ;;  %v16273_v24 = vld [vmem:[#allocation255_spill] sm:$0xff] }
 0x920   :  { %16253 = vst [vmem:[#allocation84_spill] sm:$0xff] %v12237_v20  ;;  %v12259_v20 = vadd.f32 %v16261_v5, %v5910_v33  ;;  %v5928_v18 = vmul.f32 %v12240_v46, %v12240_v46  ;;  %v12273_v5 = vmax.f32 %v16266_v43, 0.0  ;;  %v16268_v33 = vld [vmem:[#allocation218_spill] sm:$0xff]  ;;  %v5555_v14 = vadd.f32 %v5554_v6, %v12226_v37  ;;  %v16281_v37 = vld [vmem:[#allocation241_spill] sm:$0xff] }
 0x921   :  { %16255 = vst [vmem:[#allocation249_spill] sm:$0xff] %v12240_v46  ;;  %v12276_v32 = vmax.f32 %v16268_v33, 0.0  ;;  %v12278_v52 = vmax.f32 %v5245_v34, 0.0  ;;  %v6002_v11 = vadd.f32 %v11919_v1, %v5803_v7  ;;  %v12283_v59 = vadd.f32 %v16271_v42, %v5916_v49  ;;  %v16275_v46 = vld [vmem:[#allocation189_spill] sm:$0xff] }
 0x922   :  { %16258 = vst [vmem:[#allocation200_spill] sm:$0xff] %v12251_v41  ;;  %v12287_v47 = vadd.f32 %v16273_v24, %v12256_v19  ;;  %v5934_v43 = vmul.f32 %v12256_v19, %v12256_v19  ;;  %v16277_v33 = vld [vmem:[#allocation61_spill] sm:$0xff]  ;;  %v5069_v41 = vadd.f32 %v5068_v8, %v4980_v40  ;;  %v5940_v7 = vmul.f32 %v12273_v5, %v12273_v5  ;;  %v16279_v24 = vld [vmem:[#allocation219_spill] sm:$0xff]  ;;  %v16284_v40 = vld [vmem:[#allocation220_spill] sm:$0xff] }
 0x923   :  { %16260 = vst [vmem:[#allocation134_spill] sm:$0xff] %v12256_v19  ;;  %v12295_v34 = vmax.f32 %v16277_v33, 0.0  ;;  %v5556_v6 = vadd.f32 %v5555_v14, %v12278_v52  ;;  %v5805_v1 = vmul.f32 %v12278_v52, %v12278_v52  ;;  %v6003_v49 = vadd.f32 %v6002_v11, %v5804_v28 }
 0x924   :  { %16262 = vst [vmem:[#allocation225_spill] sm:$0xff] %v12259_v20  ;;  %v5809_v42 = vmul.f32 %v12276_v32, %v12276_v32  ;;  %v12305_v19 = vmax.f32 %v16279_v24, 0.0  ;;  %v12308_v33 = vadd.f32 %v16281_v37, %v5922_v48  ;;  %v12312_v8 = vadd.f32 %v11794_v4, %v12273_v5  ;;  %v5246_v11 = vpop.f32.mrf.mxu3  ;;  %v16288_v4 = vld [vmem:[#allocation242_spill] sm:$0xff] }
 0x925   :  { %16265 = vst [vmem:[#allocation250_spill] sm:$0xff] %v12268_v29  ;;  %v12292_v29 = vmax.f32 %v16275_v46, 0.0  ;;  %v5157_v46 = vpop.f32.mrf.mxu2  ;;  %v12315_v14 = vmax.f32 %v16284_v40, 0.0  ;;  %5557 = vadd.xlane.f32.xlu2 %v5556_v6  ;;  %v5810_v48 = vmul.f32 %v12295_v34, %v12295_v34  ;;  %v5561_v6 = vadd.f32 %v11928_v63, %v12276_v32 }
 0x926   :  { %16267 = vst [vmem:[#allocation176_spill] sm:$0xff] %v12273_v5  ;;  %v5158_v28 = vadd.f32 %v5157_v46, %v5069_v41  ;;  %v12325_v5 = vadd.f32 %v16288_v4, %v5928_v18  ;;  %v6009_v18 = vadd.f32 %v11957_v56, %v5809_v42  ;;  %v16296_v42 = vld [vmem:[#allocation222_spill] sm:$0xff]  ;;  %v16299_v4 = vld [vmem:[#allocation228_spill] sm:$0xff] }
 0x927   :  { %16269 = vst [vmem:[#allocation216_spill] sm:$0xff] %v12276_v32  ;;  %v5815_v24 = vmul.f32 %v12292_v29, %v12292_v29  ;;  %v5071_v37 = vpop.f32.mrf.mxu1 }
 0x928   :  { %16270 = vst [vmem:[#allocation235_spill] sm:$0xff] %v12278_v52  ;;  %v4982_v52 = vpop.f32.mrf.mxu0  ;;  %v5247_v40 = vadd.f32 %v5246_v11, %v5158_v28  ;;  %v12341_v28 = vadd.f32 %v11806_v31, %v5940_v7  ;;  %v12355_v31 = vmax.f32 %v16296_v42, 0.0  ;;  %v16298_v7 = vld [vmem:[#allocation118_spill] sm:$0xff] }
 0x929   :  { %16272 = vst [vmem:[#allocation251_spill] sm:$0xff] %v12283_v59  ;;  %v16286_v59 = vld [vmem:[#allocation221_spill] sm:$0xff]  ;;  %v6016_v11 = vadd.f32 %v11971_v9, %v5815_v24 }
 0x92a   :  { %16274 = vst [vmem:[#allocation202_spill] sm:$0xff] %v12287_v47  ;;  %v6004_v47 = vadd.f32 %v6003_v49, %v5805_v1  ;;  %v12320_v20 = vmax.f32 %v16286_v59, 0.0  ;;  %v12331_v1 = vadd.f32 %v11788_v62, %v5934_v43  ;;  %v5821_v59 = vmul.f32 %v12305_v19, %v12305_v19  ;;  %v16290_v49 = vld [vmem:[#allocation193_spill] sm:$0xff]  ;;  %v16294_v62 = vld [vmem:[#allocation67_spill] sm:$0xff]  ;;  %5288 = vmatmul.bf16.gmra.mxu3 %v16298_v7 }
 0x92b   :  { %16276 = vst [vmem:[#allocation37_spill] sm:$0xff] %v12292_v29  ;;  %v12336_v46 = vmax.f32 %v16290_v49, 0.0  ;;  %v12345_v63 = vmax.f32 %v5247_v40, 0.0  ;;  %5110 = vmatmul.bf16.gmra.mxu1 %v16294_v62  ;;  %v5562_v43 = vadd.f32 %v5561_v6, %v12295_v34  ;;  %v12360_v40 = vmax.f32 %v16299_v4, 0.0 }
 0x92c   :  { %16278 = vst [vmem:[#allocation203_spill] sm:$0xff] %v12295_v34  ;;  %6005 = vadd.xlane.f32.xlu1 %v6004_v47  ;;  %v5827_v47 = vmul.f32 %v12315_v14, %v12315_v14  ;;  %v5833_v56 = vmul.f32 %v12320_v20, %v12320_v20  ;;  %v12375_v9 = vadd.f32 %v11976_v21, %v5821_v59  ;;  %v16305_v21 = vld [vmem:[#allocation16_spill] sm:$0xff] }
 0x92d   :  { %16280 = vst [vmem:[#allocation52_spill] sm:$0xff] %v12305_v19  ;;  %v5563_v6 = vadd.f32 %v5562_v43, %v12345_v63  ;;  %v5839_v62 = vmul.f32 %v12336_v46, %v12336_v46  ;;  %v12379_v43 = vadd.f32 %v11980_v53, %v12315_v14  ;;  %v5845_v4 = vmul.f32 %v12355_v31, %v12355_v31  ;;  %v16307_v53 = vld [vmem:[#allocation229_spill] sm:$0xff] }
 0x92e   :  { %16282 = vst [vmem:[#allocation169_spill] sm:$0xff] %v12308_v33  ;;  %v16292_v33 = vld [vmem:[#allocation66_spill] sm:$0xff]  ;;  %v12382_v7 = vadd.f32 %v11988_v50, %v5827_v47  ;;  %v12390_v59 = vmax.f32 %v16305_v21, 0.0  ;;  %v5816_v50 = vmul.f32 %v12360_v40, %v12360_v40  ;;  %v12400_v47 = vadd.f32 %v12012_v16, %v5833_v56 }
 0x92f   :  { %16283 = vst [vmem:[#allocation177_spill] sm:$0xff] %v12312_v8  ;;  %v16289_v8 = vld [vmem:[#allocation65_spill] sm:$0xff]  ;;  %5021 = vmatmul.bf16.gmra.mxu0 %v16292_v33  ;;  %v6010_v33 = vadd.f32 %v6009_v18, %v5810_v48  ;;  %v12372_v48 = vadd.f32 %v11963_v27, %v12305_v19  ;;  %5564 = vadd.xlane.f32.xlu0 %v5563_v6 }
 0x930   :  { %16285 = vst [vmem:[#allocation168_spill] sm:$0xff] %v12315_v14  ;;  %v4983_v41 = vadd.f32 %v4982_v52, %v16289_v8  ;;  %v16295_v52 = vld [vmem:[#allocation117_spill] sm:$0xff]  ;;  %v5568_v8 = vadd.f32 %v11948_v12, %v12292_v29  ;;  %v5811_v12 = vmul.f32 %v12345_v63, %v12345_v63  ;;  %v5160_v29 = vpop.f32.mrf.mxu2  ;;  %v12422_v56 = vadd.f32 %v12043_v60, %v12355_v31 }
 0x931   :  { %16287 = vst [vmem:[#allocation47_spill] sm:$0xff] %v12320_v20  ;;  %5199 = vmatmul.bf16.gmra.mxu2 %v16295_v52  ;;  %v16301_v52 = vld [vmem:[#allocation12_spill] sm:$0xff]  ;;  %v16303_v27 = vld [vmem:[#allocation13_spill] sm:$0xff]  ;;  %v6017_v60 = vadd.f32 %v6016_v11, %v5816_v50 }
 0x932   :  { %16291 = vst [vmem:[#allocation60_spill] sm:$0xff] %v12336_v46  ;;  %v5072_v49 = vadd.f32 %v5071_v37, %v4983_v41  ;;  %v12368_v42 = vmax.f32 %v16301_v52, 0.0  ;;  %v5249_v37 = vpop.f32.mrf.mxu3  ;;  %v4984_v41 = vpop.f32.mrf.mxu0  ;;  %v6011_v18 = vadd.f32 %v6010_v33, %v5811_v12  ;;  %v12387_v52 = vmax.f32 %v16303_v27, 0.0  ;;  %v16308_v27 = vld [vmem:[#allocation17_spill] sm:$0xff] }
 0x933   :  { %16293 = vst [vmem:[#allocation178_spill] sm:$0xff] %v12345_v63  ;;  %v12394_v33 = vadd.f32 %v11992_v25, %v12320_v20  ;;  %v4985_v6 = vadd.f32 %v4984_v41, %v16307_v53  ;;  %v12405_v21 = vmax.f32 %v16308_v27, 0.0  ;;  %v12409_v25 = vadd.f32 %v12028_v58, %v12336_v46  ;;  %v16313_v27 = vld [vmem:[#allocation40_spill] sm:$0xff] }
 0x934   :  { %16297 = vst [vmem:[#allocation62_spill] sm:$0xff] %v12355_v31  ;;  %v5161_v24 = vadd.f32 %v5160_v29, %v5072_v49  ;;  %v5073_v29 = vpop.f32.mrf.mxu1  ;;  %6012 = vadd.xlane.f32.xlu2 %v6011_v18  ;;  %v5851_v12 = vmul.f32 %v12368_v42, %v12368_v42  ;;  %v5569_v16 = vadd.f32 %v5568_v8, %v12360_v40  ;;  %v16315_v46 = vld [vmem:[#allocation20_spill] sm:$0xff] }
 0x935   :  { %16300 = vst [vmem:[#allocation209_spill] sm:$0xff] %v12360_v40  ;;  %v5857_v53 = vmul.f32 %v12387_v52, %v12387_v52  ;;  %v5863_v58 = vmul.f32 %v12390_v59, %v12390_v59  ;;  %v5869_v31 = vmul.f32 %v12405_v21, %v12405_v21  ;;  %v12440_v20 = vmax.f32 %v16315_v46, 0.0  ;;  %v16362_v40 = vld [vmem:[#allocation74_spill] sm:$0xff] }
 0x936   :  { %16302 = vst [vmem:[#allocation39_spill] sm:$0xff] %v12368_v42  ;;  %v5250_v49 = vadd.f32 %v5249_v37, %v5161_v24  ;;  %v12412_v24 = vadd.f32 %v12036_v0, %v5839_v62  ;;  %v16310_v37 = vld [vmem:[#allocation197_spill] sm:$0xff]  ;;  %v12429_v0 = vmax.f32 %v16313_v27, 0.0  ;;  %v12432_v62 = vadd.f32 %v12051_v57, %v5845_v4 }
 0x937   :  { %16304 = vst [vmem:[#allocation217_spill] sm:$0xff] %v12387_v52  ;;  %v12415_v41 = vmax.f32 %v16310_v37, 0.0  ;;  %v12444_v27 = vadd.f32 %v12058_v44, %v12368_v42  ;;  %v12447_v57 = vadd.f32 %v12077_v17, %v5851_v12  ;;  %v12453_v46 = vadd.f32 %v12081_v13, %v12387_v52  ;;  %v16319_v44 = vld [vmem:[#allocation24_spill] sm:$0xff] }
 0x938   :  { %16306 = vst [vmem:[#allocation63_spill] sm:$0xff] %v12390_v59  ;;  %v12417_v18 = vmax.f32 %v5250_v49, 0.0  ;;  %v5074_v49 = vadd.f32 %v5073_v29, %v4985_v6  ;;  %v5162_v14 = vpop.f32.mrf.mxu2  ;;  %v12459_v42 = vmax.f32 %v16319_v44, 0.0  ;;  %v5822_v12 = vmul.f32 %v12429_v0, %v12429_v0  ;;  %v16322_v44 = vld [vmem:[#allocation25_spill] sm:$0xff] }
 0x939   :  { %16309 = vst [vmem:[#allocation113_spill] sm:$0xff] %v12405_v21  ;;  %v5875_v4 = vmul.f32 %v12415_v41, %v12415_v41  ;;  %v12469_v13 = vadd.f32 %v12097_v38, %v12390_v59  ;;  %v12477_v52 = vmax.f32 %v16322_v44, 0.0 }
 0x93a   :  { %16311 = vst [vmem:[#allocation205_spill] sm:$0xff] %v12415_v41  ;;  %v5570_v37 = vadd.f32 %v5569_v16, %v12417_v18  ;;  %v5817_v8 = vmul.f32 %v12417_v18, %v12417_v18  ;;  %v5163_v29 = vadd.f32 %v5162_v14, %v5074_v49  ;;  %v5251_v6 = vpop.f32.mrf.mxu3  ;;  %v4987_v11 = vpop.f32.mrf.mxu0  ;;  %v16317_v16 = vld [vmem:[#allocation21_spill] sm:$0xff]  ;;  %v12464_v14 = vadd.f32 %v12088_v2, %v5857_v53 }
 0x93b   :  { %16312 = vst [vmem:[#allocation114_spill] sm:$0xff] %v12417_v18  ;;  %v12456_v19 = vmax.f32 %v16317_v16, 0.0  ;;  %v5881_v16 = vmul.f32 %v12440_v20, %v12440_v20  ;;  %v16324_v18 = vld [vmem:[#allocation70_spill] sm:$0xff]  ;;  %v12482_v2 = vadd.f32 %v12112_v39, %v12405_v21  ;;  %v12485_v53 = vadd.f32 %v12120_v23, %v5869_v31  ;;  %v16328_v31 = vld [vmem:[#allocation201_spill] sm:$0xff] }
 0x93c   :  { %16314 = vst [vmem:[#allocation97_spill] sm:$0xff] %v12429_v0  ;;  %5571 = vadd.xlane.f32.xlu1 %v5570_v37  ;;  %v6018_v50 = vadd.f32 %v6017_v60, %v5817_v8  ;;  %v5076_v17 = vpop.f32.mrf.mxu1  ;;  %v5252_v49 = vadd.f32 %v5251_v6, %v5163_v29  ;;  %v16321_v37 = vld [vmem:[#allocation68_spill] sm:$0xff]  ;;  %v12472_v60 = vadd.f32 %v12105_v45, %v5863_v58  ;;  %v16326_v29 = vld [vmem:[#allocation71_spill] sm:$0xff]  ;;  %v16327_v45 = vld [vmem:[#allocation121_spill] sm:$0xff] }
 0x93d   :  { %16316 = vst [vmem:[#allocation226_spill] sm:$0xff] %v12440_v20  ;;  %v4988_v8 = vadd.f32 %v4987_v11, %v16321_v37  ;;  %5115 = vmatmul.bf16.gmra.mxu1 %v16326_v29  ;;  %v5576_v58 = vadd.f32 %v12372_v48, %v12429_v0  ;;  %v12495_v6 = vadd.f32 %v12127_v55, %v12415_v41  ;;  %v12505_v11 = vmax.f32 %v16328_v31, 0.0  ;;  %v16333_v29 = vld [vmem:[#allocation28_spill] sm:$0xff] }
 0x93e   :  { %16318 = vst [vmem:[#allocation49_spill] sm:$0xff] %v12456_v19  ;;  %6019 = vadd.xlane.f32.xlu0 %v6018_v50  ;;  %v12487_v38 = vmax.f32 %v5252_v49, 0.0  ;;  %v5887_v39 = vmul.f32 %v12456_v19, %v12456_v19  ;;  %v5893_v23 = vmul.f32 %v12459_v42, %v12459_v42  ;;  %v16330_v50 = vld [vmem:[#allocation122_spill] sm:$0xff]  ;;  %v6024_v48 = vadd.f32 %v12375_v9, %v5822_v12 }
 0x93f   :  { %16320 = vst [vmem:[#allocation239_spill] sm:$0xff] %v12459_v42  ;;  %5026 = vmatmul.bf16.gmra.mxu0 %v16324_v18  ;;  %v12498_v18 = vadd.f32 %v12142_v30, %v5875_v4  ;;  %5293 = vmatmul.bf16.gmra.mxu3 %v16330_v50  ;;  %v16331_v49 = vld [vmem:[#allocation230_spill] sm:$0xff]  ;;  %v5077_v55 = vadd.f32 %v5076_v17, %v4988_v8  ;;  %v16335_v17 = vld [vmem:[#allocation29_spill] sm:$0xff] }
 0x940   :  { %16323 = vst [vmem:[#allocation206_spill] sm:$0xff] %v12477_v52  ;;  %v12510_v37 = vmax.f32 %v16331_v49, 0.0  ;;  %v5577_v30 = vadd.f32 %v5576_v58, %v12487_v38  ;;  %v5823_v4 = vmul.f32 %v12487_v38, %v12487_v38  ;;  %v5899_v44 = vmul.f32 %v12477_v52, %v12477_v52  ;;  %v5165_v31 = vpop.f32.mrf.mxu2 }
 0x941   :  { %16325 = vst [vmem:[#allocation92_spill] sm:$0xff] %v12487_v38  ;;  %5204 = vmatmul.bf16.gmra.mxu2 %v16327_v45  ;;  %v12518_v45 = vmax.f32 %v16333_v29, 0.0  ;;  %v12522_v50 = vadd.f32 %v12146_v36, %v12440_v20  ;;  %v12525_v9 = vadd.f32 %v12167_v10, %v5881_v16  ;;  %v12528_v12 = vmax.f32 %v16335_v17, 0.0  ;;  %v16337_v36 = vld [vmem:[#allocation32_spill] sm:$0xff]  ;;  %v16360_v38 = vld [vmem:[#allocation234_spill] sm:$0xff] }
 0x942   :  { %16329 = vst [vmem:[#allocation240_spill] sm:$0xff] %v12505_v11  ;;  %v5166_v8 = vadd.f32 %v5165_v31, %v5077_v55  ;;  %v5254_v58 = vpop.f32.mrf.mxu3  ;;  %5578 = vadd.xlane.f32.xlu2 %v5577_v30  ;;  %v4989_v49 = vpop.f32.mrf.mxu0  ;;  %v6025_v41 = vadd.f32 %v6024_v48, %v5823_v4  ;;  %v12532_v29 = vadd.f32 %v12171_v26, %v12456_v19  ;;  %v12537_v20 = vmax.f32 %v16337_v36, 0.0  ;;  %v16339_v48 = vld [vmem:[#allocation231_spill] sm:$0xff]  ;;  %v16340_v36 = vld [vmem:[#allocation33_spill] sm:$0xff] }
 0x943   :  { %16332 = vst [vmem:[#allocation207_spill] sm:$0xff] %v12510_v37  ;;  %v5905_v21 = vmul.f32 %v12505_v11, %v12505_v11  ;;  %v12540_v16 = vadd.f32 %v12185_v15, %v5887_v39  ;;  %v12544_v55 = vadd.f32 %v12175_v35, %v12459_v42  ;;  %v4990_v4 = vadd.f32 %v4989_v49, %v16339_v48 }
 0x944   :  { %16334 = vst [vmem:[#allocation93_spill] sm:$0xff] %v12518_v45  ;;  %v5078_v10 = vpop.f32.mrf.mxu1  ;;  %v5255_v30 = vadd.f32 %v5254_v58, %v5166_v8  ;;  %6026 = vadd.xlane.f32.xlu1 %v6025_v41  ;;  %v5828_v26 = vmul.f32 %v12510_v37, %v12510_v37  ;;  %v12550_v31 = vadd.f32 %v12202_v54, %v5893_v23  ;;  %v12555_v15 = vmax.f32 %v16340_v36, 0.0 }
 0x945   :  { %16336 = vst [vmem:[#allocation227_spill] sm:$0xff] %v12528_v12  ;;  %v5911_v17 = vmul.f32 %v12518_v45, %v12518_v45  ;;  %v12559_v35 = vadd.f32 %v12189_v61, %v12477_v52  ;;  %v12562_v39 = vadd.f32 %v12223_v3, %v5899_v44  ;;  %v5917_v41 = vmul.f32 %v12528_v12, %v12528_v12  ;;  %v16343_v61 = vld [vmem:[#allocation204_spill] sm:$0xff]  ;;  %v16345_v3 = vld [vmem:[#allocation69_spill] sm:$0xff] }
 0x946   :  { %16338 = vst [vmem:[#allocation254_spill] sm:$0xff] %v12537_v20  ;;  %v12566_v8 = vmax.f32 %v5255_v30, 0.0  ;;  %v5583_v54 = vadd.f32 %v12379_v43, %v12510_v37  ;;  %v12572_v23 = vadd.f32 %v12206_v22, %v12505_v11  ;;  %v5923_v58 = vmul.f32 %v12537_v20, %v12537_v20  ;;  %v16347_v52 = vld [vmem:[#allocation36_spill] sm:$0xff] }
 0x947   :  { %16341 = vst [vmem:[#allocation208_spill] sm:$0xff] %v12555_v15  ;;  %v12577_v49 = vmax.f32 %v16343_v61, 0.0  ;;  %v12580_v44 = vmax.f32 %v16345_v3, 0.0  ;;  %v12583_v48 = vadd.f32 %v12243_v51, %v5905_v21  ;;  %v5079_v30 = vadd.f32 %v5078_v10, %v4990_v4  ;;  %v16349_v3 = vld [vmem:[#allocation199_spill] sm:$0xff]  ;;  %v16350_v51 = vld [vmem:[#allocation225_spill] sm:$0xff] }
 0x948   :  { %16342 = vst [vmem:[#allocation218_spill] sm:$0xff] %v12566_v8  ;;  %v5584_v36 = vadd.f32 %v5583_v54, %v12566_v8  ;;  %v5829_v43 = vmul.f32 %v12566_v8, %v12566_v8  ;;  %v6031_v22 = vadd.f32 %v12382_v7, %v5828_v26  ;;  %v5929_v11 = vmul.f32 %v12555_v15, %v12555_v15  ;;  %v5167_v42 = vpop.f32.mrf.mxu2  ;;  %v16351_v7 = vld [vmem:[#allocation84_spill] sm:$0xff]  ;;  %v16352_v8 = vld [vmem:[#allocation251_spill] sm:$0xff] }
 0x949   :  { %16344 = vst [vmem:[#allocation56_spill] sm:$0xff] %v12577_v49  ;;  %v12592_v61 = vmax.f32 %v16347_v52, 0.0  ;;  %v12596_v19 = vadd.f32 %v16349_v3, %v12518_v45  ;;  %v12599_v21 = vadd.f32 %v16350_v51, %v5911_v17  ;;  %v5168_v10 = vadd.f32 %v5167_v42, %v5079_v30  ;;  %v16353_v3 = vld [vmem:[#allocation232_spill] sm:$0xff] }
 0x94a   :  { %16346 = vst [vmem:[#allocation255_spill] sm:$0xff] %v12580_v44  ;;  %v5256_v4 = vpop.f32.mrf.mxu3  ;;  %5585 = vadd.xlane.f32.xlu0 %v5584_v36  ;;  %v4992_v54 = vpop.f32.mrf.mxu0  ;;  %v6032_v59 = vadd.f32 %v6031_v22, %v5829_v43  ;;  %v12603_v26 = vadd.f32 %v16351_v7, %v12528_v12  ;;  %v12606_v52 = vadd.f32 %v16352_v8, %v5917_v41  ;;  %v12611_v45 = vmax.f32 %v16353_v3, 0.0  ;;  %v16355_v30 = vld [vmem:[#allocation200_spill] sm:$0xff]  ;;  %v16356_v43 = vld [vmem:[#allocation41_spill] sm:$0xff] }
 0x94b   :  { %16348 = vst [vmem:[#allocation189_spill] sm:$0xff] %v12592_v61  ;;  %v5935_v37 = vmul.f32 %v12577_v49, %v12577_v49  ;;  %v5834_v42 = vmul.f32 %v12580_v44, %v12580_v44  ;;  %v12617_v36 = vadd.f32 %v16355_v30, %v12537_v20  ;;  %v12620_v22 = vmax.f32 %v16356_v43, 0.0  ;;  %v16358_v41 = vld [vmem:[#allocation73_spill] sm:$0xff]  ;;  %v16363_v30 = vld [vmem:[#allocation250_spill] sm:$0xff] }
 0x94c   :  { %16354 = vst [vmem:[#allocation61_spill] sm:$0xff] %v12611_v45  ;;  %v5081_v17 = vpop.f32.mrf.mxu1  ;;  %v5257_v51 = vadd.f32 %v5256_v4, %v5168_v10  ;;  %v4993_v8 = vadd.f32 %v4992_v54, %v16358_v41  ;;  %6033 = vadd.xlane.f32.xlu2 %v6032_v59  ;;  %v16359_v7 = vld [vmem:[#allocation169_spill] sm:$0xff]  ;;  %v5941_v3 = vmul.f32 %v12592_v61, %v12592_v61  ;;  %v12629_v0 = vmax.f32 %v16360_v38, 0.0  ;;  %v16364_v4 = vld [vmem:[#allocation15_spill] sm:$0xff] }
 0x94d   :  { %16357 = vst [vmem:[#allocation219_spill] sm:$0xff] %v12620_v22  ;;  %v12624_v12 = vadd.f32 %v16359_v7, %v5923_v58  ;;  %v12634_v20 = vadd.f32 %v16363_v30, %v12555_v15  ;;  %v12637_v10 = vadd.f32 %v12325_v5, %v5929_v11  ;;  %v12640_v59 = vmax.f32 %v16364_v4, 0.0  ;;  %v16367_v54 = vld [vmem:[#allocation75_spill] sm:$0xff]  ;;  %v16368_v43 = vld [vmem:[#allocation125_spill] sm:$0xff]  ;;  %v16371_v7 = vld [vmem:[#allocation78_spill] sm:$0xff] }
 0x94e   :  { %16361 = vst [vmem:[#allocation241_spill] sm:$0xff] %v12629_v0  ;;  %v12642_v58 = vmax.f32 %v5257_v51, 0.0  ;;  %5120 = vmatmul.bf16.gmra.mxu1 %v16367_v54  ;;  %v5590_v38 = vadd.f32 %v12394_v33, %v12580_v44  ;;  %v12653_v30 = vmax.f32 %v16371_v7, 0.0  ;;  %v16373_v5 = vld [vmem:[#allocation126_spill] sm:$0xff]  ;;  %v6038_v11 = vadd.f32 %v12400_v47, %v5834_v42  ;;  %v16375_v7 = vld [vmem:[#allocation19_spill] sm:$0xff]  ;;  %v16377_v42 = vld [vmem:[#allocation177_spill] sm:$0xff] }
 0x94f   :  { %5031 = vmatmul.bf16.gmra.mxu0 %v16362_v40  ;;  %16365 = vst [vmem:[#allocation220_spill] sm:$0xff] %v12640_v59  ;;  %v16369_v40 = vld [vmem:[#allocation202_spill] sm:$0xff]  ;;  %5298 = vmatmul.bf16.gmra.mxu3 %v16373_v5  ;;  %v5840_v51 = vmul.f32 %v12611_v45, %v12611_v45  ;;  %v12660_v4 = vadd.f32 %v12331_v1, %v5935_v37  ;;  %v12668_v15 = vmax.f32 %v16375_v7, 0.0  ;;  %v16380_v44 = vld [vmem:[#allocation44_spill] sm:$0xff] }
 0x950   :  { %16366 = vst [vmem:[#allocation221_spill] sm:$0xff] %v12642_v58  ;;  %v12650_v41 = vadd.f32 %v16369_v40, %v12577_v49  ;;  %v5082_v54 = vadd.f32 %v5081_v17, %v4993_v8  ;;  %v5591_v33 = vadd.f32 %v5590_v38, %v12642_v58  ;;  %v5846_v40 = vmul.f32 %v12620_v22, %v12620_v22  ;;  %v5170_v5 = vpop.f32.mrf.mxu2 }
 0x951   :  { %5209 = vmatmul.bf16.gmra.mxu2 %v16368_v43  ;;  %16372 = vst [vmem:[#allocation65_spill] sm:$0xff] %v12653_v30  ;;  %v5835_v43 = vmul.f32 %v12642_v58, %v12642_v58  ;;  %v5852_v47 = vmul.f32 %v12629_v0, %v12629_v0  ;;  %v12674_v1 = vadd.f32 %v16377_v42, %v12592_v61  ;;  %v12684_v63 = vmax.f32 %v16380_v44, 0.0 }
 0x952   :  { %16370 = vst [vmem:[#allocation242_spill] sm:$0xff] %v12650_v41  ;;  %v12677_v37 = vadd.f32 %v12341_v28, %v5941_v3  ;;  %v5171_v17 = vadd.f32 %v5170_v5, %v5082_v54  ;;  %v5259_v8 = vpop.f32.mrf.mxu3  ;;  %5592 = vadd.xlane.f32.xlu1 %v5591_v33  ;;  %v4994_v38 = vpop.f32.mrf.mxu0  ;;  %v5597_v7 = vadd.f32 %v12409_v25, %v12611_v45  ;;  %v16384_v33 = vld [vmem:[#allocation233_spill] sm:$0xff]  ;;  %v16385_v5 = vld [vmem:[#allocation83_spill] sm:$0xff] }
 0x953   :  { %16374 = vst [vmem:[#allocation193_spill] sm:$0xff] %v12660_v4  ;;  %v6039_v49 = vadd.f32 %v6038_v11, %v5835_v43  ;;  %v5858_v58 = vmul.f32 %v12640_v59, %v12640_v59  ;;  %v6045_v42 = vadd.f32 %v12412_v24, %v5840_v51  ;;  %v12689_v28 = vadd.f32 %v12422_v56, %v12620_v22  ;;  %v16382_v11 = vld [vmem:[#allocation23_spill] sm:$0xff] }
 0x954   :  { %16376 = vst [vmem:[#allocation66_spill] sm:$0xff] %v12668_v15  ;;  %v5083_v34 = vpop.f32.mrf.mxu1  ;;  %v5864_v3 = vmul.f32 %v12653_v30, %v12653_v30  ;;  %v12694_v54 = vmax.f32 %v16382_v11, 0.0  ;;  %v5260_v25 = vadd.f32 %v5259_v8, %v5171_v17  ;;  %v4995_v43 = vadd.f32 %v4994_v38, %v16384_v33  ;;  %v16387_v17 = vld [vmem:[#allocation27_spill] sm:$0xff] }
 0x955   :  { %16378 = vst [vmem:[#allocation67_spill] sm:$0xff] %v12674_v1  ;;  %6040 = vadd.xlane.f32.xlu0 %v6039_v49  ;;  %v12698_v44 = vadd.f32 %v12432_v62, %v5846_v40  ;;  %v12701_v61 = vmax.f32 %v16385_v5, 0.0  ;;  %v12705_v24 = vadd.f32 %v12444_v27, %v12629_v0  ;;  %v12708_v56 = vadd.f32 %v12447_v57, %v5852_v47  ;;  %v16390_v27 = vld [vmem:[#allocation45_spill] sm:$0xff]  ;;  %v16392_v33 = vld [vmem:[#allocation31_spill] sm:$0xff] }
 0x956   :  { %16379 = vst [vmem:[#allocation117_spill] sm:$0xff] %v12677_v37  ;;  %v5870_v51 = vmul.f32 %v12668_v15, %v12668_v15  ;;  %v12713_v8 = vmax.f32 %v16387_v17, 0.0  ;;  %v12715_v49 = vmax.f32 %v5260_v25, 0.0  ;;  %v12719_v62 = vadd.f32 %v12453_v46, %v12640_v59 }
 0x957   :  { %16381 = vst [vmem:[#allocation222_spill] sm:$0xff] %v12684_v63  ;;  %v12722_v40 = vadd.f32 %v12464_v14, %v5858_v58  ;;  %v12725_v38 = vmax.f32 %v16390_v27, 0.0  ;;  %v12729_v57 = vadd.f32 %v12469_v13, %v12653_v30  ;;  %v12732_v47 = vadd.f32 %v12472_v60, %v5864_v3 }
 0x958   :  { %16383 = vst [vmem:[#allocation118_spill] sm:$0xff] %v12694_v54  ;;  %v5876_v11 = vmul.f32 %v12684_v63, %v12684_v63  ;;  %v5084_v25 = vadd.f32 %v5083_v34, %v4995_v43  ;;  %v5598_v46 = vadd.f32 %v5597_v7, %v12715_v49  ;;  %v5841_v14 = vmul.f32 %v12715_v49, %v12715_v49  ;;  %v5172_v13 = vpop.f32.mrf.mxu2 }
 0x959   :  { %16386 = vst [vmem:[#allocation228_spill] sm:$0xff] %v12701_v61  ;;  %v5882_v58 = vmul.f32 %v12694_v54, %v12694_v54  ;;  %v12742_v5 = vmax.f32 %v16392_v33, 0.0  ;;  %v12746_v60 = vadd.f32 %v12482_v2, %v12668_v15  ;;  %v12749_v3 = vadd.f32 %v12485_v53, %v5870_v51  ;;  %v16394_v2 = vld [vmem:[#allocation107_spill] sm:$0xff] }
 0x95a   :  { %16388 = vst [vmem:[#allocation12_spill] sm:$0xff] %v12713_v8  ;;  %v5888_v34 = vmul.f32 %v12701_v61, %v12701_v61  ;;  %v5173_v7 = vadd.f32 %v5172_v13, %v5084_v25  ;;  %v5261_v43 = vpop.f32.mrf.mxu3  ;;  %5599 = vadd.xlane.f32.xlu2 %v5598_v46  ;;  %v4997_v17 = vpop.f32.mrf.mxu0  ;;  %v6046_v27 = vadd.f32 %v6045_v42, %v5841_v14  ;;  %v12760_v15 = vmax.f32 %v16394_v2, 0.0 }
 0x95b   :  { %16389 = vst [vmem:[#allocation13_spill] sm:$0xff] %v12715_v49  ;;  %v12755_v33 = vadd.f32 %v12495_v6, %v12684_v63  ;;  %v5894_v30 = vmul.f32 %v12713_v8, %v12713_v8  ;;  %v12763_v51 = vadd.f32 %v12498_v18, %v5876_v11  ;;  %v12767_v25 = vadd.f32 %v12522_v50, %v12694_v54  ;;  %v16396_v6 = vld [vmem:[#allocation14_spill] sm:$0xff]  ;;  %v16397_v18 = vld [vmem:[#allocation79_spill] sm:$0xff]  ;;  %v16399_v63 = vld [vmem:[#allocation237_spill] sm:$0xff]  ;;  %v5502_v54 = vpop.xlane.xlu0 %5501 }
 0x95c   :  { %16391 = vst [vmem:[#allocation16_spill] sm:$0xff] %v12725_v38  ;;  %v5086_v53 = vpop.f32.mrf.mxu1  ;;  %v5900_v42 = vmul.f32 %v12725_v38, %v12725_v38  ;;  %v5262_v46 = vadd.f32 %v5261_v43, %v5173_v7  ;;  %v4998_v14 = vadd.f32 %v4997_v17, %v16396_v6  ;;  %6047 = vadd.xlane.f32.xlu1 %v6046_v27  ;;  %v12780_v11 = vmax.f32 %v16397_v18, 0.0  ;;  %v5950_v27 = vpop.xlane.xlu2 %5949 }
 0x95d   :  { %16393 = vst [vmem:[#allocation229_spill] sm:$0xff] %v12742_v5  ;;  %v12773_v13 = vadd.f32 %v12525_v9, %v5882_v58  ;;  %v12777_v2 = vadd.f32 %v12532_v29, %v12701_v61  ;;  %v12783_v50 = vmax.f32 %v16399_v63, 0.0  ;;  %v12786_v59 = vadd.f32 %v12540_v16, %v5888_v34  ;;  %v16405_v63 = vld [vmem:[#allocation245_spill] sm:$0xff] }
 0x95e   :  { %16395 = vst [vmem:[#allocation17_spill] sm:$0xff] %v12760_v15  ;;  %v5906_v7 = vmul.f32 %v12742_v5, %v12742_v5  ;;  %v12790_v43 = vmax.f32 %v5262_v46, 0.0  ;;  %v12792_v9 = vmul.f32 0.0013020834, %v5502_v54  ;;  %v12796_v29 = vadd.f32 %v12544_v55, %v12713_v8 }
 0x95f   :  { %16398 = vst [vmem:[#allocation197_spill] sm:$0xff] %v12780_v11  ;;  %v12799_v58 = vadd.f32 %v12550_v31, %v5894_v30  ;;  %v12802_v17 = vmax.f32 %v16405_v63, 0.0  ;;  %v12806_v16 = vadd.f32 %v12559_v35, %v12725_v38  ;;  %v12809_v34 = vadd.f32 %v12562_v39, %v5900_v42 }
 0x960   :  { %16400 = vst [vmem:[#allocation40_spill] sm:$0xff] %v12783_v50  ;;  %v5912_v54 = vmul.f32 %v12760_v15, %v12760_v15  ;;  %v5087_v46 = vadd.f32 %v5086_v53, %v4998_v14  ;;  %v6168_v55 = vmul.f32 0.0013020834, %v5950_v27  ;;  %v6200_v31 = vmul.f32 %v12792_v9, %v12792_v9  ;;  %v5175_v6 = vpop.f32.mrf.mxu2 }
 0x961   :  { %16401 = vst [vmem:[#allocation20_spill] sm:$0xff] %v12786_v59  ;;  %v12817_v30 = vadd.f32 %v12572_v23, %v12742_v5  ;;  %v12820_v18 = vadd.f32 %v12583_v48, %v5906_v7  ;;  %v12824_v35 = vadd.f32 %v12596_v19, %v12760_v15  ;;  %v5918_v39 = vmul.f32 %v12780_v11, %v12780_v11  ;;  %v16412_v7 = vld [vmem:[#allocation247_spill] sm:$0xff] }
 0x962   :  { %16402 = vst [vmem:[#allocation21_spill] sm:$0xff] %v12790_v43  ;;  %v5924_v53 = vmul.f32 %v12783_v50, %v12783_v50  ;;  %v6232_v42 = vsub.f32 %v6168_v55, %v6200_v31  ;;  %v5176_v14 = vadd.f32 %v5175_v6, %v5087_v46  ;;  %v5264_v63 = vpop.f32.mrf.mxu3  ;;  %v5605_v23 = vadd.f32 %v12689_v28, %v12790_v43  ;;  %v4999_v27 = vpop.f32.mrf.mxu0  ;;  %v16416_v28 = vld [vmem:[#allocation77_spill] sm:$0xff] }
 0x963   :  { %16403 = vst [vmem:[#allocation24_spill] sm:$0xff] %v12796_v29  ;;  %v5847_v48 = vmul.f32 %v12790_v43, %v12790_v43  ;;  %v12835_v5 = vmax.f32 %v16412_v7, 0.0  ;;  %v12838_v19 = vadd.f32 %v12599_v21, %v5912_v54  ;;  %v12842_v15 = vadd.f32 %v12603_v26, %v12780_v11  ;;  %v16417_v7 = vld [vmem:[#allocation164_spill] sm:$0xff]  ;;  %v5509_v21 = vpop.xlane.xlu0 %5508 }
 0x964   :  { %16404 = vst [vmem:[#allocation68_spill] sm:$0xff] %v12799_v58  ;;  %v5930_v46 = vmul.f32 %v12802_v17, %v12802_v17  ;;  %v6264_v55 = vmax.f32 %v6232_v42, 0.0  ;;  %v5265_v31 = vadd.f32 %v5264_v63, %v5176_v14  ;;  %5606 = vadd.xlane.f32.xlu0 %v5605_v23  ;;  %v5000_v6 = vadd.f32 %v4999_v27, %v16416_v28  ;;  %v5088_v38 = vpop.f32.mrf.mxu1  ;;  %v9177_v14 = vld [vmem:[#allocation7] sm:$0x77] }
 0x965   :  { %16406 = vst [vmem:[#allocation25_spill] sm:$0xff] %v12802_v17  ;;  %v6053_v8 = vadd.f32 %v12698_v44, %v5847_v48  ;;  %v12849_v61 = vmax.f32 %v16417_v7, 0.0  ;;  %v12852_v54 = vadd.f32 %v12606_v52, %v5918_v39  ;;  %v12856_v26 = vadd.f32 %v12617_v36, %v12783_v50  ;;  %v9178_v39 = vld [vmem:[#allocation7 + $0x8] sm:$0x77] }
 0x966   :  { %16407 = vst [vmem:[#allocation70_spill] sm:$0xff] %v12806_v16  ;;  %v12859_v42 = vadd.f32 %v12624_v12, %v5924_v53  ;;  %v7032_v63 = vperm.slane %v9177_v14, 1  ;;  %v12861_v23 = vadd.f32 1e-12, %v6264_v55  ;;  %v12863_v27 = vmax.f32 %v5265_v31, 0.0 }
 0x967   :  { %16408 = vst [vmem:[#allocation71_spill] sm:$0xff] %v12809_v34  ;;  %6054 = vadd.xlane.f32.xlu2 %v6053_v8  ;;  %v12867_v44 = vadd.f32 %v12634_v20, %v12802_v17  ;;  %v7033_v52 = vperm.slane %v9177_v14, 5  ;;  %v7034_v48 = vperm.slane %v9178_v39, 1  ;;  %v7035_v28 = vperm.slane %v9178_v39, 5  ;;  %v9179_v55 = vld [vmem:[#allocation7 + $0x10] sm:$0x77] }
 0x968   :  { %16409 = vst [vmem:[#allocation121_spill] sm:$0xff] %v12817_v30  ;;  %v12870_v36 = vadd.f32 %v12637_v10, %v5930_v46  ;;  %9112 = vrsqrt.f32 %v12861_v23  ;;  %v5089_v12 = vadd.f32 %v5088_v38, %v5000_v6  ;;  %v5612_v53 = vadd.f32 %v12705_v24, %v12863_v27  ;;  %v5177_v17 = vpop.f32.mrf.mxu2  ;;  %v16441_v30 = vld [vmem:[#allocation184_spill] sm:$0xff] }
 0x969   :  { %16410 = vst [vmem:[#allocation201_spill] sm:$0xff] %v12820_v18  ;;  %v5853_v8 = vmul.f32 %v12863_v27, %v12863_v27  ;;  %v7036_v31 = vperm.slane %v9179_v55, 1  ;;  %v7037_v20 = vperm.slane %v9179_v55, 5  ;;  %v7242_v7 = vperm.slane %v9177_v14, 2 }
 0x96a   :  { %16411 = vst [vmem:[#allocation122_spill] sm:$0xff] %v12824_v35  ;;  %v12879_v50 = vmul.f32 %v12835_v5, %v12835_v5  ;;  %v12881_v10 = vperm.slane %v7032_v63, 1  ;;  %v12883_v46 = vmul.f32 0.0013020834, %v5509_v21  ;;  %v5178_v38 = vadd.f32 %v5177_v17, %v5089_v12  ;;  %v5266_v6 = vpop.f32.mrf.mxu3  ;;  %5613 = vadd.xlane.f32.xlu1 %v5612_v53  ;;  %v5002_v24 = vpop.f32.mrf.mxu0  ;;  %v16426_v63 = vld [vmem:[#allocation18_spill] sm:$0xff] }
 0x96b   :  { %16413 = vst [vmem:[#allocation230_spill] sm:$0xff] %v12835_v5  ;;  %v6060_v11 = vadd.f32 %v12708_v56, %v5853_v8  ;;  %v7243_v0 = vperm.slane %v9177_v14, 6  ;;  %v7245_v43 = vperm.slane %v9178_v39, 6  ;;  %v12888_v22 = vperm.slane %v7034_v48, 1  ;;  %v5516_v56 = vpop.xlane.xlu1 %5515 }
 0x96c   :  { %16414 = vst [vmem:[#allocation28_spill] sm:$0xff] %v12838_v19  ;;  %v12890_v49 = vperm.slane %v7035_v28, 1  ;;  %v5267_v45 = vadd.f32 %v5266_v6, %v5178_v38  ;;  %v12893_v21 = vperm.slane %v7036_v31, 1  ;;  %v12895_v17 = vperm.slane %v7037_v20, 1  ;;  %v5091_v48 = vpop.f32.mrf.mxu1 }
 0x96d   :  { %16415 = vst [vmem:[#allocation29_spill] sm:$0xff] %v12842_v15  ;;  %6061 = vadd.xlane.f32.xlu0 %v6060_v11  ;;  %v7246_v12 = vperm.slane %v9179_v55, 2  ;;  %v7247_v53 = vperm.slane %v9179_v55, 6  ;;  %v12897_v14 = vperm.slane %v7242_v7, 2  ;;  %v6201_v28 = vmul.f32 %v12883_v46, %v12883_v46 }
 0x96e   :  { %16418 = vst [vmem:[#allocation32_spill] sm:$0xff] %v12849_v61  ;;  %v9113_v8 = vpop.eup %9112  ;;  %v12903_v6 = vperm.slane %v7243_v0, 2  ;;  %v12907_v31 = vperm.slane %v7245_v43, 2  ;;  %vm6334_vm0 = vweird.f32 %v12861_v23 }
 0x96f   :  { %16419 = vst [vmem:[#allocation231_spill] sm:$0xff] %v12852_v54  ;;  %v6329_v55 = vmul.f32 %v9113_v8, %v12861_v23  ;;  %vm6335_vm1 = vweird.f32 %v9113_v8  ;;  %v16438_v23 = vld [vmem:[#allocation180_spill] sm:$0xff] }
 0x970   :  { %16420 = vst [vmem:[#allocation33_spill] sm:$0xff] %v12856_v26  ;;  %v5180_v43 = vpop.f32.mrf.mxu2  ;;  %v12920_v26 = vmul.f32 0.0013020834, %v5516_v56  ;;  %v16432_v56 = vld [vmem:[#allocation98_spill] sm:$0xff]  ;;  %vm6336_vm2 = vmor %vm6334_vm0, %vm6335_vm1  ;;  %v16458_v41 = vsub.f32 %v16438_v23, %v12883_v46 }
 0x971   :  { %16421 = vst [vmem:[#allocation204_spill] sm:$0xff] %v12859_v42  ;;  %v12916_v42 = vperm.slane %v7247_v53, 2  ;;  %v6330_v0 = vmul.f32 %v9113_v8, %v6329_v55  ;;  %v16430_v53 = vld [vmem:[#allocation179_spill] sm:$0xff]  ;;  %v16431_v55 = vld [vmem:[#allocation238_spill] sm:$0xff]  ;;  %v6652_v19 = vsub.f32 %v16432_v56, %v12792_v9 }
 0x972   :  { %16422 = vst [vmem:[#allocation69_spill] sm:$0xff] %v12863_v27  ;;  %v12886_v27 = vperm.slane %v7033_v52, 1  ;;  %v5957_v52 = vpop.xlane.xlu0 %5956  ;;  %v6651_v15 = vsub.f32 %v16431_v55, %v12792_v9  ;;  %v6202_v55 = vmul.f32 %v12920_v26, %v12920_v26 }
 0x973   :  { %16423 = vst [vmem:[#allocation36_spill] sm:$0xff] %v12867_v44  ;;  %v5003_v44 = vadd.f32 %v5002_v24, %v16426_v63  ;;  %v6169_v38 = vmul.f32 0.0013020834, %v5957_v52  ;;  %v12914_v63 = vperm.slane %v7246_v12, 2 }
 0x974   :  { %16424 = vst [vmem:[#allocation199_spill] sm:$0xff] %v12870_v36  ;;  %v7244_v36 = vperm.slane %v9178_v39, 2  ;;  %v12899_v39 = vmax.f32 %v5267_v45, 0.0  ;;  %v5093_v18 = vpop.f32.mrf.mxu1 }
 0x975   :  { %16425 = vst [vmem:[#allocation225_spill] sm:$0xff] %v12879_v50  ;;  %v5092_v20 = vadd.f32 %v5091_v48, %v5003_v44  ;;  %v6233_v24 = vsub.f32 %v6169_v38, %v6201_v28  ;;  %v5004_v48 = vpop.f32.mrf.mxu0  ;;  %v6331_v28 = vmul.f32 0.5, %v6330_v0  ;;  %v16429_v38 = vld [vmem:[#allocation145_spill] sm:$0xff] }
 0x976   :  { %16427 = vst [vmem:[#allocation84_spill] sm:$0xff] %v12899_v39  ;;  %v12905_v11 = vperm.slane %v7244_v36, 2  ;;  %v5619_v7 = vadd.f32 %v12719_v62, %v12899_v39  ;;  %v5859_v45 = vmul.f32 %v12899_v39, %v12899_v39  ;;  %v16428_v36 = vld [vmem:[#allocation87_spill] sm:$0xff]  ;;  %v6649_v12 = vsub.f32 %v16429_v38, %v12792_v9  ;;  %v16434_v0 = vld [vmem:[#allocation81_spill] sm:$0xff]  ;;  %v5964_v38 = vpop.xlane.xlu1 %5963 }
 0x977   :  { %v6648_v52 = vsub.f32 %v16428_v36, %v12792_v9  ;;  %v6265_v54 = vmax.f32 %v6233_v24, 0.0  ;;  %v5181_v44 = vadd.f32 %v5180_v43, %v5092_v20  ;;  %v6650_v39 = vsub.f32 %v16430_v53, %v12792_v9  ;;  %v5269_v36 = vpop.f32.mrf.mxu3  ;;  %v16433_v20 = vld [vmem:[#allocation253_spill] sm:$0xff] }
 0x978   :  { %5620 = vadd.xlane.f32.xlu2 %v5619_v7  ;;  %v6067_v62 = vadd.f32 %v12722_v40, %v5859_v45  ;;  %v6653_v24 = vsub.f32 %v16433_v20, %v12792_v9  ;;  %v6332_v45 = vsub.f32 1.5, %v6331_v28  ;;  %v5005_v43 = vadd.f32 %v5004_v48, %v16434_v0  ;;  %v5971_v48 = vpop.xlane.xlu2 %5970  ;;  %v16439_v20 = vld [vmem:[#allocation210_spill] sm:$0xff]  ;;  %v16440_v0 = vld [vmem:[#allocation53_spill] sm:$0xff]  ;;  %v5182_v34 = vpop.f32.mrf.mxu2 }
 0x979   :  { %v12933_v7 = vadd.f32 1e-12, %v6265_v54  ;;  %v5270_v40 = vadd.f32 %v5269_v36, %v5181_v44  ;;  %v6170_v56 = vmul.f32 0.0013020834, %v5964_v38  ;;  %v16436_v54 = vld [vmem:[#allocation88_spill] sm:$0xff]  ;;  %v16444_v28 = vld [vmem:[#allocation22_spill] sm:$0xff] }
 0x97a   :  { %6068 = vadd.xlane.f32.xlu1 %v6067_v62  ;;  %v6333_v9 = vmul.f32 %v9113_v8, %v6332_v45  ;;  %v16437_v62 = vld [vmem:[#allocation146_spill] sm:$0xff]  ;;  %v5094_v32 = vadd.f32 %v5093_v18, %v5005_v43 }
 0x97b   :  { %9114 = vrsqrt.f32 %v12933_v7  ;;  %v12938_v53 = vmax.f32 %v5270_v40, 0.0  ;;  %v6234_v38 = vsub.f32 %v6170_v56, %v6202_v55  ;;  %vm6344_vm4 = vweird.f32 %v12933_v7 }
 0x97c   :  { %v6337_v44 = vsel %vm6336_vm2, %v9113_v8, %v6333_v9  ;;  %v5183_v56 = vadd.f32 %v5182_v34, %v5094_v32 }
 0x97d   :  { %16435 = vst [vmem:[#allocation251_spill] sm:$0xff] %v12938_v53  ;;  %v5626_v45 = vadd.f32 %v12729_v57, %v12938_v53  ;;  %v5865_v36 = vmul.f32 %v12938_v53, %v12938_v53  ;;  %v6840_v16 = vmul.f32 %v6648_v52, %v6337_v44  ;;  %v6841_v58 = vmul.f32 %v6649_v12, %v6337_v44  ;;  %v5007_v9 = vpop.f32.mrf.mxu0 }
 0x97e   :  { %v6842_v40 = vmul.f32 %v6650_v39, %v6337_v44  ;;  %v6843_v29 = vmul.f32 %v6651_v15, %v6337_v44  ;;  %v6844_v35 = vmul.f32 %v6652_v19, %v6337_v44  ;;  %v6845_v37 = vmul.f32 %v6653_v24, %v6337_v44  ;;  %v16442_v19 = vld [vmem:[#allocation100_spill] sm:$0xff]  ;;  %v5523_v32 = vpop.xlane.xlu1 %5522  ;;  %v16443_v24 = vld [vmem:[#allocation147_spill] sm:$0xff] }
 0x97f   :  { %5627 = vadd.xlane.f32.xlu0 %v5626_v45  ;;  %v6266_v55 = vmax.f32 %v6234_v38, 0.0  ;;  %v7050_v57 = vmul.f32 %v12881_v10, %v6840_v16  ;;  %v7051_v8 = vmul.f32 %v12886_v27, %v6841_v58  ;;  %v5271_v38 = vpop.f32.mrf.mxu3  ;;  %v12978_v53 = vmul.f32 0.0013020834, %v5523_v32 }
 0x980   :  { %v7052_v18 = vmul.f32 %v12888_v22, %v6842_v40  ;;  %v7053_v43 = vmul.f32 %v12890_v49, %v6843_v29  ;;  %v7054_v52 = vmul.f32 %v12893_v21, %v6844_v35  ;;  %v7055_v39 = vmul.f32 %v12895_v17, %v6845_v37  ;;  %v5530_v45 = vpop.xlane.xlu2 %5529 }
 0x981   :  { %v9115_v1 = vpop.eup %9114  ;;  %v7260_v34 = vadd.f32 %v12897_v14, %v7050_v57  ;;  %v7261_v16 = vadd.f32 %v12903_v6, %v7051_v8  ;;  %v12974_v40 = vadd.f32 1e-12, %v6266_v55  ;;  %v5272_v12 = vadd.f32 %v5271_v38, %v5183_v56  ;;  %v16446_v55 = vld [vmem:[#allocation185_spill] sm:$0xff] }
 0x982   :  { %v6339_v15 = vmul.f32 %v9115_v1, %v12933_v7  ;;  %v7262_v58 = vadd.f32 %v12905_v11, %v7052_v18  ;;  %v7263_v44 = vadd.f32 %v12907_v31, %v7053_v43  ;;  %v7264_v35 = vadd.f32 %v12914_v63, %v7054_v52  ;;  %v16445_v43 = vld [vmem:[#allocation181_spill] sm:$0xff] }
 0x983   :  { %7452 = vst [vmem:[#allocation8] sm:$0xff] %v7260_v34  ;;  %v5008_v57 = vadd.f32 %v5007_v9, %v16444_v28  ;;  %v6074_v8 = vadd.f32 %v12732_v47, %v5865_v36  ;;  %v7265_v18 = vadd.f32 %v12916_v42, %v7055_v39  ;;  %9116 = vrsqrt.f32 %v12974_v40  ;;  %v16447_v9 = vld [vmem:[#allocation51_spill] sm:$0xff]  ;;  %v5096_v34 = vpop.f32.mrf.mxu1  ;;  %v16455_v39 = vld [vmem:[#allocation104_spill] sm:$0xff]  ;;  %v16463_v52 = vld [vmem:[#allocation149_spill] sm:$0xff] }
 0x984   :  { %v6340_v37 = vmul.f32 %v9115_v1, %v6339_v15  ;;  %7453 = vst [vmem:[#allocation8 + $0x8] sm:$0xff] %v7261_v16  ;;  %v6171_v56 = vmul.f32 0.0013020834, %v5971_v48  ;;  %v6203_v47 = vmul.f32 %v12978_v53, %v12978_v53  ;;  %v12988_v28 = vmul.f32 0.0013020834, %v5530_v45  ;;  %v16448_v48 = vld [vmem:[#allocation211_spill] sm:$0xff] }
 0x985   :  { %7454 = vst [vmem:[#allocation8 + $0x10] sm:$0xff] %v7262_v58  ;;  %6075 = vadd.xlane.f32.xlu2 %v6074_v8  ;;  %vm6345_vm3 = vweird.f32 %v9115_v1  ;;  %v12992_v32 = vmax.f32 %v5272_v12, 0.0  ;;  %v5097_v58 = vadd.f32 %v5096_v34, %v5008_v57  ;;  %v16450_v45 = vld [vmem:[#allocation148_spill] sm:$0xff]  ;;  %v16451_v12 = vld [vmem:[#allocation182_spill] sm:$0xff]  ;;  %v16456_v16 = vsub.f32 %v16436_v54, %v12883_v46 }
 0x986   :  { %v6341_v29 = vmul.f32 0.5, %v6340_v37  ;;  %7455 = vst [vmem:[#allocation8 + $0x18] sm:$0xff] %v7263_v44  ;;  %v6235_v37 = vsub.f32 %v6171_v56, %v6203_v47  ;;  %v16449_v44 = vld [vmem:[#allocation103_spill] sm:$0xff]  ;;  %vm6346_vm5 = vmor %vm6344_vm4, %vm6345_vm3  ;;  %v16453_v15 = vld [vmem:[#allocation64_spill] sm:$0xff]  ;;  %v6204_v56 = vmul.f32 %v12988_v28, %v12988_v28  ;;  %v5185_v47 = vpop.f32.mrf.mxu2  ;;  %v16461_v54 = vsub.f32 %v16441_v30, %v12883_v46 }
 0x987   :  { %7456 = vst [vmem:[#allocation8 + $0x20] sm:$0xff] %v7264_v35  ;;  %v16452_v35 = vld [vmem:[#allocation102_spill] sm:$0xff]  ;;  %v16454_v57 = vld [vmem:[#allocation188_spill] sm:$0xff]  ;;  %v5633_v7 = vadd.f32 %v12746_v60, %v12992_v32  ;;  %vm6354_vm6 = vweird.f32 %v12974_v40  ;;  %v5186_v23 = vadd.f32 %v5185_v47, %v5097_v58 }
 0x988   :  { %v6342_v36 = vsub.f32 1.5, %v6341_v29  ;;  %7457 = vst [vmem:[#allocation8 + $0x28] sm:$0xff] %v7265_v18  ;;  %v6267_v29 = vmax.f32 %v6235_v37, 0.0  ;;  %v16457_v18 = vsub.f32 %v16437_v62, %v12883_v46 }
 0x989   :  { %v13011_v34 = vpop.eup %9116  ;;  %5634 = vadd.xlane.f32.xlu1 %v5633_v7 }
 0x98a   :  { %v6343_v38 = vmul.f32 %v9115_v1, %v6342_v36  ;;  %v5009_v36 = vpop.f32.mrf.mxu0  ;;  %v6349_v62 = vmul.f32 %v13011_v34, %v12974_v40  ;;  %vm6355_vm7 = vweird.f32 %v13011_v34  ;;  %v16469_v40 = vld [vmem:[#allocation26_spill] sm:$0xff] }
 0x98b   :  { %vm6356_vm8 = vmor %vm6354_vm6, %vm6355_vm7 }
 0x98c   :  { %v6347_v8 = vsel %vm6346_vm5, %v9115_v1, %v6343_v38  ;;  %v16459_v1 = vsub.f32 %v16439_v20, %v12883_v46  ;;  %v16460_v38 = vsub.f32 %v16440_v0, %v12883_v46  ;;  %v6350_v46 = vmul.f32 %v13011_v34, %v6349_v62  ;;  %v16462_v62 = vld [vmem:[#allocation82_spill] sm:$0xff] }
 0x98d   :  { %v6846_v4 = vmul.f32 %v16456_v16, %v6347_v8  ;;  %v6847_v50 = vmul.f32 %v16457_v18, %v6347_v8  ;;  %v6848_v5 = vmul.f32 %v16458_v41, %v6347_v8  ;;  %v6851_v16 = vmul.f32 %v16461_v54, %v6347_v8  ;;  %v5978_v18 = vpop.xlane.xlu0 %5977 }
 0x98e   :  { %v6849_v37 = vmul.f32 %v16459_v1, %v6347_v8  ;;  %v6850_v60 = vmul.f32 %v16460_v38, %v6347_v8  ;;  %v13045_v8 = vadd.f32 1e-12, %v6267_v29  ;;  %v6172_v7 = vmul.f32 0.0013020834, %v5978_v18 }
 0x98f   :  { %v7056_v41 = vmul.f32 %v12881_v10, %v6846_v4  ;;  %v7057_v20 = vmul.f32 %v12886_v27, %v6847_v50  ;;  %v7058_v1 = vmul.f32 %v12888_v22, %v6848_v5  ;;  %v7061_v30 = vmul.f32 %v12895_v17, %v6851_v16  ;;  %v5537_v50 = vpop.xlane.xlu2 %5536 }
 0x990   :  { %v7059_v0 = vmul.f32 %v12890_v49, %v6849_v37  ;;  %v7060_v38 = vmul.f32 %v12893_v21, %v6850_v60  ;;  %v6351_v47 = vmul.f32 0.5, %v6350_v46  ;;  %9118 = vrsqrt.f32 %v13045_v8  ;;  %v5274_v37 = vpop.f32.mrf.mxu3 }
 0x991   :  { %v7266_v54 = vadd.f32 %v12897_v14, %v7056_v41  ;;  %v7267_v58 = vadd.f32 %v12903_v6, %v7057_v20  ;;  %v7268_v4 = vadd.f32 %v12905_v11, %v7058_v1  ;;  %v6236_v29 = vsub.f32 %v6172_v7, %v6204_v56  ;;  %v16466_v7 = vld [vmem:[#allocation173_spill] sm:$0xff] }
 0x992   :  { %v7269_v5 = vadd.f32 %v12907_v31, %v7059_v0  ;;  %v7270_v60 = vadd.f32 %v12914_v63, %v7060_v38  ;;  %v5275_v16 = vadd.f32 %v5274_v37, %v5186_v23  ;;  %v5010_v41 = vadd.f32 %v5009_v36, %v16462_v62  ;;  %v5985_v0 = vpop.xlane.xlu1 %5984  ;;  %v16464_v38 = vld [vmem:[#allocation183_spill] sm:$0xff] }
 0x993   :  { %7458 = vst [vmem:[#allocation8 + $0x30] sm:$0xff] %v7266_v54  ;;  %v7271_v20 = vadd.f32 %v12916_v42, %v7061_v30  ;;  %v6352_v18 = vsub.f32 1.5, %v6351_v47  ;;  %v5871_v1 = vmul.f32 %v12992_v32, %v12992_v32  ;;  %v13058_v46 = vmul.f32 0.0013020834, %v5537_v50  ;;  %v16465_v23 = vld [vmem:[#allocation187_spill] sm:$0xff]  ;;  %v5012_v30 = vpop.f32.mrf.mxu0  ;;  %v5098_v50 = vpop.f32.mrf.mxu1 }
 0x994   :  { %7459 = vst [vmem:[#allocation8 + $0x38] sm:$0xff] %v7267_v58  ;;  %v6268_v54 = vmax.f32 %v6236_v29, 0.0  ;;  %v16467_v29 = vld [vmem:[#allocation191_spill] sm:$0xff]  ;;  %v13078_v62 = vmax.f32 %v5275_v16, 0.0  ;;  %v6173_v36 = vmul.f32 0.0013020834, %v5985_v0  ;;  %v5013_v59 = vadd.f32 %v5012_v30, %v16469_v40 }
 0x995   :  { %7460 = vst [vmem:[#allocation8 + $0x40] sm:$0xff] %v7268_v4  ;;  %v6353_v58 = vmul.f32 %v13011_v34, %v6352_v18  ;;  %v6081_v4 = vadd.f32 %v12749_v3, %v5871_v1  ;;  %v6205_v37 = vmul.f32 %v13058_v46, %v13058_v46  ;;  %v5099_v18 = vadd.f32 %v5098_v50, %v5010_v41 }
 0x996   :  { %7461 = vst [vmem:[#allocation8 + $0x48] sm:$0xff] %v7269_v5  ;;  %v13080_v47 = vpop.eup %9118  ;;  %v13083_v1 = vadd.f32 1e-12, %v6268_v54  ;;  %v16470_v5 = vsub.f32 %v16442_v19, %v12920_v26  ;;  %v16471_v41 = vsub.f32 %v16443_v24, %v12920_v26  ;;  %v16473_v54 = vsub.f32 %v16446_v55, %v12920_v26 }
 0x997   :  { %7462 = vst [vmem:[#allocation8 + $0x50] sm:$0xff] %v7270_v60  ;;  %v6357_v3 = vsel %vm6356_vm8, %v13011_v34, %v6353_v58  ;;  %6082 = vadd.xlane.f32.xlu0 %v6081_v4  ;;  %v16468_v60 = vld [vmem:[#allocation34_spill] sm:$0xff]  ;;  %v16474_v50 = vsub.f32 %v16447_v9, %v12920_v26  ;;  %v16475_v19 = vsub.f32 %v16448_v48, %v12920_v26  ;;  %vm6364_vm9 = vweird.f32 %v13045_v8 }
 0x998   :  { %7463 = vst [vmem:[#allocation8 + $0x58] sm:$0xff] %v7271_v20  ;;  %v6852_v16 = vmul.f32 %v16470_v5, %v6357_v3  ;;  %v6853_v0 = vmul.f32 %v16471_v41, %v6357_v3  ;;  %v16472_v20 = vsub.f32 %v16445_v43, %v12920_v26  ;;  %v6855_v58 = vmul.f32 %v16473_v54, %v6357_v3  ;;  %v5544_v43 = vpop.xlane.xlu0 %5543 }
 0x999   :  { %v6856_v30 = vmul.f32 %v16474_v50, %v6357_v3  ;;  %v6857_v4 = vmul.f32 %v16475_v19, %v6357_v3  ;;  %v6359_v24 = vmul.f32 %v13080_v47, %v13045_v8  ;;  %v6237_v5 = vsub.f32 %v6173_v36, %v6205_v37  ;;  %v16476_v50 = vld [vmem:[#allocation150_spill] sm:$0xff] }
 0x99a   :  { %v6854_v34 = vmul.f32 %v16472_v20, %v6357_v3  ;;  %v7062_v40 = vmul.f32 %v12881_v10, %v6852_v16  ;;  %v7063_v55 = vmul.f32 %v12886_v27, %v6853_v0  ;;  %v7065_v9 = vmul.f32 %v12890_v49, %v6855_v58  ;;  %v5187_v3 = vpop.f32.mrf.mxu2 }
 0x99b   :  { %v7066_v20 = vmul.f32 %v12893_v21, %v6856_v30  ;;  %v7067_v26 = vmul.f32 %v12895_v17, %v6857_v4  ;;  %v6360_v48 = vmul.f32 %v13080_v47, %v6359_v24  ;;  %9120 = vrsqrt.f32 %v13083_v1  ;;  %v16477_v30 = vld [vmem:[#allocation243_spill] sm:$0xff] }
 0x99c   :  { %v7064_v41 = vmul.f32 %v12888_v22, %v6854_v34  ;;  %v7272_v36 = vadd.f32 %v12897_v14, %v7062_v40  ;;  %v7273_v37 = vadd.f32 %v12903_v6, %v7063_v55  ;;  %v13120_v0 = vmul.f32 0.0013020834, %v5544_v43  ;;  %v5992_v34 = vpop.xlane.xlu2 %5991 }
 0x99d   :  { %v7275_v54 = vadd.f32 %v12907_v31, %v7065_v9  ;;  %v6361_v58 = vmul.f32 0.5, %v6360_v48  ;;  %vm6365_vm10 = vweird.f32 %v13080_v47  ;;  %v7276_v19 = vadd.f32 %v12914_v63, %v7066_v20 }
 0x99e   :  { %v7274_v16 = vadd.f32 %v12905_v11, %v7064_v41  ;;  %7464 = vst [vmem:[#allocation8 + $0x60] sm:$0xff] %v7272_v36  ;;  %v6269_v4 = vmax.f32 %v6237_v5, 0.0  ;;  %v5188_v24 = vadd.f32 %v5187_v3, %v5099_v18  ;;  %v5640_v40 = vadd.f32 %v12755_v33, %v13078_v62  ;;  %v16478_v5 = vld [vmem:[#allocation54_spill] sm:$0xff]  ;;  %v16479_v36 = vld [vmem:[#allocation105_spill] sm:$0xff]  ;;  %vm6366_vm11 = vmor %vm6364_vm9, %vm6365_vm10 }
 0x99f   :  { %v7277_v43 = vadd.f32 %v12916_v42, %v7067_v26  ;;  %7465 = vst [vmem:[#allocation8 + $0x68] sm:$0xff] %v7273_v37  ;;  %v6362_v55 = vsub.f32 1.5, %v6361_v58  ;;  %v5877_v41 = vmul.f32 %v13078_v62, %v13078_v62  ;;  %v6174_v9 = vmul.f32 0.0013020834, %v5992_v34  ;;  %v5276_v58 = vpop.f32.mrf.mxu3 }
 0x9a0   :  { %7466 = vst [vmem:[#allocation8 + $0x70] sm:$0xff] %v7274_v16  ;;  %v13132_v48 = vadd.f32 1e-12, %v6269_v4  ;;  %5641 = vadd.xlane.f32.xlu2 %v5640_v40  ;;  %v6206_v33 = vmul.f32 %v13120_v0, %v13120_v0  ;;  %v16480_v16 = vld [vmem:[#allocation223_spill] sm:$0xff]  ;;  %v5101_v4 = vpop.f32.mrf.mxu1  ;;  %v5277_v40 = vadd.f32 %v5276_v58, %v5188_v24  ;;  %vm6374_vm12 = vweird.f32 %v13083_v1 }
 0x9a1   :  { %v13140_v26 = vpop.eup %9120  ;;  %7467 = vst [vmem:[#allocation8 + $0x78] sm:$0xff] %v7275_v54  ;;  %v6363_v3 = vmul.f32 %v13080_v47, %v6362_v55  ;;  %v6088_v20 = vadd.f32 %v12763_v51, %v5877_v41  ;;  %v5102_v55 = vadd.f32 %v5101_v4, %v5013_v59  ;;  %v16482_v8 = vsub.f32 %v16449_v44, %v12978_v53 }
 0x9a2   :  { %7468 = vst [vmem:[#allocation8 + $0x80] sm:$0xff] %v7276_v19  ;;  %v6369_v54 = vmul.f32 %v13140_v26, %v13083_v1  ;;  %9122 = vrsqrt.f32 %v13132_v48  ;;  %v6238_v51 = vsub.f32 %v6174_v9, %v6206_v33  ;;  %v16481_v19 = vld [vmem:[#allocation35_spill] sm:$0xff]  ;;  %v16483_v18 = vsub.f32 %v16450_v45, %v12978_v53 }
 0x9a3   :  { %7469 = vst [vmem:[#allocation8 + $0x88] sm:$0xff] %v7277_v43  ;;  %v6367_v34 = vsel %vm6366_vm11, %v13080_v47, %v6363_v3  ;;  %6089 = vadd.xlane.f32.xlu1 %v6088_v20  ;;  %v6684_v41 = vsub.f32 %v16481_v19, %v13120_v0  ;;  %v16484_v59 = vsub.f32 %v16451_v12, %v12978_v53  ;;  %vm6375_vm13 = vweird.f32 %v13140_v26 }
 0x9a4   :  { %v6858_v37 = vmul.f32 %v16482_v8, %v6367_v34  ;;  %v6859_v56 = vmul.f32 %v16483_v18, %v6367_v34  ;;  %v16485_v47 = vsub.f32 %v16452_v35, %v12978_v53  ;;  %v16486_v9 = vsub.f32 %v16453_v15, %v12978_v53  ;;  %vm6376_vm15 = vmor %vm6374_vm12, %vm6375_vm13 }
 0x9a5   :  { %v6860_v24 = vmul.f32 %v16484_v59, %v6367_v34  ;;  %v16487_v44 = vsub.f32 %v16454_v57, %v12978_v53  ;;  %v6370_v3 = vmul.f32 %v13140_v26, %v6369_v54  ;;  %v6270_v45 = vmax.f32 %v6238_v51, 0.0 }
 0x9a6   :  { %v6861_v43 = vmul.f32 %v16485_v47, %v6367_v34  ;;  %v6862_v20 = vmul.f32 %v16486_v9, %v6367_v34  ;;  %v7068_v18 = vmul.f32 %v12881_v10, %v6858_v37  ;;  %v7069_v12 = vmul.f32 %v12886_v27, %v6859_v56  ;;  %v5190_v47 = vpop.f32.mrf.mxu2  ;;  %v16488_v9 = vld [vmem:[#allocation151_spill] sm:$0xff] }
 0x9a7   :  { %v6863_v33 = vmul.f32 %v16487_v44, %v6367_v34  ;;  %v7070_v58 = vmul.f32 %v12888_v22, %v6860_v24  ;;  %v6371_v8 = vmul.f32 0.5, %v6370_v3  ;;  %v13184_v59 = vadd.f32 1e-12, %v6270_v45  ;;  %v16489_v44 = vld [vmem:[#allocation72_spill] sm:$0xff] }
 0x9a8   :  { %v7071_v35 = vmul.f32 %v12890_v49, %v6861_v43  ;;  %v7072_v4 = vmul.f32 %v12893_v21, %v6862_v20  ;;  %v9123_v53 = vpop.eup %9122  ;;  %v7278_v57 = vadd.f32 %v12897_v14, %v7068_v18  ;;  %v7279_v34 = vadd.f32 %v12903_v6, %v7069_v12  ;;  %v16490_v12 = vld [vmem:[#allocation174_spill] sm:$0xff] }
 0x9a9   :  { %v7073_v15 = vmul.f32 %v12895_v17, %v6863_v33  ;;  %v7280_v37 = vadd.f32 %v12905_v11, %v7070_v58  ;;  %v13189_v54 = vmax.f32 %v5277_v40, 0.0  ;;  %v6372_v51 = vsub.f32 1.5, %v6371_v8  ;;  %v5014_v33 = vpop.f32.mrf.mxu0 }
 0x9aa   :  { %v7281_v56 = vadd.f32 %v12907_v31, %v7071_v35  ;;  %v6379_v24 = vmul.f32 %v9123_v53, %v13132_v48  ;;  %v7282_v43 = vadd.f32 %v12914_v63, %v7072_v4  ;;  %7470 = vst [vmem:[#allocation8 + $0x90] sm:$0xff] %v7278_v57  ;;  %9124 = vrsqrt.f32 %v13184_v59 }
 0x9ab   :  { %v6685_v20 = vsub.f32 %v16488_v9, %v13120_v0  ;;  %v6686_v40 = vsub.f32 %v16489_v44, %v13120_v0  ;;  %v7283_v3 = vadd.f32 %v12916_v42, %v7073_v15  ;;  %7471 = vst [vmem:[#allocation8 + $0x98] sm:$0xff] %v7279_v34  ;;  %v6373_v45 = vmul.f32 %v13140_v26, %v6372_v51  ;;  %v5551_v15 = vpop.xlane.xlu1 %5550  ;;  %v16491_v34 = vld [vmem:[#allocation86_spill] sm:$0xff] }
 0x9ac   :  { %v6380_v18 = vmul.f32 %v9123_v53, %v6379_v24  ;;  %vm6384_vm14 = vweird.f32 %v13132_v48  ;;  %7472 = vst [vmem:[#allocation8 + $0xa0] sm:$0xff] %v7280_v37  ;;  %vm6385_vm0 = vweird.f32 %v9123_v53  ;;  %v6687_v58 = vsub.f32 %v16490_v12, %v13120_v0 }
 0x9ad   :  { %v5191_v35 = vadd.f32 %v5190_v47, %v5102_v55  ;;  %v5647_v4 = vadd.f32 %v12767_v25, %v13189_v54  ;;  %7473 = vst [vmem:[#allocation8 + $0xa8] sm:$0xff] %v7281_v56  ;;  %v6377_v8 = vsel %vm6376_vm15, %v13140_v26, %v6373_v45  ;;  %v13213_v37 = vadd.f32 %v5014_v33, %v16491_v34  ;;  %vm6386_vm1 = vmor %vm6384_vm14, %vm6385_vm0 }
 0x9ae   :  { %v6381_v57 = vmul.f32 0.5, %v6380_v18  ;;  %v13217_v1 = vmul.f32 %v13189_v54, %v13189_v54  ;;  %7474 = vst [vmem:[#allocation8 + $0xb0] sm:$0xff] %v7282_v43  ;;  %v16492_v51 = vsub.f32 %v16455_v39, %v12988_v28  ;;  %v16493_v25 = vsub.f32 %v16463_v52, %v12988_v28  ;;  %v5279_v52 = vpop.f32.mrf.mxu3 }
 0x9af   :  { %v16494_v26 = vsub.f32 %v16464_v38, %v12988_v28  ;;  %v16495_v47 = vsub.f32 %v16465_v23, %v12988_v28  ;;  %7475 = vst [vmem:[#allocation8 + $0xb8] sm:$0xff] %v7283_v3  ;;  %v16496_v43 = vsub.f32 %v16466_v7, %v12988_v28  ;;  %v16497_v39 = vsub.f32 %v16467_v29, %v12988_v28 }
 0x9b0   :  { %v6864_v55 = vmul.f32 %v16492_v51, %v6377_v8  ;;  %v6865_v24 = vmul.f32 %v16493_v25, %v6377_v8  ;;  %v6382_v34 = vsub.f32 1.5, %v6381_v57  ;;  %5648 = vadd.xlane.f32.xlu0 %v5647_v4  ;;  %v13237_v51 = vmul.f32 0.0013020834, %v5551_v15  ;;  %v13239_v38 = vpop.eup %9124 }
 0x9b1   :  { %v6866_v56 = vmul.f32 %v16494_v26, %v6377_v8  ;;  %v6867_v33 = vmul.f32 %v16495_v47, %v6377_v8  ;;  %v6868_v45 = vmul.f32 %v16496_v43, %v6377_v8  ;;  %v6869_v18 = vmul.f32 %v16497_v39, %v6377_v8 }
 0x9b2   :  { %v7074_v25 = vmul.f32 %v12881_v10, %v6864_v55  ;;  %v7075_v23 = vmul.f32 %v12886_v27, %v6865_v24  ;;  %v6383_v29 = vmul.f32 %v9123_v53, %v6382_v34  ;;  %v6389_v4 = vmul.f32 %v13239_v38, %v13184_v59 }
 0x9b3   :  { %v7076_v3 = vmul.f32 %v12888_v22, %v6866_v56  ;;  %v7077_v7 = vmul.f32 %v12890_v49, %v6867_v33  ;;  %v7078_v26 = vmul.f32 %v12893_v21, %v6868_v45  ;;  %v7079_v28 = vmul.f32 %v12895_v17, %v6869_v18 }
 0x9b4   :  { %v7284_v15 = vadd.f32 %v12897_v14, %v7074_v25  ;;  %v7285_v8 = vadd.f32 %v12903_v6, %v7075_v23  ;;  %v5280_v55 = vadd.f32 %v5279_v52, %v5191_v35  ;;  %v6387_v47 = vsel %vm6386_vm1, %v9123_v53, %v6383_v29  ;;  %v5103_v53 = vpop.f32.mrf.mxu1 }
 0x9b5   :  { %v7286_v57 = vadd.f32 %v12905_v11, %v7076_v3  ;;  %v7287_v24 = vadd.f32 %v12907_v31, %v7077_v7  ;;  %v7288_v56 = vadd.f32 %v12914_v63, %v7078_v26  ;;  %v6390_v33 = vmul.f32 %v13239_v38, %v6389_v4  ;;  %v5192_v26 = vpop.f32.mrf.mxu2  ;;  %v5999_v4 = vpop.xlane.xlu0 %5998 }
 0x9b6   :  { %7476 = vst [vmem:[#allocation8 + $0xc0] sm:$0xff] %v7284_v15  ;;  %v16498_v43 = vsub.f32 %v16468_v60, %v13058_v46  ;;  %v16499_v39 = vsub.f32 %v16476_v50, %v13058_v46  ;;  %v16500_v48 = vsub.f32 %v16477_v30, %v13058_v46  ;;  %v16501_v34 = vsub.f32 %v16478_v5, %v13058_v46 }
 0x9b7   :  { %v7289_v25 = vadd.f32 %v12916_v42, %v7079_v28  ;;  %7477 = vst [vmem:[#allocation8 + $0xc8] sm:$0xff] %v7285_v8  ;;  %v16502_v60 = vsub.f32 %v16479_v36, %v13058_v46  ;;  %v16503_v50 = vsub.f32 %v16480_v16, %v13058_v46  ;;  %v6391_v7 = vmul.f32 0.5, %v6390_v33 }
 0x9b8   :  { %v6870_v45 = vmul.f32 %v16498_v43, %v6387_v47  ;;  %v6871_v18 = vmul.f32 %v16499_v39, %v6387_v47  ;;  %v6872_v35 = vmul.f32 %v16500_v48, %v6387_v47  ;;  %v6873_v52 = vmul.f32 %v16501_v34, %v6387_v47  ;;  %7478 = vst [vmem:[#allocation8 + $0xd0] sm:$0xff] %v7286_v57  ;;  %v5281_v39 = vpop.f32.mrf.mxu3  ;;  %v16505_v48 = vld [vmem:[#allocation175_spill] sm:$0xff] }
 0x9b9   :  { %v6874_v23 = vmul.f32 %v16502_v60, %v6387_v47  ;;  %v6875_v3 = vmul.f32 %v16503_v50, %v6387_v47  ;;  %7479 = vst [vmem:[#allocation8 + $0xd8] sm:$0xff] %v7287_v24  ;;  %v6392_v8 = vsub.f32 1.5, %v6391_v7  ;;  %vm6395_vm2 = vweird.f32 %v13239_v38  ;;  %v5017_v47 = vpop.f32.mrf.mxu0 }
 0x9ba   :  { %v7080_v30 = vmul.f32 %v12881_v10, %v6870_v45  ;;  %v7081_v5 = vmul.f32 %v12886_v27, %v6871_v18  ;;  %v7082_v29 = vmul.f32 %v12888_v22, %v6872_v35  ;;  %v7083_v28 = vmul.f32 %v12890_v49, %v6873_v52  ;;  %7480 = vst [vmem:[#allocation8 + $0xe0] sm:$0xff] %v7288_v56  ;;  %v16504_v18 = vld [vmem:[#allocation194_spill] sm:$0xff]  ;;  %v5558_v52 = vpop.xlane.xlu2 %5557 }
 0x9bb   :  { %v7084_v36 = vmul.f32 %v12893_v21, %v6874_v23  ;;  %v7085_v15 = vmul.f32 %v12895_v17, %v6875_v3  ;;  %vm6394_vm3 = vweird.f32 %v13184_v59  ;;  %7481 = vst [vmem:[#allocation8 + $0xe8] sm:$0xff] %v7289_v25  ;;  %v6393_v33 = vmul.f32 %v13239_v38, %v6392_v8 }
 0x9bc   :  { %v7290_v46 = vadd.f32 %v12897_v14, %v7080_v30  ;;  %v7291_v16 = vadd.f32 %v12903_v6, %v7081_v5  ;;  %v7292_v57 = vadd.f32 %v12905_v11, %v7082_v29  ;;  %v7293_v24 = vadd.f32 %v12907_v31, %v7083_v28  ;;  %vm6396_vm4 = vmor %vm6394_vm3, %vm6395_vm2  ;;  %v5106_v44 = vpop.f32.mrf.mxu1  ;;  %v6006_v30 = vpop.xlane.xlu1 %6005 }
 0x9bd   :  { %v6095_v43 = vadd.f32 %v12773_v13, %v13217_v1  ;;  %v6175_v45 = vmul.f32 0.0013020834, %v5999_v4  ;;  %v7294_v56 = vadd.f32 %v12914_v63, %v7084_v36  ;;  %v6688_v59 = vsub.f32 %v16504_v18, %v13120_v0  ;;  %v5195_v5 = vpop.f32.mrf.mxu2 }
 0x9be   :  { %7482 = vst [vmem:[#allocation8 + $0xf0] sm:$0xff] %v7290_v46  ;;  %v6689_v35 = vsub.f32 %v16505_v48, %v13120_v0  ;;  %v6207_v34 = vmul.f32 %v13237_v51, %v13237_v51  ;;  %v7295_v13 = vadd.f32 %v12916_v42, %v7085_v15  ;;  %v6397_v1 = vsel %vm6396_vm4, %v13239_v38, %v6393_v33 }
 0x9bf   :  { %7483 = vst [vmem:[#allocation8 + $0xf8] sm:$0xff] %v7291_v16  ;;  %v13303_v25 = vmax.f32 %v5280_v55, 0.0  ;;  %v5104_v60 = vadd.f32 %v5103_v53, %v13213_v37  ;;  %6096 = vadd.xlane.f32.xlu2 %v6095_v43  ;;  %v6876_v23 = vmul.f32 %v6684_v41, %v6397_v1  ;;  %v6877_v50 = vmul.f32 %v6685_v20, %v6397_v1 }
 0x9c0   :  { %7484 = vst [vmem:[#allocation8 + $0x100] sm:$0xff] %v7292_v57  ;;  %v6878_v3 = vmul.f32 %v6686_v40, %v6397_v1  ;;  %v6879_v38 = vmul.f32 %v6687_v58, %v6397_v1  ;;  %v6880_v37 = vmul.f32 %v6688_v59, %v6397_v1  ;;  %v6881_v55 = vmul.f32 %v6689_v35, %v6397_v1  ;;  %v5565_v57 = vpop.xlane.xlu0 %5564  ;;  %v5284_v48 = vpop.f32.mrf.mxu3  ;;  %v16511_v1 = vld [vmem:[#allocation242_spill] sm:$0xff] }
 0x9c1   :  { %16506 = vst [vmem:[#allocation232_spill] sm:$0xff] %v13303_v25  ;;  %v6239_v53 = vsub.f32 %v6175_v45, %v6207_v34  ;;  %v13318_v7 = vmul.f32 0.0013020834, %v5558_v52  ;;  %v7086_v19 = vmul.f32 %v12881_v10, %v6876_v23  ;;  %v7087_v41 = vmul.f32 %v12886_v27, %v6877_v50  ;;  %v16512_v50 = vld [vmem:[#allocation225_spill] sm:$0xff] }
 0x9c2   :  { %7485 = vst [vmem:[#allocation8 + $0x108] sm:$0xff] %v7293_v24  ;;  %v7088_v9 = vmul.f32 %v12888_v22, %v6878_v3  ;;  %v7089_v20 = vmul.f32 %v12890_v49, %v6879_v38  ;;  %v7090_v0 = vmul.f32 %v12893_v21, %v6880_v37  ;;  %v7091_v40 = vmul.f32 %v12895_v17, %v6881_v55  ;;  %v16507_v24 = vld [vmem:[#allocation30_spill] sm:$0xff]  ;;  %v6013_v35 = vpop.xlane.xlu2 %6012  ;;  %v16513_v3 = vld [vmem:[#allocation193_spill] sm:$0xff]  ;;  %v16514_v37 = vld [vmem:[#allocation67_spill] sm:$0xff] }
 0x9c3   :  { %7486 = vst [vmem:[#allocation8 + $0x110] sm:$0xff] %v7294_v56  ;;  %v6271_v12 = vmax.f32 %v6239_v53, 0.0  ;;  %v5193_v58 = vadd.f32 %v5192_v26, %v5104_v60  ;;  %v7296_v29 = vadd.f32 %v12897_v14, %v7086_v19  ;;  %v7297_v28 = vadd.f32 %v12903_v6, %v7087_v41  ;;  %v5019_v56 = vpop.f32.mrf.mxu0  ;;  %v16515_v53 = vld [vmem:[#allocation117_spill] sm:$0xff]  ;;  %v16516_v41 = vld [vmem:[#allocation91_spill] sm:$0xff] }
 0x9c4   :  { %7487 = vst [vmem:[#allocation8 + $0x118] sm:$0xff] %v7295_v13  ;;  %v7298_v4 = vadd.f32 %v12905_v11, %v7088_v9  ;;  %v5942_v36 = vmul.f32 %v12849_v61, %v12849_v61  ;;  %v7299_v15 = vadd.f32 %v12907_v31, %v7089_v20  ;;  %v7300_v8 = vadd.f32 %v12914_v63, %v7090_v0  ;;  %v16510_v13 = vld [vmem:[#allocation230_spill] sm:$0xff]  ;;  %v16517_v20 = vld [vmem:[#allocation152_spill] sm:$0xff] }
 0x9c5   :  { %v13333_v46 = vadd.f32 1e-12, %v6271_v12  ;;  %v5282_v16 = vadd.f32 %v5281_v39, %v5193_v58  ;;  %7488 = vst [vmem:[#allocation8 + $0x120] sm:$0xff] %v7296_v29  ;;  %v5654_v26 = vadd.f32 %v12777_v2, %v13303_v25  ;;  %v5018_v33 = vadd.f32 %v5017_v47, %v16507_v24  ;;  %v16509_v47 = vld [vmem:[#allocation20_spill] sm:$0xff]  ;;  %v16519_v29 = vld [vmem:[#allocation99_spill] sm:$0xff] }
 0x9c6   :  { %v5889_v43 = vmul.f32 %v13303_v25, %v13303_v25  ;;  %v6176_v45 = vmul.f32 0.0013020834, %v6006_v30  ;;  %v7301_v18 = vadd.f32 %v12916_v42, %v7091_v40  ;;  %7489 = vst [vmem:[#allocation8 + $0x128] sm:$0xff] %v7297_v28  ;;  %v6208_v39 = vmul.f32 %v13318_v7, %v13318_v7  ;;  %v16518_v58 = vld [vmem:[#allocation24_spill] sm:$0xff] }
 0x9c7   :  { %9126 = vrsqrt.f32 %v13333_v46  ;;  %v13342_v59 = vmax.f32 %v5282_v16, 0.0  ;;  %7490 = vst [vmem:[#allocation8 + $0x130] sm:$0xff] %v7298_v4  ;;  %5655 = vadd.xlane.f32.xlu1 %v5654_v26  ;;  %v5107_v2 = vadd.f32 %v5106_v44, %v5018_v33  ;;  %v13347_v52 = vmul.f32 0.0013020834, %v5565_v57  ;;  %v5108_v26 = vpop.f32.mrf.mxu1  ;;  %v16522_v33 = vld [vmem:[#allocation198_spill] sm:$0xff] }
 0x9c8   :  { %v6102_v34 = vadd.f32 %v16509_v47, %v5889_v43  ;;  %v13351_v60 = vadd.f32 %v16511_v1, %v16510_v13  ;;  %7491 = vst [vmem:[#allocation8 + $0x138] sm:$0xff] %v7299_v15  ;;  %v6240_v23 = vsub.f32 %v6176_v45, %v6208_v39  ;;  %v13355_v38 = vadd.f32 %v16513_v3, %v16512_v50  ;;  %v16523_v45 = vld [vmem:[#allocation110_spill] sm:$0xff]  ;;  %v16524_v39 = vld [vmem:[#allocation68_spill] sm:$0xff] }
 0x9c9   :  { %16508 = vst [vmem:[#allocation200_spill] sm:$0xff] %v13342_v59  ;;  %v13359_v55 = vadd.f32 %v16514_v37, %v12849_v61  ;;  %v13362_v19 = vadd.f32 %v16515_v53, %v5942_v36  ;;  %v5196_v0 = vadd.f32 %v5195_v5, %v5107_v2  ;;  %v6177_v40 = vmul.f32 0.0013020834, %v6013_v35  ;;  %v16520_v36 = vld [vmem:[#allocation50_spill] sm:$0xff]  ;;  %v5197_v2 = vpop.f32.mrf.mxu2  ;;  %v16526_v50 = vld [vmem:[#allocation108_spill] sm:$0xff]  ;;  %v16527_v37 = vld [vmem:[#allocation153_spill] sm:$0xff] }
 0x9ca   :  { %7492 = vst [vmem:[#allocation8 + $0x140] sm:$0xff] %v7300_v8  ;;  %6103 = vadd.xlane.f32.xlu0 %v6102_v34  ;;  %v6272_v12 = vmax.f32 %v6240_v23, 0.0  ;;  %v5661_v30 = vadd.f32 %v16518_v58, %v13342_v59  ;;  %v5020_v28 = vadd.f32 %v5019_v56, %v16519_v29  ;;  %v5895_v4 = vmul.f32 %v13342_v59, %v13342_v59  ;;  %v16521_v8 = vld [vmem:[#allocation196_spill] sm:$0xff]  ;;  %v5572_v23 = vpop.xlane.xlu1 %5571 }
 0x9cb   :  { %7493 = vst [vmem:[#allocation8 + $0x148] sm:$0xff] %v7301_v18  ;;  %v5285_v57 = vadd.f32 %v5284_v48, %v5196_v0  ;;  %v6209_v5 = vmul.f32 %v13347_v52, %v13347_v52  ;;  %vm6404_vm5 = vweird.f32 %v13333_v46  ;;  %v13403_v53 = vmul.f32 0.0013020834, %v5572_v23  ;;  %v16531_v58 = vld [vmem:[#allocation248_spill] sm:$0xff] }
 0x9cc   :  { %v13383_v18 = vadd.f32 1e-12, %v6272_v12  ;;  %5662 = vadd.xlane.f32.xlu2 %v5661_v30  ;;  %v6109_v35 = vadd.f32 %v16524_v39, %v5895_v4  ;;  %v5109_v34 = vadd.f32 %v5108_v26, %v5020_v28  ;;  %v16528_v12 = vld [vmem:[#allocation101_spill] sm:$0xff]  ;;  %v5022_v28 = vpop.f32.mrf.mxu0  ;;  %v5286_v26 = vpop.f32.mrf.mxu3  ;;  %v16542_v44 = vsub.f32 %v16516_v41, %v13237_v51 }
 0x9cd   :  { %v9127_v24 = vpop.eup %9126  ;;  %v13387_v48 = vmax.f32 %v5285_v57, 0.0  ;;  %v6241_v1 = vsub.f32 %v6177_v40, %v6209_v5  ;;  %v6020_v40 = vpop.xlane.xlu0 %6019  ;;  %v16529_v4 = vld [vmem:[#allocation109_spill] sm:$0xff]  ;;  %v16530_v5 = vld [vmem:[#allocation70_spill] sm:$0xff]  ;;  %v16533_v57 = vld [vmem:[#allocation71_spill] sm:$0xff] }
 0x9ce   :  { %v6399_v47 = vmul.f32 %v9127_v24, %v13333_v46  ;;  %9128 = vrsqrt.f32 %v13383_v18  ;;  %v5198_v29 = vadd.f32 %v5197_v2, %v5109_v34  ;;  %v16532_v34 = vld [vmem:[#allocation48_spill] sm:$0xff]  ;;  %v6178_v16 = vmul.f32 0.0013020834, %v6020_v40 }
 0x9cf   :  { %16525 = vst [vmem:[#allocation41_spill] sm:$0xff] %v13387_v48  ;;  %6110 = vadd.xlane.f32.xlu1 %v6109_v35  ;;  %v6273_v30 = vmax.f32 %v6241_v1, 0.0  ;;  %v5668_v39 = vadd.f32 %v16530_v5, %v13387_v48  ;;  %v5901_v3 = vmul.f32 %v13387_v48, %v13387_v48  ;;  %v5023_v56 = vadd.f32 %v5022_v28, %v16532_v34  ;;  %v16536_v28 = vld [vmem:[#allocation154_spill] sm:$0xff]  ;;  %v16539_v35 = vld [vmem:[#allocation203_spill] sm:$0xff]  ;;  %v5111_v9 = vpop.f32.mrf.mxu1 }
 0x9d0   :  { %v6400_v0 = vmul.f32 %v9127_v24, %v6399_v47  ;;  %v5287_v2 = vadd.f32 %v5286_v26, %v5198_v29  ;;  %v6210_v5 = vmul.f32 %v13403_v53, %v13403_v53  ;;  %vm6405_vm6 = vweird.f32 %v9127_v24  ;;  %v16535_v29 = vld [vmem:[#allocation111_spill] sm:$0xff]  ;;  %v16541_v26 = vld [vmem:[#allocation121_spill] sm:$0xff] }
 0x9d1   :  { %v13407_v1 = vadd.f32 1e-12, %v6273_v30  ;;  %v6116_v43 = vadd.f32 %v16533_v57, %v5901_v3  ;;  %v16534_v30 = vld [vmem:[#allocation235_spill] sm:$0xff]  ;;  %v16537_v57 = vld [vmem:[#allocation172_spill] sm:$0xff]  ;;  %vm6414_vm7 = vweird.f32 %v13383_v18  ;;  %vm6406_vm8 = vmor %vm6404_vm5, %vm6405_vm6  ;;  %v16543_v46 = vsub.f32 %v16517_v20, %v13237_v51 }
 0x9d2   :  { %v6401_v47 = vmul.f32 0.5, %v6400_v0  ;;  %5669 = vadd.xlane.f32.xlu0 %v5668_v39  ;;  %v13414_v23 = vmax.f32 %v5287_v2, 0.0  ;;  %v16538_v2 = vld [vmem:[#allocation216_spill] sm:$0xff]  ;;  %v16540_v3 = vld [vmem:[#allocation178_spill] sm:$0xff] }
 0x9d3   :  { %9130 = vrsqrt.f32 %v13407_v1  ;;  %v6707_v39 = vsub.f32 %v16540_v3, %v13347_v52  ;;  %vm6424_vm10 = vweird.f32 %v13407_v1  ;;  %v16561_v3 = vld [vmem:[#allocation112_spill] sm:$0xff] }
 0x9d4   :  { %v6402_v15 = vsub.f32 1.5, %v6401_v47  ;;  %v9129_v0 = vpop.eup %9128  ;;  %6117 = vadd.xlane.f32.xlu2 %v6116_v43  ;;  %v5112_v43 = vadd.f32 %v5111_v9, %v5023_v56  ;;  %v5675_v61 = vadd.f32 %v16541_v26, %v13414_v23  ;;  %v5907_v34 = vmul.f32 %v13414_v23, %v13414_v23 }
 0x9d5   :  { %v6409_v47 = vmul.f32 %v9129_v0, %v13383_v18  ;;  %vm6415_vm9 = vweird.f32 %v9129_v0  ;;  %v16544_v9 = vsub.f32 %v16520_v36, %v13237_v51  ;;  %v16546_v26 = vsub.f32 %v16522_v33, %v13237_v51 }
 0x9d6   :  { %v6403_v40 = vmul.f32 %v9127_v24, %v6402_v15  ;;  %v6242_v15 = vsub.f32 %v6178_v16, %v6210_v5  ;;  %vm6416_vm11 = vmor %vm6414_vm7, %vm6415_vm9  ;;  %v16551_v18 = vsub.f32 %v16527_v37, %v13318_v7 }
 0x9d7   :  { %v6410_v48 = vmul.f32 %v9129_v0, %v6409_v47  ;;  %5676 = vadd.xlane.f32.xlu1 %v5675_v61 }
 0x9d8   :  { %v6407_v13 = vsel %vm6406_vm8, %v9127_v24, %v6403_v40  ;;  %v16545_v24 = vsub.f32 %v16521_v8, %v13237_v51  ;;  %v6274_v47 = vmax.f32 %v6242_v15, 0.0 }
 0x9d9   :  { %v6882_v59 = vmul.f32 %v16542_v44, %v6407_v13  ;;  %v6883_v25 = vmul.f32 %v16543_v46, %v6407_v13  ;;  %v6884_v16 = vmul.f32 %v16544_v9, %v6407_v13  ;;  %v13451_v5 = vpop.eup %9130  ;;  %v6886_v41 = vmul.f32 %v16546_v26, %v6407_v13  ;;  %v5200_v9 = vpop.f32.mrf.mxu2 }
 0x9da   :  { %v6885_v56 = vmul.f32 %v16545_v24, %v6407_v13  ;;  %v16547_v44 = vsub.f32 %v16523_v45, %v13237_v51  ;;  %v6411_v40 = vmul.f32 0.5, %v6410_v48  ;;  %v6419_v51 = vmul.f32 %v13451_v5, %v13407_v1 }
 0x9db   :  { %v7092_v36 = vmul.f32 %v12881_v10, %v6882_v59  ;;  %v7093_v46 = vmul.f32 %v12886_v27, %v6883_v25  ;;  %v7094_v8 = vmul.f32 %v12888_v22, %v6884_v16  ;;  %v7096_v24 = vmul.f32 %v12893_v21, %v6886_v41 }
 0x9dc   :  { %v6887_v20 = vmul.f32 %v16547_v44, %v6407_v13  ;;  %v7095_v61 = vmul.f32 %v12890_v49, %v6885_v56  ;;  %v6412_v26 = vsub.f32 1.5, %v6411_v40  ;;  %v5024_v13 = vpop.f32.mrf.mxu0  ;;  %v6420_v16 = vmul.f32 %v13451_v5, %v6419_v51  ;;  %v16548_v40 = vld [vmem:[#allocation236_spill] sm:$0xff] }
 0x9dd   :  { %v7302_v45 = vadd.f32 %v12897_v14, %v7092_v36  ;;  %v7303_v59 = vadd.f32 %v12903_v6, %v7093_v46  ;;  %v7304_v25 = vadd.f32 %v12905_v11, %v7094_v8  ;;  %v5201_v56 = vadd.f32 %v5200_v9, %v5112_v43  ;;  %v16549_v43 = vld [vmem:[#allocation201_spill] sm:$0xff] }
 0x9de   :  { %v7097_v33 = vmul.f32 %v12895_v17, %v6887_v20  ;;  %v7305_v48 = vadd.f32 %v12907_v31, %v7095_v61  ;;  %v6413_v15 = vmul.f32 %v9129_v0, %v6412_v26  ;;  %v7306_v41 = vadd.f32 %v12914_v63, %v7096_v24 }
 0x9df   :  { %7494 = vst [vmem:[#allocation8 + $0x150] sm:$0xff] %v7302_v45  ;;  %v13478_v20 = vadd.f32 1e-12, %v6274_v47  ;;  %v13481_v36 = vadd.f32 %v5024_v13, %v16548_v40  ;;  %v6421_v8 = vmul.f32 0.5, %v6420_v16  ;;  %vm6425_vm12 = vweird.f32 %v13451_v5  ;;  %v5579_v13 = vpop.xlane.xlu2 %5578 }
 0x9e0   :  { %v7307_v44 = vadd.f32 %v12916_v42, %v7097_v33  ;;  %7495 = vst [vmem:[#allocation8 + $0x158] sm:$0xff] %v7303_v59  ;;  %v6417_v46 = vsel %vm6416_vm11, %v9129_v0, %v6413_v15  ;;  %v6123_v61 = vadd.f32 %v16549_v43, %v5907_v34  ;;  %v16550_v9 = vsub.f32 %v16526_v50, %v13318_v7  ;;  %v5289_v15 = vpop.f32.mrf.mxu3  ;;  %vm6426_vm13 = vmor %vm6424_vm10, %vm6425_vm12 }
 0x9e1   :  { %7496 = vst [vmem:[#allocation8 + $0x160] sm:$0xff] %v7304_v25  ;;  %v6889_v47 = vmul.f32 %v16551_v18, %v6417_v46  ;;  %v16552_v33 = vsub.f32 %v16528_v12, %v13318_v7  ;;  %v16553_v0 = vsub.f32 %v16529_v4, %v13318_v7  ;;  %v16554_v34 = vsub.f32 %v16531_v58, %v13318_v7  ;;  %v6027_v58 = vpop.xlane.xlu1 %6026 }
 0x9e2   :  { %v6888_v24 = vmul.f32 %v16550_v9, %v6417_v46  ;;  %7497 = vst [vmem:[#allocation8 + $0x168] sm:$0xff] %v7305_v48  ;;  %v16555_v50 = vsub.f32 %v16534_v30, %v13318_v7  ;;  %v6422_v37 = vsub.f32 1.5, %v6421_v8  ;;  %9132 = vrsqrt.f32 %v13478_v20  ;;  %6124 = vadd.xlane.f32.xlu0 %v6123_v61 }
 0x9e3   :  { %v6890_v26 = vmul.f32 %v16552_v33, %v6417_v46  ;;  %v6891_v51 = vmul.f32 %v16553_v0, %v6417_v46  ;;  %v6892_v45 = vmul.f32 %v16554_v34, %v6417_v46  ;;  %7498 = vst [vmem:[#allocation8 + $0x170] sm:$0xff] %v7306_v41  ;;  %v7099_v4 = vmul.f32 %v12886_v27, %v6889_v47 }
 0x9e4   :  { %v6893_v59 = vmul.f32 %v16555_v50, %v6417_v46  ;;  %v7098_v12 = vmul.f32 %v12881_v10, %v6888_v24  ;;  %7499 = vst [vmem:[#allocation8 + $0x178] sm:$0xff] %v7307_v44  ;;  %v6423_v30 = vmul.f32 %v13451_v5, %v6422_v37  ;;  %v13511_v40 = vmul.f32 0.0013020834, %v5579_v13  ;;  %v5113_v37 = vpop.f32.mrf.mxu1 }
 0x9e5   :  { %v7100_v25 = vmul.f32 %v12888_v22, %v6890_v26  ;;  %v7101_v48 = vmul.f32 %v12890_v49, %v6891_v51  ;;  %v7102_v16 = vmul.f32 %v12893_v21, %v6892_v45  ;;  %v7309_v46 = vadd.f32 %v12903_v6, %v7099_v4 }
 0x9e6   :  { %v7103_v7 = vmul.f32 %v12895_v17, %v6893_v59  ;;  %v7308_v41 = vadd.f32 %v12897_v14, %v7098_v12  ;;  %v5290_v44 = vadd.f32 %v5289_v15, %v5201_v56  ;;  %v6427_v9 = vsel %vm6426_vm13, %v13451_v5, %v6423_v30  ;;  %v5202_v12 = vpop.f32.mrf.mxu2 }
 0x9e7   :  { %v7310_v8 = vadd.f32 %v12905_v11, %v7100_v25  ;;  %v7311_v43 = vadd.f32 %v12907_v31, %v7101_v48  ;;  %v7312_v61 = vadd.f32 %v12914_v63, %v7102_v16  ;;  %v6179_v24 = vmul.f32 0.0013020834, %v6027_v58  ;;  %7501 = vst [vmem:[#allocation8 + $0x188] sm:$0xff] %v7309_v46  ;;  %v5027_v25 = vpop.f32.mrf.mxu0 }
 0x9e8   :  { %7500 = vst [vmem:[#allocation8 + $0x180] sm:$0xff] %v7308_v41  ;;  %v16556_v18 = vsub.f32 %v16535_v29, %v13347_v52  ;;  %v16557_v33 = vsub.f32 %v16536_v28, %v13347_v52  ;;  %v16558_v1 = vsub.f32 %v16537_v57, %v13347_v52  ;;  %v16559_v0 = vsub.f32 %v16538_v2, %v13347_v52  ;;  %v13535_v13 = vpop.eup %9132 }
 0x9e9   :  { %v7313_v5 = vadd.f32 %v12916_v42, %v7103_v7  ;;  %v16560_v29 = vsub.f32 %v16539_v35, %v13347_v52  ;;  %v6899_v28 = vmul.f32 %v6707_v39, %v6427_v9  ;;  %v6211_v57 = vmul.f32 %v13511_v40, %v13511_v40  ;;  %7502 = vst [vmem:[#allocation8 + $0x190] sm:$0xff] %v7310_v8  ;;  %v5586_v8 = vpop.xlane.xlu0 %5585 }
 0x9ea   :  { %v6894_v47 = vmul.f32 %v16556_v18, %v6427_v9  ;;  %v6895_v26 = vmul.f32 %v16557_v33, %v6427_v9  ;;  %v6896_v56 = vmul.f32 %v16558_v1, %v6427_v9  ;;  %v6897_v51 = vmul.f32 %v16559_v0, %v6427_v9  ;;  %7503 = vst [vmem:[#allocation8 + $0x198] sm:$0xff] %v7311_v43  ;;  %v16563_v18 = vld [vmem:[#allocation186_spill] sm:$0xff]  ;;  %v6034_v33 = vpop.xlane.xlu2 %6033 }
 0x9eb   :  { %v6898_v34 = vmul.f32 %v16560_v29, %v6427_v9  ;;  %v7109_v52 = vmul.f32 %v12895_v17, %v6899_v28  ;;  %v6708_v39 = vsub.f32 %v16561_v3, %v13403_v53  ;;  %v6429_v4 = vmul.f32 %v13535_v13, %v13478_v20  ;;  %7504 = vst [vmem:[#allocation8 + $0x1a0] sm:$0xff] %v7312_v61  ;;  %v16562_v61 = vld [vmem:[#allocation155_spill] sm:$0xff]  ;;  %v16568_v3 = vld [vmem:[#allocation209_spill] sm:$0xff] }
 0x9ec   :  { %v7104_v2 = vmul.f32 %v12881_v10, %v6894_v47  ;;  %v7105_v45 = vmul.f32 %v12886_v27, %v6895_v26  ;;  %v7106_v50 = vmul.f32 %v12888_v22, %v6896_v56  ;;  %v7107_v59 = vmul.f32 %v12890_v49, %v6897_v51  ;;  %7505 = vst [vmem:[#allocation8 + $0x1a8] sm:$0xff] %v7313_v5  ;;  %v16564_v56 = vld [vmem:[#allocation122_spill] sm:$0xff]  ;;  %v16565_v51 = vld [vmem:[#allocation244_spill] sm:$0xff] }
 0x9ed   :  { %v7108_v35 = vmul.f32 %v12893_v21, %v6898_v34  ;;  %v13559_v16 = vmax.f32 %v5290_v44, 0.0  ;;  %v6430_v30 = vmul.f32 %v13535_v13, %v6429_v4  ;;  %v5114_v41 = vadd.f32 %v5113_v37, %v13481_v36  ;;  %v5291_v44 = vpop.f32.mrf.mxu3  ;;  %v16567_v37 = vld [vmem:[#allocation28_spill] sm:$0xff] }
 0x9ee   :  { %v7314_v48 = vadd.f32 %v12897_v14, %v7104_v2  ;;  %v7315_v15 = vadd.f32 %v12903_v6, %v7105_v45  ;;  %v7316_v58 = vadd.f32 %v12905_v11, %v7106_v50  ;;  %v7317_v7 = vadd.f32 %v12907_v31, %v7107_v59  ;;  %v16566_v50 = vld [vmem:[#allocation37_spill] sm:$0xff] }
 0x9ef   :  { %v6243_v46 = vsub.f32 %v6179_v24, %v6211_v57  ;;  %v7318_v43 = vadd.f32 %v12914_v63, %v7108_v35  ;;  %v6709_v9 = vsub.f32 %v16562_v61, %v13403_v53  ;;  %v6710_v47 = vsub.f32 %v16563_v18, %v13403_v53 }
 0x9f0   :  { %7506 = vst [vmem:[#allocation8 + $0x1b0] sm:$0xff] %v7314_v48  ;;  %vm6435_vm14 = vweird.f32 %v13535_v13  ;;  %v7319_v26 = vadd.f32 %v12916_v42, %v7109_v52  ;;  %v6431_v1 = vmul.f32 0.5, %v6430_v30  ;;  %v5203_v24 = vadd.f32 %v5202_v12, %v5114_v41  ;;  %v5593_v52 = vpop.xlane.xlu1 %5592  ;;  %v16569_v48 = vld [vmem:[#allocation114_spill] sm:$0xff]  ;;  %v16571_v30 = vld [vmem:[#allocation156_spill] sm:$0xff] }
 0x9f1   :  { %7507 = vst [vmem:[#allocation8 + $0x1b8] sm:$0xff] %v7315_v15  ;;  %v6275_v36 = vmax.f32 %v6243_v46, 0.0  ;;  %v5682_v0 = vadd.f32 %v16564_v56, %v13559_v16  ;;  %v5028_v5 = vadd.f32 %v5027_v25, %v16565_v51  ;;  %v5913_v29 = vmul.f32 %v13559_v16, %v13559_v16  ;;  %v5116_v46 = vpop.f32.mrf.mxu1 }
 0x9f2   :  { %7508 = vst [vmem:[#allocation8 + $0x1c0] sm:$0xff] %v7316_v58  ;;  %v13576_v34 = vmul.f32 0.0013020834, %v5586_v8  ;;  %v6432_v28 = vsub.f32 1.5, %v6431_v1  ;;  %v5292_v2 = vadd.f32 %v5291_v44, %v5203_v24  ;;  %v6180_v45 = vmul.f32 0.0013020834, %v6034_v33  ;;  %v5029_v44 = vpop.f32.mrf.mxu0 }
 0x9f3   :  { %7509 = vst [vmem:[#allocation8 + $0x1c8] sm:$0xff] %v7317_v7  ;;  %v13578_v57 = vadd.f32 1e-12, %v6275_v36  ;;  %v6711_v59 = vsub.f32 %v16566_v50, %v13403_v53  ;;  %5683 = vadd.xlane.f32.xlu2 %v5682_v0  ;;  %v6130_v12 = vadd.f32 %v16567_v37, %v5913_v29  ;;  %v6712_v4 = vsub.f32 %v16568_v3, %v13403_v53  ;;  %v16570_v58 = vld [vmem:[#allocation115_spill] sm:$0xff] }
 0x9f4   :  { %7510 = vst [vmem:[#allocation8 + $0x1d0] sm:$0xff] %v7318_v43  ;;  %v6212_v35 = vmul.f32 %v13576_v34, %v13576_v34  ;;  %v6433_v25 = vmul.f32 %v13535_v13, %v6432_v28  ;;  %vm6434_vm15 = vweird.f32 %v13478_v20  ;;  %v6713_v15 = vsub.f32 %v16569_v48, %v13403_v53  ;;  %v5205_v43 = vpop.f32.mrf.mxu2  ;;  %v16573_v48 = vld [vmem:[#allocation52_spill] sm:$0xff] }
 0x9f5   :  { %7511 = vst [vmem:[#allocation8 + $0x1d8] sm:$0xff] %v7319_v26  ;;  %9134 = vrsqrt.f32 %v13578_v57  ;;  %vm6436_vm0 = vmor %vm6434_vm15, %vm6435_vm14  ;;  %v6714_v7 = vsub.f32 %v16570_v58, %v13511_v40  ;;  %v6715_v41 = vsub.f32 %v16571_v30, %v13511_v40  ;;  %6131 = vadd.xlane.f32.xlu1 %v6130_v12  ;;  %v13599_v61 = vmax.f32 %v5292_v2, 0.0 }
 0x9f6   :  { %v6244_v8 = vsub.f32 %v6180_v45, %v6212_v35  ;;  %v6437_v20 = vsel %vm6436_vm0, %v13535_v13, %v6433_v25  ;;  %v5117_v18 = vadd.f32 %v5116_v46, %v5028_v5  ;;  %v13601_v53 = vmul.f32 0.0013020834, %v5593_v52  ;;  %v5294_v5 = vpop.f32.mrf.mxu3  ;;  %v16572_v35 = vld [vmem:[#allocation85_spill] sm:$0xff]  ;;  %v6041_v46 = vpop.xlane.xlu0 %6040 }
 0x9f7   :  { %v6900_v33 = vmul.f32 %v6708_v39, %v6437_v20  ;;  %v6901_v26 = vmul.f32 %v6709_v9, %v6437_v20  ;;  %v6902_v1 = vmul.f32 %v6710_v47, %v6437_v20  ;;  %v6903_v36 = vmul.f32 %v6711_v59, %v6437_v20 }
 0x9f8   :  { %v6904_v24 = vmul.f32 %v6712_v4, %v6437_v20  ;;  %v6905_v56 = vmul.f32 %v6713_v15, %v6437_v20  ;;  %v6276_v0 = vmax.f32 %v6244_v8, 0.0  ;;  %v5206_v51 = vadd.f32 %v5205_v43, %v5117_v18  ;;  %v16574_v20 = vld [vmem:[#allocation29_spill] sm:$0xff] }
 0x9f9   :  { %v7110_v29 = vmul.f32 %v12881_v10, %v6900_v33  ;;  %v7111_v28 = vmul.f32 %v12886_v27, %v6901_v26  ;;  %v7112_v13 = vmul.f32 %v12888_v22, %v6902_v1  ;;  %v7113_v2 = vmul.f32 %v12890_v49, %v6903_v36  ;;  %v16575_v26 = vld [vmem:[#allocation246_spill] sm:$0xff] }
 0x9fa   :  { %v7114_v39 = vmul.f32 %v12893_v21, %v6904_v24  ;;  %v7115_v9 = vmul.f32 %v12895_v17, %v6905_v56  ;;  %v13611_v47 = vadd.f32 1e-12, %v6276_v0  ;;  %v5295_v50 = vadd.f32 %v5294_v5, %v5206_v51  ;;  %v16576_v56 = vld [vmem:[#allocation97_spill] sm:$0xff]  ;;  %v16577_v51 = vld [vmem:[#allocation92_spill] sm:$0xff] }
 0x9fb   :  { %v13607_v45 = vpop.eup %9134  ;;  %v7320_v59 = vadd.f32 %v12897_v14, %v7110_v29  ;;  %v7321_v37 = vadd.f32 %v12903_v6, %v7111_v28  ;;  %v7322_v12 = vadd.f32 %v12905_v11, %v7112_v13  ;;  %v7323_v3 = vadd.f32 %v12907_v31, %v7113_v2  ;;  %v16579_v5 = vld [vmem:[#allocation157_spill] sm:$0xff] }
 0x9fc   :  { %v7324_v4 = vadd.f32 %v12914_v63, %v7114_v39  ;;  %v6439_v25 = vmul.f32 %v13607_v45, %v13578_v57  ;;  %v6717_v15 = vsub.f32 %v16573_v48, %v13511_v40  ;;  %v7325_v8 = vadd.f32 %v12916_v42, %v7115_v9  ;;  %v16580_v9 = vld [vmem:[#allocation231_spill] sm:$0xff]  ;;  %v16582_v48 = vld [vmem:[#allocation168_spill] sm:$0xff] }
 0x9fd   :  { %7512 = vst [vmem:[#allocation8 + $0x1e0] sm:$0xff] %v7320_v59  ;;  %9136 = vrsqrt.f32 %v13611_v47  ;;  %v13626_v43 = vmax.f32 %v5295_v50, 0.0  ;;  %v5689_v18 = vadd.f32 %v16574_v20, %v13599_v61  ;;  %v5030_v1 = vadd.f32 %v5029_v44, %v16575_v26  ;;  %v16578_v44 = vld [vmem:[#allocation116_spill] sm:$0xff]  ;;  %v5032_v59 = vpop.f32.mrf.mxu0 }
 0x9fe   :  { %7513 = vst [vmem:[#allocation8 + $0x1e8] sm:$0xff] %v7321_v37  ;;  %v6440_v33 = vmul.f32 %v13607_v45, %v6439_v25  ;;  %v5919_v36 = vmul.f32 %v13599_v61, %v13599_v61  ;;  %v6213_v24 = vmul.f32 %v13601_v53, %v13601_v53  ;;  %vm6444_vm1 = vweird.f32 %v13578_v57  ;;  %v5600_v37 = vpop.xlane.xlu2 %5599  ;;  %v16584_v25 = vld [vmem:[#allocation207_spill] sm:$0xff] }
 0x9ff   :  { %7514 = vst [vmem:[#allocation8 + $0x1f0] sm:$0xff] %v7322_v12  ;;  %v6718_v0 = vsub.f32 %v16576_v56, %v13511_v40  ;;  %v6719_v29 = vsub.f32 %v16577_v51, %v13511_v40  ;;  %5690 = vadd.xlane.f32.xlu0 %v5689_v18  ;;  %v6181_v28 = vmul.f32 0.0013020834, %v6041_v46  ;;  %v16581_v12 = vld [vmem:[#allocation212_spill] sm:$0xff]  ;;  %v5118_v46 = vpop.f32.mrf.mxu1  ;;  %v5207_v18 = vpop.f32.mrf.mxu2  ;;  %vm6445_vm2 = vweird.f32 %v13607_v45 }
 0xa00   :  { %7515 = vst [vmem:[#allocation8 + $0x1f8] sm:$0xff] %v7323_v3  ;;  %v6441_v13 = vmul.f32 0.5, %v6440_v33  ;;  %v6137_v50 = vadd.f32 %v16580_v9, %v5919_v36  ;;  %v16583_v33 = vld [vmem:[#allocation33_spill] sm:$0xff]  ;;  %v5119_v36 = vadd.f32 %v5118_v46, %v5030_v1  ;;  %v6048_v51 = vpop.xlane.xlu1 %6047  ;;  %vm6454_vm3 = vweird.f32 %v13611_v47  ;;  %vm6446_vm4 = vmor %vm6444_vm1, %vm6445_vm2 }
 0xa01   :  { %7516 = vst [vmem:[#allocation8 + $0x200] sm:$0xff] %v7324_v4  ;;  %v6245_v3 = vsub.f32 %v6181_v28, %v6213_v24  ;;  %v5696_v26 = vadd.f32 %v16583_v33, %v13626_v43  ;;  %v5925_v4 = vmul.f32 %v13626_v43, %v13626_v43  ;;  %v16585_v24 = vld [vmem:[#allocation218_spill] sm:$0xff]  ;;  %v13659_v33 = vmul.f32 0.0013020834, %v5600_v37 }
 0xa02   :  { %7517 = vst [vmem:[#allocation8 + $0x208] sm:$0xff] %v7325_v8  ;;  %v6442_v56 = vsub.f32 1.5, %v6441_v13  ;;  %6138 = vadd.xlane.f32.xlu2 %v6137_v50  ;;  %v16586_v13 = vld [vmem:[#allocation119_spill] sm:$0xff]  ;;  %v5208_v46 = vadd.f32 %v5207_v18, %v5119_v36 }
 0xa03   :  { %v9137_v9 = vpop.eup %9136  ;;  %v6277_v39 = vmax.f32 %v6245_v3, 0.0  ;;  %5697 = vadd.xlane.f32.xlu1 %v5696_v26  ;;  %v16587_v3 = vld [vmem:[#allocation162_spill] sm:$0xff]  ;;  %v16588_v26 = vld [vmem:[#allocation204_spill] sm:$0xff]  ;;  %v6214_v50 = vmul.f32 %v13659_v33, %v13659_v33 }
 0xa04   :  { %v6443_v8 = vmul.f32 %v13607_v45, %v6442_v56  ;;  %v6449_v1 = vmul.f32 %v9137_v9, %v13611_v47  ;;  %v5033_v37 = vadd.f32 %v5032_v59, %v16587_v3  ;;  %v6144_v20 = vadd.f32 %v16588_v26, %v5925_v4  ;;  %v5296_v4 = vpop.f32.mrf.mxu3 }
 0xa05   :  { %v13670_v28 = vadd.f32 1e-12, %v6277_v39  ;;  %v6182_v56 = vmul.f32 0.0013020834, %v6048_v51  ;;  %vm6455_vm5 = vweird.f32 %v9137_v9  ;;  %v16589_v39 = vsub.f32 %v16572_v35, %v13511_v40 }
 0xa06   :  { %v6447_v2 = vsel %vm6446_vm4, %v13607_v45, %v6443_v8  ;;  %v6450_v52 = vmul.f32 %v9137_v9, %v6449_v1  ;;  %vm6456_vm6 = vmor %vm6454_vm3, %vm6455_vm5  ;;  %v16595_v47 = vsub.f32 %v16578_v44, %v13576_v34  ;;  %v16600_v44 = vsub.f32 %v16585_v24, %v13576_v34 }
 0xa07   :  { %v6906_v18 = vmul.f32 %v6714_v7, %v6447_v2  ;;  %v6907_v57 = vmul.f32 %v6715_v41, %v6447_v2  ;;  %v6908_v59 = vmul.f32 %v16589_v39, %v6447_v2  ;;  %v6909_v36 = vmul.f32 %v6717_v15, %v6447_v2  ;;  %6145 = vadd.xlane.f32.xlu0 %v6144_v20  ;;  %v5034_v20 = vpop.f32.mrf.mxu0  ;;  %v5121_v26 = vpop.f32.mrf.mxu1 }
 0xa08   :  { %v6910_v45 = vmul.f32 %v6718_v0, %v6447_v2  ;;  %v6911_v51 = vmul.f32 %v6719_v29, %v6447_v2  ;;  %v6451_v8 = vmul.f32 0.5, %v6450_v52  ;;  %9138 = vrsqrt.f32 %v13670_v28  ;;  %v16590_v2 = vld [vmem:[#allocation158_spill] sm:$0xff] }
 0xa09   :  { %v7116_v1 = vmul.f32 %v12881_v10, %v6906_v18  ;;  %v7117_v58 = vmul.f32 %v12886_v27, %v6907_v57  ;;  %v7118_v7 = vmul.f32 %v12888_v22, %v6908_v59  ;;  %v7119_v30 = vmul.f32 %v12890_v49, %v6909_v36  ;;  %v5210_v18 = vpop.f32.mrf.mxu2  ;;  %v16591_v59 = vld [vmem:[#allocation80_spill] sm:$0xff] }
 0xa0a   :  { %v7120_v41 = vmul.f32 %v12893_v21, %v6910_v45  ;;  %v7121_v40 = vmul.f32 %v12895_v17, %v6911_v51  ;;  %v6452_v35 = vsub.f32 1.5, %v6451_v8  ;;  %v5297_v15 = vadd.f32 %v5296_v4, %v5208_v46  ;;  %v16592_v4 = vld [vmem:[#allocation47_spill] sm:$0xff] }
 0xa0b   :  { %v7326_v0 = vadd.f32 %v12897_v14, %v7116_v1  ;;  %v7327_v52 = vadd.f32 %v12903_v6, %v7117_v58  ;;  %v7328_v29 = vadd.f32 %v12905_v11, %v7118_v7  ;;  %v6727_v3 = vsub.f32 %v16590_v2, %v13601_v53  ;;  %v16593_v1 = vld [vmem:[#allocation252_spill] sm:$0xff] }
 0xa0c   :  { %v7329_v57 = vadd.f32 %v12907_v31, %v7119_v30  ;;  %v6453_v39 = vmul.f32 %v9137_v9, %v6452_v35  ;;  %v6728_v36 = vsub.f32 %v16591_v59, %v13601_v53  ;;  %v6246_v45 = vsub.f32 %v6182_v56, %v6214_v50 }
 0xa0d   :  { %v7330_v46 = vadd.f32 %v12914_v63, %v7120_v41  ;;  %7518 = vst [vmem:[#allocation8 + $0x210] sm:$0xff] %v7326_v0  ;;  %v6729_v51 = vsub.f32 %v16592_v4, %v13601_v53  ;;  %v5122_v8 = vadd.f32 %v5121_v26, %v5033_v37  ;;  %v5035_v58 = vadd.f32 %v5034_v20, %v16593_v1  ;;  %v5299_v1 = vpop.f32.mrf.mxu3 }
 0xa0e   :  { %v13708_v7 = vpop.eup %9138  ;;  %v7331_v30 = vadd.f32 %v12916_v42, %v7121_v40  ;;  %7519 = vst [vmem:[#allocation8 + $0x218] sm:$0xff] %v7327_v52  ;;  %v6457_v35 = vsel %vm6456_vm6, %v9137_v9, %v6453_v39  ;;  %v13711_v50 = vmax.f32 %v5297_v15, 0.0  ;;  %v6278_v56 = vmax.f32 %v6246_v45, 0.0 }
 0xa0f   :  { %7520 = vst [vmem:[#allocation8 + $0x220] sm:$0xff] %v7328_v29  ;;  %v6912_v41 = vmul.f32 %v16595_v47, %v6457_v35  ;;  %v16596_v0 = vsub.f32 %v16579_v5, %v13576_v34  ;;  %v16597_v20 = vsub.f32 %v16581_v12, %v13576_v34  ;;  %v16598_v40 = vsub.f32 %v16582_v48, %v13576_v34  ;;  %v16601_v47 = vld [vmem:[#allocation255_spill] sm:$0xff] }
 0xa10   :  { %16594 = vst [vmem:[#allocation73_spill] sm:$0xff] %v13711_v50  ;;  %v16599_v15 = vsub.f32 %v16584_v25, %v13576_v34  ;;  %v6917_v29 = vmul.f32 %v16600_v44, %v6457_v35  ;;  %v6459_v5 = vmul.f32 %v13708_v7, %v13670_v28  ;;  %v5211_v39 = vadd.f32 %v5210_v18, %v5122_v8 }
 0xa11   :  { %v6913_v37 = vmul.f32 %v16596_v0, %v6457_v35  ;;  %v6914_v26 = vmul.f32 %v16597_v20, %v6457_v35  ;;  %v6915_v9 = vmul.f32 %v16598_v40, %v6457_v35  ;;  %7521 = vst [vmem:[#allocation8 + $0x228] sm:$0xff] %v7329_v57  ;;  %v7122_v12 = vmul.f32 %v12881_v10, %v6912_v41  ;;  %v5607_v0 = vpop.xlane.xlu0 %5606  ;;  %v5212_v44 = vpop.f32.mrf.mxu2 }
 0xa12   :  { %v6916_v52 = vmul.f32 %v16599_v15, %v6457_v35  ;;  %7522 = vst [vmem:[#allocation8 + $0x230] sm:$0xff] %v7330_v46  ;;  %v7127_v34 = vmul.f32 %v12895_v17, %v6917_v29  ;;  %v6460_v24 = vmul.f32 %v13708_v7, %v6459_v5  ;;  %v13740_v35 = vadd.f32 1e-12, %v6278_v56 }
 0xa13   :  { %v7123_v45 = vmul.f32 %v12886_v27, %v6913_v37  ;;  %v7124_v48 = vmul.f32 %v12888_v22, %v6914_v26  ;;  %v7125_v57 = vmul.f32 %v12890_v49, %v6915_v9  ;;  %7523 = vst [vmem:[#allocation8 + $0x238] sm:$0xff] %v7331_v30  ;;  %v7332_v18 = vadd.f32 %v12897_v14, %v7122_v12  ;;  %v6055_v37 = vpop.xlane.xlu2 %6054  ;;  %v16602_v9 = vld [vmem:[#allocation36_spill] sm:$0xff] }
 0xa14   :  { %v7126_v25 = vmul.f32 %v12893_v21, %v6916_v52  ;;  %v6730_v41 = vsub.f32 %v16601_v47, %v13601_v53  ;;  %v6461_v20 = vmul.f32 0.5, %v6460_v24  ;;  %vm6465_vm7 = vweird.f32 %v13708_v7  ;;  %v5123_v52 = vpop.f32.mrf.mxu1 }
 0xa15   :  { %v7333_v46 = vadd.f32 %v12903_v6, %v7123_v45  ;;  %v7334_v8 = vadd.f32 %v12905_v11, %v7124_v48  ;;  %v7335_v30 = vadd.f32 %v12907_v31, %v7125_v57  ;;  %9140 = vrsqrt.f32 %v13740_v35  ;;  %7524 = vst [vmem:[#allocation8 + $0x240] sm:$0xff] %v7332_v18  ;;  %v16603_v48 = vld [vmem:[#allocation221_spill] sm:$0xff] }
 0xa16   :  { %v7336_v56 = vadd.f32 %v12914_v63, %v7126_v25  ;;  %v7337_v26 = vadd.f32 %v12916_v42, %v7127_v34  ;;  %v5300_v40 = vadd.f32 %v5299_v1, %v5211_v39  ;;  %v5703_v15 = vadd.f32 %v16602_v9, %v13711_v50  ;;  %v16604_v25 = vld [vmem:[#allocation120_spill] sm:$0xff]  ;;  %v5614_v34 = vpop.xlane.xlu1 %5613 }
 0xa17   :  { %7525 = vst [vmem:[#allocation8 + $0x248] sm:$0xff] %v7333_v46  ;;  %v6462_v29 = vsub.f32 1.5, %v6461_v20  ;;  %v5124_v5 = vadd.f32 %v5123_v52, %v5035_v58  ;;  %v13754_v12 = vmul.f32 0.0013020834, %v5607_v0  ;;  %v6183_v45 = vmul.f32 0.0013020834, %v6055_v37 }
 0xa18   :  { %7526 = vst [vmem:[#allocation8 + $0x250] sm:$0xff] %v7334_v8  ;;  %v6731_v57 = vsub.f32 %v16603_v48, %v13601_v53  ;;  %vm6464_vm8 = vweird.f32 %v13670_v28  ;;  %v6732_v39 = vsub.f32 %v16604_v25, %v13659_v33  ;;  %v13761_v1 = vmax.f32 %v5300_v40, 0.0  ;;  %5704 = vadd.xlane.f32.xlu2 %v5703_v15  ;;  %v16605_v58 = vld [vmem:[#allocation127_spill] sm:$0xff]  ;;  %v16606_v28 = vld [vmem:[#allocation190_spill] sm:$0xff]  ;;  %v16607_v0 = vld [vmem:[#allocation60_spill] sm:$0xff] }
 0xa19   :  { %7527 = vst [vmem:[#allocation8 + $0x258] sm:$0xff] %v7335_v30  ;;  %v6463_v24 = vmul.f32 %v13708_v7, %v6462_v29  ;;  %v6733_v18 = vsub.f32 %v16605_v58, %v13659_v33  ;;  %v6215_v46 = vmul.f32 %v13754_v12, %v13754_v12  ;;  %v5213_v8 = vadd.f32 %v5212_v44, %v5124_v5  ;;  %vm6466_vm9 = vmor %vm6464_vm8, %vm6465_vm7  ;;  %v16608_v30 = vld [vmem:[#allocation61_spill] sm:$0xff] }
 0xa1a   :  { %7528 = vst [vmem:[#allocation8 + $0x260] sm:$0xff] %v7336_v56  ;;  %v6734_v47 = vsub.f32 %v16606_v28, %v13659_v33  ;;  %v6735_v37 = vsub.f32 %v16607_v0, %v13659_v33  ;;  %v16609_v40 = vld [vmem:[#allocation13_spill] sm:$0xff]  ;;  %v5710_v44 = vadd.f32 %v13351_v60, %v13761_v1  ;;  %v13781_v29 = vmul.f32 0.0013020834, %v5614_v34 }
 0xa1b   :  { %v6737_v9 = vsub.f32 %v16609_v40, %v13659_v33  ;;  %v9141_v15 = vpop.eup %9140  ;;  %7529 = vst [vmem:[#allocation8 + $0x268] sm:$0xff] %v7337_v26  ;;  %v6467_v52 = vsel %vm6466_vm9, %v13708_v7, %v6463_v24  ;;  %v6247_v56 = vsub.f32 %v6183_v45, %v6215_v46  ;;  %v16610_v5 = vsub.f32 %v16586_v13, %v13601_v53  ;;  %v5301_v45 = vpop.f32.mrf.mxu3 }
 0xa1c   :  { %v6919_v20 = vmul.f32 %v6727_v3, %v6467_v52  ;;  %v6920_v26 = vmul.f32 %v6728_v36, %v6467_v52  ;;  %v6921_v7 = vmul.f32 %v6729_v51, %v6467_v52  ;;  %v6922_v60 = vmul.f32 %v6730_v41, %v6467_v52  ;;  %5711 = vadd.xlane.f32.xlu0 %v5710_v44  ;;  %v6062_v36 = vpop.xlane.xlu0 %6061 }
 0xa1d   :  { %v6918_v48 = vmul.f32 %v16610_v5, %v6467_v52  ;;  %v6923_v34 = vmul.f32 %v6731_v57, %v6467_v52  ;;  %v6469_v24 = vmul.f32 %v9141_v15, %v13740_v35  ;;  %v5302_v46 = vadd.f32 %v5301_v45, %v5213_v8 }
 0xa1e   :  { %v7129_v2 = vmul.f32 %v12886_v27, %v6919_v20  ;;  %v7130_v3 = vmul.f32 %v12888_v22, %v6920_v26  ;;  %v7131_v59 = vmul.f32 %v12890_v49, %v6921_v7  ;;  %v7132_v5 = vmul.f32 %v12893_v21, %v6922_v60 }
 0xa1f   :  { %v7128_v13 = vmul.f32 %v12881_v10, %v6918_v48  ;;  %v7133_v53 = vmul.f32 %v12895_v17, %v6923_v34  ;;  %v6470_v4 = vmul.f32 %v9141_v15, %v6469_v24  ;;  %v6279_v51 = vmax.f32 %v6247_v56, 0.0  ;;  %v5621_v24 = vpop.xlane.xlu2 %5620 }
 0xa20   :  { %v7339_v57 = vadd.f32 %v12903_v6, %v7129_v2  ;;  %v7340_v8 = vadd.f32 %v12905_v11, %v7130_v3  ;;  %vm6474_vm10 = vweird.f32 %v13740_v35  ;;  %v7341_v20 = vadd.f32 %v12907_v31, %v7131_v59 }
 0xa21   :  { %v7338_v41 = vadd.f32 %v12897_v14, %v7128_v13  ;;  %v6471_v52 = vmul.f32 0.5, %v6470_v4  ;;  %v13807_v44 = vadd.f32 1e-12, %v6279_v51  ;;  %v6184_v48 = vmul.f32 0.0013020834, %v6062_v36  ;;  %v16612_v13 = vld [vmem:[#allocation123_spill] sm:$0xff] }
 0xa22   :  { %v7342_v26 = vadd.f32 %v12914_v63, %v7132_v5  ;;  %v13810_v7 = vmax.f32 %v5302_v46, 0.0  ;;  %v5937_v56 = vmul.f32 %v13761_v1, %v13761_v1  ;;  %v6216_v45 = vmul.f32 %v13781_v29, %v13781_v29  ;;  %7531 = vst [vmem:[#allocation8 + $0x278] sm:$0xff] %v7339_v57  ;;  %v16613_v46 = vld [vmem:[#allocation42_spill] sm:$0xff] }
 0xa23   :  { %7530 = vst [vmem:[#allocation8 + $0x270] sm:$0xff] %v7338_v41  ;;  %v7343_v60 = vadd.f32 %v12916_v42, %v7133_v53  ;;  %v6472_v34 = vsub.f32 1.5, %v6471_v52  ;;  %vm6475_vm11 = vweird.f32 %v9141_v15  ;;  %9142 = vrsqrt.f32 %v13807_v44  ;;  %v16614_v53 = vld [vmem:[#allocation95_spill] sm:$0xff]  ;;  %v16615_v57 = vld [vmem:[#allocation62_spill] sm:$0xff]  ;;  %v16632_v52 = vld [vmem:[#allocation128_spill] sm:$0xff] }
 0xa24   :  { %16611 = vst [vmem:[#allocation169_spill] sm:$0xff] %v13810_v7  ;;  %v6738_v2 = vsub.f32 %v16612_v13, %v13754_v12  ;;  %v6739_v3 = vsub.f32 %v16613_v46, %v13754_v12  ;;  %v6158_v59 = vadd.f32 %v13355_v38, %v5937_v56  ;;  %v5931_v36 = vmul.f32 %v13711_v50, %v13711_v50  ;;  %vm6476_vm12 = vmor %vm6474_vm10, %vm6475_vm11  ;;  %v16616_v38 = vld [vmem:[#allocation219_spill] sm:$0xff]  ;;  %v5628_v28 = vpop.xlane.xlu0 %5627 }
 0xa25   :  { %7532 = vst [vmem:[#allocation8 + $0x280] sm:$0xff] %v7340_v8  ;;  %v6473_v5 = vmul.f32 %v9141_v15, %v6472_v34  ;;  %v6248_v51 = vsub.f32 %v6184_v48, %v6216_v45  ;;  %v5717_v41 = vadd.f32 %v13359_v55, %v13810_v7  ;;  %v16617_v48 = vld [vmem:[#allocation21_spill] sm:$0xff]  ;;  %vm6484_vm13 = vweird.f32 %v13807_v44 }
 0xa26   :  { %7533 = vst [vmem:[#allocation8 + $0x288] sm:$0xff] %v7341_v20  ;;  %6159 = vadd.xlane.f32.xlu2 %v6158_v59  ;;  %v5943_v20 = vmul.f32 %v13810_v7, %v13810_v7  ;;  %v6069_v59 = vpop.xlane.xlu1 %6068  ;;  %v16636_v13 = vsub.f32 %v16617_v48, %v13754_v12 }
 0xa27   :  { %7534 = vst [vmem:[#allocation8 + $0x290] sm:$0xff] %v7342_v26  ;;  %v6477_v56 = vsel %vm6476_vm12, %v9141_v15, %v6473_v5  ;;  %v6280_v55 = vmax.f32 %v6248_v51, 0.0  ;;  %5718 = vadd.xlane.f32.xlu1 %v5717_v41  ;;  %v13839_v26 = vmul.f32 0.0013020834, %v5621_v24  ;;  %v16618_v24 = vsub.f32 %v16608_v30, %v13659_v33 }
 0xa28   :  { %7535 = vst [vmem:[#allocation8 + $0x298] sm:$0xff] %v7343_v60  ;;  %v6924_v35 = vmul.f32 %v6732_v39, %v6477_v56  ;;  %v6925_v34 = vmul.f32 %v6733_v18, %v6477_v56  ;;  %v6926_v60 = vmul.f32 %v6734_v47, %v6477_v56  ;;  %v6927_v15 = vmul.f32 %v6735_v37, %v6477_v56 }
 0xa29   :  { %v13853_v5 = vpop.eup %9142  ;;  %v6928_v25 = vmul.f32 %v16618_v24, %v6477_v56  ;;  %v6929_v39 = vmul.f32 %v6737_v9, %v6477_v56  ;;  %v13861_v58 = vadd.f32 1e-12, %v6280_v55  ;;  %v6165_v18 = vadd.f32 %v13362_v19, %v5943_v20  ;;  %v6076_v9 = vpop.xlane.xlu2 %6075 }
 0xa2a   :  { %v7134_v47 = vmul.f32 %v12881_v10, %v6924_v35  ;;  %v7135_v0 = vmul.f32 %v12886_v27, %v6925_v34  ;;  %v7136_v37 = vmul.f32 %v12888_v22, %v6926_v60  ;;  %v7137_v51 = vmul.f32 %v12890_v49, %v6927_v15  ;;  %v16619_v60 = vld [vmem:[#allocation199_spill] sm:$0xff] }
 0xa2b   :  { %v7138_v30 = vmul.f32 %v12893_v21, %v6928_v25  ;;  %v7139_v41 = vmul.f32 %v12895_v17, %v6929_v39  ;;  %v6479_v33 = vmul.f32 %v13853_v5, %v13807_v44  ;;  %6166 = vadd.xlane.f32.xlu0 %v6165_v18  ;;  %v6185_v40 = vmul.f32 0.0013020834, %v6069_v59  ;;  %v16620_v59 = vld [vmem:[#allocation124_spill] sm:$0xff] }
 0xa2c   :  { %v7344_v19 = vadd.f32 %v12897_v14, %v7134_v47  ;;  %v7345_v20 = vadd.f32 %v12903_v6, %v7135_v0  ;;  %v7346_v56 = vadd.f32 %v12905_v11, %v7136_v37  ;;  %v13875_v55 = vmul.f32 0.0013020834, %v5628_v28  ;;  %v16621_v0 = vld [vmem:[#allocation159_spill] sm:$0xff] }
 0xa2d   :  { %v7347_v35 = vadd.f32 %v12907_v31, %v7137_v51  ;;  %v6480_v34 = vmul.f32 %v13853_v5, %v6479_v33  ;;  %9144 = vrsqrt.f32 %v13861_v58  ;;  %v6151_v15 = vadd.f32 %v16619_v60, %v5931_v36  ;;  %v16622_v36 = vld [vmem:[#allocation213_spill] sm:$0xff]  ;;  %v16626_v51 = vld [vmem:[#allocation76_spill] sm:$0xff] }
 0xa2e   :  { %v7348_v24 = vadd.f32 %v12914_v63, %v7138_v30  ;;  %7536 = vst [vmem:[#allocation8 + $0x2a0] sm:$0xff] %v7344_v19  ;;  %v6217_v39 = vmul.f32 %v13839_v26, %v13839_v26  ;;  %v6186_v18 = vmul.f32 0.0013020834, %v6076_v9  ;;  %v7349_v28 = vadd.f32 %v12916_v42, %v7139_v41  ;;  %v16623_v30 = vld [vmem:[#allocation39_spill] sm:$0xff]  ;;  %v16625_v60 = vld [vmem:[#allocation69_spill] sm:$0xff]  ;;  %v5635_v25 = vpop.xlane.xlu1 %5634 }
 0xa2f   :  { %7537 = vst [vmem:[#allocation8 + $0x2a8] sm:$0xff] %v7345_v20  ;;  %v6481_v47 = vmul.f32 0.5, %v6480_v34  ;;  %6152 = vadd.xlane.f32.xlu1 %v6151_v15  ;;  %v6218_v9 = vmul.f32 %v13875_v55, %v13875_v55  ;;  %vm6485_vm14 = vweird.f32 %v13853_v5  ;;  %v16624_v20 = vld [vmem:[#allocation241_spill] sm:$0xff]  ;;  %v16628_v34 = vld [vmem:[#allocation55_spill] sm:$0xff]  ;;  %vm6494_vm0 = vweird.f32 %v13861_v58 }
 0xa30   :  { %7538 = vst [vmem:[#allocation8 + $0x2b0] sm:$0xff] %v7346_v56  ;;  %v6249_v19 = vsub.f32 %v6185_v40, %v6217_v39  ;;  %v16627_v40 = vld [vmem:[#allocation43_spill] sm:$0xff]  ;;  %v16629_v56 = vld [vmem:[#allocation217_spill] sm:$0xff]  ;;  %vm6486_vm15 = vmor %vm6484_vm13, %vm6485_vm14  ;;  %v13925_v37 = vmul.f32 0.0013020834, %v5635_v25  ;;  %v16635_v25 = vsub.f32 %v16616_v38, %v13754_v12 }
 0xa31   :  { %7539 = vst [vmem:[#allocation8 + $0x2b8] sm:$0xff] %v7347_v35  ;;  %v6482_v41 = vsub.f32 1.5, %v6481_v47  ;;  %v6250_v33 = vsub.f32 %v6186_v18, %v6218_v9  ;;  %v6083_v35 = vpop.xlane.xlu0 %6082  ;;  %v5642_v50 = vpop.xlane.xlu2 %5641 }
 0xa32   :  { %7540 = vst [vmem:[#allocation8 + $0x2c0] sm:$0xff] %v7348_v24  ;;  %v6281_v15 = vmax.f32 %v6249_v19, 0.0  ;;  %v16630_v19 = vld [vmem:[#allocation220_spill] sm:$0xff]  ;;  %v6187_v4 = vmul.f32 0.0013020834, %v6083_v35 }
 0xa33   :  { %v9145_v47 = vpop.eup %9144  ;;  %7541 = vst [vmem:[#allocation8 + $0x2c8] sm:$0xff] %v7349_v28  ;;  %v6483_v45 = vmul.f32 %v13853_v5, %v6482_v41  ;;  %v16631_v28 = vld [vmem:[#allocation84_spill] sm:$0xff]  ;;  %v6282_v8 = vmax.f32 %v6250_v33, 0.0  ;;  %v16633_v41 = vsub.f32 %v16614_v53, %v13754_v12 }
 0xa34   :  { %v6489_v18 = vmul.f32 %v9145_v47, %v13861_v58  ;;  %v13917_v9 = vadd.f32 1e-12, %v6281_v15  ;;  %vm6495_vm1 = vweird.f32 %v9145_v47  ;;  %v16644_v58 = vsub.f32 %v16620_v59, %v13781_v29 }
 0xa35   :  { %v6487_v24 = vsel %vm6486_vm15, %v13853_v5, %v6483_v45  ;;  %v16634_v45 = vsub.f32 %v16615_v57, %v13754_v12  ;;  %v6219_v12 = vmul.f32 %v13925_v37, %v13925_v37  ;;  %vm6496_vm2 = vmor %vm6494_vm0, %vm6495_vm1  ;;  %v16649_v59 = vsub.f32 %v16625_v60, %v13781_v29 }
 0xa36   :  { %v6930_v44 = vmul.f32 %v6738_v2, %v6487_v24  ;;  %v6931_v15 = vmul.f32 %v6739_v3, %v6487_v24  ;;  %v6932_v39 = vmul.f32 %v16633_v41, %v6487_v24  ;;  %v6934_v33 = vmul.f32 %v16635_v25, %v6487_v24 }
 0xa37   :  { %v6933_v5 = vmul.f32 %v16634_v45, %v6487_v24  ;;  %v6935_v2 = vmul.f32 %v16636_v13, %v6487_v24  ;;  %v6490_v35 = vmul.f32 %v9145_v47, %v6489_v18  ;;  %9146 = vrsqrt.f32 %v13917_v9  ;;  %v16638_v13 = vld [vmem:[#allocation90_spill] sm:$0xff] }
 0xa38   :  { %v7140_v46 = vmul.f32 %v12881_v10, %v6930_v44  ;;  %v7141_v3 = vmul.f32 %v12886_v27, %v6931_v15  ;;  %v7142_v53 = vmul.f32 %v12888_v22, %v6932_v39  ;;  %v7144_v41 = vmul.f32 %v12893_v21, %v6934_v33  ;;  %v16637_v44 = vld [vmem:[#allocation160_spill] sm:$0xff] }
 0xa39   :  { %v7143_v57 = vmul.f32 %v12890_v49, %v6933_v5  ;;  %v7145_v38 = vmul.f32 %v12895_v17, %v6935_v2  ;;  %v6491_v45 = vmul.f32 0.5, %v6490_v35  ;;  %v13960_v25 = vadd.f32 1e-12, %v6282_v8  ;;  %v16639_v35 = vld [vmem:[#allocation63_spill] sm:$0xff] }
 0xa3a   :  { %v7350_v48 = vadd.f32 %v12897_v14, %v7140_v46  ;;  %v7351_v24 = vadd.f32 %v12903_v6, %v7141_v3  ;;  %v7352_v18 = vadd.f32 %v12905_v11, %v7142_v53  ;;  %v7354_v33 = vadd.f32 %v12914_v63, %v7144_v41  ;;  %v16640_v3 = vld [vmem:[#allocation65_spill] sm:$0xff] }
 0xa3b   :  { %v7353_v39 = vadd.f32 %v12907_v31, %v7143_v57  ;;  %v6492_v5 = vsub.f32 1.5, %v6491_v45  ;;  %v7355_v57 = vadd.f32 %v12916_v42, %v7145_v38  ;;  %9148 = vrsqrt.f32 %v13960_v25  ;;  %v16642_v46 = vld [vmem:[#allocation129_spill] sm:$0xff] }
 0xa3c   :  { %7542 = vst [vmem:[#allocation8 + $0x2d0] sm:$0xff] %v7350_v48  ;;  %v6251_v41 = vsub.f32 %v6187_v4, %v6219_v12  ;;  %v16641_v48 = vld [vmem:[#allocation251_spill] sm:$0xff]  ;;  %v16643_v38 = vld [vmem:[#allocation161_spill] sm:$0xff]  ;;  %vm6504_vm3 = vweird.f32 %v13917_v9  ;;  %v13985_v12 = vmul.f32 0.0013020834, %v5642_v50  ;;  %v16645_v53 = vsub.f32 %v16621_v0, %v13781_v29 }
 0xa3d   :  { %v13969_v15 = vpop.eup %9146  ;;  %7543 = vst [vmem:[#allocation8 + $0x2d8] sm:$0xff] %v7351_v24  ;;  %v6493_v8 = vmul.f32 %v9145_v47, %v6492_v5  ;;  %v16646_v2 = vsub.f32 %v16622_v36, %v13781_v29  ;;  %v16648_v50 = vsub.f32 %v16624_v20, %v13781_v29  ;;  %vm6514_vm6 = vweird.f32 %v13960_v25 }
 0xa3e   :  { %7544 = vst [vmem:[#allocation8 + $0x2e0] sm:$0xff] %v7352_v18  ;;  %v6499_v45 = vmul.f32 %v13969_v15, %v13917_v9  ;;  %v6283_v4 = vmax.f32 %v6251_v41, 0.0  ;;  %v6090_v41 = vpop.xlane.xlu1 %6089  ;;  %vm6505_vm4 = vweird.f32 %v13969_v15 }
 0xa3f   :  { %7545 = vst [vmem:[#allocation8 + $0x2e8] sm:$0xff] %v7353_v39  ;;  %v6497_v5 = vsel %vm6496_vm2, %v9145_v47, %v6493_v8  ;;  %v16647_v47 = vsub.f32 %v16623_v30, %v13781_v29  ;;  %vm6506_vm5 = vmor %vm6504_vm3, %vm6505_vm4 }
 0xa40   :  { %7546 = vst [vmem:[#allocation8 + $0x2f0] sm:$0xff] %v7354_v33  ;;  %v6936_v18 = vmul.f32 %v16644_v58, %v6497_v5  ;;  %v6937_v7 = vmul.f32 %v16645_v53, %v6497_v5  ;;  %v6938_v24 = vmul.f32 %v16646_v2, %v6497_v5  ;;  %v6940_v33 = vmul.f32 %v16648_v50, %v6497_v5  ;;  %v6097_v50 = vpop.xlane.xlu2 %6096 }
 0xa41   :  { %v6939_v39 = vmul.f32 %v16647_v47, %v6497_v5  ;;  %7547 = vst [vmem:[#allocation8 + $0x2f8] sm:$0xff] %v7355_v57  ;;  %v6941_v8 = vmul.f32 %v16649_v59, %v6497_v5  ;;  %v6500_v0 = vmul.f32 %v13969_v15, %v6499_v45  ;;  %v14006_v53 = vadd.f32 1e-12, %v6283_v4  ;;  %v14012_v58 = vpop.eup %9148  ;;  %v16650_v59 = vld [vmem:[#allocation106_spill] sm:$0xff] }
 0xa42   :  { %v7146_v36 = vmul.f32 %v12881_v10, %v6936_v18  ;;  %v7147_v2 = vmul.f32 %v12886_v27, %v6937_v7  ;;  %v7148_v30 = vmul.f32 %v12888_v22, %v6938_v24  ;;  %v7150_v20 = vmul.f32 %v12893_v21, %v6940_v33 }
 0xa43   :  { %v7149_v57 = vmul.f32 %v12890_v49, %v6939_v39  ;;  %v7151_v29 = vmul.f32 %v12895_v17, %v6941_v8  ;;  %v6501_v60 = vmul.f32 0.5, %v6500_v0  ;;  %9150 = vrsqrt.f32 %v14006_v53  ;;  %v5649_v39 = vpop.xlane.xlu0 %5648  ;;  %v16651_v0 = vld [vmem:[#allocation113_spill] sm:$0xff] }
 0xa44   :  { %v7356_v45 = vadd.f32 %v12897_v14, %v7146_v36  ;;  %v7357_v5 = vadd.f32 %v12903_v6, %v7147_v2  ;;  %v7358_v7 = vadd.f32 %v12905_v11, %v7148_v30  ;;  %v6509_v18 = vmul.f32 %v14012_v58, %v13960_v25 }
 0xa45   :  { %v7359_v24 = vadd.f32 %v12907_v31, %v7149_v57  ;;  %v6502_v4 = vsub.f32 1.5, %v6501_v60  ;;  %v14024_v47 = vmul.f32 0.0013020834, %v6090_v41  ;;  %v7360_v33 = vadd.f32 %v12914_v63, %v7150_v20  ;;  %v16652_v20 = vld [vmem:[#allocation66_spill] sm:$0xff] }
 0xa46   :  { %7548 = vst [vmem:[#allocation8 + $0x300] sm:$0xff] %v7356_v45  ;;  %v6764_v8 = vsub.f32 %v16650_v59, %v13925_v37  ;;  %v14033_v2 = vmul.f32 %v13985_v12, %v13985_v12  ;;  %v7361_v30 = vadd.f32 %v12916_v42, %v7151_v29  ;;  %v6510_v41 = vmul.f32 %v14012_v58, %v6509_v18 }
 0xa47   :  { %7549 = vst [vmem:[#allocation8 + $0x308] sm:$0xff] %v7357_v5  ;;  %v6503_v57 = vmul.f32 %v13969_v15, %v6502_v4  ;;  %v14047_v29 = vmul.f32 0.0013020834, %v5649_v39  ;;  %v14049_v5 = vmul.f32 0.0013020834, %v6097_v50  ;;  %vm6515_vm7 = vweird.f32 %v14012_v58 }
 0xa48   :  { %7550 = vst [vmem:[#allocation8 + $0x310] sm:$0xff] %v7358_v7  ;;  %v6511_v7 = vmul.f32 0.5, %v6510_v41  ;;  %v6252_v9 = vsub.f32 %v14024_v47, %v14033_v2  ;;  %v16653_v60 = vsub.f32 %v16626_v51, %v13839_v26  ;;  %v16654_v39 = vsub.f32 %v16627_v40, %v13839_v26  ;;  %vm6516_vm9 = vmor %vm6514_vm6, %vm6515_vm7 }
 0xa49   :  { %v14051_v4 = vpop.eup %9150  ;;  %7551 = vst [vmem:[#allocation8 + $0x318] sm:$0xff] %v7359_v24  ;;  %v6507_v18 = vsel %vm6506_vm5, %v13969_v15, %v6503_v57  ;;  %v16655_v24 = vsub.f32 %v16628_v34, %v13839_v26  ;;  %v16656_v15 = vsub.f32 %v16629_v56, %v13839_v26  ;;  %v16657_v47 = vsub.f32 %v16630_v19, %v13839_v26 }
 0xa4a   :  { %7552 = vst [vmem:[#allocation8 + $0x320] sm:$0xff] %v7360_v33  ;;  %v6942_v45 = vmul.f32 %v16653_v60, %v6507_v18  ;;  %v6943_v50 = vmul.f32 %v16654_v39, %v6507_v18  ;;  %v16658_v51 = vsub.f32 %v16631_v28, %v13839_v26  ;;  %v6512_v41 = vsub.f32 1.5, %v6511_v7 }
 0xa4b   :  { %v6944_v36 = vmul.f32 %v16655_v24, %v6507_v18  ;;  %v6945_v57 = vmul.f32 %v16656_v15, %v6507_v18  ;;  %7553 = vst [vmem:[#allocation8 + $0x328] sm:$0xff] %v7361_v30  ;;  %v6946_v33 = vmul.f32 %v16657_v47, %v6507_v18  ;;  %v6519_v40 = vmul.f32 %v14051_v4, %v14006_v53  ;;  %v6104_v59 = vpop.xlane.xlu0 %6103 }
 0xa4c   :  { %v6947_v2 = vmul.f32 %v16658_v51, %v6507_v18  ;;  %vm6524_vm8 = vweird.f32 %v14006_v53  ;;  %v7152_v34 = vmul.f32 %v12881_v10, %v6942_v45  ;;  %v7153_v56 = vmul.f32 %v12886_v27, %v6943_v50 }
 0xa4d   :  { %v7154_v30 = vmul.f32 %v12888_v22, %v6944_v36  ;;  %v7155_v60 = vmul.f32 %v12890_v49, %v6945_v57  ;;  %v7156_v19 = vmul.f32 %v12893_v21, %v6946_v33  ;;  %v6513_v26 = vmul.f32 %v14012_v58, %v6512_v41 }
 0xa4e   :  { %v7157_v39 = vmul.f32 %v12895_v17, %v6947_v2  ;;  %v6520_v28 = vmul.f32 %v14051_v4, %v6519_v40  ;;  %v7362_v18 = vadd.f32 %v12897_v14, %v7152_v34  ;;  %v7363_v7 = vadd.f32 %v12903_v6, %v7153_v56 }
 0xa4f   :  { %v7364_v45 = vadd.f32 %v12905_v11, %v7154_v30  ;;  %v7365_v50 = vadd.f32 %v12907_v31, %v7155_v60  ;;  %v7366_v36 = vadd.f32 %v12914_v63, %v7156_v19  ;;  %v6517_v15 = vsel %vm6516_vm9, %v14012_v58, %v6513_v26 }
 0xa50   :  { %v7367_v24 = vadd.f32 %v12916_v42, %v7157_v39  ;;  %v6521_v57 = vmul.f32 0.5, %v6520_v28  ;;  %7554 = vst [vmem:[#allocation8 + $0x330] sm:$0xff] %v7362_v18  ;;  %v16659_v47 = vsub.f32 %v16632_v52, %v13875_v55  ;;  %v16660_v51 = vsub.f32 %v16637_v44, %v13875_v55 }
 0xa51   :  { %v16661_v25 = vsub.f32 %v16638_v13, %v13875_v55  ;;  %v16662_v40 = vsub.f32 %v16639_v35, %v13875_v55  ;;  %7555 = vst [vmem:[#allocation8 + $0x338] sm:$0xff] %v7363_v7  ;;  %v16663_v58 = vsub.f32 %v16640_v3, %v13875_v55  ;;  %v16664_v52 = vsub.f32 %v16641_v48, %v13875_v55 }
 0xa52   :  { %v6948_v33 = vmul.f32 %v16659_v47, %v6517_v15  ;;  %v6949_v2 = vmul.f32 %v16660_v51, %v6517_v15  ;;  %v6522_v60 = vsub.f32 1.5, %v6521_v57  ;;  %vm6525_vm10 = vweird.f32 %v14051_v4  ;;  %7556 = vst [vmem:[#allocation8 + $0x340] sm:$0xff] %v7364_v45 }
 0xa53   :  { %v6950_v41 = vmul.f32 %v16661_v25, %v6517_v15  ;;  %v6951_v34 = vmul.f32 %v16662_v40, %v6517_v15  ;;  %v6952_v56 = vmul.f32 %v16663_v58, %v6517_v15  ;;  %v6953_v30 = vmul.f32 %v16664_v52, %v6517_v15  ;;  %7557 = vst [vmem:[#allocation8 + $0x348] sm:$0xff] %v7365_v50  ;;  %vm6526_vm11 = vmor %vm6524_vm8, %vm6525_vm10 }
 0xa54   :  { %v7158_v44 = vmul.f32 %v12881_v10, %v6948_v33  ;;  %v7159_v13 = vmul.f32 %v12886_v27, %v6949_v2  ;;  %v6523_v55 = vmul.f32 %v14051_v4, %v6522_v60  ;;  %v6284_v48 = vmax.f32 %v6252_v9, 0.0  ;;  %7558 = vst [vmem:[#allocation8 + $0x350] sm:$0xff] %v7366_v36 }
 0xa55   :  { %v7160_v35 = vmul.f32 %v12888_v22, %v6950_v41  ;;  %v7161_v19 = vmul.f32 %v12890_v49, %v6951_v34  ;;  %v7162_v3 = vmul.f32 %v12893_v21, %v6952_v56  ;;  %v7163_v39 = vmul.f32 %v12895_v17, %v6953_v30  ;;  %7559 = vst [vmem:[#allocation8 + $0x358] sm:$0xff] %v7367_v24 }
 0xa56   :  { %v7368_v26 = vadd.f32 %v12897_v14, %v7158_v44  ;;  %v7369_v28 = vadd.f32 %v12903_v6, %v7159_v13  ;;  %v6221_v7 = vmul.f32 %v14047_v29, %v14047_v29  ;;  %v6527_v50 = vsel %vm6526_vm11, %v14051_v4, %v6523_v55  ;;  %v5656_v4 = vpop.xlane.xlu1 %5655 }
 0xa57   :  { %v7370_v18 = vadd.f32 %v12905_v11, %v7160_v35  ;;  %v7371_v45 = vadd.f32 %v12907_v31, %v7161_v19  ;;  %v7372_v9 = vadd.f32 %v12914_v63, %v7162_v3  ;;  %v14135_v36 = vadd.f32 1e-12, %v6284_v48  ;;  %v16670_v48 = vld [vmem:[#allocation130_spill] sm:$0xff] }
 0xa58   :  { %7560 = vst [vmem:[#allocation8 + $0x360] sm:$0xff] %v7368_v26  ;;  %v16665_v15 = vsub.f32 %v16642_v46, %v13925_v37  ;;  %v16666_v53 = vsub.f32 %v16643_v38, %v13925_v37  ;;  %v6956_v24 = vmul.f32 %v6764_v8, %v6527_v50  ;;  %v16667_v33 = vsub.f32 %v16651_v0, %v13925_v37 }
 0xa59   :  { %v7373_v2 = vadd.f32 %v12916_v42, %v7163_v39  ;;  %7561 = vst [vmem:[#allocation8 + $0x368] sm:$0xff] %v7369_v28  ;;  %v16668_v46 = vsub.f32 %v16652_v20, %v13925_v37  ;;  %v16669_v38 = vsub.f32 %v12992_v32, %v13925_v37  ;;  %9152 = vrsqrt.f32 %v14135_v36  ;;  %v5663_v37 = vpop.xlane.xlu2 %5662  ;;  %v16671_v28 = vld [vmem:[#allocation131_spill] sm:$0xff] }
 0xa5a   :  { %v6954_v57 = vmul.f32 %v16665_v15, %v6527_v50  ;;  %v6955_v47 = vmul.f32 %v16666_v53, %v6527_v50  ;;  %v6957_v51 = vmul.f32 %v16667_v33, %v6527_v50  ;;  %7562 = vst [vmem:[#allocation8 + $0x370] sm:$0xff] %v7370_v18  ;;  %v7166_v40 = vmul.f32 %v12888_v22, %v6956_v24  ;;  %v16673_v15 = vld [vmem:[#allocation205_spill] sm:$0xff]  ;;  %v16674_v53 = vld [vmem:[#allocation222_spill] sm:$0xff]  ;;  %v5670_v24 = vpop.xlane.xlu0 %5669 }
 0xa5b   :  { %v6958_v25 = vmul.f32 %v16668_v46, %v6527_v50  ;;  %v6959_v41 = vmul.f32 %v16669_v38, %v6527_v50  ;;  %7563 = vst [vmem:[#allocation8 + $0x378] sm:$0xff] %v7371_v45  ;;  %v6253_v32 = vsub.f32 %v14049_v5, %v6221_v7  ;;  %v14169_v35 = vmul.f32 0.0013020834, %v5656_v4  ;;  %v16675_v4 = vld [vmem:[#allocation132_spill] sm:$0xff]  ;;  %v16676_v46 = vld [vmem:[#allocation163_spill] sm:$0xff] }
 0xa5c   :  { %v7164_v8 = vmul.f32 %v12881_v10, %v6954_v57  ;;  %v7165_v0 = vmul.f32 %v12886_v27, %v6955_v47  ;;  %v7167_v34 = vmul.f32 %v12890_v49, %v6957_v51  ;;  %7564 = vst [vmem:[#allocation8 + $0x380] sm:$0xff] %v7372_v9  ;;  %v7376_v30 = vadd.f32 %v12905_v11, %v7166_v40  ;;  %v16672_v9 = vld [vmem:[#allocation192_spill] sm:$0xff]  ;;  %v16677_v40 = vld [vmem:[#allocation214_spill] sm:$0xff] }
 0xa5d   :  { %v7168_v20 = vmul.f32 %v12893_v21, %v6958_v25  ;;  %v7169_v58 = vmul.f32 %v12895_v17, %v6959_v41  ;;  %7565 = vst [vmem:[#allocation8 + $0x388] sm:$0xff] %v7373_v2  ;;  %v6285_v44 = vmax.f32 %v6253_v32, 0.0  ;;  %v6190_v39 = vmul.f32 0.0013020834, %v6104_v59 }
 0xa5e   :  { %v7374_v56 = vadd.f32 %v12897_v14, %v7164_v8  ;;  %v7375_v52 = vadd.f32 %v12903_v6, %v7165_v0  ;;  %v7377_v60 = vadd.f32 %v12907_v31, %v7167_v34  ;;  %7568 = vst [vmem:[#allocation8 + $0x3a0] sm:$0xff] %v7376_v30  ;;  %v6768_v26 = vsub.f32 %v16670_v48, %v13985_v12  ;;  %v6111_v45 = vpop.xlane.xlu1 %6110 }
 0xa5f   :  { %v7378_v13 = vadd.f32 %v12914_v63, %v7168_v20  ;;  %v9153_v19 = vpop.eup %9152  ;;  %v7379_v5 = vadd.f32 %v12916_v42, %v7169_v58  ;;  %v14172_v3 = vadd.f32 1e-12, %v6285_v44  ;;  %v6769_v18 = vsub.f32 %v16671_v28, %v13985_v12  ;;  %v16678_v20 = vld [vmem:[#allocation226_spill] sm:$0xff] }
 0xa60   :  { %7566 = vst [vmem:[#allocation8 + $0x390] sm:$0xff] %v7374_v56  ;;  %v6529_v55 = vmul.f32 %v9153_v19, %v14135_v36  ;;  %v6222_v7 = vmul.f32 %v14169_v35, %v14169_v35  ;;  %v6770_v50 = vsub.f32 %v16672_v9, %v13985_v12  ;;  %v6771_v57 = vsub.f32 %v16673_v15, %v13985_v12  ;;  %v16682_v15 = vld [vmem:[#allocation195_spill] sm:$0xff] }
 0xa61   :  { %7567 = vst [vmem:[#allocation8 + $0x398] sm:$0xff] %v7375_v52  ;;  %v6772_v47 = vsub.f32 %v16674_v53, %v13985_v12  ;;  %9154 = vrsqrt.f32 %v14172_v3  ;;  %vm6534_vm12 = vweird.f32 %v14135_v36  ;;  %v6773_v51 = vsub.f32 %v13078_v62, %v13985_v12  ;;  %v6118_v8 = vpop.xlane.xlu2 %6117  ;;  %v16679_v12 = vld [vmem:[#allocation118_spill] sm:$0xff] }
 0xa62   :  { %7569 = vst [vmem:[#allocation8 + $0x3a8] sm:$0xff] %v7377_v60  ;;  %v6530_v33 = vmul.f32 %v9153_v19, %v6529_v55  ;;  %v6774_v2 = vsub.f32 %v16675_v4, %v14047_v29  ;;  %v6254_v38 = vsub.f32 %v6190_v39, %v6222_v7  ;;  %v14195_v41 = vmul.f32 0.0013020834, %v5663_v37  ;;  %v16680_v60 = vld [vmem:[#allocation133_spill] sm:$0xff]  ;;  %v16681_v39 = vld [vmem:[#allocation135_spill] sm:$0xff] }
 0xa63   :  { %7570 = vst [vmem:[#allocation8 + $0x3b0] sm:$0xff] %v7378_v13  ;;  %v6191_v59 = vmul.f32 0.0013020834, %v6111_v45  ;;  %v14201_v62 = vmul.f32 0.0013020834, %v5670_v24  ;;  %vm6535_vm13 = vweird.f32 %v9153_v19  ;;  %vm6544_vm14 = vweird.f32 %v14172_v3  ;;  %v16683_v24 = vld [vmem:[#allocation49_spill] sm:$0xff] }
 0xa64   :  { %7571 = vst [vmem:[#allocation8 + $0x3b8] sm:$0xff] %v7379_v5  ;;  %v6531_v0 = vmul.f32 0.5, %v6530_v33  ;;  %v6286_v52 = vmax.f32 %v6254_v38, 0.0  ;;  %v6223_v37 = vmul.f32 %v14195_v41, %v14195_v41  ;;  %v6192_v13 = vmul.f32 0.0013020834, %v6118_v8  ;;  %vm6536_vm15 = vmor %vm6534_vm12, %vm6535_vm13  ;;  %v16684_v38 = vld [vmem:[#allocation228_spill] sm:$0xff] }
 0xa65   :  { %v6224_v7 = vmul.f32 %v14201_v62, %v14201_v62  ;;  %v16685_v8 = vld [vmem:[#allocation232_spill] sm:$0xff] }
 0xa66   :  { %v6532_v30 = vsub.f32 1.5, %v6531_v0  ;;  %v14213_v48 = vadd.f32 1e-12, %v6286_v52  ;;  %v6255_v28 = vsub.f32 %v6191_v59, %v6223_v37 }
 0xa67   :  { %v9155_v5 = vpop.eup %9154  ;;  %v6256_v55 = vsub.f32 %v6192_v13, %v6224_v7 }
 0xa68   :  { %v6533_v45 = vmul.f32 %v9153_v19, %v6532_v30  ;;  %v6539_v9 = vmul.f32 %v9155_v5, %v14172_v3  ;;  %9156 = vrsqrt.f32 %v14213_v48  ;;  %v6287_v52 = vmax.f32 %v6255_v28, 0.0 }
 0xa69   :  { %vm6545_vm0 = vweird.f32 %v9155_v5  ;;  %v16690_v3 = vsub.f32 %v16676_v46, %v14047_v29  ;;  %vm6554_vm3 = vweird.f32 %v14213_v48 }
 0xa6a   :  { %v6537_v37 = vsel %vm6536_vm15, %v9153_v19, %v6533_v45  ;;  %v6540_v30 = vmul.f32 %v9155_v5, %v6539_v9  ;;  %v14230_v34 = vadd.f32 1e-12, %v6287_v52  ;;  %v16687_v45 = vld [vmem:[#allocation165_spill] sm:$0xff]  ;;  %vm6546_vm1 = vmor %vm6544_vm14, %vm6545_vm0 }
 0xa6b   :  { %v6960_v53 = vmul.f32 %v6768_v26, %v6537_v37  ;;  %v6961_v44 = vmul.f32 %v6769_v18, %v6537_v37  ;;  %v6962_v56 = vmul.f32 %v6770_v50, %v6537_v37  ;;  %v6963_v33 = vmul.f32 %v6771_v57, %v6537_v37 }
 0xa6c   :  { %v6964_v32 = vmul.f32 %v6772_v47, %v6537_v37  ;;  %v6965_v36 = vmul.f32 %v6773_v51, %v6537_v37  ;;  %v6541_v58 = vmul.f32 0.5, %v6540_v30  ;;  %9158 = vrsqrt.f32 %v14230_v34 }
 0xa6d   :  { %v7170_v59 = vmul.f32 %v12881_v10, %v6960_v53  ;;  %v7171_v0 = vmul.f32 %v12886_v27, %v6961_v44  ;;  %v7172_v25 = vmul.f32 %v12888_v22, %v6962_v56  ;;  %v7173_v19 = vmul.f32 %v12890_v49, %v6963_v33  ;;  %v16686_v44 = vld [vmem:[#allocation89_spill] sm:$0xff]  ;;  %v16689_v33 = vld [vmem:[#allocation239_spill] sm:$0xff] }
 0xa6e   :  { %v7174_v28 = vmul.f32 %v12893_v21, %v6964_v32  ;;  %v7175_v26 = vmul.f32 %v12895_v17, %v6965_v36  ;;  %v6542_v18 = vsub.f32 1.5, %v6541_v58  ;;  %v9157_v50 = vpop.eup %9156  ;;  %v6786_v13 = vsub.f32 %v16686_v44, %v14195_v41 }
 0xa6f   :  { %v7380_v57 = vadd.f32 %v12897_v14, %v7170_v59  ;;  %v7381_v47 = vadd.f32 %v12903_v6, %v7171_v0  ;;  %v7382_v51 = vadd.f32 %v12905_v11, %v7172_v25  ;;  %v7383_v56 = vadd.f32 %v12907_v31, %v7173_v19  ;;  %v16688_v25 = vld [vmem:[#allocation96_spill] sm:$0xff] }
 0xa70   :  { %v6543_v7 = vmul.f32 %v9155_v5, %v6542_v18  ;;  %v6549_v32 = vmul.f32 %v9157_v50, %v14213_v48  ;;  %v6787_v58 = vsub.f32 %v16687_v45, %v14195_v41  ;;  %v7384_v9 = vadd.f32 %v12914_v63, %v7174_v28 }
 0xa71   :  { %7572 = vst [vmem:[#allocation8 + $0x3c0] sm:$0xff] %v7380_v57  ;;  %v6788_v53 = vsub.f32 %v16688_v25, %v14195_v41  ;;  %v6789_v59 = vsub.f32 %v16689_v33, %v14195_v41  ;;  %v6288_v0 = vmax.f32 %v6256_v55, 0.0  ;;  %v7385_v52 = vadd.f32 %v12916_v42, %v7175_v26 }
 0xa72   :  { %7573 = vst [vmem:[#allocation8 + $0x3c8] sm:$0xff] %v7381_v47  ;;  %v6547_v37 = vsel %vm6546_vm1, %v9155_v5, %v6543_v7  ;;  %v6550_v30 = vmul.f32 %v9157_v50, %v6549_v32  ;;  %vm6555_vm2 = vweird.f32 %v9157_v50  ;;  %v16691_v28 = vsub.f32 %v16677_v40, %v14047_v29  ;;  %v14269_v5 = vpop.eup %9158 }
 0xa73   :  { %7574 = vst [vmem:[#allocation8 + $0x3d0] sm:$0xff] %v7382_v51  ;;  %v6966_v36 = vmul.f32 %v6774_v2, %v6547_v37  ;;  %v6967_v19 = vmul.f32 %v16690_v3, %v6547_v37  ;;  %v16692_v55 = vsub.f32 %v16678_v20, %v14047_v29  ;;  %v16693_v57 = vsub.f32 %v16679_v12, %v14047_v29  ;;  %vm6556_vm4 = vmor %vm6554_vm3, %vm6555_vm2 }
 0xa74   :  { %v6968_v18 = vmul.f32 %v16691_v28, %v6547_v37  ;;  %7575 = vst [vmem:[#allocation8 + $0x3d8] sm:$0xff] %v7383_v56  ;;  %v16694_v2 = vsub.f32 %v13189_v54, %v14047_v29  ;;  %v6551_v47 = vmul.f32 0.5, %v6550_v30  ;;  %v14277_v51 = vadd.f32 1e-12, %v6288_v0 }
 0xa75   :  { %v6969_v26 = vmul.f32 %v16692_v55, %v6547_v37  ;;  %v6970_v4 = vmul.f32 %v16693_v57, %v6547_v37  ;;  %7576 = vst [vmem:[#allocation8 + $0x3e0] sm:$0xff] %v7384_v9  ;;  %v7176_v40 = vmul.f32 %v12881_v10, %v6966_v36  ;;  %v7177_v20 = vmul.f32 %v12886_v27, %v6967_v19  ;;  %v5677_v36 = vpop.xlane.xlu1 %5676  ;;  %v16696_v55 = vld [vmem:[#allocation200_spill] sm:$0xff] }
 0xa76   :  { %v6971_v46 = vmul.f32 %v16694_v2, %v6547_v37  ;;  %v7178_v7 = vmul.f32 %v12888_v22, %v6968_v18  ;;  %7577 = vst [vmem:[#allocation8 + $0x3e8] sm:$0xff] %v7385_v52  ;;  %v6552_v3 = vsub.f32 1.5, %v6551_v47  ;;  %v6559_v54 = vmul.f32 %v14269_v5, %v14230_v34  ;;  %v16695_v37 = vld [vmem:[#allocation12_spill] sm:$0xff] }
 0xa77   :  { %v7179_v56 = vmul.f32 %v12890_v49, %v6969_v26  ;;  %v7180_v12 = vmul.f32 %v12893_v21, %v6970_v4  ;;  %v7386_v29 = vadd.f32 %v12897_v14, %v7176_v40  ;;  %v7387_v9 = vadd.f32 %v12903_v6, %v7177_v20 }
 0xa78   :  { %v7181_v32 = vmul.f32 %v12895_v17, %v6971_v46  ;;  %v7388_v0 = vadd.f32 %v12905_v11, %v7178_v7  ;;  %v6790_v30 = vsub.f32 %v16695_v37, %v14195_v41  ;;  %v6553_v19 = vmul.f32 %v9157_v50, %v6552_v3 }
 0xa79   :  { %v7389_v52 = vadd.f32 %v12907_v31, %v7179_v56  ;;  %v6560_v28 = vmul.f32 %v14269_v5, %v6559_v54  ;;  %v7390_v18 = vadd.f32 %v12914_v63, %v7180_v12  ;;  %7578 = vst [vmem:[#allocation8 + $0x3f0] sm:$0xff] %v7386_v29  ;;  %vm6564_vm5 = vweird.f32 %v14230_v34 }
 0xa7a   :  { %v6791_v26 = vsub.f32 %v16696_v55, %v14195_v41  ;;  %9160 = vrsqrt.f32 %v14277_v51  ;;  %v7391_v57 = vadd.f32 %v12916_v42, %v7181_v32  ;;  %7579 = vst [vmem:[#allocation8 + $0x3f8] sm:$0xff] %v7387_v9  ;;  %v6557_v4 = vsel %vm6556_vm4, %v9157_v50, %v6553_v19  ;;  %v6125_v32 = vpop.xlane.xlu0 %6124 }
 0xa7b   :  { %v6561_v2 = vmul.f32 0.5, %v6560_v28  ;;  %v14302_v48 = vmul.f32 0.0013020834, %v5677_v36  ;;  %7580 = vst [vmem:[#allocation8 + $0x400] sm:$0xff] %v7388_v0  ;;  %v16697_v46 = vsub.f32 %v16680_v60, %v14169_v35  ;;  %v16698_v40 = vsub.f32 %v16681_v39, %v14169_v35 }
 0xa7c   :  { %v16699_v7 = vsub.f32 %v16682_v15, %v14169_v35  ;;  %v16700_v12 = vsub.f32 %v16683_v24, %v14169_v35  ;;  %7581 = vst [vmem:[#allocation8 + $0x408] sm:$0xff] %v7389_v52  ;;  %v16701_v3 = vsub.f32 %v16684_v38, %v14169_v35  ;;  %v16702_v60 = vsub.f32 %v16685_v8, %v14169_v35 }
 0xa7d   :  { %v6972_v47 = vmul.f32 %v16697_v46, %v6557_v4  ;;  %v6973_v20 = vmul.f32 %v16698_v40, %v6557_v4  ;;  %v6562_v39 = vsub.f32 1.5, %v6561_v2  ;;  %vm6565_vm6 = vweird.f32 %v14269_v5  ;;  %7582 = vst [vmem:[#allocation8 + $0x410] sm:$0xff] %v7390_v18 }
 0xa7e   :  { %v6974_v56 = vmul.f32 %v16699_v7, %v6557_v4  ;;  %v6975_v50 = vmul.f32 %v16700_v12, %v6557_v4  ;;  %v6976_v54 = vmul.f32 %v16701_v3, %v6557_v4  ;;  %v6977_v29 = vmul.f32 %v16702_v60, %v6557_v4  ;;  %7583 = vst [vmem:[#allocation8 + $0x418] sm:$0xff] %v7391_v57  ;;  %vm6566_vm7 = vmor %vm6564_vm5, %vm6565_vm6 }
 0xa7f   :  { %v7182_v15 = vmul.f32 %v12881_v10, %v6972_v47  ;;  %v7183_v9 = vmul.f32 %v12886_v27, %v6973_v20  ;;  %v6563_v35 = vmul.f32 %v14269_v5, %v6562_v39  ;;  %v6193_v8 = vmul.f32 0.0013020834, %v6125_v32  ;;  %v6132_v32 = vpop.xlane.xlu1 %6131 }
 0xa80   :  { %v7184_v24 = vmul.f32 %v12888_v22, %v6974_v56  ;;  %v7185_v0 = vmul.f32 %v12890_v49, %v6975_v50  ;;  %v7186_v38 = vmul.f32 %v12893_v21, %v6976_v54  ;;  %v7187_v37 = vmul.f32 %v12895_v17, %v6977_v29  ;;  %v9161_v36 = vpop.eup %9160  ;;  %v16703_v29 = vld [vmem:[#allocation136_spill] sm:$0xff] }
 0xa81   :  { %v7392_v52 = vadd.f32 %v12897_v14, %v7182_v15  ;;  %v7393_v19 = vadd.f32 %v12903_v6, %v7183_v9  ;;  %v6225_v18 = vmul.f32 %v14302_v48, %v14302_v48  ;;  %v6567_v4 = vsel %vm6566_vm7, %v14269_v5, %v6563_v35  ;;  %v5684_v5 = vpop.xlane.xlu2 %5683 }
 0xa82   :  { %v7394_v28 = vadd.f32 %v12905_v11, %v7184_v24  ;;  %v7395_v55 = vadd.f32 %v12907_v31, %v7185_v0  ;;  %v7396_v57 = vadd.f32 %v12914_v63, %v7186_v38  ;;  %v6569_v2 = vmul.f32 %v9161_v36, %v14277_v51 }
 0xa83   :  { %7584 = vst [vmem:[#allocation8 + $0x420] sm:$0xff] %v7392_v52  ;;  %v6978_v46 = vmul.f32 %v6786_v13, %v6567_v4  ;;  %v6979_v34 = vmul.f32 %v6787_v58, %v6567_v4  ;;  %v6980_v47 = vmul.f32 %v6788_v53, %v6567_v4  ;;  %v6981_v40 = vmul.f32 %v6789_v59, %v6567_v4  ;;  %v16705_v52 = vld [vmem:[#allocation57_spill] sm:$0xff] }
 0xa84   :  { %v7397_v20 = vadd.f32 %v12916_v42, %v7187_v37  ;;  %7585 = vst [vmem:[#allocation8 + $0x428] sm:$0xff] %v7393_v19  ;;  %v6982_v7 = vmul.f32 %v6790_v30, %v6567_v4  ;;  %v6983_v56 = vmul.f32 %v6791_v26, %v6567_v4  ;;  %v6570_v44 = vmul.f32 %v9161_v36, %v6569_v2  ;;  %v5691_v30 = vpop.xlane.xlu0 %5690  ;;  %v16704_v37 = vld [vmem:[#allocation166_spill] sm:$0xff]  ;;  %v16708_v4 = vld [vmem:[#allocation41_spill] sm:$0xff] }
 0xa85   :  { %7586 = vst [vmem:[#allocation8 + $0x430] sm:$0xff] %v7394_v28  ;;  %v7188_v13 = vmul.f32 %v12881_v10, %v6978_v46  ;;  %v7189_v45 = vmul.f32 %v12886_v27, %v6979_v34  ;;  %v7190_v58 = vmul.f32 %v12888_v22, %v6980_v47  ;;  %v7191_v25 = vmul.f32 %v12890_v49, %v6981_v40  ;;  %v16706_v19 = vld [vmem:[#allocation206_spill] sm:$0xff] }
 0xa86   :  { %7587 = vst [vmem:[#allocation8 + $0x438] sm:$0xff] %v7395_v55  ;;  %v7192_v41 = vmul.f32 %v12893_v21, %v6982_v7  ;;  %v7193_v53 = vmul.f32 %v12895_v17, %v6983_v56  ;;  %v6571_v33 = vmul.f32 0.5, %v6570_v44  ;;  %v14362_v59 = vmul.f32 0.0013020834, %v5684_v5  ;;  %v16707_v55 = vld [vmem:[#allocation16_spill] sm:$0xff] }
 0xa87   :  { %7588 = vst [vmem:[#allocation8 + $0x440] sm:$0xff] %v7396_v57  ;;  %v7398_v26 = vadd.f32 %v12897_v14, %v7188_v13  ;;  %v7399_v12 = vadd.f32 %v12903_v6, %v7189_v45  ;;  %v7400_v50 = vadd.f32 %v12905_v11, %v7190_v58  ;;  %v7401_v3 = vadd.f32 %v12907_v31, %v7191_v25 }
 0xa88   :  { %7589 = vst [vmem:[#allocation8 + $0x448] sm:$0xff] %v7397_v20  ;;  %v6572_v54 = vsub.f32 1.5, %v6571_v33  ;;  %vm6575_vm8 = vweird.f32 %v9161_v36  ;;  %v7402_v60 = vadd.f32 %v12914_v63, %v7192_v41  ;;  %vm6574_vm9 = vweird.f32 %v14277_v51  ;;  %v5698_v33 = vpop.xlane.xlu1 %5697 }
 0xa89   :  { %7590 = vst [vmem:[#allocation8 + $0x450] sm:$0xff] %v7398_v26  ;;  %v6792_v39 = vsub.f32 %v16703_v29, %v14201_v62  ;;  %v6257_v15 = vsub.f32 %v6193_v8, %v6225_v18  ;;  %v7403_v9 = vadd.f32 %v12916_v42, %v7193_v53  ;;  %v6194_v0 = vmul.f32 0.0013020834, %v6132_v32  ;;  %vm6576_vm10 = vmor %vm6574_vm9, %vm6575_vm8  ;;  %v6139_v20 = vpop.xlane.xlu2 %6138 }
 0xa8a   :  { %7591 = vst [vmem:[#allocation8 + $0x458] sm:$0xff] %v7399_v12  ;;  %v6573_v24 = vmul.f32 %v9161_v36, %v6572_v54  ;;  %v6226_v38 = vmul.f32 %v14362_v59, %v14362_v59  ;;  %v6793_v35 = vsub.f32 %v16704_v37, %v14201_v62  ;;  %v6794_v51 = vsub.f32 %v16705_v52, %v14201_v62  ;;  %v16710_v37 = vld [vmem:[#allocation167_spill] sm:$0xff]  ;;  %v16711_v52 = vld [vmem:[#allocation58_spill] sm:$0xff] }
 0xa8b   :  { %7592 = vst [vmem:[#allocation8 + $0x460] sm:$0xff] %v7400_v50  ;;  %v6795_v28 = vsub.f32 %v16706_v19, %v14201_v62  ;;  %v6289_v8 = vmax.f32 %v6257_v15, 0.0  ;;  %v6796_v57 = vsub.f32 %v16707_v55, %v14201_v62  ;;  %v6797_v2 = vsub.f32 %v16708_v4, %v14201_v62  ;;  %v16712_v19 = vld [vmem:[#allocation240_spill] sm:$0xff]  ;;  %v16713_v55 = vld [vmem:[#allocation229_spill] sm:$0xff] }
 0xa8c   :  { %7593 = vst [vmem:[#allocation8 + $0x468] sm:$0xff] %v7401_v3  ;;  %v6577_v18 = vsel %vm6576_vm10, %v9161_v36, %v6573_v24  ;;  %v6258_v46 = vsub.f32 %v6194_v0, %v6226_v38  ;;  %v6146_v36 = vpop.xlane.xlu0 %6145  ;;  %v14400_v54 = vmul.f32 0.0013020834, %v5691_v30  ;;  %v6195_v29 = vmul.f32 0.0013020834, %v6139_v20  ;;  %v16709_v24 = vld [vmem:[#allocation137_spill] sm:$0xff] }
 0xa8d   :  { %7594 = vst [vmem:[#allocation8 + $0x470] sm:$0xff] %v7402_v60  ;;  %v6984_v34 = vmul.f32 %v6792_v39, %v6577_v18  ;;  %v6985_v47 = vmul.f32 %v6793_v35, %v6577_v18  ;;  %v6986_v40 = vmul.f32 %v6794_v51, %v6577_v18  ;;  %v6987_v5 = vmul.f32 %v6795_v28, %v6577_v18  ;;  %v16716_v20 = vld [vmem:[#allocation215_spill] sm:$0xff] }
 0xa8e   :  { %7595 = vst [vmem:[#allocation8 + $0x478] sm:$0xff] %v7403_v9  ;;  %v6988_v7 = vmul.f32 %v6796_v57, %v6577_v18  ;;  %v6989_v56 = vmul.f32 %v6797_v2, %v6577_v18  ;;  %v14385_v44 = vadd.f32 1e-12, %v6289_v8  ;;  %v6290_v13 = vmax.f32 %v6258_v46, 0.0 }
 0xa8f   :  { %v7194_v45 = vmul.f32 %v12881_v10, %v6984_v34  ;;  %v7195_v58 = vmul.f32 %v12886_v27, %v6985_v47  ;;  %v7196_v62 = vmul.f32 %v12888_v22, %v6986_v40  ;;  %v7197_v25 = vmul.f32 %v12890_v49, %v6987_v5  ;;  %v16714_v34 = vld [vmem:[#allocation138_spill] sm:$0xff]  ;;  %v16715_v40 = vld [vmem:[#allocation139_spill] sm:$0xff] }
 0xa90   :  { %v7198_v41 = vmul.f32 %v12893_v21, %v6988_v7  ;;  %v7199_v53 = vmul.f32 %v12895_v17, %v6989_v56  ;;  %9162 = vrsqrt.f32 %v14385_v44  ;;  %v14398_v3 = vadd.f32 1e-12, %v6290_v13 }
 0xa91   :  { %v7404_v26 = vadd.f32 %v12897_v14, %v7194_v45  ;;  %v7405_v12 = vadd.f32 %v12903_v6, %v7195_v58  ;;  %v7406_v50 = vadd.f32 %v12905_v11, %v7196_v62  ;;  %v7407_v32 = vadd.f32 %v12907_v31, %v7197_v25  ;;  %v14411_v30 = vpop.xlane.xlu2 %5704  ;;  %v16717_v45 = vld [vmem:[#allocation93_spill] sm:$0xff] }
 0xa92   :  { %v7408_v60 = vadd.f32 %v12914_v63, %v7198_v41  ;;  %v14403_v39 = vmul.f32 0.0013020834, %v5698_v33  ;;  %v7409_v15 = vadd.f32 %v12916_v42, %v7199_v53  ;;  %9164 = vrsqrt.f32 %v14398_v3  ;;  %v16718_v25 = vld [vmem:[#allocation17_spill] sm:$0xff] }
 0xa93   :  { %7596 = vst [vmem:[#allocation8 + $0x480] sm:$0xff] %v7404_v26  ;;  %v6227_v9 = vmul.f32 %v14400_v54, %v14400_v54  ;;  %v6798_v0 = vsub.f32 %v16709_v24, %v14302_v48  ;;  %v6799_v35 = vsub.f32 %v16710_v37, %v14302_v48  ;;  %v6800_v51 = vsub.f32 %v16711_v52, %v14302_v48 }
 0xa94   :  { %7597 = vst [vmem:[#allocation8 + $0x488] sm:$0xff] %v7405_v12  ;;  %v6801_v28 = vsub.f32 %v16712_v19, %v14302_v48  ;;  %v5712_v18 = vpop.xlane.xlu0 %5711  ;;  %v6802_v57 = vsub.f32 %v16713_v55, %v14302_v48  ;;  %v6803_v4 = vsub.f32 %v13414_v23, %v14302_v48  ;;  %v6228_v46 = vmul.f32 %v14403_v39, %v14403_v39  ;;  %v16721_v19 = vld [vmem:[#allocation59_spill] sm:$0xff] }
 0xa95   :  { %7598 = vst [vmem:[#allocation8 + $0x490] sm:$0xff] %v7406_v50  ;;  %v6259_v8 = vsub.f32 %v6195_v29, %v6227_v9  ;;  %v6804_v47 = vsub.f32 %v16714_v34, %v14362_v59  ;;  %v6805_v5 = vsub.f32 %v16715_v40, %v14362_v59  ;;  %v6196_v48 = vmul.f32 0.0013020834, %v6146_v36  ;;  %v16719_v36 = vld [vmem:[#allocation94_spill] sm:$0xff] }
 0xa96   :  { %v9163_v38 = vpop.eup %9162  ;;  %7599 = vst [vmem:[#allocation8 + $0x498] sm:$0xff] %v7407_v32  ;;  %v14434_v58 = vmul.f32 0.0013020834, %v5712_v18  ;;  %vm6584_vm11 = vweird.f32 %v14385_v44  ;;  %vm6594_vm12 = vweird.f32 %v14398_v3  ;;  %v16722_v18 = vld [vmem:[#allocation227_spill] sm:$0xff]  ;;  %v16730_v34 = vsub.f32 %v13559_v16, %v14362_v59 }
 0xa97   :  { %7600 = vst [vmem:[#allocation8 + $0x4a0] sm:$0xff] %v7408_v60  ;;  %v6579_v2 = vmul.f32 %v9163_v38, %v14385_v44  ;;  %v6291_v56 = vmax.f32 %v6259_v8, 0.0  ;;  %v6260_v50 = vsub.f32 %v6196_v48, %v6228_v46  ;;  %vm6585_vm13 = vweird.f32 %v9163_v38  ;;  %v16720_v60 = vld [vmem:[#allocation38_spill] sm:$0xff] }
 0xa98   :  { %7601 = vst [vmem:[#allocation8 + $0x4a8] sm:$0xff] %v7409_v15  ;;  %v9165_v62 = vpop.eup %9164  ;;  %v14452_v52 = vmul.f32 %v14434_v58, %v14434_v58  ;;  %vm6586_vm14 = vmor %vm6584_vm11, %vm6585_vm13  ;;  %v16725_v8 = vld [vmem:[#allocation46_spill] sm:$0xff] }
 0xa99   :  { %v6580_v13 = vmul.f32 %v9163_v38, %v6579_v2  ;;  %v14441_v33 = vadd.f32 1e-12, %v6291_v56  ;;  %v6589_v12 = vmul.f32 %v9165_v62, %v14398_v3  ;;  %v6292_v24 = vmax.f32 %v6260_v50, 0.0  ;;  %v6160_v37 = vpop.xlane.xlu2 %6159  ;;  %v16723_v2 = vld [vmem:[#allocation197_spill] sm:$0xff]  ;;  %v16724_v50 = vld [vmem:[#allocation140_spill] sm:$0xff] }
 0xa9a   :  { %v14460_v56 = vmul.f32 0.0013020834, %v6160_v37  ;;  %vm6595_vm15 = vweird.f32 %v9165_v62  ;;  %v16726_v37 = vld [vmem:[#allocation224_spill] sm:$0xff] }
 0xa9b   :  { %v6581_v26 = vmul.f32 0.5, %v6580_v13  ;;  %9166 = vrsqrt.f32 %v14441_v33  ;;  %v6590_v9 = vmul.f32 %v9165_v62, %v6589_v12  ;;  %v14464_v12 = vadd.f32 1e-12, %v6292_v24  ;;  %vm6596_vm0 = vmor %vm6594_vm12, %vm6595_vm15 }
 0xa9c   :  { %v6262_v24 = vsub.f32 %v14460_v56, %v14452_v52  ;;  %vm6604_vm2 = vweird.f32 %v14441_v33 }
 0xa9d   :  { %v6582_v15 = vsub.f32 1.5, %v6581_v26  ;;  %v6591_v48 = vmul.f32 0.5, %v6590_v9  ;;  %9168 = vrsqrt.f32 %v14464_v12  ;;  %vm6614_vm5 = vweird.f32 %v14464_v12 }
 0xa9f   :  { %v6583_v13 = vmul.f32 %v9163_v38, %v6582_v15  ;;  %v6818_v15 = vsub.f32 %v16726_v37, %v14403_v39  ;;  %v6592_v29 = vsub.f32 1.5, %v6591_v48 }
 0xaa1   :  { %v6587_v9 = vsel %vm6586_vm14, %v9163_v38, %v6583_v13  ;;  %v14478_v26 = vpop.eup %9166  ;;  %v6593_v7 = vmul.f32 %v9165_v62, %v6592_v29 }
 0xaa2   :  { %v6990_v44 = vmul.f32 %v6798_v0, %v6587_v9  ;;  %v6991_v32 = vmul.f32 %v6799_v35, %v6587_v9  ;;  %v6992_v53 = vmul.f32 %v6800_v51, %v6587_v9  ;;  %v6993_v41 = vmul.f32 %v6801_v28, %v6587_v9 }
 0xaa3   :  { %v6994_v55 = vmul.f32 %v6802_v57, %v6587_v9  ;;  %v6995_v23 = vmul.f32 %v6803_v4, %v6587_v9  ;;  %v6599_v46 = vmul.f32 %v14478_v26, %v14441_v33  ;;  %v6597_v51 = vsel %vm6596_vm0, %v9165_v62, %v6593_v7 }
 0xaa4   :  { %v7200_v38 = vmul.f32 %v12881_v10, %v6990_v44  ;;  %v7201_v13 = vmul.f32 %v12886_v27, %v6991_v32  ;;  %v7202_v48 = vmul.f32 %v12888_v22, %v6992_v53  ;;  %v7203_v52 = vmul.f32 %v12890_v49, %v6993_v41  ;;  %v14496_v41 = vpop.eup %9168 }
 0xaa5   :  { %v7204_v0 = vmul.f32 %v12893_v21, %v6994_v55  ;;  %v7205_v35 = vmul.f32 %v12895_v17, %v6995_v23  ;;  %v6600_v28 = vmul.f32 %v14478_v26, %v6599_v46  ;;  %v6996_v7 = vmul.f32 %v6804_v47, %v6597_v51 }
 0xaa6   :  { %v7410_v57 = vadd.f32 %v12897_v14, %v7200_v38  ;;  %v7411_v4 = vadd.f32 %v12903_v6, %v7201_v13  ;;  %v7412_v32 = vadd.f32 %v12905_v11, %v7202_v48  ;;  %v7413_v53 = vadd.f32 %v12907_v31, %v7203_v52 }
 0xaa7   :  { %v7414_v3 = vadd.f32 %v12914_v63, %v7204_v0  ;;  %v7415_v29 = vadd.f32 %v12916_v42, %v7205_v35  ;;  %v6997_v23 = vmul.f32 %v6805_v5, %v6597_v51  ;;  %v16727_v62 = vsub.f32 %v16716_v20, %v14362_v59  ;;  %v5719_v0 = vpop.xlane.xlu1 %5718 }
 0xaa8   :  { %7602 = vst [vmem:[#allocation8 + $0x4b0] sm:$0xff] %v7410_v57  ;;  %v16728_v46 = vsub.f32 %v16717_v45, %v14362_v59  ;;  %v16729_v9 = vsub.f32 %v16718_v25, %v14362_v59  ;;  %v7001_v47 = vmul.f32 %v16730_v34, %v6597_v51  ;;  %v7206_v40 = vmul.f32 %v12881_v10, %v6996_v7  ;;  %v16732_v57 = vld [vmem:[#allocation40_spill] sm:$0xff] }
 0xaa9   :  { %v6998_v55 = vmul.f32 %v16727_v62, %v6597_v51  ;;  %7603 = vst [vmem:[#allocation8 + $0x4b8] sm:$0xff] %v7411_v4  ;;  %v7207_v5 = vmul.f32 %v12886_v27, %v6997_v23  ;;  %v6601_v38 = vmul.f32 0.5, %v6600_v28  ;;  %vm6605_vm1 = vweird.f32 %v14478_v26 }
 0xaaa   :  { %v6999_v56 = vmul.f32 %v16728_v46, %v6597_v51  ;;  %v7000_v44 = vmul.f32 %v16729_v9, %v6597_v51  ;;  %7604 = vst [vmem:[#allocation8 + $0x4c0] sm:$0xff] %v7412_v32  ;;  %v7211_v13 = vmul.f32 %v12895_v17, %v7001_v47  ;;  %v7416_v16 = vadd.f32 %v12897_v14, %v7206_v40  ;;  %v16731_v51 = vld [vmem:[#allocation254_spill] sm:$0xff]  ;;  %vm6606_vm3 = vmor %vm6604_vm2, %vm6605_vm1 }
 0xaab   :  { %v7208_v20 = vmul.f32 %v12888_v22, %v6998_v55  ;;  %7605 = vst [vmem:[#allocation8 + $0x4c8] sm:$0xff] %v7413_v53  ;;  %v7417_v59 = vadd.f32 %v12903_v6, %v7207_v5  ;;  %v6602_v48 = vsub.f32 1.5, %v6601_v38  ;;  %v6609_v52 = vmul.f32 %v14496_v41, %v14464_v12 }
 0xaac   :  { %v7209_v45 = vmul.f32 %v12890_v49, %v6999_v56  ;;  %v7210_v25 = vmul.f32 %v12893_v21, %v7000_v44  ;;  %7606 = vst [vmem:[#allocation8 + $0x4d0] sm:$0xff] %v7414_v3  ;;  %v6819_v28 = vsub.f32 %v16731_v51, %v14403_v39  ;;  %v6820_v4 = vsub.f32 %v16732_v57, %v14403_v39 }
 0xaad   :  { %v7418_v35 = vadd.f32 %v12905_v11, %v7208_v20  ;;  %7607 = vst [vmem:[#allocation8 + $0x4d8] sm:$0xff] %v7415_v29  ;;  %v6603_v53 = vmul.f32 %v14478_v26, %v6602_v48  ;;  %v6610_v7 = vmul.f32 %v14496_v41, %v6609_v52  ;;  %v6294_v23 = vmax.f32 %v6262_v24, 0.0  ;;  %v6167_v52 = vpop.xlane.xlu0 %6166 }
 0xaae   :  { %v7419_v32 = vadd.f32 %v12907_v31, %v7209_v45  ;;  %v7420_v3 = vadd.f32 %v12914_v63, %v7210_v25  ;;  %v7421_v62 = vadd.f32 %v12916_v42, %v7211_v13  ;;  %7608 = vst [vmem:[#allocation8 + $0x4e0] sm:$0xff] %v7416_v16  ;;  %v6821_v33 = vsub.f32 %v13626_v43, %v14403_v39 }
 0xaaf   :  { %v14544_v55 = vmul.f32 0.0013020834, %v5719_v0  ;;  %7609 = vst [vmem:[#allocation8 + $0x4e8] sm:$0xff] %v7417_v59  ;;  %v6607_v29 = vsel %vm6606_vm3, %v14478_v26, %v6603_v53  ;;  %v6611_v46 = vmul.f32 0.5, %v6610_v7  ;;  %vm6615_vm4 = vweird.f32 %v14496_v41 }
 0xab0   :  { %v14548_v24 = vadd.f32 1e-12, %v6294_v23  ;;  %7610 = vst [vmem:[#allocation8 + $0x4f0] sm:$0xff] %v7418_v35  ;;  %v16733_v56 = vsub.f32 %v16719_v36, %v14400_v54  ;;  %v16734_v44 = vsub.f32 %v16720_v60, %v14400_v54  ;;  %v16735_v43 = vsub.f32 %v16721_v19, %v14400_v54  ;;  %vm6616_vm6 = vmor %vm6614_vm5, %vm6615_vm4 }
 0xab1   :  { %v16736_v26 = vsub.f32 %v16722_v18, %v14400_v54  ;;  %7611 = vst [vmem:[#allocation8 + $0x4f8] sm:$0xff] %v7419_v32  ;;  %v16737_v5 = vsub.f32 %v16723_v2, %v14400_v54  ;;  %v16738_v36 = vsub.f32 %v13599_v61, %v14400_v54  ;;  %v6612_v45 = vsub.f32 1.5, %v6611_v46 }
 0xab2   :  { %v7002_v9 = vmul.f32 %v16733_v56, %v6607_v29  ;;  %v7003_v34 = vmul.f32 %v16734_v44, %v6607_v29  ;;  %v7004_v47 = vmul.f32 %v16735_v43, %v6607_v29  ;;  %9170 = vrsqrt.f32 %v14548_v24  ;;  %7612 = vst [vmem:[#allocation8 + $0x500] sm:$0xff] %v7420_v3 }
 0xab3   :  { %v7005_v40 = vmul.f32 %v16736_v26, %v6607_v29  ;;  %v7006_v38 = vmul.f32 %v16737_v5, %v6607_v29  ;;  %v7007_v20 = vmul.f32 %v16738_v36, %v6607_v29  ;;  %7613 = vst [vmem:[#allocation8 + $0x508] sm:$0xff] %v7421_v62  ;;  %v6613_v61 = vmul.f32 %v14496_v41, %v6612_v45 }
 0xab4   :  { %v7212_v60 = vmul.f32 %v12881_v10, %v7002_v9  ;;  %v7213_v19 = vmul.f32 %v12886_v27, %v7003_v34  ;;  %v7214_v18 = vmul.f32 %v12888_v22, %v7004_v47  ;;  %v14583_v48 = vmul.f32 0.0013020834, %v14411_v30 }
 0xab5   :  { %v7215_v25 = vmul.f32 %v12890_v49, %v7005_v40  ;;  %v7216_v2 = vmul.f32 %v12893_v21, %v7006_v38  ;;  %v7217_v13 = vmul.f32 %v12895_v17, %v7007_v20  ;;  %v6617_v51 = vsel %vm6616_vm6, %v14496_v41, %v6613_v61  ;;  %v16742_v61 = vld [vmem:[#allocation144_spill] sm:$0xff] }
 0xab6   :  { %v7422_v54 = vadd.f32 %v12897_v14, %v7212_v60  ;;  %v7423_v16 = vadd.f32 %v12903_v6, %v7213_v19  ;;  %v7424_v59 = vadd.f32 %v12905_v11, %v7214_v18  ;;  %v6231_v12 = vmul.f32 %v14544_v55, %v14544_v55 }
 0xab7   :  { %v7425_v0 = vadd.f32 %v12907_v31, %v7215_v25  ;;  %v7426_v35 = vadd.f32 %v12914_v63, %v7216_v2  ;;  %v16739_v57 = vsub.f32 %v16724_v50, %v14403_v39  ;;  %v16740_v53 = vsub.f32 %v16725_v8, %v14403_v39  ;;  %v16741_v2 = vld [vmem:[#allocation142_spill] sm:$0xff] }
 0xab8   :  { %7614 = vst [vmem:[#allocation8 + $0x510] sm:$0xff] %v7422_v54  ;;  %v7010_v7 = vmul.f32 %v6818_v15, %v6617_v51  ;;  %v7011_v23 = vmul.f32 %v6819_v28, %v6617_v51  ;;  %v9171_v3 = vpop.eup %9170  ;;  %v7427_v41 = vadd.f32 %v12916_v42, %v7217_v13  ;;  %v7012_v62 = vmul.f32 %v6820_v4, %v6617_v51  ;;  %v6153_v28 = vpop.xlane.xlu1 %6152 }
 0xab9   :  { %v7008_v32 = vmul.f32 %v16739_v57, %v6617_v51  ;;  %v7009_v30 = vmul.f32 %v16740_v53, %v6617_v51  ;;  %7615 = vst [vmem:[#allocation8 + $0x518] sm:$0xff] %v7423_v16  ;;  %v7013_v29 = vmul.f32 %v6821_v33, %v6617_v51  ;;  %v6199_v46 = vmul.f32 0.0013020834, %v6167_v52  ;;  %v16743_v16 = vld [vmem:[#allocation134_spill] sm:$0xff]  ;;  %v16744_v52 = vld [vmem:[#allocation56_spill] sm:$0xff] }
 0xaba   :  { %7616 = vst [vmem:[#allocation8 + $0x520] sm:$0xff] %v7424_v59  ;;  %v7220_v8 = vmul.f32 %v12888_v22, %v7010_v7  ;;  %v7221_v9 = vmul.f32 %v12890_v49, %v7011_v23  ;;  %v7222_v39 = vmul.f32 %v12893_v21, %v7012_v62  ;;  %v6629_v15 = vmul.f32 %v9171_v3, %v14548_v24 }
 0xabb   :  { %v7218_v50 = vmul.f32 %v12881_v10, %v7008_v32  ;;  %v7219_v56 = vmul.f32 %v12886_v27, %v7009_v30  ;;  %7617 = vst [vmem:[#allocation8 + $0x528] sm:$0xff] %v7425_v0  ;;  %v7223_v37 = vmul.f32 %v12895_v17, %v7013_v29  ;;  %v6263_v47 = vsub.f32 %v6199_v46, %v6231_v12  ;;  %v16745_v12 = vld [vmem:[#allocation230_spill] sm:$0xff] }
 0xabc   :  { %7618 = vst [vmem:[#allocation8 + $0x530] sm:$0xff] %v7426_v35  ;;  %v7430_v44 = vadd.f32 %v12905_v11, %v7220_v8  ;;  %v7431_v34 = vadd.f32 %v12907_v31, %v7221_v9  ;;  %v6630_v43 = vmul.f32 %v9171_v3, %v6629_v15  ;;  %v7432_v26 = vadd.f32 %v12914_v63, %v7222_v39 }
 0xabd   :  { %v7428_v4 = vadd.f32 %v12897_v14, %v7218_v50  ;;  %v7429_v33 = vadd.f32 %v12903_v6, %v7219_v56  ;;  %7619 = vst [vmem:[#allocation8 + $0x538] sm:$0xff] %v7427_v41  ;;  %v6197_v40 = vmul.f32 0.0013020834, %v6153_v28  ;;  %v6229_v5 = vmul.f32 %v14583_v48, %v14583_v48 }
 0xabe   :  { %v7433_v38 = vadd.f32 %v12916_v42, %v7223_v37  ;;  %v6631_v36 = vmul.f32 0.5, %v6630_v43  ;;  %v6295_v20 = vmax.f32 %v6263_v47, 0.0  ;;  %7622 = vst [vmem:[#allocation8 + $0x550] sm:$0xff] %v7430_v44  ;;  %vm6635_vm7 = vweird.f32 %v9171_v3 }
 0xabf   :  { %7620 = vst [vmem:[#allocation8 + $0x540] sm:$0xff] %v7428_v4  ;;  %v6261_v45 = vsub.f32 %v6197_v40, %v6229_v5  ;;  %vm6634_vm8 = vweird.f32 %v14548_v24  ;;  %v6828_v13 = vsub.f32 %v16741_v2, %v14434_v58  ;;  %v6829_v54 = vsub.f32 %v16742_v61, %v14434_v58  ;;  %v16747_v5 = vld [vmem:[#allocation171_spill] sm:$0xff]  ;;  %v16751_v61 = vld [vmem:[#allocation32_spill] sm:$0xff] }
 0xac0   :  { %7621 = vst [vmem:[#allocation8 + $0x548] sm:$0xff] %v7429_v33  ;;  %v6632_v60 = vsub.f32 1.5, %v6631_v36  ;;  %v6327_v19 = vadd.f32 1e-12, %v6295_v20  ;;  %vm6636_vm9 = vmor %vm6634_vm8, %vm6635_vm7  ;;  %v6830_v59 = vsub.f32 %v16743_v16, %v14434_v58  ;;  %v6831_v0 = vsub.f32 %v16744_v52, %v14434_v58  ;;  %v16748_v20 = vld [vmem:[#allocation141_spill] sm:$0xff] }
 0xac1   :  { %7623 = vst [vmem:[#allocation8 + $0x558] sm:$0xff] %v7431_v34  ;;  %v6293_v18 = vmax.f32 %v6261_v45, 0.0  ;;  %v6832_v24 = vsub.f32 %v16745_v12, %v14434_v58  ;;  %v6833_v57 = vsub.f32 %v13761_v1, %v14434_v58  ;;  %v6822_v45 = vsub.f32 %v16748_v20, %v14583_v48  ;;  %v16752_v16 = vld [vmem:[#allocation169_spill] sm:$0xff] }
 0xac2   :  { %7624 = vst [vmem:[#allocation8 + $0x560] sm:$0xff] %v7432_v26  ;;  %v6633_v25 = vmul.f32 %v9171_v3, %v6632_v60  ;;  %9172 = vrsqrt.f32 %v6327_v19  ;;  %v16746_v26 = vld [vmem:[#allocation143_spill] sm:$0xff]  ;;  %v16749_v60 = vld [vmem:[#allocation176_spill] sm:$0xff]  ;;  %vm6644_vm11 = vweird.f32 %v6327_v19 }
 0xac3   :  { %7625 = vst [vmem:[#allocation8 + $0x568] sm:$0xff] %v7433_v38  ;;  %v14624_v35 = vadd.f32 1e-12, %v6293_v18  ;;  %v6834_v40 = vsub.f32 %v16746_v26, %v14544_v55  ;;  %v6835_v38 = vsub.f32 %v16747_v5, %v14544_v55  ;;  %v6836_v18 = vsub.f32 %v16749_v60, %v14544_v55 }
 0xac4   :  { %v6637_v51 = vsel %vm6636_vm9, %v9171_v3, %v6633_v25  ;;  %v16750_v25 = vld [vmem:[#allocation189_spill] sm:$0xff] }
 0xac5   :  { %v7020_v32 = vmul.f32 %v6828_v13, %v6637_v51  ;;  %v7021_v53 = vmul.f32 %v6829_v54, %v6637_v51  ;;  %v7022_v30 = vmul.f32 %v6830_v59, %v6637_v51  ;;  %v7023_v7 = vmul.f32 %v6831_v0, %v6637_v51  ;;  %v16753_v0 = vld [vmem:[#allocation170_spill] sm:$0xff] }
 0xac6   :  { %v7024_v23 = vmul.f32 %v6832_v24, %v6637_v51  ;;  %v7025_v41 = vmul.f32 %v6833_v57, %v6637_v51  ;;  %9174 = vrsqrt.f32 %v14624_v35  ;;  %v6837_v2 = vsub.f32 %v16750_v25, %v14544_v55  ;;  %v16754_v24 = vld [vmem:[#allocation249_spill] sm:$0xff] }
 0xac7   :  { %v7230_v62 = vmul.f32 %v12881_v10, %v7020_v32  ;;  %v7231_v29 = vmul.f32 %v12886_v27, %v7021_v53  ;;  %v7232_v3 = vmul.f32 %v12888_v22, %v7022_v30  ;;  %v7233_v46 = vmul.f32 %v12890_v49, %v7023_v7  ;;  %v16755_v32 = vld [vmem:[#allocation208_spill] sm:$0xff] }
 0xac8   :  { %v9173_v50 = vpop.eup %9172  ;;  %v7234_v56 = vmul.f32 %v12893_v21, %v7024_v23  ;;  %v7235_v1 = vmul.f32 %v12895_v17, %v7025_v41  ;;  %v6838_v54 = vsub.f32 %v16751_v61, %v14544_v55  ;;  %v6839_v59 = vsub.f32 %v16752_v16, %v14544_v55 }
 0xac9   :  { %v7440_v58 = vadd.f32 %v12897_v14, %v7230_v62  ;;  %v7441_v8 = vadd.f32 %v12903_v6, %v7231_v29  ;;  %v7442_v9 = vadd.f32 %v12905_v11, %v7232_v3  ;;  %v7443_v39 = vadd.f32 %v12907_v31, %v7233_v46 }
 0xaca   :  { %v6639_v37 = vmul.f32 %v9173_v50, %v6327_v19  ;;  %v7444_v15 = vadd.f32 %v12914_v63, %v7234_v56  ;;  %v7445_v4 = vadd.f32 %v12916_v42, %v7235_v1  ;;  %vm6645_vm10 = vweird.f32 %v9173_v50 }
 0xacb   :  { %7632 = vst [vmem:[#allocation8 + $0x5a0] sm:$0xff] %v7440_v58  ;;  %vm6646_vm12 = vmor %vm6644_vm11, %vm6645_vm10  ;;  %v6823_v51 = vsub.f32 %v16753_v0, %v14583_v48  ;;  %v6824_v57 = vsub.f32 %v16754_v24, %v14583_v48  ;;  %v6825_v53 = vsub.f32 %v16755_v32, %v14583_v48  ;;  %vm6624_vm14 = vweird.f32 %v14624_v35 }
 0xacc   :  { %v9175_v28 = vpop.eup %9174  ;;  %7633 = vst [vmem:[#allocation8 + $0x5a8] sm:$0xff] %v7441_v8  ;;  %v6640_v33 = vmul.f32 %v9173_v50, %v6639_v37  ;;  %v16756_v8 = vld [vmem:[#allocation25_spill] sm:$0xff] }
 0xacd   :  { %7634 = vst [vmem:[#allocation8 + $0x5b0] sm:$0xff] %v7442_v9  ;;  %v6619_v44 = vmul.f32 %v9175_v28, %v14624_v35  ;;  %vm6625_vm13 = vweird.f32 %v9175_v28  ;;  %v6826_v9 = vsub.f32 %v16756_v8, %v14583_v48 }
 0xace   :  { %7635 = vst [vmem:[#allocation8 + $0x5b8] sm:$0xff] %v7443_v39  ;;  %v6641_v34 = vmul.f32 0.5, %v6640_v33  ;;  %vm6626_vm15 = vmor %vm6624_vm14, %vm6625_vm13 }
 0xacf   :  { %7636 = vst [vmem:[#allocation8 + $0x5c0] sm:$0xff] %v7444_v15  ;;  %v6620_v43 = vmul.f32 %v9175_v28, %v6619_v44  ;;  %v16757_v15 = vld [vmem:[#allocation73_spill] sm:$0xff] }
 0xad0   :  { %7637 = vst [vmem:[#allocation8 + $0x5c8] sm:$0xff] %v7445_v4  ;;  %v6642_v47 = vsub.f32 1.5, %v6641_v34  ;;  %v6827_v4 = vsub.f32 %v16757_v15, %v14583_v48 }
 0xad1   :  { %v6621_v36 = vmul.f32 0.5, %v6620_v43 }
 0xad2   :  { %v6643_v13 = vmul.f32 %v9173_v50, %v6642_v47 }
 0xad3   :  { %v6622_v52 = vsub.f32 1.5, %v6621_v36 }
 0xad4   :  { %v6647_v12 = vsel %vm6646_vm12, %v9173_v50, %v6643_v13 }
 0xad5   :  { %v7026_v19 = vmul.f32 %v6834_v40, %v6647_v12  ;;  %v7027_v30 = vmul.f32 %v6835_v38, %v6647_v12  ;;  %v7028_v7 = vmul.f32 %v6836_v18, %v6647_v12  ;;  %v7029_v23 = vmul.f32 %v6837_v2, %v6647_v12 }
 0xad6   :  { %v7030_v41 = vmul.f32 %v6838_v54, %v6647_v12  ;;  %v7031_v62 = vmul.f32 %v6839_v59, %v6647_v12  ;;  %v6623_v55 = vmul.f32 %v9175_v28, %v6622_v52 }
 0xad7   :  { %v7236_v29 = vmul.f32 %v12881_v10, %v7026_v19  ;;  %v7237_v3 = vmul.f32 %v12886_v27, %v7027_v30  ;;  %v7238_v46 = vmul.f32 %v12888_v22, %v7028_v7  ;;  %v7239_v50 = vmul.f32 %v12890_v49, %v7029_v23 }
 0xad8   :  { %v7240_v56 = vmul.f32 %v12893_v21, %v7030_v41  ;;  %v7241_v1 = vmul.f32 %v12895_v17, %v7031_v62  ;;  %v6627_v58 = vsel %vm6626_vm15, %v9175_v28, %v6623_v55 }
 0xad9   :  { %v7446_v35 = vadd.f32 %v12897_v14, %v7236_v29  ;;  %v7447_v39 = vadd.f32 %v12903_v6, %v7237_v3  ;;  %v7448_v37 = vadd.f32 %v12905_v11, %v7238_v46  ;;  %v7449_v33 = vadd.f32 %v12907_v31, %v7239_v50 }
 0xada   :  { %v7450_v44 = vadd.f32 %v12914_v63, %v7240_v56  ;;  %v7014_v34 = vmul.f32 %v6822_v45, %v6627_v58  ;;  %v7015_v43 = vmul.f32 %v6823_v51, %v6627_v58  ;;  %v7016_v28 = vmul.f32 %v6824_v57, %v6627_v58 }
 0xadb   :  { %7638 = vst [vmem:[#allocation8 + $0x5d0] sm:$0xff] %v7446_v35  ;;  %v7017_v47 = vmul.f32 %v6825_v53, %v6627_v58  ;;  %v7018_v26 = vmul.f32 %v6826_v9, %v6627_v58  ;;  %v7019_v40 = vmul.f32 %v6827_v4, %v6627_v58  ;;  %v7451_v5 = vadd.f32 %v12916_v42, %v7241_v1 }
 0xadc   :  { %7639 = vst [vmem:[#allocation8 + $0x5d8] sm:$0xff] %v7447_v39  ;;  %v7224_v38 = vmul.f32 %v12881_v10, %v7014_v34  ;;  %v7225_v36 = vmul.f32 %v12886_v27, %v7015_v43  ;;  %v7226_v48 = vmul.f32 %v12888_v22, %v7016_v28 }
 0xadd   :  { %7640 = vst [vmem:[#allocation8 + $0x5e0] sm:$0xff] %v7448_v37  ;;  %v7227_v20 = vmul.f32 %v12890_v49, %v7017_v47  ;;  %v7228_v45 = vmul.f32 %v12893_v21, %v7018_v26  ;;  %v7229_v60 = vmul.f32 %v12895_v17, %v7019_v40 }
 0xade   :  { %7641 = vst [vmem:[#allocation8 + $0x5e8] sm:$0xff] %v7449_v33  ;;  %v7434_v18 = vadd.f32 %v12897_v14, %v7224_v38  ;;  %v7435_v25 = vadd.f32 %v12903_v6, %v7225_v36  ;;  %v7436_v2 = vadd.f32 %v12905_v11, %v7226_v48 }
 0xadf   :  { %7642 = vst [vmem:[#allocation8 + $0x5f0] sm:$0xff] %v7450_v44  ;;  %v7437_v27 = vadd.f32 %v12907_v31, %v7227_v20  ;;  %v7438_v10 = vadd.f32 %v12914_v63, %v7228_v45  ;;  %v7439_v22 = vadd.f32 %v12916_v42, %v7229_v60 }
 0xae0   :  { %7643 = vst [vmem:[#allocation8 + $0x5f8] sm:$0xff] %v7451_v5 }
 0xae1   :  { %7626 = vst [vmem:[#allocation8 + $0x570] sm:$0xff] %v7434_v18 }
 0xae2   :  { %7627 = vst [vmem:[#allocation8 + $0x578] sm:$0xff] %v7435_v25 }
 0xae3   :  { %7628 = vst [vmem:[#allocation8 + $0x580] sm:$0xff] %v7436_v2 }
 0xae4   :  { %7629 = vst [vmem:[#allocation8 + $0x588] sm:$0xff] %v7437_v27 }
 0xae5   :  { %7630 = vst [vmem:[#allocation8 + $0x590] sm:$0xff] %v7438_v10 }
 0xae6   :  { %7631 = vst [vmem:[#allocation8 + $0x598] sm:$0xff] %v7439_v22 }
 0xae7   :  { %7647 = vsyncadd [#allocation4], 23040  ;;  %s7650_s30 = sshll.u32 %s14703_s3, 4  ;;  %s9289_s4 = smov [#allocation8]   ;;  %s7651_s30 = int_to_ptr.hbm [resolvable:$true] %s7650_s30 }
 0xae8   :  { %s7648_s5 = sshll.u32 %s9289_s4, 4  ;;  %s7649_s5 = int_to_ptr.vmem [resolvable:$true] %s7648_s5 }
 0xae9   :  { %7656 = dma.vmem_to_hbm [thread:$0]  %s7649_s5, 1536, %s7651_s30, [#allocation4], %s9286_s24, %s9286_s24, %s9287_s25  }
 0xaea   :  { %9280 = dma.done.wait [#allocation4], 24576  }
 0xaeb   :  { %9281 = vsyncadd [#allocation4], 4294942720 }
 0xaec   :  { %7661 = vsyncpa [#allocation3], 1 }
 0xaed   :  { %7662 = vsyncpa [#allocation6], 1 }
 0xaee   :  { %7663 = vsyncpa [#allocation4], 1 }

</bundles_post_ra>
